<compile_context>
chip_gen: v7x
topology: tpu7x:2x2x1
jax: 0.10.0
libtpu: 0.0.40
codegen_flags: <defaults>
</compile_context>

<pallas_src>
import functools
import math

import jax
import jax.numpy as jnp
from jax import lax
from jax.experimental import pallas as pl
from jax.experimental.pallas import tpu as pltpu

# ----------------------------- config ---------------------------------------
HIDDEN = 32          # __C.HIDDEN_SIZE
FF = 64              # __C.FF_SIZE
HEADS = 4            # __C.MULTI_HEAD
D_HEAD = HIDDEN // HEADS   # __C.HIDDEN_SIZE_HEAD
LAYERS = 2           # __C.LAYER
LN_EPS = 1e-6
NEG_INF = -1e9


# ----------------------- in-kernel building blocks ---------------------------
def _add_layernorm(x, r, g, b):
    # LayerNorm(x + r) with torch-style unbiased std: g*(s-mean)/(std+eps)+b
    s = x + r
    mean = jnp.mean(s, axis=-1, keepdims=True)
    d = s - mean
    var = jnp.sum(d * d, axis=-1, keepdims=True) / (s.shape[-1] - 1)
    std = jnp.sqrt(var)
    return g * d / (std + LN_EPS) + b


def _ffn(x2d, w1, b1, w2, b2):
    # fused MLP: H -> FF (ReLU) -> H, intermediate stays in VMEM/vregs
    h = jnp.dot(x2d, w1, preferred_element_type=jnp.float32) + b1
    h = jnp.maximum(h, 0.0)
    return jnp.dot(h, w2, preferred_element_type=jnp.float32) + b2


def _mha(q2d, kv2d, wqkv, bqkv, wm, bm, maskf, B, Sq, Sk):
    """Multi-head attention on [B*Sq, H] / [B*Sk, H] slabs.

    wqkv is [H, 3H] = [wq | wk | wv]; maskf is [B, Sk] float (1.0 == masked).
    Heads are contiguous lane slices of H, which matches torch's
    view(B,S,nH,dH).transpose(1,2) / transpose back + view(B,S,H) layout.
    """
    H = HIDDEN
    if q2d is kv2d:
        # self-attention: one fused QKV matmul (N = 3H)
        qkv = jnp.dot(q2d, wqkv, preferred_element_type=jnp.float32) + bqkv
        q, k, v = qkv[:, :H], qkv[:, H:2 * H], qkv[:, 2 * H:]
    else:
        # cross-attention: Q from the query stream, fused KV from the memory
        q = jnp.dot(q2d, wqkv[:, :H], preferred_element_type=jnp.float32) + bqkv[:, :H]
        kv = jnp.dot(kv2d, wqkv[:, H:], preferred_element_type=jnp.float32) + bqkv[:, H:]
        k, v = kv[:, :H], kv[:, H:]

    scale = 1.0 / math.sqrt(D_HEAD)
    batch_out = []
    for b in range(B):                       # static unroll (B=2)
        qb = q[b * Sq:(b + 1) * Sq, :]
        kb = k[b * Sk:(b + 1) * Sk, :]
        vb = v[b * Sk:(b + 1) * Sk, :]
        mrow = maskf[b:b + 1, :]             # [1, Sk]
        head_out = []
        for h in range(HEADS):               # static unroll (HEADS=4)
            c = slice(h * D_HEAD, (h + 1) * D_HEAD)
            # q @ k^T without materializing a transpose
            s = lax.dot_general(qb[:, c], kb[:, c], (((1,), (1,)), ((), ())),
                                preferred_element_type=jnp.float32) * scale
            s = jnp.where(mrow > 0.5, NEG_INF, s)   # exact masked_fill semantics
            s = s - jnp.max(s, axis=-1, keepdims=True)
            p = jnp.exp(s)
            p = p * pl.reciprocal(jnp.sum(p, axis=-1, keepdims=True), approx=True)
            head_out.append(jnp.dot(p, vb[:, c], preferred_element_type=jnp.float32))
        batch_out.append(jnp.concatenate(head_out, axis=-1))   # [Sq, H]
    atted = jnp.concatenate(batch_out, axis=0)                 # [B*Sq, H]
    return jnp.dot(atted, wm, preferred_element_type=jnp.float32) + bm


# ----------------------------- fused kernel ----------------------------------
def _mca_ed_kernel(*refs, treedef, n_params, B, Sx, Sy):
    x_ref, y_ref, xm_ref, ym_ref = refs[:4]
    param_refs = refs[4:4 + n_params]
    xo_ref, yo_ref = refs[4 + n_params:]

    enc, dec = jax.tree_util.tree_unflatten(treedef, list(param_refs))

    x = x_ref[...]        # [B*Sx, H]
    y = y_ref[...]        # [B*Sy, H]
    xm = xm_ref[...]      # [B, Sx] float, 1.0 == masked
    ym = ym_ref[...]      # [B, Sy]

    # ---- encoder: LAYERS x SA(x, x_mask) ----
    for l in range(LAYERS):
        att = _mha(x, x, enc['wqkv'][l], enc['bqkv'][l], enc['wm'][l], enc['bm'][l],
                   xm, B, Sx, Sx)
        x = _add_layernorm(x, att, enc['ln1g'][l], enc['ln1b'][l])
        f = _ffn(x, enc['w1'][l], enc['b1'][l], enc['w2'][l], enc['b2'][l])
        x = _add_layernorm(x, f, enc['ln2g'][l], enc['ln2b'][l])

    # ---- decoder: LAYERS x SGA(y, x, y_mask, x_mask) ----
    for l in range(LAYERS):
        att = _mha(y, y, dec['wqkv1'][l], dec['bqkv1'][l], dec['wm1'][l], dec['bm1'][l],
                   ym, B, Sy, Sy)
        y = _add_layernorm(y, att, dec['ln1g'][l], dec['ln1b'][l])
        att = _mha(y, x, dec['wqkv2'][l], dec['bqkv2'][l], dec['wm2'][l], dec['bm2'][l],
                   xm, B, Sy, Sx)
        y = _add_layernorm(y, att, dec['ln2g'][l], dec['ln2b'][l])
        f = _ffn(y, dec['w1'][l], dec['b1'][l], dec['w2'][l], dec['b2'][l])
        y = _add_layernorm(y, f, dec['ln3g'][l], dec['ln3b'][l])

    xo_ref[...] = x.astype(xo_ref.dtype)
    yo_ref[...] = y.astype(yo_ref.dtype)


@jax.jit
def mca_ed(params, x, y, x_mask, y_mask):
    """MCA_ED.forward (model_type='base'): returns (x, y)."""
    B, Sx, H = x.shape
    Sy = y.shape[1]
    x2d = x.reshape(B * Sx, H).astype(jnp.float32)
    y2d = y.reshape(B * Sy, H).astype(jnp.float32)
    xm = x_mask.astype(jnp.float32)            # un-broadcast [B, Sx]
    ym = y_mask.astype(jnp.float32)            # un-broadcast [B, Sy]

    leaves, treedef = jax.tree_util.tree_flatten((params['enc'], params['dec']))
    n_params = len(leaves)

    kernel = functools.partial(_mca_ed_kernel, treedef=treedef,
                               n_params=n_params, B=B, Sx=Sx, Sy=Sy)
    vmem = pl.BlockSpec(memory_space=pltpu.MemorySpace.VMEM)

    xo, yo = pl.pallas_call(
        kernel,
        out_shape=(jax.ShapeDtypeStruct((B * Sx, H), jnp.float32),
                   jax.ShapeDtypeStruct((B * Sy, H), jnp.float32)),
        in_specs=[vmem] * (4 + n_params),
        out_specs=(vmem, vmem),
    )(x2d, y2d, xm, ym, *leaves)

    return xo.reshape(B, Sx, H), yo.reshape(B, Sy, H)


# ----------------------------- parameter init --------------------------------
def _init_mhatt_params(key, scale=0.05):
    kq, kk, kv, km = jax.random.split(key, 4)
    wq = jax.random.normal(kq, (HIDDEN, HIDDEN), jnp.float32) * scale
    wk = jax.random.normal(kk, (HIDDEN, HIDDEN), jnp.float32) * scale
    wv = jax.random.normal(kv, (HIDDEN, HIDDEN), jnp.float32) * scale
    wm = jax.random.normal(km, (HIDDEN, HIDDEN), jnp.float32) * scale
    return dict(wqkv=jnp.concatenate([wq, wk, wv], axis=1),   # [H, 3H]
                bqkv=jnp.zeros((1, 3 * HIDDEN), jnp.float32),
                wm=wm, bm=jnp.zeros((1, HIDDEN), jnp.float32))


def _init_ffn_params(key, scale=0.05):
    k1, k2 = jax.random.split(key)
    return dict(w1=jax.random.normal(k1, (HIDDEN, FF), jnp.float32) * scale,
                b1=jnp.zeros((1, FF), jnp.float32),
                w2=jax.random.normal(k2, (FF, HIDDEN), jnp.float32) * scale,
                b2=jnp.zeros((1, HIDDEN), jnp.float32))


def _ln_params():
    return jnp.ones((1, HIDDEN), jnp.float32), jnp.zeros((1, HIDDEN), jnp.float32)


def init_params(key):
    enc_layers, dec_layers = [], []
    for _ in range(LAYERS):
        key, ka, kf = jax.random.split(key, 3)
        d = {}
        d.update(_init_mhatt_params(ka))
        d.update(_init_ffn_params(kf))
        d['ln1g'], d['ln1b'] = _ln_params()
        d['ln2g'], d['ln2b'] = _ln_params()
        enc_layers.append(d)
    for _ in range(LAYERS):
        key, k1, k2, kf = jax.random.split(key, 4)
        d = {}
        d.update({k + '1': v for k, v in _init_mhatt_params(k1).items()})
        d.update({k + '2': v for k, v in _init_mhatt_params(k2).items()})
        d.update(_init_ffn_params(kf))
        d['ln1g'], d['ln1b'] = _ln_params()
        d['ln2g'], d['ln2b'] = _ln_params()
        d['ln3g'], d['ln3b'] = _ln_params()
        dec_layers.append(d)

    def stack(layers):
        return {k: jnp.stack([layer[k] for layer in layers]) for k in layers[0]}

    return {'enc': stack(enc_layers), 'dec': stack(dec_layers)}


# ----------------------------- pure-JAX reference ----------------------------
def _ref_forward(params, x, y, x_mask, y_mask):
    def ln(s, g, b):
        mean = s.mean(-1, keepdims=True)
        d = s - mean
        var = (d * d).sum(-1, keepdims=True) / (s.shape[-1] - 1)
        return g * d / (jnp.sqrt(var) + LN_EPS) + b

    def mha(qin, kvin, wqkv, bqkv, wm, bm, mask):
        B, Sq, H = qin.shape
        Sk = kvin.shape[1]
        q = qin @ wqkv[:, :H] + bqkv[:, :H]
        k = kvin @ wqkv[:, H:2 * H] + bqkv[:, H:2 * H]
        v = kvin @ wqkv[:, 2 * H:] + bqkv[:, 2 * H:]
        split = lambda t, S: t.reshape(B, S, HEADS, D_HEAD).transpose(0, 2, 1, 3)
        qh, kh, vh = split(q, Sq), split(k, Sk), split(v, Sk)
        s = jnp.einsum('bhqd,bhkd->bhqk', qh, kh) / math.sqrt(D_HEAD)
        s = jnp.where(mask[:, None, None, :], NEG_INF, s)
        p = jax.nn.softmax(s, axis=-1)
        o = jnp.einsum('bhqk,bhkd->bhqd', p, vh)
        o = o.transpose(0, 2, 1, 3).reshape(B, Sq, H)
        return o @ wm + bm

    def ffn_f(t, w1, b1, w2, b2):
        return jnp.maximum(t @ w1 + b1, 0.0) @ w2 + b2

    enc, dec = params['enc'], params['dec']
    for l in range(LAYERS):
        x = ln(x + mha(x, x, enc['wqkv'][l], enc['bqkv'][l], enc['wm'][l],
                       enc['bm'][l], x_mask), enc['ln1g'][l], enc['ln1b'][l])
        x = ln(x + ffn_f(x, enc['w1'][l], enc['b1'][l], enc['w2'][l], enc['b2'][l]),
               enc['ln2g'][l], enc['ln2b'][l])
    for l in range(LAYERS):
        y = ln(y + mha(y, y, dec['wqkv1'][l], dec['bqkv1'][l], dec['wm1'][l],
                       dec['bm1'][l], y_mask), dec['ln1g'][l], dec['ln1b'][l])
        y = ln(y + mha(y, x, dec['wqkv2'][l], dec['bqkv2'][l], dec['wm2'][l],
                       dec['bm2'][l], x_mask), dec['ln2g'][l], dec['ln2b'][l])
        y = ln(y + ffn_f(y, dec['w1'][l], dec['b1'][l], dec['w2'][l], dec['b2'][l]),
               dec['ln3g'][l], dec['ln3b'][l])
    return x, y


# ----------------------------- main ------------------------------------------
if __name__ == "__main__":
    key = jax.random.PRNGKey(0)
    kp, kx, ky = jax.random.split(key, 3)
    params = init_params(kp)

    B, Sx, Sy = 2, 8, 8
    x = jax.random.normal(kx, (B, Sx, HIDDEN), jnp.float32)
    y = jax.random.normal(ky, (B, Sy, HIDDEN), jnp.float32)
    # True == masked (same semantics as torch masked_fill(mask, -1e9))
    x_mask = jnp.zeros((B, Sx), jnp.bool_).at[1, -2:].set(True)
    y_mask = jnp.zeros((B, Sy), jnp.bool_).at[0, -1:].set(True)

    x_out, y_out = mca_ed(params, x, y, x_mask, y_mask)
    jax.block_until_ready((x_out, y_out))

    assert x_out.shape == (B, Sx, HIDDEN) and y_out.shape == (B, Sy, HIDDEN)
    assert bool(jnp.all(jnp.isfinite(x_out))) and bool(jnp.all(jnp.isfinite(y_out)))

    # numerical check against a pure-JAX reference of the same forward
    x_ref, y_ref = _ref_forward(params, x, y, x_mask, y_mask)
    err = max(float(jnp.max(jnp.abs(x_out - x_ref))),
              float(jnp.max(jnp.abs(y_out - y_ref))))
    assert err < 1e-2, f"mismatch vs pure-JAX reference: {err}"

    print("KERNEL_OK")
</pallas_src>

<mosaic_0001>
module attributes {stable_mosaic.version = 11 : i64} {
  func.func @_mca_ed_kernel(%arg0: memref<16x32xf32, #tpu.memory_space<vmem>>, %arg1: memref<16x32xf32, #tpu.memory_space<vmem>>, %arg2: memref<2x8xf32, #tpu.memory_space<vmem>>, %arg3: memref<2x8xf32, #tpu.memory_space<vmem>>, %arg4: memref<2x1x64xf32, #tpu.memory_space<vmem>>, %arg5: memref<2x1x32xf32, #tpu.memory_space<vmem>>, %arg6: memref<2x1x32xf32, #tpu.memory_space<vmem>>, %arg7: memref<2x1x96xf32, #tpu.memory_space<vmem>>, %arg8: memref<2x1x32xf32, #tpu.memory_space<vmem>>, %arg9: memref<2x1x32xf32, #tpu.memory_space<vmem>>, %arg10: memref<2x1x32xf32, #tpu.memory_space<vmem>>, %arg11: memref<2x1x32xf32, #tpu.memory_space<vmem>>, %arg12: memref<2x32x64xf32, #tpu.memory_space<vmem>>, %arg13: memref<2x64x32xf32, #tpu.memory_space<vmem>>, %arg14: memref<2x32x32xf32, #tpu.memory_space<vmem>>, %arg15: memref<2x32x96xf32, #tpu.memory_space<vmem>>, %arg16: memref<2x1x64xf32, #tpu.memory_space<vmem>>, %arg17: memref<2x1x32xf32, #tpu.memory_space<vmem>>, %arg18: memref<2x1x32xf32, #tpu.memory_space<vmem>>, %arg19: memref<2x1x32xf32, #tpu.memory_space<vmem>>, %arg20: memref<2x1x96xf32, #tpu.memory_space<vmem>>, %arg21: memref<2x1x96xf32, #tpu.memory_space<vmem>>, %arg22: memref<2x1x32xf32, #tpu.memory_space<vmem>>, %arg23: memref<2x1x32xf32, #tpu.memory_space<vmem>>, %arg24: memref<2x1x32xf32, #tpu.memory_space<vmem>>, %arg25: memref<2x1x32xf32, #tpu.memory_space<vmem>>, %arg26: memref<2x1x32xf32, #tpu.memory_space<vmem>>, %arg27: memref<2x1x32xf32, #tpu.memory_space<vmem>>, %arg28: memref<2x32x64xf32, #tpu.memory_space<vmem>>, %arg29: memref<2x64x32xf32, #tpu.memory_space<vmem>>, %arg30: memref<2x32x32xf32, #tpu.memory_space<vmem>>, %arg31: memref<2x32x32xf32, #tpu.memory_space<vmem>>, %arg32: memref<2x32x96xf32, #tpu.memory_space<vmem>>, %arg33: memref<2x32x96xf32, #tpu.memory_space<vmem>>, %arg34: memref<16x32xf32, #tpu.memory_space<vmem>>, %arg35: memref<16x32xf32, #tpu.memory_space<vmem>>) attributes {dimension_semantics = [], scalar_prefetch = 0 : i64, scratch_operands = 0 : i64, tpu.core_type = #tpu.core_type<tc>} {
    %c0 = arith.constant 0 : index
    %c0_0 = arith.constant 0 : index
    %0 = vector.load %arg0[%c0, %c0_0] : memref<16x32xf32, #tpu.memory_space<vmem>>, vector<16x32xf32>
    %c0_1 = arith.constant 0 : index
    %c0_2 = arith.constant 0 : index
    %1 = vector.load %arg1[%c0_1, %c0_2] : memref<16x32xf32, #tpu.memory_space<vmem>>, vector<16x32xf32>
    %c0_3 = arith.constant 0 : index
    %c0_4 = arith.constant 0 : index
    %2 = vector.load %arg2[%c0_3, %c0_4] : memref<2x8xf32, #tpu.memory_space<vmem>>, vector<2x8xf32>
    %c0_5 = arith.constant 0 : index
    %c0_6 = arith.constant 0 : index
    %3 = vector.load %arg3[%c0_5, %c0_6] : memref<2x8xf32, #tpu.memory_space<vmem>>, vector<2x8xf32>
    %c0_7 = arith.constant 0 : index
    %c0_8 = arith.constant 0 : index
    %c0_9 = arith.constant 0 : index
    %4 = vector.load %arg15[%c0_7, %c0_8, %c0_9] : memref<2x32x96xf32, #tpu.memory_space<vmem>>, vector<1x32x96xf32>
    %5 = vector.shape_cast %4 : vector<1x32x96xf32> to vector<32x96xf32>
    %c0_10 = arith.constant 0 : index
    %c0_11 = arith.constant 0 : index
    %c0_12 = arith.constant 0 : index
    %6 = vector.load %arg7[%c0_10, %c0_11, %c0_12] : memref<2x1x96xf32, #tpu.memory_space<vmem>>, vector<1x1x96xf32>
    %7 = vector.shape_cast %6 : vector<1x1x96xf32> to vector<1x96xf32>
    %c0_13 = arith.constant 0 : index
    %c0_14 = arith.constant 0 : index
    %c0_15 = arith.constant 0 : index
    %8 = vector.load %arg14[%c0_13, %c0_14, %c0_15] : memref<2x32x32xf32, #tpu.memory_space<vmem>>, vector<1x32x32xf32>
    %9 = vector.shape_cast %8 : vector<1x32x32xf32> to vector<32x32xf32>
    %c0_16 = arith.constant 0 : index
    %c0_17 = arith.constant 0 : index
    %c0_18 = arith.constant 0 : index
    %10 = vector.load %arg6[%c0_16, %c0_17, %c0_18] : memref<2x1x32xf32, #tpu.memory_space<vmem>>, vector<1x1x32xf32>
    %11 = vector.shape_cast %10 : vector<1x1x32xf32> to vector<1x32xf32>
    %cst = arith.constant dense<0.000000e+00> : vector<16x96xf32>
    %12 = tpu.matmul %0, %5, %cst {dimension_numbers = #tpu.dot_dimension_numbers<[1], [0], [0], [1], [0, 0, 1, 1], [], []>} : vector<16x32xf32>, vector<32x96xf32>, vector<16x96xf32> -> vector<16x96xf32>
    %13 = vector.broadcast %7 : vector<1x96xf32> to vector<16x96xf32>
    %14 = arith.addf %12, %13 : vector<16x96xf32>
    %15 = vector.extract_strided_slice %14 {offsets = [0, 0], sizes = [16, 32], strides = [1, 1]} : vector<16x96xf32> to vector<16x32xf32>
    %16 = vector.extract_strided_slice %14 {offsets = [0, 32], sizes = [16, 32], strides = [1, 1]} : vector<16x96xf32> to vector<16x32xf32>
    %17 = vector.extract_strided_slice %14 {offsets = [0, 64], sizes = [16, 32], strides = [1, 1]} : vector<16x96xf32> to vector<16x32xf32>
    %18 = vector.extract_strided_slice %15 {offsets = [0, 0], sizes = [8, 32], strides = [1, 1]} : vector<16x32xf32> to vector<8x32xf32>
    %19 = vector.extract_strided_slice %16 {offsets = [0, 0], sizes = [8, 32], strides = [1, 1]} : vector<16x32xf32> to vector<8x32xf32>
    %20 = vector.extract_strided_slice %17 {offsets = [0, 0], sizes = [8, 32], strides = [1, 1]} : vector<16x32xf32> to vector<8x32xf32>
    %21 = vector.extract_strided_slice %2 {offsets = [0, 0], sizes = [1, 8], strides = [1, 1]} : vector<2x8xf32> to vector<1x8xf32>
    %22 = vector.extract_strided_slice %18 {offsets = [0, 0], sizes = [8, 8], strides = [1, 1]} : vector<8x32xf32> to vector<8x8xf32>
    %23 = vector.extract_strided_slice %19 {offsets = [0, 0], sizes = [8, 8], strides = [1, 1]} : vector<8x32xf32> to vector<8x8xf32>
    %cst_19 = arith.constant dense<0.000000e+00> : vector<8x8xf32>
    %24 = tpu.matmul %22, %23, %cst_19 {dimension_numbers = #tpu.dot_dimension_numbers<[1], [1], [0], [0], [0, 0, 1, 0], [], []>} : vector<8x8xf32>, vector<8x8xf32>, vector<8x8xf32> -> vector<8x8xf32>
    %cst_20 = arith.constant 0.353553385 : f32
    %25 = vector.broadcast %cst_20 : f32 to vector<8x8xf32>
    %26 = arith.mulf %24, %25 : vector<8x8xf32>
    %cst_21 = arith.constant 5.000000e-01 : f32
    %27 = vector.broadcast %cst_21 : f32 to vector<1x8xf32>
    %28 = arith.cmpf ogt, %21, %27 : vector<1x8xf32>
    %cst_22 = arith.constant -1.000000e+09 : f32
    %29 = vector.shape_cast %28 : vector<1x8xi1> to vector<1x8xi1>
    %30 = vector.broadcast %29 : vector<1x8xi1> to vector<8x8xi1>
    %31 = vector.broadcast %cst_22 : f32 to vector<8x8xf32>
    %32 = arith.select %30, %31, %26 : vector<8x8xi1>, vector<8x8xf32>
    %cst_23 = arith.constant dense<0xFF800000> : vector<8xf32>
    %33 = vector.multi_reduction <maximumf>, %32, %cst_23 [1] : vector<8x8xf32> to vector<8xf32>
    %34 = vector.shape_cast %33 : vector<8xf32> to vector<8x1xf32>
    %35 = vector.broadcast %34 : vector<8x1xf32> to vector<8x8xf32>
    %36 = arith.subf %32, %35 : vector<8x8xf32>
    %37 = math.exp %36 : vector<8x8xf32>
    %cst_24 = arith.constant dense<0.000000e+00> : vector<8xf32>
    %38 = vector.multi_reduction <add>, %37, %cst_24 [1] : vector<8x8xf32> to vector<8xf32>
    %39 = vector.shape_cast %38 : vector<8xf32> to vector<8x1xf32>
    %40 = tpu.reciprocal %39 {approx = true} : vector<8x1xf32> -> vector<8x1xf32>
    %41 = vector.broadcast %40 : vector<8x1xf32> to vector<8x8xf32>
    %42 = arith.mulf %37, %41 : vector<8x8xf32>
    %43 = vector.extract_strided_slice %20 {offsets = [0, 0], sizes = [8, 8], strides = [1, 1]} : vector<8x32xf32> to vector<8x8xf32>
    %cst_25 = arith.constant dense<0.000000e+00> : vector<8x8xf32>
    %44 = tpu.matmul %42, %43, %cst_25 {dimension_numbers = #tpu.dot_dimension_numbers<[1], [0], [0], [1], [0, 0, 1, 1], [], []>} : vector<8x8xf32>, vector<8x8xf32>, vector<8x8xf32> -> vector<8x8xf32>
    %45 = vector.extract_strided_slice %18 {offsets = [0, 8], sizes = [8, 8], strides = [1, 1]} : vector<8x32xf32> to vector<8x8xf32>
    %46 = vector.extract_strided_slice %19 {offsets = [0, 8], sizes = [8, 8], strides = [1, 1]} : vector<8x32xf32> to vector<8x8xf32>
    %cst_26 = arith.constant dense<0.000000e+00> : vector<8x8xf32>
    %47 = tpu.matmul %45, %46, %cst_26 {dimension_numbers = #tpu.dot_dimension_numbers<[1], [1], [0], [0], [0, 0, 1, 0], [], []>} : vector<8x8xf32>, vector<8x8xf32>, vector<8x8xf32> -> vector<8x8xf32>
    %cst_27 = arith.constant 0.353553385 : f32
    %48 = vector.broadcast %cst_27 : f32 to vector<8x8xf32>
    %49 = arith.mulf %47, %48 : vector<8x8xf32>
    %cst_28 = arith.constant 5.000000e-01 : f32
    %50 = vector.broadcast %cst_28 : f32 to vector<1x8xf32>
    %51 = arith.cmpf ogt, %21, %50 : vector<1x8xf32>
    %cst_29 = arith.constant -1.000000e+09 : f32
    %52 = vector.shape_cast %51 : vector<1x8xi1> to vector<1x8xi1>
    %53 = vector.broadcast %52 : vector<1x8xi1> to vector<8x8xi1>
    %54 = vector.broadcast %cst_29 : f32 to vector<8x8xf32>
    %55 = arith.select %53, %54, %49 : vector<8x8xi1>, vector<8x8xf32>
    %cst_30 = arith.constant dense<0xFF800000> : vector<8xf32>
    %56 = vector.multi_reduction <maximumf>, %55, %cst_30 [1] : vector<8x8xf32> to vector<8xf32>
    %57 = vector.shape_cast %56 : vector<8xf32> to vector<8x1xf32>
    %58 = vector.broadcast %57 : vector<8x1xf32> to vector<8x8xf32>
    %59 = arith.subf %55, %58 : vector<8x8xf32>
    %60 = math.exp %59 : vector<8x8xf32>
    %cst_31 = arith.constant dense<0.000000e+00> : vector<8xf32>
    %61 = vector.multi_reduction <add>, %60, %cst_31 [1] : vector<8x8xf32> to vector<8xf32>
    %62 = vector.shape_cast %61 : vector<8xf32> to vector<8x1xf32>
    %63 = tpu.reciprocal %62 {approx = true} : vector<8x1xf32> -> vector<8x1xf32>
    %64 = vector.broadcast %63 : vector<8x1xf32> to vector<8x8xf32>
    %65 = arith.mulf %60, %64 : vector<8x8xf32>
    %66 = vector.extract_strided_slice %20 {offsets = [0, 8], sizes = [8, 8], strides = [1, 1]} : vector<8x32xf32> to vector<8x8xf32>
    %cst_32 = arith.constant dense<0.000000e+00> : vector<8x8xf32>
    %67 = tpu.matmul %65, %66, %cst_32 {dimension_numbers = #tpu.dot_dimension_numbers<[1], [0], [0], [1], [0, 0, 1, 1], [], []>} : vector<8x8xf32>, vector<8x8xf32>, vector<8x8xf32> -> vector<8x8xf32>
    %68 = vector.extract_strided_slice %18 {offsets = [0, 16], sizes = [8, 8], strides = [1, 1]} : vector<8x32xf32> to vector<8x8xf32>
    %69 = vector.extract_strided_slice %19 {offsets = [0, 16], sizes = [8, 8], strides = [1, 1]} : vector<8x32xf32> to vector<8x8xf32>
    %cst_33 = arith.constant dense<0.000000e+00> : vector<8x8xf32>
    %70 = tpu.matmul %68, %69, %cst_33 {dimension_numbers = #tpu.dot_dimension_numbers<[1], [1], [0], [0], [0, 0, 1, 0], [], []>} : vector<8x8xf32>, vector<8x8xf32>, vector<8x8xf32> -> vector<8x8xf32>
    %cst_34 = arith.constant 0.353553385 : f32
    %71 = vector.broadcast %cst_34 : f32 to vector<8x8xf32>
    %72 = arith.mulf %70, %71 : vector<8x8xf32>
    %cst_35 = arith.constant 5.000000e-01 : f32
    %73 = vector.broadcast %cst_35 : f32 to vector<1x8xf32>
    %74 = arith.cmpf ogt, %21, %73 : vector<1x8xf32>
    %cst_36 = arith.constant -1.000000e+09 : f32
    %75 = vector.shape_cast %74 : vector<1x8xi1> to vector<1x8xi1>
    %76 = vector.broadcast %75 : vector<1x8xi1> to vector<8x8xi1>
    %77 = vector.broadcast %cst_36 : f32 to vector<8x8xf32>
    %78 = arith.select %76, %77, %72 : vector<8x8xi1>, vector<8x8xf32>
    %cst_37 = arith.constant dense<0xFF800000> : vector<8xf32>
    %79 = vector.multi_reduction <maximumf>, %78, %cst_37 [1] : vector<8x8xf32> to vector<8xf32>
    %80 = vector.shape_cast %79 : vector<8xf32> to vector<8x1xf32>
    %81 = vector.broadcast %80 : vector<8x1xf32> to vector<8x8xf32>
    %82 = arith.subf %78, %81 : vector<8x8xf32>
    %83 = math.exp %82 : vector<8x8xf32>
    %cst_38 = arith.constant dense<0.000000e+00> : vector<8xf32>
    %84 = vector.multi_reduction <add>, %83, %cst_38 [1] : vector<8x8xf32> to vector<8xf32>
    %85 = vector.shape_cast %84 : vector<8xf32> to vector<8x1xf32>
    %86 = tpu.reciprocal %85 {approx = true} : vector<8x1xf32> -> vector<8x1xf32>
    %87 = vector.broadcast %86 : vector<8x1xf32> to vector<8x8xf32>
    %88 = arith.mulf %83, %87 : vector<8x8xf32>
    %89 = vector.extract_strided_slice %20 {offsets = [0, 16], sizes = [8, 8], strides = [1, 1]} : vector<8x32xf32> to vector<8x8xf32>
    %cst_39 = arith.constant dense<0.000000e+00> : vector<8x8xf32>
    %90 = tpu.matmul %88, %89, %cst_39 {dimension_numbers = #tpu.dot_dimension_numbers<[1], [0], [0], [1], [0, 0, 1, 1], [], []>} : vector<8x8xf32>, vector<8x8xf32>, vector<8x8xf32> -> vector<8x8xf32>
    %91 = vector.extract_strided_slice %18 {offsets = [0, 24], sizes = [8, 8], strides = [1, 1]} : vector<8x32xf32> to vector<8x8xf32>
    %92 = vector.extract_strided_slice %19 {offsets = [0, 24], sizes = [8, 8], strides = [1, 1]} : vector<8x32xf32> to vector<8x8xf32>
    %cst_40 = arith.constant dense<0.000000e+00> : vector<8x8xf32>
    %93 = tpu.matmul %91, %92, %cst_40 {dimension_numbers = #tpu.dot_dimension_numbers<[1], [1], [0], [0], [0, 0, 1, 0], [], []>} : vector<8x8xf32>, vector<8x8xf32>, vector<8x8xf32> -> vector<8x8xf32>
    %cst_41 = arith.constant 0.353553385 : f32
    %94 = vector.broadcast %cst_41 : f32 to vector<8x8xf32>
    %95 = arith.mulf %93, %94 : vector<8x8xf32>
    %cst_42 = arith.constant 5.000000e-01 : f32
    %96 = vector.broadcast %cst_42 : f32 to vector<1x8xf32>
    %97 = arith.cmpf ogt, %21, %96 : vector<1x8xf32>
    %cst_43 = arith.constant -1.000000e+09 : f32
    %98 = vector.shape_cast %97 : vector<1x8xi1> to vector<1x8xi1>
    %99 = vector.broadcast %98 : vector<1x8xi1> to vector<8x8xi1>
    %100 = vector.broadcast %cst_43 : f32 to vector<8x8xf32>
    %101 = arith.select %99, %100, %95 : vector<8x8xi1>, vector<8x8xf32>
    %cst_44 = arith.constant dense<0xFF800000> : vector<8xf32>
    %102 = vector.multi_reduction <maximumf>, %101, %cst_44 [1] : vector<8x8xf32> to vector<8xf32>
    %103 = vector.shape_cast %102 : vector<8xf32> to vector<8x1xf32>
    %104 = vector.broadcast %103 : vector<8x1xf32> to vector<8x8xf32>
    %105 = arith.subf %101, %104 : vector<8x8xf32>
    %106 = math.exp %105 : vector<8x8xf32>
    %cst_45 = arith.constant dense<0.000000e+00> : vector<8xf32>
    %107 = vector.multi_reduction <add>, %106, %cst_45 [1] : vector<8x8xf32> to vector<8xf32>
    %108 = vector.shape_cast %107 : vector<8xf32> to vector<8x1xf32>
    %109 = tpu.reciprocal %108 {approx = true} : vector<8x1xf32> -> vector<8x1xf32>
    %110 = vector.broadcast %109 : vector<8x1xf32> to vector<8x8xf32>
    %111 = arith.mulf %106, %110 : vector<8x8xf32>
    %112 = vector.extract_strided_slice %20 {offsets = [0, 24], sizes = [8, 8], strides = [1, 1]} : vector<8x32xf32> to vector<8x8xf32>
    %cst_46 = arith.constant dense<0.000000e+00> : vector<8x8xf32>
    %113 = tpu.matmul %111, %112, %cst_46 {dimension_numbers = #tpu.dot_dimension_numbers<[1], [0], [0], [1], [0, 0, 1, 1], [], []>} : vector<8x8xf32>, vector<8x8xf32>, vector<8x8xf32> -> vector<8x8xf32>
    %114 = tpu.concatenate %44, %67, %90, %113 in 1 : vector<8x8xf32>, vector<8x8xf32>, vector<8x8xf32>, vector<8x8xf32> -> vector<8x32xf32>
    %115 = vector.extract_strided_slice %15 {offsets = [8, 0], sizes = [8, 32], strides = [1, 1]} : vector<16x32xf32> to vector<8x32xf32>
    %116 = vector.extract_strided_slice %16 {offsets = [8, 0], sizes = [8, 32], strides = [1, 1]} : vector<16x32xf32> to vector<8x32xf32>
    %117 = vector.extract_strided_slice %17 {offsets = [8, 0], sizes = [8, 32], strides = [1, 1]} : vector<16x32xf32> to vector<8x32xf32>
    %118 = vector.extract_strided_slice %2 {offsets = [1, 0], sizes = [1, 8], strides = [1, 1]} : vector<2x8xf32> to vector<1x8xf32>
    %119 = vector.extract_strided_slice %115 {offsets = [0, 0], sizes = [8, 8], strides = [1, 1]} : vector<8x32xf32> to vector<8x8xf32>
    %120 = vector.extract_strided_slice %116 {offsets = [0, 0], sizes = [8, 8], strides = [1, 1]} : vector<8x32xf32> to vector<8x8xf32>
    %cst_47 = arith.constant dense<0.000000e+00> : vector<8x8xf32>
    %121 = tpu.matmul %119, %120, %cst_47 {dimension_numbers = #tpu.dot_dimension_numbers<[1], [1], [0], [0], [0, 0, 1, 0], [], []>} : vector<8x8xf32>, vector<8x8xf32>, vector<8x8xf32> -> vector<8x8xf32>
    %cst_48 = arith.constant 0.353553385 : f32
    %122 = vector.broadcast %cst_48 : f32 to vector<8x8xf32>
    %123 = arith.mulf %121, %122 : vector<8x8xf32>
    %cst_49 = arith.constant 5.000000e-01 : f32
    %124 = vector.broadcast %cst_49 : f32 to vector<1x8xf32>
    %125 = arith.cmpf ogt, %118, %124 : vector<1x8xf32>
    %cst_50 = arith.constant -1.000000e+09 : f32
    %126 = vector.shape_cast %125 : vector<1x8xi1> to vector<1x8xi1>
    %127 = vector.broadcast %126 : vector<1x8xi1> to vector<8x8xi1>
    %128 = vector.broadcast %cst_50 : f32 to vector<8x8xf32>
    %129 = arith.select %127, %128, %123 : vector<8x8xi1>, vector<8x8xf32>
    %cst_51 = arith.constant dense<0xFF800000> : vector<8xf32>
    %130 = vector.multi_reduction <maximumf>, %129, %cst_51 [1] : vector<8x8xf32> to vector<8xf32>
    %131 = vector.shape_cast %130 : vector<8xf32> to vector<8x1xf32>
    %132 = vector.broadcast %131 : vector<8x1xf32> to vector<8x8xf32>
    %133 = arith.subf %129, %132 : vector<8x8xf32>
    %134 = math.exp %133 : vector<8x8xf32>
    %cst_52 = arith.constant dense<0.000000e+00> : vector<8xf32>
    %135 = vector.multi_reduction <add>, %134, %cst_52 [1] : vector<8x8xf32> to vector<8xf32>
    %136 = vector.shape_cast %135 : vector<8xf32> to vector<8x1xf32>
    %137 = tpu.reciprocal %136 {approx = true} : vector<8x1xf32> -> vector<8x1xf32>
    %138 = vector.broadcast %137 : vector<8x1xf32> to vector<8x8xf32>
    %139 = arith.mulf %134, %138 : vector<8x8xf32>
    %140 = vector.extract_strided_slice %117 {offsets = [0, 0], sizes = [8, 8], strides = [1, 1]} : vector<8x32xf32> to vector<8x8xf32>
    %cst_53 = arith.constant dense<0.000000e+00> : vector<8x8xf32>
    %141 = tpu.matmul %139, %140, %cst_53 {dimension_numbers = #tpu.dot_dimension_numbers<[1], [0], [0], [1], [0, 0, 1, 1], [], []>} : vector<8x8xf32>, vector<8x8xf32>, vector<8x8xf32> -> vector<8x8xf32>
    %142 = vector.extract_strided_slice %115 {offsets = [0, 8], sizes = [8, 8], strides = [1, 1]} : vector<8x32xf32> to vector<8x8xf32>
    %143 = vector.extract_strided_slice %116 {offsets = [0, 8], sizes = [8, 8], strides = [1, 1]} : vector<8x32xf32> to vector<8x8xf32>
    %cst_54 = arith.constant dense<0.000000e+00> : vector<8x8xf32>
    %144 = tpu.matmul %142, %143, %cst_54 {dimension_numbers = #tpu.dot_dimension_numbers<[1], [1], [0], [0], [0, 0, 1, 0], [], []>} : vector<8x8xf32>, vector<8x8xf32>, vector<8x8xf32> -> vector<8x8xf32>
    %cst_55 = arith.constant 0.353553385 : f32
    %145 = vector.broadcast %cst_55 : f32 to vector<8x8xf32>
    %146 = arith.mulf %144, %145 : vector<8x8xf32>
    %cst_56 = arith.constant 5.000000e-01 : f32
    %147 = vector.broadcast %cst_56 : f32 to vector<1x8xf32>
    %148 = arith.cmpf ogt, %118, %147 : vector<1x8xf32>
    %cst_57 = arith.constant -1.000000e+09 : f32
    %149 = vector.shape_cast %148 : vector<1x8xi1> to vector<1x8xi1>
    %150 = vector.broadcast %149 : vector<1x8xi1> to vector<8x8xi1>
    %151 = vector.broadcast %cst_57 : f32 to vector<8x8xf32>
    %152 = arith.select %150, %151, %146 : vector<8x8xi1>, vector<8x8xf32>
    %cst_58 = arith.constant dense<0xFF800000> : vector<8xf32>
    %153 = vector.multi_reduction <maximumf>, %152, %cst_58 [1] : vector<8x8xf32> to vector<8xf32>
    %154 = vector.shape_cast %153 : vector<8xf32> to vector<8x1xf32>
    %155 = vector.broadcast %154 : vector<8x1xf32> to vector<8x8xf32>
    %156 = arith.subf %152, %155 : vector<8x8xf32>
    %157 = math.exp %156 : vector<8x8xf32>
    %cst_59 = arith.constant dense<0.000000e+00> : vector<8xf32>
    %158 = vector.multi_reduction <add>, %157, %cst_59 [1] : vector<8x8xf32> to vector<8xf32>
    %159 = vector.shape_cast %158 : vector<8xf32> to vector<8x1xf32>
    %160 = tpu.reciprocal %159 {approx = true} : vector<8x1xf32> -> vector<8x1xf32>
    %161 = vector.broadcast %160 : vector<8x1xf32> to vector<8x8xf32>
    %162 = arith.mulf %157, %161 : vector<8x8xf32>
    %163 = vector.extract_strided_slice %117 {offsets = [0, 8], sizes = [8, 8], strides = [1, 1]} : vector<8x32xf32> to vector<8x8xf32>
    %cst_60 = arith.constant dense<0.000000e+00> : vector<8x8xf32>
    %164 = tpu.matmul %162, %163, %cst_60 {dimension_numbers = #tpu.dot_dimension_numbers<[1], [0], [0], [1], [0, 0, 1, 1], [], []>} : vector<8x8xf32>, vector<8x8xf32>, vector<8x8xf32> -> vector<8x8xf32>
    %165 = vector.extract_strided_slice %115 {offsets = [0, 16], sizes = [8, 8], strides = [1, 1]} : vector<8x32xf32> to vector<8x8xf32>
    %166 = vector.extract_strided_slice %116 {offsets = [0, 16], sizes = [8, 8], strides = [1, 1]} : vector<8x32xf32> to vector<8x8xf32>
    %cst_61 = arith.constant dense<0.000000e+00> : vector<8x8xf32>
    %167 = tpu.matmul %165, %166, %cst_61 {dimension_numbers = #tpu.dot_dimension_numbers<[1], [1], [0], [0], [0, 0, 1, 0], [], []>} : vector<8x8xf32>, vector<8x8xf32>, vector<8x8xf32> -> vector<8x8xf32>
    %cst_62 = arith.constant 0.353553385 : f32
    %168 = vector.broadcast %cst_62 : f32 to vector<8x8xf32>
    %169 = arith.mulf %167, %168 : vector<8x8xf32>
    %cst_63 = arith.constant 5.000000e-01 : f32
    %170 = vector.broadcast %cst_63 : f32 to vector<1x8xf32>
    %171 = arith.cmpf ogt, %118, %170 : vector<1x8xf32>
    %cst_64 = arith.constant -1.000000e+09 : f32
    %172 = vector.shape_cast %171 : vector<1x8xi1> to vector<1x8xi1>
    %173 = vector.broadcast %172 : vector<1x8xi1> to vector<8x8xi1>
    %174 = vector.broadcast %cst_64 : f32 to vector<8x8xf32>
    %175 = arith.select %173, %174, %169 : vector<8x8xi1>, vector<8x8xf32>
    %cst_65 = arith.constant dense<0xFF800000> : vector<8xf32>
    %176 = vector.multi_reduction <maximumf>, %175, %cst_65 [1] : vector<8x8xf32> to vector<8xf32>
    %177 = vector.shape_cast %176 : vector<8xf32> to vector<8x1xf32>
    %178 = vector.broadcast %177 : vector<8x1xf32> to vector<8x8xf32>
    %179 = arith.subf %175, %178 : vector<8x8xf32>
    %180 = math.exp %179 : vector<8x8xf32>
    %cst_66 = arith.constant dense<0.000000e+00> : vector<8xf32>
    %181 = vector.multi_reduction <add>, %180, %cst_66 [1] : vector<8x8xf32> to vector<8xf32>
    %182 = vector.shape_cast %181 : vector<8xf32> to vector<8x1xf32>
    %183 = tpu.reciprocal %182 {approx = true} : vector<8x1xf32> -> vector<8x1xf32>
    %184 = vector.broadcast %183 : vector<8x1xf32> to vector<8x8xf32>
    %185 = arith.mulf %180, %184 : vector<8x8xf32>
    %186 = vector.extract_strided_slice %117 {offsets = [0, 16], sizes = [8, 8], strides = [1, 1]} : vector<8x32xf32> to vector<8x8xf32>
    %cst_67 = arith.constant dense<0.000000e+00> : vector<8x8xf32>
    %187 = tpu.matmul %185, %186, %cst_67 {dimension_numbers = #tpu.dot_dimension_numbers<[1], [0], [0], [1], [0, 0, 1, 1], [], []>} : vector<8x8xf32>, vector<8x8xf32>, vector<8x8xf32> -> vector<8x8xf32>
    %188 = vector.extract_strided_slice %115 {offsets = [0, 24], sizes = [8, 8], strides = [1, 1]} : vector<8x32xf32> to vector<8x8xf32>
    %189 = vector.extract_strided_slice %116 {offsets = [0, 24], sizes = [8, 8], strides = [1, 1]} : vector<8x32xf32> to vector<8x8xf32>
    %cst_68 = arith.constant dense<0.000000e+00> : vector<8x8xf32>
    %190 = tpu.matmul %188, %189, %cst_68 {dimension_numbers = #tpu.dot_dimension_numbers<[1], [1], [0], [0], [0, 0, 1, 0], [], []>} : vector<8x8xf32>, vector<8x8xf32>, vector<8x8xf32> -> vector<8x8xf32>
    %cst_69 = arith.constant 0.353553385 : f32
    %191 = vector.broadcast %cst_69 : f32 to vector<8x8xf32>
    %192 = arith.mulf %190, %191 : vector<8x8xf32>
    %cst_70 = arith.constant 5.000000e-01 : f32
    %193 = vector.broadcast %cst_70 : f32 to vector<1x8xf32>
    %194 = arith.cmpf ogt, %118, %193 : vector<1x8xf32>
    %cst_71 = arith.constant -1.000000e+09 : f32
    %195 = vector.shape_cast %194 : vector<1x8xi1> to vector<1x8xi1>
    %196 = vector.broadcast %195 : vector<1x8xi1> to vector<8x8xi1>
    %197 = vector.broadcast %cst_71 : f32 to vector<8x8xf32>
    %198 = arith.select %196, %197, %192 : vector<8x8xi1>, vector<8x8xf32>
    %cst_72 = arith.constant dense<0xFF800000> : vector<8xf32>
    %199 = vector.multi_reduction <maximumf>, %198, %cst_72 [1] : vector<8x8xf32> to vector<8xf32>
    %200 = vector.shape_cast %199 : vector<8xf32> to vector<8x1xf32>
    %201 = vector.broadcast %200 : vector<8x1xf32> to vector<8x8xf32>
    %202 = arith.subf %198, %201 : vector<8x8xf32>
    %203 = math.exp %202 : vector<8x8xf32>
    %cst_73 = arith.constant dense<0.000000e+00> : vector<8xf32>
    %204 = vector.multi_reduction <add>, %203, %cst_73 [1] : vector<8x8xf32> to vector<8xf32>
    %205 = vector.shape_cast %204 : vector<8xf32> to vector<8x1xf32>
    %206 = tpu.reciprocal %205 {approx = true} : vector<8x1xf32> -> vector<8x1xf32>
    %207 = vector.broadcast %206 : vector<8x1xf32> to vector<8x8xf32>
    %208 = arith.mulf %203, %207 : vector<8x8xf32>
    %209 = vector.extract_strided_slice %117 {offsets = [0, 24], sizes = [8, 8], strides = [1, 1]} : vector<8x32xf32> to vector<8x8xf32>
    %cst_74 = arith.constant dense<0.000000e+00> : vector<8x8xf32>
    %210 = tpu.matmul %208, %209, %cst_74 {dimension_numbers = #tpu.dot_dimension_numbers<[1], [0], [0], [1], [0, 0, 1, 1], [], []>} : vector<8x8xf32>, vector<8x8xf32>, vector<8x8xf32> -> vector<8x8xf32>
    %211 = tpu.concatenate %141, %164, %187, %210 in 1 : vector<8x8xf32>, vector<8x8xf32>, vector<8x8xf32>, vector<8x8xf32> -> vector<8x32xf32>
    %212 = tpu.concatenate %114, %211 in 0 : vector<8x32xf32>, vector<8x32xf32> -> vector<16x32xf32>
    %cst_75 = arith.constant dense<0.000000e+00> : vector<16x32xf32>
    %213 = tpu.matmul %212, %9, %cst_75 {dimension_numbers = #tpu.dot_dimension_numbers<[1], [0], [0], [1], [0, 0, 1, 1], [], []>} : vector<16x32xf32>, vector<32x32xf32>, vector<16x32xf32> -> vector<16x32xf32>
    %214 = vector.broadcast %11 : vector<1x32xf32> to vector<16x32xf32>
    %215 = arith.addf %213, %214 : vector<16x32xf32>
    %c0_76 = arith.constant 0 : index
    %c0_77 = arith.constant 0 : index
    %c0_78 = arith.constant 0 : index
    %216 = vector.load %arg9[%c0_76, %c0_77, %c0_78] : memref<2x1x32xf32, #tpu.memory_space<vmem>>, vector<1x1x32xf32>
    %217 = vector.shape_cast %216 : vector<1x1x32xf32> to vector<1x32xf32>
    %c0_79 = arith.constant 0 : index
    %c0_80 = arith.constant 0 : index
    %c0_81 = arith.constant 0 : index
    %218 = vector.load %arg8[%c0_79, %c0_80, %c0_81] : memref<2x1x32xf32, #tpu.memory_space<vmem>>, vector<1x1x32xf32>
    %219 = vector.shape_cast %218 : vector<1x1x32xf32> to vector<1x32xf32>
    %220 = arith.addf %0, %215 : vector<16x32xf32>
    %cst_82 = arith.constant dense<0.000000e+00> : vector<16xf32>
    %221 = vector.multi_reduction <add>, %220, %cst_82 [1] : vector<16x32xf32> to vector<16xf32>
    %222 = vector.shape_cast %221 : vector<16xf32> to vector<16x1xf32>
    %cst_83 = arith.constant 3.200000e+01 : f32
    %223 = vector.broadcast %cst_83 : f32 to vector<16x1xf32>
    %224 = arith.divf %222, %223 : vector<16x1xf32>
    %225 = vector.broadcast %224 : vector<16x1xf32> to vector<16x32xf32>
    %226 = arith.subf %220, %225 : vector<16x32xf32>
    %227 = arith.mulf %226, %226 : vector<16x32xf32>
    %cst_84 = arith.constant dense<0.000000e+00> : vector<16xf32>
    %228 = vector.multi_reduction <add>, %227, %cst_84 [1] : vector<16x32xf32> to vector<16xf32>
    %229 = vector.shape_cast %228 : vector<16xf32> to vector<16x1xf32>
    %cst_85 = arith.constant 3.100000e+01 : f32
    %230 = vector.broadcast %cst_85 : f32 to vector<16x1xf32>
    %231 = arith.divf %229, %230 : vector<16x1xf32>
    %232 = math.sqrt %231 : vector<16x1xf32>
    %233 = vector.broadcast %217 : vector<1x32xf32> to vector<16x32xf32>
    %234 = arith.mulf %233, %226 : vector<16x32xf32>
    %cst_86 = arith.constant 9.99999997E-7 : f32
    %235 = vector.broadcast %cst_86 : f32 to vector<16x1xf32>
    %236 = arith.addf %232, %235 : vector<16x1xf32>
    %237 = vector.broadcast %236 : vector<16x1xf32> to vector<16x32xf32>
    %238 = arith.divf %234, %237 : vector<16x32xf32>
    %239 = vector.broadcast %219 : vector<1x32xf32> to vector<16x32xf32>
    %240 = arith.addf %238, %239 : vector<16x32xf32>
    %c0_87 = arith.constant 0 : index
    %c0_88 = arith.constant 0 : index
    %c0_89 = arith.constant 0 : index
    %241 = vector.load %arg12[%c0_87, %c0_88, %c0_89] : memref<2x32x64xf32, #tpu.memory_space<vmem>>, vector<1x32x64xf32>
    %242 = vector.shape_cast %241 : vector<1x32x64xf32> to vector<32x64xf32>
    %c0_90 = arith.constant 0 : index
    %c0_91 = arith.constant 0 : index
    %c0_92 = arith.constant 0 : index
    %243 = vector.load %arg4[%c0_90, %c0_91, %c0_92] : memref<2x1x64xf32, #tpu.memory_space<vmem>>, vector<1x1x64xf32>
    %244 = vector.shape_cast %243 : vector<1x1x64xf32> to vector<1x64xf32>
    %c0_93 = arith.constant 0 : index
    %c0_94 = arith.constant 0 : index
    %c0_95 = arith.constant 0 : index
    %245 = vector.load %arg13[%c0_93, %c0_94, %c0_95] : memref<2x64x32xf32, #tpu.memory_space<vmem>>, vector<1x64x32xf32>
    %246 = vector.shape_cast %245 : vector<1x64x32xf32> to vector<64x32xf32>
    %c0_96 = arith.constant 0 : index
    %c0_97 = arith.constant 0 : index
    %c0_98 = arith.constant 0 : index
    %247 = vector.load %arg5[%c0_96, %c0_97, %c0_98] : memref<2x1x32xf32, #tpu.memory_space<vmem>>, vector<1x1x32xf32>
    %248 = vector.shape_cast %247 : vector<1x1x32xf32> to vector<1x32xf32>
    %cst_99 = arith.constant dense<0.000000e+00> : vector<16x64xf32>
    %249 = tpu.matmul %240, %242, %cst_99 {dimension_numbers = #tpu.dot_dimension_numbers<[1], [0], [0], [1], [0, 0, 1, 1], [], []>} : vector<16x32xf32>, vector<32x64xf32>, vector<16x64xf32> -> vector<16x64xf32>
    %250 = vector.broadcast %244 : vector<1x64xf32> to vector<16x64xf32>
    %251 = arith.addf %249, %250 : vector<16x64xf32>
    %cst_100 = arith.constant 0.000000e+00 : f32
    %252 = vector.broadcast %cst_100 : f32 to vector<16x64xf32>
    %253 = arith.maximumf %251, %252 : vector<16x64xf32>
    %cst_101 = arith.constant dense<0.000000e+00> : vector<16x32xf32>
    %254 = tpu.matmul %253, %246, %cst_101 {dimension_numbers = #tpu.dot_dimension_numbers<[1], [0], [0], [1], [0, 0, 1, 1], [], []>} : vector<16x64xf32>, vector<64x32xf32>, vector<16x32xf32> -> vector<16x32xf32>
    %255 = vector.broadcast %248 : vector<1x32xf32> to vector<16x32xf32>
    %256 = arith.addf %254, %255 : vector<16x32xf32>
    %c0_102 = arith.constant 0 : index
    %c0_103 = arith.constant 0 : index
    %c0_104 = arith.constant 0 : index
    %257 = vector.load %arg11[%c0_102, %c0_103, %c0_104] : memref<2x1x32xf32, #tpu.memory_space<vmem>>, vector<1x1x32xf32>
    %258 = vector.shape_cast %257 : vector<1x1x32xf32> to vector<1x32xf32>
    %c0_105 = arith.constant 0 : index
    %c0_106 = arith.constant 0 : index
    %c0_107 = arith.constant 0 : index
    %259 = vector.load %arg10[%c0_105, %c0_106, %c0_107] : memref<2x1x32xf32, #tpu.memory_space<vmem>>, vector<1x1x32xf32>
    %260 = vector.shape_cast %259 : vector<1x1x32xf32> to vector<1x32xf32>
    %261 = arith.addf %240, %256 : vector<16x32xf32>
    %cst_108 = arith.constant dense<0.000000e+00> : vector<16xf32>
    %262 = vector.multi_reduction <add>, %261, %cst_108 [1] : vector<16x32xf32> to vector<16xf32>
    %263 = vector.shape_cast %262 : vector<16xf32> to vector<16x1xf32>
    %cst_109 = arith.constant 3.200000e+01 : f32
    %264 = vector.broadcast %cst_109 : f32 to vector<16x1xf32>
    %265 = arith.divf %263, %264 : vector<16x1xf32>
    %266 = vector.broadcast %265 : vector<16x1xf32> to vector<16x32xf32>
    %267 = arith.subf %261, %266 : vector<16x32xf32>
    %268 = arith.mulf %267, %267 : vector<16x32xf32>
    %cst_110 = arith.constant dense<0.000000e+00> : vector<16xf32>
    %269 = vector.multi_reduction <add>, %268, %cst_110 [1] : vector<16x32xf32> to vector<16xf32>
    %270 = vector.shape_cast %269 : vector<16xf32> to vector<16x1xf32>
    %cst_111 = arith.constant 3.100000e+01 : f32
    %271 = vector.broadcast %cst_111 : f32 to vector<16x1xf32>
    %272 = arith.divf %270, %271 : vector<16x1xf32>
    %273 = math.sqrt %272 : vector<16x1xf32>
    %274 = vector.broadcast %258 : vector<1x32xf32> to vector<16x32xf32>
    %275 = arith.mulf %274, %267 : vector<16x32xf32>
    %cst_112 = arith.constant 9.99999997E-7 : f32
    %276 = vector.broadcast %cst_112 : f32 to vector<16x1xf32>
    %277 = arith.addf %273, %276 : vector<16x1xf32>
    %278 = vector.broadcast %277 : vector<16x1xf32> to vector<16x32xf32>
    %279 = arith.divf %275, %278 : vector<16x32xf32>
    %280 = vector.broadcast %260 : vector<1x32xf32> to vector<16x32xf32>
    %281 = arith.addf %279, %280 : vector<16x32xf32>
    %c1 = arith.constant 1 : index
    %c0_113 = arith.constant 0 : index
    %c0_114 = arith.constant 0 : index
    %282 = vector.load %arg15[%c1, %c0_113, %c0_114] : memref<2x32x96xf32, #tpu.memory_space<vmem>>, vector<1x32x96xf32>
    %283 = vector.shape_cast %282 : vector<1x32x96xf32> to vector<32x96xf32>
    %c1_115 = arith.constant 1 : index
    %c0_116 = arith.constant 0 : index
    %c0_117 = arith.constant 0 : index
    %284 = vector.load %arg7[%c1_115, %c0_116, %c0_117] : memref<2x1x96xf32, #tpu.memory_space<vmem>>, vector<1x1x96xf32>
    %285 = vector.shape_cast %284 : vector<1x1x96xf32> to vector<1x96xf32>
    %c1_118 = arith.constant 1 : index
    %c0_119 = arith.constant 0 : index
    %c0_120 = arith.constant 0 : index
    %286 = vector.load %arg14[%c1_118, %c0_119, %c0_120] : memref<2x32x32xf32, #tpu.memory_space<vmem>>, vector<1x32x32xf32>
    %287 = vector.shape_cast %286 : vector<1x32x32xf32> to vector<32x32xf32>
    %c1_121 = arith.constant 1 : index
    %c0_122 = arith.constant 0 : index
    %c0_123 = arith.constant 0 : index
    %288 = vector.load %arg6[%c1_121, %c0_122, %c0_123] : memref<2x1x32xf32, #tpu.memory_space<vmem>>, vector<1x1x32xf32>
    %289 = vector.shape_cast %288 : vector<1x1x32xf32> to vector<1x32xf32>
    %cst_124 = arith.constant dense<0.000000e+00> : vector<16x96xf32>
    %290 = tpu.matmul %281, %283, %cst_124 {dimension_numbers = #tpu.dot_dimension_numbers<[1], [0], [0], [1], [0, 0, 1, 1], [], []>} : vector<16x32xf32>, vector<32x96xf32>, vector<16x96xf32> -> vector<16x96xf32>
    %291 = vector.broadcast %285 : vector<1x96xf32> to vector<16x96xf32>
    %292 = arith.addf %290, %291 : vector<16x96xf32>
    %293 = vector.extract_strided_slice %292 {offsets = [0, 0], sizes = [16, 32], strides = [1, 1]} : vector<16x96xf32> to vector<16x32xf32>
    %294 = vector.extract_strided_slice %292 {offsets = [0, 32], sizes = [16, 32], strides = [1, 1]} : vector<16x96xf32> to vector<16x32xf32>
    %295 = vector.extract_strided_slice %292 {offsets = [0, 64], sizes = [16, 32], strides = [1, 1]} : vector<16x96xf32> to vector<16x32xf32>
    %296 = vector.extract_strided_slice %293 {offsets = [0, 0], sizes = [8, 32], strides = [1, 1]} : vector<16x32xf32> to vector<8x32xf32>
    %297 = vector.extract_strided_slice %294 {offsets = [0, 0], sizes = [8, 32], strides = [1, 1]} : vector<16x32xf32> to vector<8x32xf32>
    %298 = vector.extract_strided_slice %295 {offsets = [0, 0], sizes = [8, 32], strides = [1, 1]} : vector<16x32xf32> to vector<8x32xf32>
    %299 = vector.extract_strided_slice %2 {offsets = [0, 0], sizes = [1, 8], strides = [1, 1]} : vector<2x8xf32> to vector<1x8xf32>
    %300 = vector.extract_strided_slice %296 {offsets = [0, 0], sizes = [8, 8], strides = [1, 1]} : vector<8x32xf32> to vector<8x8xf32>
    %301 = vector.extract_strided_slice %297 {offsets = [0, 0], sizes = [8, 8], strides = [1, 1]} : vector<8x32xf32> to vector<8x8xf32>
    %cst_125 = arith.constant dense<0.000000e+00> : vector<8x8xf32>
    %302 = tpu.matmul %300, %301, %cst_125 {dimension_numbers = #tpu.dot_dimension_numbers<[1], [1], [0], [0], [0, 0, 1, 0], [], []>} : vector<8x8xf32>, vector<8x8xf32>, vector<8x8xf32> -> vector<8x8xf32>
    %cst_126 = arith.constant 0.353553385 : f32
    %303 = vector.broadcast %cst_126 : f32 to vector<8x8xf32>
    %304 = arith.mulf %302, %303 : vector<8x8xf32>
    %cst_127 = arith.constant 5.000000e-01 : f32
    %305 = vector.broadcast %cst_127 : f32 to vector<1x8xf32>
    %306 = arith.cmpf ogt, %299, %305 : vector<1x8xf32>
    %cst_128 = arith.constant -1.000000e+09 : f32
    %307 = vector.shape_cast %306 : vector<1x8xi1> to vector<1x8xi1>
    %308 = vector.broadcast %307 : vector<1x8xi1> to vector<8x8xi1>
    %309 = vector.broadcast %cst_128 : f32 to vector<8x8xf32>
    %310 = arith.select %308, %309, %304 : vector<8x8xi1>, vector<8x8xf32>
    %cst_129 = arith.constant dense<0xFF800000> : vector<8xf32>
    %311 = vector.multi_reduction <maximumf>, %310, %cst_129 [1] : vector<8x8xf32> to vector<8xf32>
    %312 = vector.shape_cast %311 : vector<8xf32> to vector<8x1xf32>
    %313 = vector.broadcast %312 : vector<8x1xf32> to vector<8x8xf32>
    %314 = arith.subf %310, %313 : vector<8x8xf32>
    %315 = math.exp %314 : vector<8x8xf32>
    %cst_130 = arith.constant dense<0.000000e+00> : vector<8xf32>
    %316 = vector.multi_reduction <add>, %315, %cst_130 [1] : vector<8x8xf32> to vector<8xf32>
    %317 = vector.shape_cast %316 : vector<8xf32> to vector<8x1xf32>
    %318 = tpu.reciprocal %317 {approx = true} : vector<8x1xf32> -> vector<8x1xf32>
    %319 = vector.broadcast %318 : vector<8x1xf32> to vector<8x8xf32>
    %320 = arith.mulf %315, %319 : vector<8x8xf32>
    %321 = vector.extract_strided_slice %298 {offsets = [0, 0], sizes = [8, 8], strides = [1, 1]} : vector<8x32xf32> to vector<8x8xf32>
    %cst_131 = arith.constant dense<0.000000e+00> : vector<8x8xf32>
    %322 = tpu.matmul %320, %321, %cst_131 {dimension_numbers = #tpu.dot_dimension_numbers<[1], [0], [0], [1], [0, 0, 1, 1], [], []>} : vector<8x8xf32>, vector<8x8xf32>, vector<8x8xf32> -> vector<8x8xf32>
    %323 = vector.extract_strided_slice %296 {offsets = [0, 8], sizes = [8, 8], strides = [1, 1]} : vector<8x32xf32> to vector<8x8xf32>
    %324 = vector.extract_strided_slice %297 {offsets = [0, 8], sizes = [8, 8], strides = [1, 1]} : vector<8x32xf32> to vector<8x8xf32>
    %cst_132 = arith.constant dense<0.000000e+00> : vector<8x8xf32>
    %325 = tpu.matmul %323, %324, %cst_132 {dimension_numbers = #tpu.dot_dimension_numbers<[1], [1], [0], [0], [0, 0, 1, 0], [], []>} : vector<8x8xf32>, vector<8x8xf32>, vector<8x8xf32> -> vector<8x8xf32>
    %cst_133 = arith.constant 0.353553385 : f32
    %326 = vector.broadcast %cst_133 : f32 to vector<8x8xf32>
    %327 = arith.mulf %325, %326 : vector<8x8xf32>
    %cst_134 = arith.constant 5.000000e-01 : f32
    %328 = vector.broadcast %cst_134 : f32 to vector<1x8xf32>
    %329 = arith.cmpf ogt, %299, %328 : vector<1x8xf32>
    %cst_135 = arith.constant -1.000000e+09 : f32
    %330 = vector.shape_cast %329 : vector<1x8xi1> to vector<1x8xi1>
    %331 = vector.broadcast %330 : vector<1x8xi1> to vector<8x8xi1>
    %332 = vector.broadcast %cst_135 : f32 to vector<8x8xf32>
    %333 = arith.select %331, %332, %327 : vector<8x8xi1>, vector<8x8xf32>
    %cst_136 = arith.constant dense<0xFF800000> : vector<8xf32>
    %334 = vector.multi_reduction <maximumf>, %333, %cst_136 [1] : vector<8x8xf32> to vector<8xf32>
    %335 = vector.shape_cast %334 : vector<8xf32> to vector<8x1xf32>
    %336 = vector.broadcast %335 : vector<8x1xf32> to vector<8x8xf32>
    %337 = arith.subf %333, %336 : vector<8x8xf32>
    %338 = math.exp %337 : vector<8x8xf32>
    %cst_137 = arith.constant dense<0.000000e+00> : vector<8xf32>
    %339 = vector.multi_reduction <add>, %338, %cst_137 [1] : vector<8x8xf32> to vector<8xf32>
    %340 = vector.shape_cast %339 : vector<8xf32> to vector<8x1xf32>
    %341 = tpu.reciprocal %340 {approx = true} : vector<8x1xf32> -> vector<8x1xf32>
    %342 = vector.broadcast %341 : vector<8x1xf32> to vector<8x8xf32>
    %343 = arith.mulf %338, %342 : vector<8x8xf32>
    %344 = vector.extract_strided_slice %298 {offsets = [0, 8], sizes = [8, 8], strides = [1, 1]} : vector<8x32xf32> to vector<8x8xf32>
    %cst_138 = arith.constant dense<0.000000e+00> : vector<8x8xf32>
    %345 = tpu.matmul %343, %344, %cst_138 {dimension_numbers = #tpu.dot_dimension_numbers<[1], [0], [0], [1], [0, 0, 1, 1], [], []>} : vector<8x8xf32>, vector<8x8xf32>, vector<8x8xf32> -> vector<8x8xf32>
    %346 = vector.extract_strided_slice %296 {offsets = [0, 16], sizes = [8, 8], strides = [1, 1]} : vector<8x32xf32> to vector<8x8xf32>
    %347 = vector.extract_strided_slice %297 {offsets = [0, 16], sizes = [8, 8], strides = [1, 1]} : vector<8x32xf32> to vector<8x8xf32>
    %cst_139 = arith.constant dense<0.000000e+00> : vector<8x8xf32>
    %348 = tpu.matmul %346, %347, %cst_139 {dimension_numbers = #tpu.dot_dimension_numbers<[1], [1], [0], [0], [0, 0, 1, 0], [], []>} : vector<8x8xf32>, vector<8x8xf32>, vector<8x8xf32> -> vector<8x8xf32>
    %cst_140 = arith.constant 0.353553385 : f32
    %349 = vector.broadcast %cst_140 : f32 to vector<8x8xf32>
    %350 = arith.mulf %348, %349 : vector<8x8xf32>
    %cst_141 = arith.constant 5.000000e-01 : f32
    %351 = vector.broadcast %cst_141 : f32 to vector<1x8xf32>
    %352 = arith.cmpf ogt, %299, %351 : vector<1x8xf32>
    %cst_142 = arith.constant -1.000000e+09 : f32
    %353 = vector.shape_cast %352 : vector<1x8xi1> to vector<1x8xi1>
    %354 = vector.broadcast %353 : vector<1x8xi1> to vector<8x8xi1>
    %355 = vector.broadcast %cst_142 : f32 to vector<8x8xf32>
    %356 = arith.select %354, %355, %350 : vector<8x8xi1>, vector<8x8xf32>
    %cst_143 = arith.constant dense<0xFF800000> : vector<8xf32>
    %357 = vector.multi_reduction <maximumf>, %356, %cst_143 [1] : vector<8x8xf32> to vector<8xf32>
    %358 = vector.shape_cast %357 : vector<8xf32> to vector<8x1xf32>
    %359 = vector.broadcast %358 : vector<8x1xf32> to vector<8x8xf32>
    %360 = arith.subf %356, %359 : vector<8x8xf32>
    %361 = math.exp %360 : vector<8x8xf32>
    %cst_144 = arith.constant dense<0.000000e+00> : vector<8xf32>
    %362 = vector.multi_reduction <add>, %361, %cst_144 [1] : vector<8x8xf32> to vector<8xf32>
    %363 = vector.shape_cast %362 : vector<8xf32> to vector<8x1xf32>
    %364 = tpu.reciprocal %363 {approx = true} : vector<8x1xf32> -> vector<8x1xf32>
    %365 = vector.broadcast %364 : vector<8x1xf32> to vector<8x8xf32>
    %366 = arith.mulf %361, %365 : vector<8x8xf32>
    %367 = vector.extract_strided_slice %298 {offsets = [0, 16], sizes = [8, 8], strides = [1, 1]} : vector<8x32xf32> to vector<8x8xf32>
    %cst_145 = arith.constant dense<0.000000e+00> : vector<8x8xf32>
    %368 = tpu.matmul %366, %367, %cst_145 {dimension_numbers = #tpu.dot_dimension_numbers<[1], [0], [0], [1], [0, 0, 1, 1], [], []>} : vector<8x8xf32>, vector<8x8xf32>, vector<8x8xf32> -> vector<8x8xf32>
    %369 = vector.extract_strided_slice %296 {offsets = [0, 24], sizes = [8, 8], strides = [1, 1]} : vector<8x32xf32> to vector<8x8xf32>
    %370 = vector.extract_strided_slice %297 {offsets = [0, 24], sizes = [8, 8], strides = [1, 1]} : vector<8x32xf32> to vector<8x8xf32>
    %cst_146 = arith.constant dense<0.000000e+00> : vector<8x8xf32>
    %371 = tpu.matmul %369, %370, %cst_146 {dimension_numbers = #tpu.dot_dimension_numbers<[1], [1], [0], [0], [0, 0, 1, 0], [], []>} : vector<8x8xf32>, vector<8x8xf32>, vector<8x8xf32> -> vector<8x8xf32>
    %cst_147 = arith.constant 0.353553385 : f32
    %372 = vector.broadcast %cst_147 : f32 to vector<8x8xf32>
    %373 = arith.mulf %371, %372 : vector<8x8xf32>
    %cst_148 = arith.constant 5.000000e-01 : f32
    %374 = vector.broadcast %cst_148 : f32 to vector<1x8xf32>
    %375 = arith.cmpf ogt, %299, %374 : vector<1x8xf32>
    %cst_149 = arith.constant -1.000000e+09 : f32
    %376 = vector.shape_cast %375 : vector<1x8xi1> to vector<1x8xi1>
    %377 = vector.broadcast %376 : vector<1x8xi1> to vector<8x8xi1>
    %378 = vector.broadcast %cst_149 : f32 to vector<8x8xf32>
    %379 = arith.select %377, %378, %373 : vector<8x8xi1>, vector<8x8xf32>
    %cst_150 = arith.constant dense<0xFF800000> : vector<8xf32>
    %380 = vector.multi_reduction <maximumf>, %379, %cst_150 [1] : vector<8x8xf32> to vector<8xf32>
    %381 = vector.shape_cast %380 : vector<8xf32> to vector<8x1xf32>
    %382 = vector.broadcast %381 : vector<8x1xf32> to vector<8x8xf32>
    %383 = arith.subf %379, %382 : vector<8x8xf32>
    %384 = math.exp %383 : vector<8x8xf32>
    %cst_151 = arith.constant dense<0.000000e+00> : vector<8xf32>
    %385 = vector.multi_reduction <add>, %384, %cst_151 [1] : vector<8x8xf32> to vector<8xf32>
    %386 = vector.shape_cast %385 : vector<8xf32> to vector<8x1xf32>
    %387 = tpu.reciprocal %386 {approx = true} : vector<8x1xf32> -> vector<8x1xf32>
    %388 = vector.broadcast %387 : vector<8x1xf32> to vector<8x8xf32>
    %389 = arith.mulf %384, %388 : vector<8x8xf32>
    %390 = vector.extract_strided_slice %298 {offsets = [0, 24], sizes = [8, 8], strides = [1, 1]} : vector<8x32xf32> to vector<8x8xf32>
    %cst_152 = arith.constant dense<0.000000e+00> : vector<8x8xf32>
    %391 = tpu.matmul %389, %390, %cst_152 {dimension_numbers = #tpu.dot_dimension_numbers<[1], [0], [0], [1], [0, 0, 1, 1], [], []>} : vector<8x8xf32>, vector<8x8xf32>, vector<8x8xf32> -> vector<8x8xf32>
    %392 = tpu.concatenate %322, %345, %368, %391 in 1 : vector<8x8xf32>, vector<8x8xf32>, vector<8x8xf32>, vector<8x8xf32> -> vector<8x32xf32>
    %393 = vector.extract_strided_slice %293 {offsets = [8, 0], sizes = [8, 32], strides = [1, 1]} : vector<16x32xf32> to vector<8x32xf32>
    %394 = vector.extract_strided_slice %294 {offsets = [8, 0], sizes = [8, 32], strides = [1, 1]} : vector<16x32xf32> to vector<8x32xf32>
    %395 = vector.extract_strided_slice %295 {offsets = [8, 0], sizes = [8, 32], strides = [1, 1]} : vector<16x32xf32> to vector<8x32xf32>
    %396 = vector.extract_strided_slice %2 {offsets = [1, 0], sizes = [1, 8], strides = [1, 1]} : vector<2x8xf32> to vector<1x8xf32>
    %397 = vector.extract_strided_slice %393 {offsets = [0, 0], sizes = [8, 8], strides = [1, 1]} : vector<8x32xf32> to vector<8x8xf32>
    %398 = vector.extract_strided_slice %394 {offsets = [0, 0], sizes = [8, 8], strides = [1, 1]} : vector<8x32xf32> to vector<8x8xf32>
    %cst_153 = arith.constant dense<0.000000e+00> : vector<8x8xf32>
    %399 = tpu.matmul %397, %398, %cst_153 {dimension_numbers = #tpu.dot_dimension_numbers<[1], [1], [0], [0], [0, 0, 1, 0], [], []>} : vector<8x8xf32>, vector<8x8xf32>, vector<8x8xf32> -> vector<8x8xf32>
    %cst_154 = arith.constant 0.353553385 : f32
    %400 = vector.broadcast %cst_154 : f32 to vector<8x8xf32>
    %401 = arith.mulf %399, %400 : vector<8x8xf32>
    %cst_155 = arith.constant 5.000000e-01 : f32
    %402 = vector.broadcast %cst_155 : f32 to vector<1x8xf32>
    %403 = arith.cmpf ogt, %396, %402 : vector<1x8xf32>
    %cst_156 = arith.constant -1.000000e+09 : f32
    %404 = vector.shape_cast %403 : vector<1x8xi1> to vector<1x8xi1>
    %405 = vector.broadcast %404 : vector<1x8xi1> to vector<8x8xi1>
    %406 = vector.broadcast %cst_156 : f32 to vector<8x8xf32>
    %407 = arith.select %405, %406, %401 : vector<8x8xi1>, vector<8x8xf32>
    %cst_157 = arith.constant dense<0xFF800000> : vector<8xf32>
    %408 = vector.multi_reduction <maximumf>, %407, %cst_157 [1] : vector<8x8xf32> to vector<8xf32>
    %409 = vector.shape_cast %408 : vector<8xf32> to vector<8x1xf32>
    %410 = vector.broadcast %409 : vector<8x1xf32> to vector<8x8xf32>
    %411 = arith.subf %407, %410 : vector<8x8xf32>
    %412 = math.exp %411 : vector<8x8xf32>
    %cst_158 = arith.constant dense<0.000000e+00> : vector<8xf32>
    %413 = vector.multi_reduction <add>, %412, %cst_158 [1] : vector<8x8xf32> to vector<8xf32>
    %414 = vector.shape_cast %413 : vector<8xf32> to vector<8x1xf32>
    %415 = tpu.reciprocal %414 {approx = true} : vector<8x1xf32> -> vector<8x1xf32>
    %416 = vector.broadcast %415 : vector<8x1xf32> to vector<8x8xf32>
    %417 = arith.mulf %412, %416 : vector<8x8xf32>
    %418 = vector.extract_strided_slice %395 {offsets = [0, 0], sizes = [8, 8], strides = [1, 1]} : vector<8x32xf32> to vector<8x8xf32>
    %cst_159 = arith.constant dense<0.000000e+00> : vector<8x8xf32>
    %419 = tpu.matmul %417, %418, %cst_159 {dimension_numbers = #tpu.dot_dimension_numbers<[1], [0], [0], [1], [0, 0, 1, 1], [], []>} : vector<8x8xf32>, vector<8x8xf32>, vector<8x8xf32> -> vector<8x8xf32>
    %420 = vector.extract_strided_slice %393 {offsets = [0, 8], sizes = [8, 8], strides = [1, 1]} : vector<8x32xf32> to vector<8x8xf32>
    %421 = vector.extract_strided_slice %394 {offsets = [0, 8], sizes = [8, 8], strides = [1, 1]} : vector<8x32xf32> to vector<8x8xf32>
    %cst_160 = arith.constant dense<0.000000e+00> : vector<8x8xf32>
    %422 = tpu.matmul %420, %421, %cst_160 {dimension_numbers = #tpu.dot_dimension_numbers<[1], [1], [0], [0], [0, 0, 1, 0], [], []>} : vector<8x8xf32>, vector<8x8xf32>, vector<8x8xf32> -> vector<8x8xf32>
    %cst_161 = arith.constant 0.353553385 : f32
    %423 = vector.broadcast %cst_161 : f32 to vector<8x8xf32>
    %424 = arith.mulf %422, %423 : vector<8x8xf32>
    %cst_162 = arith.constant 5.000000e-01 : f32
    %425 = vector.broadcast %cst_162 : f32 to vector<1x8xf32>
    %426 = arith.cmpf ogt, %396, %425 : vector<1x8xf32>
    %cst_163 = arith.constant -1.000000e+09 : f32
    %427 = vector.shape_cast %426 : vector<1x8xi1> to vector<1x8xi1>
    %428 = vector.broadcast %427 : vector<1x8xi1> to vector<8x8xi1>
    %429 = vector.broadcast %cst_163 : f32 to vector<8x8xf32>
    %430 = arith.select %428, %429, %424 : vector<8x8xi1>, vector<8x8xf32>
    %cst_164 = arith.constant dense<0xFF800000> : vector<8xf32>
    %431 = vector.multi_reduction <maximumf>, %430, %cst_164 [1] : vector<8x8xf32> to vector<8xf32>
    %432 = vector.shape_cast %431 : vector<8xf32> to vector<8x1xf32>
    %433 = vector.broadcast %432 : vector<8x1xf32> to vector<8x8xf32>
    %434 = arith.subf %430, %433 : vector<8x8xf32>
    %435 = math.exp %434 : vector<8x8xf32>
    %cst_165 = arith.constant dense<0.000000e+00> : vector<8xf32>
    %436 = vector.multi_reduction <add>, %435, %cst_165 [1] : vector<8x8xf32> to vector<8xf32>
    %437 = vector.shape_cast %436 : vector<8xf32> to vector<8x1xf32>
    %438 = tpu.reciprocal %437 {approx = true} : vector<8x1xf32> -> vector<8x1xf32>
    %439 = vector.broadcast %438 : vector<8x1xf32> to vector<8x8xf32>
    %440 = arith.mulf %435, %439 : vector<8x8xf32>
    %441 = vector.extract_strided_slice %395 {offsets = [0, 8], sizes = [8, 8], strides = [1, 1]} : vector<8x32xf32> to vector<8x8xf32>
    %cst_166 = arith.constant dense<0.000000e+00> : vector<8x8xf32>
    %442 = tpu.matmul %440, %441, %cst_166 {dimension_numbers = #tpu.dot_dimension_numbers<[1], [0], [0], [1], [0, 0, 1, 1], [], []>} : vector<8x8xf32>, vector<8x8xf32>, vector<8x8xf32> -> vector<8x8xf32>
    %443 = vector.extract_strided_slice %393 {offsets = [0, 16], sizes = [8, 8], strides = [1, 1]} : vector<8x32xf32> to vector<8x8xf32>
    %444 = vector.extract_strided_slice %394 {offsets = [0, 16], sizes = [8, 8], strides = [1, 1]} : vector<8x32xf32> to vector<8x8xf32>
    %cst_167 = arith.constant dense<0.000000e+00> : vector<8x8xf32>
    %445 = tpu.matmul %443, %444, %cst_167 {dimension_numbers = #tpu.dot_dimension_numbers<[1], [1], [0], [0], [0, 0, 1, 0], [], []>} : vector<8x8xf32>, vector<8x8xf32>, vector<8x8xf32> -> vector<8x8xf32>
    %cst_168 = arith.constant 0.353553385 : f32
    %446 = vector.broadcast %cst_168 : f32 to vector<8x8xf32>
    %447 = arith.mulf %445, %446 : vector<8x8xf32>
    %cst_169 = arith.constant 5.000000e-01 : f32
    %448 = vector.broadcast %cst_169 : f32 to vector<1x8xf32>
    %449 = arith.cmpf ogt, %396, %448 : vector<1x8xf32>
    %cst_170 = arith.constant -1.000000e+09 : f32
    %450 = vector.shape_cast %449 : vector<1x8xi1> to vector<1x8xi1>
    %451 = vector.broadcast %450 : vector<1x8xi1> to vector<8x8xi1>
    %452 = vector.broadcast %cst_170 : f32 to vector<8x8xf32>
    %453 = arith.select %451, %452, %447 : vector<8x8xi1>, vector<8x8xf32>
    %cst_171 = arith.constant dense<0xFF800000> : vector<8xf32>
    %454 = vector.multi_reduction <maximumf>, %453, %cst_171 [1] : vector<8x8xf32> to vector<8xf32>
    %455 = vector.shape_cast %454 : vector<8xf32> to vector<8x1xf32>
    %456 = vector.broadcast %455 : vector<8x1xf32> to vector<8x8xf32>
    %457 = arith.subf %453, %456 : vector<8x8xf32>
    %458 = math.exp %457 : vector<8x8xf32>
    %cst_172 = arith.constant dense<0.000000e+00> : vector<8xf32>
    %459 = vector.multi_reduction <add>, %458, %cst_172 [1] : vector<8x8xf32> to vector<8xf32>
    %460 = vector.shape_cast %459 : vector<8xf32> to vector<8x1xf32>
    %461 = tpu.reciprocal %460 {approx = true} : vector<8x1xf32> -> vector<8x1xf32>
    %462 = vector.broadcast %461 : vector<8x1xf32> to vector<8x8xf32>
    %463 = arith.mulf %458, %462 : vector<8x8xf32>
    %464 = vector.extract_strided_slice %395 {offsets = [0, 16], sizes = [8, 8], strides = [1, 1]} : vector<8x32xf32> to vector<8x8xf32>
    %cst_173 = arith.constant dense<0.000000e+00> : vector<8x8xf32>
    %465 = tpu.matmul %463, %464, %cst_173 {dimension_numbers = #tpu.dot_dimension_numbers<[1], [0], [0], [1], [0, 0, 1, 1], [], []>} : vector<8x8xf32>, vector<8x8xf32>, vector<8x8xf32> -> vector<8x8xf32>
    %466 = vector.extract_strided_slice %393 {offsets = [0, 24], sizes = [8, 8], strides = [1, 1]} : vector<8x32xf32> to vector<8x8xf32>
    %467 = vector.extract_strided_slice %394 {offsets = [0, 24], sizes = [8, 8], strides = [1, 1]} : vector<8x32xf32> to vector<8x8xf32>
    %cst_174 = arith.constant dense<0.000000e+00> : vector<8x8xf32>
    %468 = tpu.matmul %466, %467, %cst_174 {dimension_numbers = #tpu.dot_dimension_numbers<[1], [1], [0], [0], [0, 0, 1, 0], [], []>} : vector<8x8xf32>, vector<8x8xf32>, vector<8x8xf32> -> vector<8x8xf32>
    %cst_175 = arith.constant 0.353553385 : f32
    %469 = vector.broadcast %cst_175 : f32 to vector<8x8xf32>
    %470 = arith.mulf %468, %469 : vector<8x8xf32>
    %cst_176 = arith.constant 5.000000e-01 : f32
    %471 = vector.broadcast %cst_176 : f32 to vector<1x8xf32>
    %472 = arith.cmpf ogt, %396, %471 : vector<1x8xf32>
    %cst_177 = arith.constant -1.000000e+09 : f32
    %473 = vector.shape_cast %472 : vector<1x8xi1> to vector<1x8xi1>
    %474 = vector.broadcast %473 : vector<1x8xi1> to vector<8x8xi1>
    %475 = vector.broadcast %cst_177 : f32 to vector<8x8xf32>
    %476 = arith.select %474, %475, %470 : vector<8x8xi1>, vector<8x8xf32>
    %cst_178 = arith.constant dense<0xFF800000> : vector<8xf32>
    %477 = vector.multi_reduction <maximumf>, %476, %cst_178 [1] : vector<8x8xf32> to vector<8xf32>
    %478 = vector.shape_cast %477 : vector<8xf32> to vector<8x1xf32>
    %479 = vector.broadcast %478 : vector<8x1xf32> to vector<8x8xf32>
    %480 = arith.subf %476, %479 : vector<8x8xf32>
    %481 = math.exp %480 : vector<8x8xf32>
    %cst_179 = arith.constant dense<0.000000e+00> : vector<8xf32>
    %482 = vector.multi_reduction <add>, %481, %cst_179 [1] : vector<8x8xf32> to vector<8xf32>
    %483 = vector.shape_cast %482 : vector<8xf32> to vector<8x1xf32>
    %484 = tpu.reciprocal %483 {approx = true} : vector<8x1xf32> -> vector<8x1xf32>
    %485 = vector.broadcast %484 : vector<8x1xf32> to vector<8x8xf32>
    %486 = arith.mulf %481, %485 : vector<8x8xf32>
    %487 = vector.extract_strided_slice %395 {offsets = [0, 24], sizes = [8, 8], strides = [1, 1]} : vector<8x32xf32> to vector<8x8xf32>
    %cst_180 = arith.constant dense<0.000000e+00> : vector<8x8xf32>
    %488 = tpu.matmul %486, %487, %cst_180 {dimension_numbers = #tpu.dot_dimension_numbers<[1], [0], [0], [1], [0, 0, 1, 1], [], []>} : vector<8x8xf32>, vector<8x8xf32>, vector<8x8xf32> -> vector<8x8xf32>
    %489 = tpu.concatenate %419, %442, %465, %488 in 1 : vector<8x8xf32>, vector<8x8xf32>, vector<8x8xf32>, vector<8x8xf32> -> vector<8x32xf32>
    %490 = tpu.concatenate %392, %489 in 0 : vector<8x32xf32>, vector<8x32xf32> -> vector<16x32xf32>
    %cst_181 = arith.constant dense<0.000000e+00> : vector<16x32xf32>
    %491 = tpu.matmul %490, %287, %cst_181 {dimension_numbers = #tpu.dot_dimension_numbers<[1], [0], [0], [1], [0, 0, 1, 1], [], []>} : vector<16x32xf32>, vector<32x32xf32>, vector<16x32xf32> -> vector<16x32xf32>
    %492 = vector.broadcast %289 : vector<1x32xf32> to vector<16x32xf32>
    %493 = arith.addf %491, %492 : vector<16x32xf32>
    %c1_182 = arith.constant 1 : index
    %c0_183 = arith.constant 0 : index
    %c0_184 = arith.constant 0 : index
    %494 = vector.load %arg9[%c1_182, %c0_183, %c0_184] : memref<2x1x32xf32, #tpu.memory_space<vmem>>, vector<1x1x32xf32>
    %495 = vector.shape_cast %494 : vector<1x1x32xf32> to vector<1x32xf32>
    %c1_185 = arith.constant 1 : index
    %c0_186 = arith.constant 0 : index
    %c0_187 = arith.constant 0 : index
    %496 = vector.load %arg8[%c1_185, %c0_186, %c0_187] : memref<2x1x32xf32, #tpu.memory_space<vmem>>, vector<1x1x32xf32>
    %497 = vector.shape_cast %496 : vector<1x1x32xf32> to vector<1x32xf32>
    %498 = arith.addf %281, %493 : vector<16x32xf32>
    %cst_188 = arith.constant dense<0.000000e+00> : vector<16xf32>
    %499 = vector.multi_reduction <add>, %498, %cst_188 [1] : vector<16x32xf32> to vector<16xf32>
    %500 = vector.shape_cast %499 : vector<16xf32> to vector<16x1xf32>
    %cst_189 = arith.constant 3.200000e+01 : f32
    %501 = vector.broadcast %cst_189 : f32 to vector<16x1xf32>
    %502 = arith.divf %500, %501 : vector<16x1xf32>
    %503 = vector.broadcast %502 : vector<16x1xf32> to vector<16x32xf32>
    %504 = arith.subf %498, %503 : vector<16x32xf32>
    %505 = arith.mulf %504, %504 : vector<16x32xf32>
    %cst_190 = arith.constant dense<0.000000e+00> : vector<16xf32>
    %506 = vector.multi_reduction <add>, %505, %cst_190 [1] : vector<16x32xf32> to vector<16xf32>
    %507 = vector.shape_cast %506 : vector<16xf32> to vector<16x1xf32>
    %cst_191 = arith.constant 3.100000e+01 : f32
    %508 = vector.broadcast %cst_191 : f32 to vector<16x1xf32>
    %509 = arith.divf %507, %508 : vector<16x1xf32>
    %510 = math.sqrt %509 : vector<16x1xf32>
    %511 = vector.broadcast %495 : vector<1x32xf32> to vector<16x32xf32>
    %512 = arith.mulf %511, %504 : vector<16x32xf32>
    %cst_192 = arith.constant 9.99999997E-7 : f32
    %513 = vector.broadcast %cst_192 : f32 to vector<16x1xf32>
    %514 = arith.addf %510, %513 : vector<16x1xf32>
    %515 = vector.broadcast %514 : vector<16x1xf32> to vector<16x32xf32>
    %516 = arith.divf %512, %515 : vector<16x32xf32>
    %517 = vector.broadcast %497 : vector<1x32xf32> to vector<16x32xf32>
    %518 = arith.addf %516, %517 : vector<16x32xf32>
    %c1_193 = arith.constant 1 : index
    %c0_194 = arith.constant 0 : index
    %c0_195 = arith.constant 0 : index
    %519 = vector.load %arg12[%c1_193, %c0_194, %c0_195] : memref<2x32x64xf32, #tpu.memory_space<vmem>>, vector<1x32x64xf32>
    %520 = vector.shape_cast %519 : vector<1x32x64xf32> to vector<32x64xf32>
    %c1_196 = arith.constant 1 : index
    %c0_197 = arith.constant 0 : index
    %c0_198 = arith.constant 0 : index
    %521 = vector.load %arg4[%c1_196, %c0_197, %c0_198] : memref<2x1x64xf32, #tpu.memory_space<vmem>>, vector<1x1x64xf32>
    %522 = vector.shape_cast %521 : vector<1x1x64xf32> to vector<1x64xf32>
    %c1_199 = arith.constant 1 : index
    %c0_200 = arith.constant 0 : index
    %c0_201 = arith.constant 0 : index
    %523 = vector.load %arg13[%c1_199, %c0_200, %c0_201] : memref<2x64x32xf32, #tpu.memory_space<vmem>>, vector<1x64x32xf32>
    %524 = vector.shape_cast %523 : vector<1x64x32xf32> to vector<64x32xf32>
    %c1_202 = arith.constant 1 : index
    %c0_203 = arith.constant 0 : index
    %c0_204 = arith.constant 0 : index
    %525 = vector.load %arg5[%c1_202, %c0_203, %c0_204] : memref<2x1x32xf32, #tpu.memory_space<vmem>>, vector<1x1x32xf32>
    %526 = vector.shape_cast %525 : vector<1x1x32xf32> to vector<1x32xf32>
    %cst_205 = arith.constant dense<0.000000e+00> : vector<16x64xf32>
    %527 = tpu.matmul %518, %520, %cst_205 {dimension_numbers = #tpu.dot_dimension_numbers<[1], [0], [0], [1], [0, 0, 1, 1], [], []>} : vector<16x32xf32>, vector<32x64xf32>, vector<16x64xf32> -> vector<16x64xf32>
    %528 = vector.broadcast %522 : vector<1x64xf32> to vector<16x64xf32>
    %529 = arith.addf %527, %528 : vector<16x64xf32>
    %cst_206 = arith.constant 0.000000e+00 : f32
    %530 = vector.broadcast %cst_206 : f32 to vector<16x64xf32>
    %531 = arith.maximumf %529, %530 : vector<16x64xf32>
    %cst_207 = arith.constant dense<0.000000e+00> : vector<16x32xf32>
    %532 = tpu.matmul %531, %524, %cst_207 {dimension_numbers = #tpu.dot_dimension_numbers<[1], [0], [0], [1], [0, 0, 1, 1], [], []>} : vector<16x64xf32>, vector<64x32xf32>, vector<16x32xf32> -> vector<16x32xf32>
    %533 = vector.broadcast %526 : vector<1x32xf32> to vector<16x32xf32>
    %534 = arith.addf %532, %533 : vector<16x32xf32>
    %c1_208 = arith.constant 1 : index
    %c0_209 = arith.constant 0 : index
    %c0_210 = arith.constant 0 : index
    %535 = vector.load %arg11[%c1_208, %c0_209, %c0_210] : memref<2x1x32xf32, #tpu.memory_space<vmem>>, vector<1x1x32xf32>
    %536 = vector.shape_cast %535 : vector<1x1x32xf32> to vector<1x32xf32>
    %c1_211 = arith.constant 1 : index
    %c0_212 = arith.constant 0 : index
    %c0_213 = arith.constant 0 : index
    %537 = vector.load %arg10[%c1_211, %c0_212, %c0_213] : memref<2x1x32xf32, #tpu.memory_space<vmem>>, vector<1x1x32xf32>
    %538 = vector.shape_cast %537 : vector<1x1x32xf32> to vector<1x32xf32>
    %539 = arith.addf %518, %534 : vector<16x32xf32>
    %cst_214 = arith.constant dense<0.000000e+00> : vector<16xf32>
    %540 = vector.multi_reduction <add>, %539, %cst_214 [1] : vector<16x32xf32> to vector<16xf32>
    %541 = vector.shape_cast %540 : vector<16xf32> to vector<16x1xf32>
    %cst_215 = arith.constant 3.200000e+01 : f32
    %542 = vector.broadcast %cst_215 : f32 to vector<16x1xf32>
    %543 = arith.divf %541, %542 : vector<16x1xf32>
    %544 = vector.broadcast %543 : vector<16x1xf32> to vector<16x32xf32>
    %545 = arith.subf %539, %544 : vector<16x32xf32>
    %546 = arith.mulf %545, %545 : vector<16x32xf32>
    %cst_216 = arith.constant dense<0.000000e+00> : vector<16xf32>
    %547 = vector.multi_reduction <add>, %546, %cst_216 [1] : vector<16x32xf32> to vector<16xf32>
    %548 = vector.shape_cast %547 : vector<16xf32> to vector<16x1xf32>
    %cst_217 = arith.constant 3.100000e+01 : f32
    %549 = vector.broadcast %cst_217 : f32 to vector<16x1xf32>
    %550 = arith.divf %548, %549 : vector<16x1xf32>
    %551 = math.sqrt %550 : vector<16x1xf32>
    %552 = vector.broadcast %536 : vector<1x32xf32> to vector<16x32xf32>
    %553 = arith.mulf %552, %545 : vector<16x32xf32>
    %cst_218 = arith.constant 9.99999997E-7 : f32
    %554 = vector.broadcast %cst_218 : f32 to vector<16x1xf32>
    %555 = arith.addf %551, %554 : vector<16x1xf32>
    %556 = vector.broadcast %555 : vector<16x1xf32> to vector<16x32xf32>
    %557 = arith.divf %553, %556 : vector<16x32xf32>
    %558 = vector.broadcast %538 : vector<1x32xf32> to vector<16x32xf32>
    %559 = arith.addf %557, %558 : vector<16x32xf32>
    %c0_219 = arith.constant 0 : index
    %c0_220 = arith.constant 0 : index
    %c0_221 = arith.constant 0 : index
    %560 = vector.load %arg32[%c0_219, %c0_220, %c0_221] : memref<2x32x96xf32, #tpu.memory_space<vmem>>, vector<1x32x96xf32>
    %561 = vector.shape_cast %560 : vector<1x32x96xf32> to vector<32x96xf32>
    %c0_222 = arith.constant 0 : index
    %c0_223 = arith.constant 0 : index
    %c0_224 = arith.constant 0 : index
    %562 = vector.load %arg20[%c0_222, %c0_223, %c0_224] : memref<2x1x96xf32, #tpu.memory_space<vmem>>, vector<1x1x96xf32>
    %563 = vector.shape_cast %562 : vector<1x1x96xf32> to vector<1x96xf32>
    %c0_225 = arith.constant 0 : index
    %c0_226 = arith.constant 0 : index
    %c0_227 = arith.constant 0 : index
    %564 = vector.load %arg30[%c0_225, %c0_226, %c0_227] : memref<2x32x32xf32, #tpu.memory_space<vmem>>, vector<1x32x32xf32>
    %565 = vector.shape_cast %564 : vector<1x32x32xf32> to vector<32x32xf32>
    %c0_228 = arith.constant 0 : index
    %c0_229 = arith.constant 0 : index
    %c0_230 = arith.constant 0 : index
    %566 = vector.load %arg18[%c0_228, %c0_229, %c0_230] : memref<2x1x32xf32, #tpu.memory_space<vmem>>, vector<1x1x32xf32>
    %567 = vector.shape_cast %566 : vector<1x1x32xf32> to vector<1x32xf32>
    %cst_231 = arith.constant dense<0.000000e+00> : vector<16x96xf32>
    %568 = tpu.matmul %1, %561, %cst_231 {dimension_numbers = #tpu.dot_dimension_numbers<[1], [0], [0], [1], [0, 0, 1, 1], [], []>} : vector<16x32xf32>, vector<32x96xf32>, vector<16x96xf32> -> vector<16x96xf32>
    %569 = vector.broadcast %563 : vector<1x96xf32> to vector<16x96xf32>
    %570 = arith.addf %568, %569 : vector<16x96xf32>
    %571 = vector.extract_strided_slice %570 {offsets = [0, 0], sizes = [16, 32], strides = [1, 1]} : vector<16x96xf32> to vector<16x32xf32>
    %572 = vector.extract_strided_slice %570 {offsets = [0, 32], sizes = [16, 32], strides = [1, 1]} : vector<16x96xf32> to vector<16x32xf32>
    %573 = vector.extract_strided_slice %570 {offsets = [0, 64], sizes = [16, 32], strides = [1, 1]} : vector<16x96xf32> to vector<16x32xf32>
    %574 = vector.extract_strided_slice %571 {offsets = [0, 0], sizes = [8, 32], strides = [1, 1]} : vector<16x32xf32> to vector<8x32xf32>
    %575 = vector.extract_strided_slice %572 {offsets = [0, 0], sizes = [8, 32], strides = [1, 1]} : vector<16x32xf32> to vector<8x32xf32>
    %576 = vector.extract_strided_slice %573 {offsets = [0, 0], sizes = [8, 32], strides = [1, 1]} : vector<16x32xf32> to vector<8x32xf32>
    %577 = vector.extract_strided_slice %3 {offsets = [0, 0], sizes = [1, 8], strides = [1, 1]} : vector<2x8xf32> to vector<1x8xf32>
    %578 = vector.extract_strided_slice %574 {offsets = [0, 0], sizes = [8, 8], strides = [1, 1]} : vector<8x32xf32> to vector<8x8xf32>
    %579 = vector.extract_strided_slice %575 {offsets = [0, 0], sizes = [8, 8], strides = [1, 1]} : vector<8x32xf32> to vector<8x8xf32>
    %cst_232 = arith.constant dense<0.000000e+00> : vector<8x8xf32>
    %580 = tpu.matmul %578, %579, %cst_232 {dimension_numbers = #tpu.dot_dimension_numbers<[1], [1], [0], [0], [0, 0, 1, 0], [], []>} : vector<8x8xf32>, vector<8x8xf32>, vector<8x8xf32> -> vector<8x8xf32>
    %cst_233 = arith.constant 0.353553385 : f32
    %581 = vector.broadcast %cst_233 : f32 to vector<8x8xf32>
    %582 = arith.mulf %580, %581 : vector<8x8xf32>
    %cst_234 = arith.constant 5.000000e-01 : f32
    %583 = vector.broadcast %cst_234 : f32 to vector<1x8xf32>
    %584 = arith.cmpf ogt, %577, %583 : vector<1x8xf32>
    %cst_235 = arith.constant -1.000000e+09 : f32
    %585 = vector.shape_cast %584 : vector<1x8xi1> to vector<1x8xi1>
    %586 = vector.broadcast %585 : vector<1x8xi1> to vector<8x8xi1>
    %587 = vector.broadcast %cst_235 : f32 to vector<8x8xf32>
    %588 = arith.select %586, %587, %582 : vector<8x8xi1>, vector<8x8xf32>
    %cst_236 = arith.constant dense<0xFF800000> : vector<8xf32>
    %589 = vector.multi_reduction <maximumf>, %588, %cst_236 [1] : vector<8x8xf32> to vector<8xf32>
    %590 = vector.shape_cast %589 : vector<8xf32> to vector<8x1xf32>
    %591 = vector.broadcast %590 : vector<8x1xf32> to vector<8x8xf32>
    %592 = arith.subf %588, %591 : vector<8x8xf32>
    %593 = math.exp %592 : vector<8x8xf32>
    %cst_237 = arith.constant dense<0.000000e+00> : vector<8xf32>
    %594 = vector.multi_reduction <add>, %593, %cst_237 [1] : vector<8x8xf32> to vector<8xf32>
    %595 = vector.shape_cast %594 : vector<8xf32> to vector<8x1xf32>
    %596 = tpu.reciprocal %595 {approx = true} : vector<8x1xf32> -> vector<8x1xf32>
    %597 = vector.broadcast %596 : vector<8x1xf32> to vector<8x8xf32>
    %598 = arith.mulf %593, %597 : vector<8x8xf32>
    %599 = vector.extract_strided_slice %576 {offsets = [0, 0], sizes = [8, 8], strides = [1, 1]} : vector<8x32xf32> to vector<8x8xf32>
    %cst_238 = arith.constant dense<0.000000e+00> : vector<8x8xf32>
    %600 = tpu.matmul %598, %599, %cst_238 {dimension_numbers = #tpu.dot_dimension_numbers<[1], [0], [0], [1], [0, 0, 1, 1], [], []>} : vector<8x8xf32>, vector<8x8xf32>, vector<8x8xf32> -> vector<8x8xf32>
    %601 = vector.extract_strided_slice %574 {offsets = [0, 8], sizes = [8, 8], strides = [1, 1]} : vector<8x32xf32> to vector<8x8xf32>
    %602 = vector.extract_strided_slice %575 {offsets = [0, 8], sizes = [8, 8], strides = [1, 1]} : vector<8x32xf32> to vector<8x8xf32>
    %cst_239 = arith.constant dense<0.000000e+00> : vector<8x8xf32>
    %603 = tpu.matmul %601, %602, %cst_239 {dimension_numbers = #tpu.dot_dimension_numbers<[1], [1], [0], [0], [0, 0, 1, 0], [], []>} : vector<8x8xf32>, vector<8x8xf32>, vector<8x8xf32> -> vector<8x8xf32>
    %cst_240 = arith.constant 0.353553385 : f32
    %604 = vector.broadcast %cst_240 : f32 to vector<8x8xf32>
    %605 = arith.mulf %603, %604 : vector<8x8xf32>
    %cst_241 = arith.constant 5.000000e-01 : f32
    %606 = vector.broadcast %cst_241 : f32 to vector<1x8xf32>
    %607 = arith.cmpf ogt, %577, %606 : vector<1x8xf32>
    %cst_242 = arith.constant -1.000000e+09 : f32
    %608 = vector.shape_cast %607 : vector<1x8xi1> to vector<1x8xi1>
    %609 = vector.broadcast %608 : vector<1x8xi1> to vector<8x8xi1>
    %610 = vector.broadcast %cst_242 : f32 to vector<8x8xf32>
    %611 = arith.select %609, %610, %605 : vector<8x8xi1>, vector<8x8xf32>
    %cst_243 = arith.constant dense<0xFF800000> : vector<8xf32>
    %612 = vector.multi_reduction <maximumf>, %611, %cst_243 [1] : vector<8x8xf32> to vector<8xf32>
    %613 = vector.shape_cast %612 : vector<8xf32> to vector<8x1xf32>
    %614 = vector.broadcast %613 : vector<8x1xf32> to vector<8x8xf32>
    %615 = arith.subf %611, %614 : vector<8x8xf32>
    %616 = math.exp %615 : vector<8x8xf32>
    %cst_244 = arith.constant dense<0.000000e+00> : vector<8xf32>
    %617 = vector.multi_reduction <add>, %616, %cst_244 [1] : vector<8x8xf32> to vector<8xf32>
    %618 = vector.shape_cast %617 : vector<8xf32> to vector<8x1xf32>
    %619 = tpu.reciprocal %618 {approx = true} : vector<8x1xf32> -> vector<8x1xf32>
    %620 = vector.broadcast %619 : vector<8x1xf32> to vector<8x8xf32>
    %621 = arith.mulf %616, %620 : vector<8x8xf32>
    %622 = vector.extract_strided_slice %576 {offsets = [0, 8], sizes = [8, 8], strides = [1, 1]} : vector<8x32xf32> to vector<8x8xf32>
    %cst_245 = arith.constant dense<0.000000e+00> : vector<8x8xf32>
    %623 = tpu.matmul %621, %622, %cst_245 {dimension_numbers = #tpu.dot_dimension_numbers<[1], [0], [0], [1], [0, 0, 1, 1], [], []>} : vector<8x8xf32>, vector<8x8xf32>, vector<8x8xf32> -> vector<8x8xf32>
    %624 = vector.extract_strided_slice %574 {offsets = [0, 16], sizes = [8, 8], strides = [1, 1]} : vector<8x32xf32> to vector<8x8xf32>
    %625 = vector.extract_strided_slice %575 {offsets = [0, 16], sizes = [8, 8], strides = [1, 1]} : vector<8x32xf32> to vector<8x8xf32>
    %cst_246 = arith.constant dense<0.000000e+00> : vector<8x8xf32>
    %626 = tpu.matmul %624, %625, %cst_246 {dimension_numbers = #tpu.dot_dimension_numbers<[1], [1], [0], [0], [0, 0, 1, 0], [], []>} : vector<8x8xf32>, vector<8x8xf32>, vector<8x8xf32> -> vector<8x8xf32>
    %cst_247 = arith.constant 0.353553385 : f32
    %627 = vector.broadcast %cst_247 : f32 to vector<8x8xf32>
    %628 = arith.mulf %626, %627 : vector<8x8xf32>
    %cst_248 = arith.constant 5.000000e-01 : f32
    %629 = vector.broadcast %cst_248 : f32 to vector<1x8xf32>
    %630 = arith.cmpf ogt, %577, %629 : vector<1x8xf32>
    %cst_249 = arith.constant -1.000000e+09 : f32
    %631 = vector.shape_cast %630 : vector<1x8xi1> to vector<1x8xi1>
    %632 = vector.broadcast %631 : vector<1x8xi1> to vector<8x8xi1>
    %633 = vector.broadcast %cst_249 : f32 to vector<8x8xf32>
    %634 = arith.select %632, %633, %628 : vector<8x8xi1>, vector<8x8xf32>
    %cst_250 = arith.constant dense<0xFF800000> : vector<8xf32>
    %635 = vector.multi_reduction <maximumf>, %634, %cst_250 [1] : vector<8x8xf32> to vector<8xf32>
    %636 = vector.shape_cast %635 : vector<8xf32> to vector<8x1xf32>
    %637 = vector.broadcast %636 : vector<8x1xf32> to vector<8x8xf32>
    %638 = arith.subf %634, %637 : vector<8x8xf32>
    %639 = math.exp %638 : vector<8x8xf32>
    %cst_251 = arith.constant dense<0.000000e+00> : vector<8xf32>
    %640 = vector.multi_reduction <add>, %639, %cst_251 [1] : vector<8x8xf32> to vector<8xf32>
    %641 = vector.shape_cast %640 : vector<8xf32> to vector<8x1xf32>
    %642 = tpu.reciprocal %641 {approx = true} : vector<8x1xf32> -> vector<8x1xf32>
    %643 = vector.broadcast %642 : vector<8x1xf32> to vector<8x8xf32>
    %644 = arith.mulf %639, %643 : vector<8x8xf32>
    %645 = vector.extract_strided_slice %576 {offsets = [0, 16], sizes = [8, 8], strides = [1, 1]} : vector<8x32xf32> to vector<8x8xf32>
    %cst_252 = arith.constant dense<0.000000e+00> : vector<8x8xf32>
    %646 = tpu.matmul %644, %645, %cst_252 {dimension_numbers = #tpu.dot_dimension_numbers<[1], [0], [0], [1], [0, 0, 1, 1], [], []>} : vector<8x8xf32>, vector<8x8xf32>, vector<8x8xf32> -> vector<8x8xf32>
    %647 = vector.extract_strided_slice %574 {offsets = [0, 24], sizes = [8, 8], strides = [1, 1]} : vector<8x32xf32> to vector<8x8xf32>
    %648 = vector.extract_strided_slice %575 {offsets = [0, 24], sizes = [8, 8], strides = [1, 1]} : vector<8x32xf32> to vector<8x8xf32>
    %cst_253 = arith.constant dense<0.000000e+00> : vector<8x8xf32>
    %649 = tpu.matmul %647, %648, %cst_253 {dimension_numbers = #tpu.dot_dimension_numbers<[1], [1], [0], [0], [0, 0, 1, 0], [], []>} : vector<8x8xf32>, vector<8x8xf32>, vector<8x8xf32> -> vector<8x8xf32>
    %cst_254 = arith.constant 0.353553385 : f32
    %650 = vector.broadcast %cst_254 : f32 to vector<8x8xf32>
    %651 = arith.mulf %649, %650 : vector<8x8xf32>
    %cst_255 = arith.constant 5.000000e-01 : f32
    %652 = vector.broadcast %cst_255 : f32 to vector<1x8xf32>
    %653 = arith.cmpf ogt, %577, %652 : vector<1x8xf32>
    %cst_256 = arith.constant -1.000000e+09 : f32
    %654 = vector.shape_cast %653 : vector<1x8xi1> to vector<1x8xi1>
    %655 = vector.broadcast %654 : vector<1x8xi1> to vector<8x8xi1>
    %656 = vector.broadcast %cst_256 : f32 to vector<8x8xf32>
    %657 = arith.select %655, %656, %651 : vector<8x8xi1>, vector<8x8xf32>
    %cst_257 = arith.constant dense<0xFF800000> : vector<8xf32>
    %658 = vector.multi_reduction <maximumf>, %657, %cst_257 [1] : vector<8x8xf32> to vector<8xf32>
    %659 = vector.shape_cast %658 : vector<8xf32> to vector<8x1xf32>
    %660 = vector.broadcast %659 : vector<8x1xf32> to vector<8x8xf32>
    %661 = arith.subf %657, %660 : vector<8x8xf32>
    %662 = math.exp %661 : vector<8x8xf32>
    %cst_258 = arith.constant dense<0.000000e+00> : vector<8xf32>
    %663 = vector.multi_reduction <add>, %662, %cst_258 [1] : vector<8x8xf32> to vector<8xf32>
    %664 = vector.shape_cast %663 : vector<8xf32> to vector<8x1xf32>
    %665 = tpu.reciprocal %664 {approx = true} : vector<8x1xf32> -> vector<8x1xf32>
    %666 = vector.broadcast %665 : vector<8x1xf32> to vector<8x8xf32>
    %667 = arith.mulf %662, %666 : vector<8x8xf32>
    %668 = vector.extract_strided_slice %576 {offsets = [0, 24], sizes = [8, 8], strides = [1, 1]} : vector<8x32xf32> to vector<8x8xf32>
    %cst_259 = arith.constant dense<0.000000e+00> : vector<8x8xf32>
    %669 = tpu.matmul %667, %668, %cst_259 {dimension_numbers = #tpu.dot_dimension_numbers<[1], [0], [0], [1], [0, 0, 1, 1], [], []>} : vector<8x8xf32>, vector<8x8xf32>, vector<8x8xf32> -> vector<8x8xf32>
    %670 = tpu.concatenate %600, %623, %646, %669 in 1 : vector<8x8xf32>, vector<8x8xf32>, vector<8x8xf32>, vector<8x8xf32> -> vector<8x32xf32>
    %671 = vector.extract_strided_slice %571 {offsets = [8, 0], sizes = [8, 32], strides = [1, 1]} : vector<16x32xf32> to vector<8x32xf32>
    %672 = vector.extract_strided_slice %572 {offsets = [8, 0], sizes = [8, 32], strides = [1, 1]} : vector<16x32xf32> to vector<8x32xf32>
    %673 = vector.extract_strided_slice %573 {offsets = [8, 0], sizes = [8, 32], strides = [1, 1]} : vector<16x32xf32> to vector<8x32xf32>
    %674 = vector.extract_strided_slice %3 {offsets = [1, 0], sizes = [1, 8], strides = [1, 1]} : vector<2x8xf32> to vector<1x8xf32>
    %675 = vector.extract_strided_slice %671 {offsets = [0, 0], sizes = [8, 8], strides = [1, 1]} : vector<8x32xf32> to vector<8x8xf32>
    %676 = vector.extract_strided_slice %672 {offsets = [0, 0], sizes = [8, 8], strides = [1, 1]} : vector<8x32xf32> to vector<8x8xf32>
    %cst_260 = arith.constant dense<0.000000e+00> : vector<8x8xf32>
    %677 = tpu.matmul %675, %676, %cst_260 {dimension_numbers = #tpu.dot_dimension_numbers<[1], [1], [0], [0], [0, 0, 1, 0], [], []>} : vector<8x8xf32>, vector<8x8xf32>, vector<8x8xf32> -> vector<8x8xf32>
    %cst_261 = arith.constant 0.353553385 : f32
    %678 = vector.broadcast %cst_261 : f32 to vector<8x8xf32>
    %679 = arith.mulf %677, %678 : vector<8x8xf32>
    %cst_262 = arith.constant 5.000000e-01 : f32
    %680 = vector.broadcast %cst_262 : f32 to vector<1x8xf32>
    %681 = arith.cmpf ogt, %674, %680 : vector<1x8xf32>
    %cst_263 = arith.constant -1.000000e+09 : f32
    %682 = vector.shape_cast %681 : vector<1x8xi1> to vector<1x8xi1>
    %683 = vector.broadcast %682 : vector<1x8xi1> to vector<8x8xi1>
    %684 = vector.broadcast %cst_263 : f32 to vector<8x8xf32>
    %685 = arith.select %683, %684, %679 : vector<8x8xi1>, vector<8x8xf32>
    %cst_264 = arith.constant dense<0xFF800000> : vector<8xf32>
    %686 = vector.multi_reduction <maximumf>, %685, %cst_264 [1] : vector<8x8xf32> to vector<8xf32>
    %687 = vector.shape_cast %686 : vector<8xf32> to vector<8x1xf32>
    %688 = vector.broadcast %687 : vector<8x1xf32> to vector<8x8xf32>
    %689 = arith.subf %685, %688 : vector<8x8xf32>
    %690 = math.exp %689 : vector<8x8xf32>
    %cst_265 = arith.constant dense<0.000000e+00> : vector<8xf32>
    %691 = vector.multi_reduction <add>, %690, %cst_265 [1] : vector<8x8xf32> to vector<8xf32>
    %692 = vector.shape_cast %691 : vector<8xf32> to vector<8x1xf32>
    %693 = tpu.reciprocal %692 {approx = true} : vector<8x1xf32> -> vector<8x1xf32>
    %694 = vector.broadcast %693 : vector<8x1xf32> to vector<8x8xf32>
    %695 = arith.mulf %690, %694 : vector<8x8xf32>
    %696 = vector.extract_strided_slice %673 {offsets = [0, 0], sizes = [8, 8], strides = [1, 1]} : vector<8x32xf32> to vector<8x8xf32>
    %cst_266 = arith.constant dense<0.000000e+00> : vector<8x8xf32>
    %697 = tpu.matmul %695, %696, %cst_266 {dimension_numbers = #tpu.dot_dimension_numbers<[1], [0], [0], [1], [0, 0, 1, 1], [], []>} : vector<8x8xf32>, vector<8x8xf32>, vector<8x8xf32> -> vector<8x8xf32>
    %698 = vector.extract_strided_slice %671 {offsets = [0, 8], sizes = [8, 8], strides = [1, 1]} : vector<8x32xf32> to vector<8x8xf32>
    %699 = vector.extract_strided_slice %672 {offsets = [0, 8], sizes = [8, 8], strides = [1, 1]} : vector<8x32xf32> to vector<8x8xf32>
    %cst_267 = arith.constant dense<0.000000e+00> : vector<8x8xf32>
    %700 = tpu.matmul %698, %699, %cst_267 {dimension_numbers = #tpu.dot_dimension_numbers<[1], [1], [0], [0], [0, 0, 1, 0], [], []>} : vector<8x8xf32>, vector<8x8xf32>, vector<8x8xf32> -> vector<8x8xf32>
    %cst_268 = arith.constant 0.353553385 : f32
    %701 = vector.broadcast %cst_268 : f32 to vector<8x8xf32>
    %702 = arith.mulf %700, %701 : vector<8x8xf32>
    %cst_269 = arith.constant 5.000000e-01 : f32
    %703 = vector.broadcast %cst_269 : f32 to vector<1x8xf32>
    %704 = arith.cmpf ogt, %674, %703 : vector<1x8xf32>
    %cst_270 = arith.constant -1.000000e+09 : f32
    %705 = vector.shape_cast %704 : vector<1x8xi1> to vector<1x8xi1>
    %706 = vector.broadcast %705 : vector<1x8xi1> to vector<8x8xi1>
    %707 = vector.broadcast %cst_270 : f32 to vector<8x8xf32>
    %708 = arith.select %706, %707, %702 : vector<8x8xi1>, vector<8x8xf32>
    %cst_271 = arith.constant dense<0xFF800000> : vector<8xf32>
    %709 = vector.multi_reduction <maximumf>, %708, %cst_271 [1] : vector<8x8xf32> to vector<8xf32>
    %710 = vector.shape_cast %709 : vector<8xf32> to vector<8x1xf32>
    %711 = vector.broadcast %710 : vector<8x1xf32> to vector<8x8xf32>
    %712 = arith.subf %708, %711 : vector<8x8xf32>
    %713 = math.exp %712 : vector<8x8xf32>
    %cst_272 = arith.constant dense<0.000000e+00> : vector<8xf32>
    %714 = vector.multi_reduction <add>, %713, %cst_272 [1] : vector<8x8xf32> to vector<8xf32>
    %715 = vector.shape_cast %714 : vector<8xf32> to vector<8x1xf32>
    %716 = tpu.reciprocal %715 {approx = true} : vector<8x1xf32> -> vector<8x1xf32>
    %717 = vector.broadcast %716 : vector<8x1xf32> to vector<8x8xf32>
    %718 = arith.mulf %713, %717 : vector<8x8xf32>
    %719 = vector.extract_strided_slice %673 {offsets = [0, 8], sizes = [8, 8], strides = [1, 1]} : vector<8x32xf32> to vector<8x8xf32>
    %cst_273 = arith.constant dense<0.000000e+00> : vector<8x8xf32>
    %720 = tpu.matmul %718, %719, %cst_273 {dimension_numbers = #tpu.dot_dimension_numbers<[1], [0], [0], [1], [0, 0, 1, 1], [], []>} : vector<8x8xf32>, vector<8x8xf32>, vector<8x8xf32> -> vector<8x8xf32>
    %721 = vector.extract_strided_slice %671 {offsets = [0, 16], sizes = [8, 8], strides = [1, 1]} : vector<8x32xf32> to vector<8x8xf32>
    %722 = vector.extract_strided_slice %672 {offsets = [0, 16], sizes = [8, 8], strides = [1, 1]} : vector<8x32xf32> to vector<8x8xf32>
    %cst_274 = arith.constant dense<0.000000e+00> : vector<8x8xf32>
    %723 = tpu.matmul %721, %722, %cst_274 {dimension_numbers = #tpu.dot_dimension_numbers<[1], [1], [0], [0], [0, 0, 1, 0], [], []>} : vector<8x8xf32>, vector<8x8xf32>, vector<8x8xf32> -> vector<8x8xf32>
    %cst_275 = arith.constant 0.353553385 : f32
    %724 = vector.broadcast %cst_275 : f32 to vector<8x8xf32>
    %725 = arith.mulf %723, %724 : vector<8x8xf32>
    %cst_276 = arith.constant 5.000000e-01 : f32
    %726 = vector.broadcast %cst_276 : f32 to vector<1x8xf32>
    %727 = arith.cmpf ogt, %674, %726 : vector<1x8xf32>
    %cst_277 = arith.constant -1.000000e+09 : f32
    %728 = vector.shape_cast %727 : vector<1x8xi1> to vector<1x8xi1>
    %729 = vector.broadcast %728 : vector<1x8xi1> to vector<8x8xi1>
    %730 = vector.broadcast %cst_277 : f32 to vector<8x8xf32>
    %731 = arith.select %729, %730, %725 : vector<8x8xi1>, vector<8x8xf32>
    %cst_278 = arith.constant dense<0xFF800000> : vector<8xf32>
    %732 = vector.multi_reduction <maximumf>, %731, %cst_278 [1] : vector<8x8xf32> to vector<8xf32>
    %733 = vector.shape_cast %732 : vector<8xf32> to vector<8x1xf32>
    %734 = vector.broadcast %733 : vector<8x1xf32> to vector<8x8xf32>
    %735 = arith.subf %731, %734 : vector<8x8xf32>
    %736 = math.exp %735 : vector<8x8xf32>
    %cst_279 = arith.constant dense<0.000000e+00> : vector<8xf32>
    %737 = vector.multi_reduction <add>, %736, %cst_279 [1] : vector<8x8xf32> to vector<8xf32>
    %738 = vector.shape_cast %737 : vector<8xf32> to vector<8x1xf32>
    %739 = tpu.reciprocal %738 {approx = true} : vector<8x1xf32> -> vector<8x1xf32>
    %740 = vector.broadcast %739 : vector<8x1xf32> to vector<8x8xf32>
    %741 = arith.mulf %736, %740 : vector<8x8xf32>
    %742 = vector.extract_strided_slice %673 {offsets = [0, 16], sizes = [8, 8], strides = [1, 1]} : vector<8x32xf32> to vector<8x8xf32>
    %cst_280 = arith.constant dense<0.000000e+00> : vector<8x8xf32>
    %743 = tpu.matmul %741, %742, %cst_280 {dimension_numbers = #tpu.dot_dimension_numbers<[1], [0], [0], [1], [0, 0, 1, 1], [], []>} : vector<8x8xf32>, vector<8x8xf32>, vector<8x8xf32> -> vector<8x8xf32>
    %744 = vector.extract_strided_slice %671 {offsets = [0, 24], sizes = [8, 8], strides = [1, 1]} : vector<8x32xf32> to vector<8x8xf32>
    %745 = vector.extract_strided_slice %672 {offsets = [0, 24], sizes = [8, 8], strides = [1, 1]} : vector<8x32xf32> to vector<8x8xf32>
    %cst_281 = arith.constant dense<0.000000e+00> : vector<8x8xf32>
    %746 = tpu.matmul %744, %745, %cst_281 {dimension_numbers = #tpu.dot_dimension_numbers<[1], [1], [0], [0], [0, 0, 1, 0], [], []>} : vector<8x8xf32>, vector<8x8xf32>, vector<8x8xf32> -> vector<8x8xf32>
    %cst_282 = arith.constant 0.353553385 : f32
    %747 = vector.broadcast %cst_282 : f32 to vector<8x8xf32>
    %748 = arith.mulf %746, %747 : vector<8x8xf32>
    %cst_283 = arith.constant 5.000000e-01 : f32
    %749 = vector.broadcast %cst_283 : f32 to vector<1x8xf32>
    %750 = arith.cmpf ogt, %674, %749 : vector<1x8xf32>
    %cst_284 = arith.constant -1.000000e+09 : f32
    %751 = vector.shape_cast %750 : vector<1x8xi1> to vector<1x8xi1>
    %752 = vector.broadcast %751 : vector<1x8xi1> to vector<8x8xi1>
    %753 = vector.broadcast %cst_284 : f32 to vector<8x8xf32>
    %754 = arith.select %752, %753, %748 : vector<8x8xi1>, vector<8x8xf32>
    %cst_285 = arith.constant dense<0xFF800000> : vector<8xf32>
    %755 = vector.multi_reduction <maximumf>, %754, %cst_285 [1] : vector<8x8xf32> to vector<8xf32>
    %756 = vector.shape_cast %755 : vector<8xf32> to vector<8x1xf32>
    %757 = vector.broadcast %756 : vector<8x1xf32> to vector<8x8xf32>
    %758 = arith.subf %754, %757 : vector<8x8xf32>
    %759 = math.exp %758 : vector<8x8xf32>
    %cst_286 = arith.constant dense<0.000000e+00> : vector<8xf32>
    %760 = vector.multi_reduction <add>, %759, %cst_286 [1] : vector<8x8xf32> to vector<8xf32>
    %761 = vector.shape_cast %760 : vector<8xf32> to vector<8x1xf32>
    %762 = tpu.reciprocal %761 {approx = true} : vector<8x1xf32> -> vector<8x1xf32>
    %763 = vector.broadcast %762 : vector<8x1xf32> to vector<8x8xf32>
    %764 = arith.mulf %759, %763 : vector<8x8xf32>
    %765 = vector.extract_strided_slice %673 {offsets = [0, 24], sizes = [8, 8], strides = [1, 1]} : vector<8x32xf32> to vector<8x8xf32>
    %cst_287 = arith.constant dense<0.000000e+00> : vector<8x8xf32>
    %766 = tpu.matmul %764, %765, %cst_287 {dimension_numbers = #tpu.dot_dimension_numbers<[1], [0], [0], [1], [0, 0, 1, 1], [], []>} : vector<8x8xf32>, vector<8x8xf32>, vector<8x8xf32> -> vector<8x8xf32>
    %767 = tpu.concatenate %697, %720, %743, %766 in 1 : vector<8x8xf32>, vector<8x8xf32>, vector<8x8xf32>, vector<8x8xf32> -> vector<8x32xf32>
    %768 = tpu.concatenate %670, %767 in 0 : vector<8x32xf32>, vector<8x32xf32> -> vector<16x32xf32>
    %cst_288 = arith.constant dense<0.000000e+00> : vector<16x32xf32>
    %769 = tpu.matmul %768, %565, %cst_288 {dimension_numbers = #tpu.dot_dimension_numbers<[1], [0], [0], [1], [0, 0, 1, 1], [], []>} : vector<16x32xf32>, vector<32x32xf32>, vector<16x32xf32> -> vector<16x32xf32>
    %770 = vector.broadcast %567 : vector<1x32xf32> to vector<16x32xf32>
    %771 = arith.addf %769, %770 : vector<16x32xf32>
    %c0_289 = arith.constant 0 : index
    %c0_290 = arith.constant 0 : index
    %c0_291 = arith.constant 0 : index
    %772 = vector.load %arg23[%c0_289, %c0_290, %c0_291] : memref<2x1x32xf32, #tpu.memory_space<vmem>>, vector<1x1x32xf32>
    %773 = vector.shape_cast %772 : vector<1x1x32xf32> to vector<1x32xf32>
    %c0_292 = arith.constant 0 : index
    %c0_293 = arith.constant 0 : index
    %c0_294 = arith.constant 0 : index
    %774 = vector.load %arg22[%c0_292, %c0_293, %c0_294] : memref<2x1x32xf32, #tpu.memory_space<vmem>>, vector<1x1x32xf32>
    %775 = vector.shape_cast %774 : vector<1x1x32xf32> to vector<1x32xf32>
    %776 = arith.addf %1, %771 : vector<16x32xf32>
    %cst_295 = arith.constant dense<0.000000e+00> : vector<16xf32>
    %777 = vector.multi_reduction <add>, %776, %cst_295 [1] : vector<16x32xf32> to vector<16xf32>
    %778 = vector.shape_cast %777 : vector<16xf32> to vector<16x1xf32>
    %cst_296 = arith.constant 3.200000e+01 : f32
    %779 = vector.broadcast %cst_296 : f32 to vector<16x1xf32>
    %780 = arith.divf %778, %779 : vector<16x1xf32>
    %781 = vector.broadcast %780 : vector<16x1xf32> to vector<16x32xf32>
    %782 = arith.subf %776, %781 : vector<16x32xf32>
    %783 = arith.mulf %782, %782 : vector<16x32xf32>
    %cst_297 = arith.constant dense<0.000000e+00> : vector<16xf32>
    %784 = vector.multi_reduction <add>, %783, %cst_297 [1] : vector<16x32xf32> to vector<16xf32>
    %785 = vector.shape_cast %784 : vector<16xf32> to vector<16x1xf32>
    %cst_298 = arith.constant 3.100000e+01 : f32
    %786 = vector.broadcast %cst_298 : f32 to vector<16x1xf32>
    %787 = arith.divf %785, %786 : vector<16x1xf32>
    %788 = math.sqrt %787 : vector<16x1xf32>
    %789 = vector.broadcast %773 : vector<1x32xf32> to vector<16x32xf32>
    %790 = arith.mulf %789, %782 : vector<16x32xf32>
    %cst_299 = arith.constant 9.99999997E-7 : f32
    %791 = vector.broadcast %cst_299 : f32 to vector<16x1xf32>
    %792 = arith.addf %788, %791 : vector<16x1xf32>
    %793 = vector.broadcast %792 : vector<16x1xf32> to vector<16x32xf32>
    %794 = arith.divf %790, %793 : vector<16x32xf32>
    %795 = vector.broadcast %775 : vector<1x32xf32> to vector<16x32xf32>
    %796 = arith.addf %794, %795 : vector<16x32xf32>
    %c0_300 = arith.constant 0 : index
    %c0_301 = arith.constant 0 : index
    %c0_302 = arith.constant 0 : index
    %797 = vector.load %arg33[%c0_300, %c0_301, %c0_302] : memref<2x32x96xf32, #tpu.memory_space<vmem>>, vector<1x32x96xf32>
    %798 = vector.shape_cast %797 : vector<1x32x96xf32> to vector<32x96xf32>
    %c0_303 = arith.constant 0 : index
    %c0_304 = arith.constant 0 : index
    %c0_305 = arith.constant 0 : index
    %799 = vector.load %arg21[%c0_303, %c0_304, %c0_305] : memref<2x1x96xf32, #tpu.memory_space<vmem>>, vector<1x1x96xf32>
    %800 = vector.shape_cast %799 : vector<1x1x96xf32> to vector<1x96xf32>
    %c0_306 = arith.constant 0 : index
    %c0_307 = arith.constant 0 : index
    %c0_308 = arith.constant 0 : index
    %801 = vector.load %arg31[%c0_306, %c0_307, %c0_308] : memref<2x32x32xf32, #tpu.memory_space<vmem>>, vector<1x32x32xf32>
    %802 = vector.shape_cast %801 : vector<1x32x32xf32> to vector<32x32xf32>
    %c0_309 = arith.constant 0 : index
    %c0_310 = arith.constant 0 : index
    %c0_311 = arith.constant 0 : index
    %803 = vector.load %arg19[%c0_309, %c0_310, %c0_311] : memref<2x1x32xf32, #tpu.memory_space<vmem>>, vector<1x1x32xf32>
    %804 = vector.shape_cast %803 : vector<1x1x32xf32> to vector<1x32xf32>
    %805 = vector.extract_strided_slice %798 {offsets = [0, 0], sizes = [32, 32], strides = [1, 1]} : vector<32x96xf32> to vector<32x32xf32>
    %cst_312 = arith.constant dense<0.000000e+00> : vector<16x32xf32>
    %806 = tpu.matmul %796, %805, %cst_312 {dimension_numbers = #tpu.dot_dimension_numbers<[1], [0], [0], [1], [0, 0, 1, 1], [], []>} : vector<16x32xf32>, vector<32x32xf32>, vector<16x32xf32> -> vector<16x32xf32>
    %807 = vector.extract_strided_slice %800 {offsets = [0, 0], sizes = [1, 32], strides = [1, 1]} : vector<1x96xf32> to vector<1x32xf32>
    %808 = vector.broadcast %807 : vector<1x32xf32> to vector<16x32xf32>
    %809 = arith.addf %806, %808 : vector<16x32xf32>
    %810 = vector.extract_strided_slice %798 {offsets = [0, 32], sizes = [32, 64], strides = [1, 1]} : vector<32x96xf32> to vector<32x64xf32>
    %cst_313 = arith.constant dense<0.000000e+00> : vector<16x64xf32>
    %811 = tpu.matmul %559, %810, %cst_313 {dimension_numbers = #tpu.dot_dimension_numbers<[1], [0], [0], [1], [0, 0, 1, 1], [], []>} : vector<16x32xf32>, vector<32x64xf32>, vector<16x64xf32> -> vector<16x64xf32>
    %812 = vector.extract_strided_slice %800 {offsets = [0, 32], sizes = [1, 64], strides = [1, 1]} : vector<1x96xf32> to vector<1x64xf32>
    %813 = vector.broadcast %812 : vector<1x64xf32> to vector<16x64xf32>
    %814 = arith.addf %811, %813 : vector<16x64xf32>
    %815 = vector.extract_strided_slice %814 {offsets = [0, 0], sizes = [16, 32], strides = [1, 1]} : vector<16x64xf32> to vector<16x32xf32>
    %816 = vector.extract_strided_slice %814 {offsets = [0, 32], sizes = [16, 32], strides = [1, 1]} : vector<16x64xf32> to vector<16x32xf32>
    %817 = vector.extract_strided_slice %809 {offsets = [0, 0], sizes = [8, 32], strides = [1, 1]} : vector<16x32xf32> to vector<8x32xf32>
    %818 = vector.extract_strided_slice %815 {offsets = [0, 0], sizes = [8, 32], strides = [1, 1]} : vector<16x32xf32> to vector<8x32xf32>
    %819 = vector.extract_strided_slice %816 {offsets = [0, 0], sizes = [8, 32], strides = [1, 1]} : vector<16x32xf32> to vector<8x32xf32>
    %820 = vector.extract_strided_slice %2 {offsets = [0, 0], sizes = [1, 8], strides = [1, 1]} : vector<2x8xf32> to vector<1x8xf32>
    %821 = vector.extract_strided_slice %817 {offsets = [0, 0], sizes = [8, 8], strides = [1, 1]} : vector<8x32xf32> to vector<8x8xf32>
    %822 = vector.extract_strided_slice %818 {offsets = [0, 0], sizes = [8, 8], strides = [1, 1]} : vector<8x32xf32> to vector<8x8xf32>
    %cst_314 = arith.constant dense<0.000000e+00> : vector<8x8xf32>
    %823 = tpu.matmul %821, %822, %cst_314 {dimension_numbers = #tpu.dot_dimension_numbers<[1], [1], [0], [0], [0, 0, 1, 0], [], []>} : vector<8x8xf32>, vector<8x8xf32>, vector<8x8xf32> -> vector<8x8xf32>
    %cst_315 = arith.constant 0.353553385 : f32
    %824 = vector.broadcast %cst_315 : f32 to vector<8x8xf32>
    %825 = arith.mulf %823, %824 : vector<8x8xf32>
    %cst_316 = arith.constant 5.000000e-01 : f32
    %826 = vector.broadcast %cst_316 : f32 to vector<1x8xf32>
    %827 = arith.cmpf ogt, %820, %826 : vector<1x8xf32>
    %cst_317 = arith.constant -1.000000e+09 : f32
    %828 = vector.shape_cast %827 : vector<1x8xi1> to vector<1x8xi1>
    %829 = vector.broadcast %828 : vector<1x8xi1> to vector<8x8xi1>
    %830 = vector.broadcast %cst_317 : f32 to vector<8x8xf32>
    %831 = arith.select %829, %830, %825 : vector<8x8xi1>, vector<8x8xf32>
    %cst_318 = arith.constant dense<0xFF800000> : vector<8xf32>
    %832 = vector.multi_reduction <maximumf>, %831, %cst_318 [1] : vector<8x8xf32> to vector<8xf32>
    %833 = vector.shape_cast %832 : vector<8xf32> to vector<8x1xf32>
    %834 = vector.broadcast %833 : vector<8x1xf32> to vector<8x8xf32>
    %835 = arith.subf %831, %834 : vector<8x8xf32>
    %836 = math.exp %835 : vector<8x8xf32>
    %cst_319 = arith.constant dense<0.000000e+00> : vector<8xf32>
    %837 = vector.multi_reduction <add>, %836, %cst_319 [1] : vector<8x8xf32> to vector<8xf32>
    %838 = vector.shape_cast %837 : vector<8xf32> to vector<8x1xf32>
    %839 = tpu.reciprocal %838 {approx = true} : vector<8x1xf32> -> vector<8x1xf32>
    %840 = vector.broadcast %839 : vector<8x1xf32> to vector<8x8xf32>
    %841 = arith.mulf %836, %840 : vector<8x8xf32>
    %842 = vector.extract_strided_slice %819 {offsets = [0, 0], sizes = [8, 8], strides = [1, 1]} : vector<8x32xf32> to vector<8x8xf32>
    %cst_320 = arith.constant dense<0.000000e+00> : vector<8x8xf32>
    %843 = tpu.matmul %841, %842, %cst_320 {dimension_numbers = #tpu.dot_dimension_numbers<[1], [0], [0], [1], [0, 0, 1, 1], [], []>} : vector<8x8xf32>, vector<8x8xf32>, vector<8x8xf32> -> vector<8x8xf32>
    %844 = vector.extract_strided_slice %817 {offsets = [0, 8], sizes = [8, 8], strides = [1, 1]} : vector<8x32xf32> to vector<8x8xf32>
    %845 = vector.extract_strided_slice %818 {offsets = [0, 8], sizes = [8, 8], strides = [1, 1]} : vector<8x32xf32> to vector<8x8xf32>
    %cst_321 = arith.constant dense<0.000000e+00> : vector<8x8xf32>
    %846 = tpu.matmul %844, %845, %cst_321 {dimension_numbers = #tpu.dot_dimension_numbers<[1], [1], [0], [0], [0, 0, 1, 0], [], []>} : vector<8x8xf32>, vector<8x8xf32>, vector<8x8xf32> -> vector<8x8xf32>
    %cst_322 = arith.constant 0.353553385 : f32
    %847 = vector.broadcast %cst_322 : f32 to vector<8x8xf32>
    %848 = arith.mulf %846, %847 : vector<8x8xf32>
    %cst_323 = arith.constant 5.000000e-01 : f32
    %849 = vector.broadcast %cst_323 : f32 to vector<1x8xf32>
    %850 = arith.cmpf ogt, %820, %849 : vector<1x8xf32>
    %cst_324 = arith.constant -1.000000e+09 : f32
    %851 = vector.shape_cast %850 : vector<1x8xi1> to vector<1x8xi1>
    %852 = vector.broadcast %851 : vector<1x8xi1> to vector<8x8xi1>
    %853 = vector.broadcast %cst_324 : f32 to vector<8x8xf32>
    %854 = arith.select %852, %853, %848 : vector<8x8xi1>, vector<8x8xf32>
    %cst_325 = arith.constant dense<0xFF800000> : vector<8xf32>
    %855 = vector.multi_reduction <maximumf>, %854, %cst_325 [1] : vector<8x8xf32> to vector<8xf32>
    %856 = vector.shape_cast %855 : vector<8xf32> to vector<8x1xf32>
    %857 = vector.broadcast %856 : vector<8x1xf32> to vector<8x8xf32>
    %858 = arith.subf %854, %857 : vector<8x8xf32>
    %859 = math.exp %858 : vector<8x8xf32>
    %cst_326 = arith.constant dense<0.000000e+00> : vector<8xf32>
    %860 = vector.multi_reduction <add>, %859, %cst_326 [1] : vector<8x8xf32> to vector<8xf32>
    %861 = vector.shape_cast %860 : vector<8xf32> to vector<8x1xf32>
    %862 = tpu.reciprocal %861 {approx = true} : vector<8x1xf32> -> vector<8x1xf32>
    %863 = vector.broadcast %862 : vector<8x1xf32> to vector<8x8xf32>
    %864 = arith.mulf %859, %863 : vector<8x8xf32>
    %865 = vector.extract_strided_slice %819 {offsets = [0, 8], sizes = [8, 8], strides = [1, 1]} : vector<8x32xf32> to vector<8x8xf32>
    %cst_327 = arith.constant dense<0.000000e+00> : vector<8x8xf32>
    %866 = tpu.matmul %864, %865, %cst_327 {dimension_numbers = #tpu.dot_dimension_numbers<[1], [0], [0], [1], [0, 0, 1, 1], [], []>} : vector<8x8xf32>, vector<8x8xf32>, vector<8x8xf32> -> vector<8x8xf32>
    %867 = vector.extract_strided_slice %817 {offsets = [0, 16], sizes = [8, 8], strides = [1, 1]} : vector<8x32xf32> to vector<8x8xf32>
    %868 = vector.extract_strided_slice %818 {offsets = [0, 16], sizes = [8, 8], strides = [1, 1]} : vector<8x32xf32> to vector<8x8xf32>
    %cst_328 = arith.constant dense<0.000000e+00> : vector<8x8xf32>
    %869 = tpu.matmul %867, %868, %cst_328 {dimension_numbers = #tpu.dot_dimension_numbers<[1], [1], [0], [0], [0, 0, 1, 0], [], []>} : vector<8x8xf32>, vector<8x8xf32>, vector<8x8xf32> -> vector<8x8xf32>
    %cst_329 = arith.constant 0.353553385 : f32
    %870 = vector.broadcast %cst_329 : f32 to vector<8x8xf32>
    %871 = arith.mulf %869, %870 : vector<8x8xf32>
    %cst_330 = arith.constant 5.000000e-01 : f32
    %872 = vector.broadcast %cst_330 : f32 to vector<1x8xf32>
    %873 = arith.cmpf ogt, %820, %872 : vector<1x8xf32>
    %cst_331 = arith.constant -1.000000e+09 : f32
    %874 = vector.shape_cast %873 : vector<1x8xi1> to vector<1x8xi1>
    %875 = vector.broadcast %874 : vector<1x8xi1> to vector<8x8xi1>
    %876 = vector.broadcast %cst_331 : f32 to vector<8x8xf32>
    %877 = arith.select %875, %876, %871 : vector<8x8xi1>, vector<8x8xf32>
    %cst_332 = arith.constant dense<0xFF800000> : vector<8xf32>
    %878 = vector.multi_reduction <maximumf>, %877, %cst_332 [1] : vector<8x8xf32> to vector<8xf32>
    %879 = vector.shape_cast %878 : vector<8xf32> to vector<8x1xf32>
    %880 = vector.broadcast %879 : vector<8x1xf32> to vector<8x8xf32>
    %881 = arith.subf %877, %880 : vector<8x8xf32>
    %882 = math.exp %881 : vector<8x8xf32>
    %cst_333 = arith.constant dense<0.000000e+00> : vector<8xf32>
    %883 = vector.multi_reduction <add>, %882, %cst_333 [1] : vector<8x8xf32> to vector<8xf32>
    %884 = vector.shape_cast %883 : vector<8xf32> to vector<8x1xf32>
    %885 = tpu.reciprocal %884 {approx = true} : vector<8x1xf32> -> vector<8x1xf32>
    %886 = vector.broadcast %885 : vector<8x1xf32> to vector<8x8xf32>
    %887 = arith.mulf %882, %886 : vector<8x8xf32>
    %888 = vector.extract_strided_slice %819 {offsets = [0, 16], sizes = [8, 8], strides = [1, 1]} : vector<8x32xf32> to vector<8x8xf32>
    %cst_334 = arith.constant dense<0.000000e+00> : vector<8x8xf32>
    %889 = tpu.matmul %887, %888, %cst_334 {dimension_numbers = #tpu.dot_dimension_numbers<[1], [0], [0], [1], [0, 0, 1, 1], [], []>} : vector<8x8xf32>, vector<8x8xf32>, vector<8x8xf32> -> vector<8x8xf32>
    %890 = vector.extract_strided_slice %817 {offsets = [0, 24], sizes = [8, 8], strides = [1, 1]} : vector<8x32xf32> to vector<8x8xf32>
    %891 = vector.extract_strided_slice %818 {offsets = [0, 24], sizes = [8, 8], strides = [1, 1]} : vector<8x32xf32> to vector<8x8xf32>
    %cst_335 = arith.constant dense<0.000000e+00> : vector<8x8xf32>
    %892 = tpu.matmul %890, %891, %cst_335 {dimension_numbers = #tpu.dot_dimension_numbers<[1], [1], [0], [0], [0, 0, 1, 0], [], []>} : vector<8x8xf32>, vector<8x8xf32>, vector<8x8xf32> -> vector<8x8xf32>
    %cst_336 = arith.constant 0.353553385 : f32
    %893 = vector.broadcast %cst_336 : f32 to vector<8x8xf32>
    %894 = arith.mulf %892, %893 : vector<8x8xf32>
    %cst_337 = arith.constant 5.000000e-01 : f32
    %895 = vector.broadcast %cst_337 : f32 to vector<1x8xf32>
    %896 = arith.cmpf ogt, %820, %895 : vector<1x8xf32>
    %cst_338 = arith.constant -1.000000e+09 : f32
    %897 = vector.shape_cast %896 : vector<1x8xi1> to vector<1x8xi1>
    %898 = vector.broadcast %897 : vector<1x8xi1> to vector<8x8xi1>
    %899 = vector.broadcast %cst_338 : f32 to vector<8x8xf32>
    %900 = arith.select %898, %899, %894 : vector<8x8xi1>, vector<8x8xf32>
    %cst_339 = arith.constant dense<0xFF800000> : vector<8xf32>
    %901 = vector.multi_reduction <maximumf>, %900, %cst_339 [1] : vector<8x8xf32> to vector<8xf32>
    %902 = vector.shape_cast %901 : vector<8xf32> to vector<8x1xf32>
    %903 = vector.broadcast %902 : vector<8x1xf32> to vector<8x8xf32>
    %904 = arith.subf %900, %903 : vector<8x8xf32>
    %905 = math.exp %904 : vector<8x8xf32>
    %cst_340 = arith.constant dense<0.000000e+00> : vector<8xf32>
    %906 = vector.multi_reduction <add>, %905, %cst_340 [1] : vector<8x8xf32> to vector<8xf32>
    %907 = vector.shape_cast %906 : vector<8xf32> to vector<8x1xf32>
    %908 = tpu.reciprocal %907 {approx = true} : vector<8x1xf32> -> vector<8x1xf32>
    %909 = vector.broadcast %908 : vector<8x1xf32> to vector<8x8xf32>
    %910 = arith.mulf %905, %909 : vector<8x8xf32>
    %911 = vector.extract_strided_slice %819 {offsets = [0, 24], sizes = [8, 8], strides = [1, 1]} : vector<8x32xf32> to vector<8x8xf32>
    %cst_341 = arith.constant dense<0.000000e+00> : vector<8x8xf32>
    %912 = tpu.matmul %910, %911, %cst_341 {dimension_numbers = #tpu.dot_dimension_numbers<[1], [0], [0], [1], [0, 0, 1, 1], [], []>} : vector<8x8xf32>, vector<8x8xf32>, vector<8x8xf32> -> vector<8x8xf32>
    %913 = tpu.concatenate %843, %866, %889, %912 in 1 : vector<8x8xf32>, vector<8x8xf32>, vector<8x8xf32>, vector<8x8xf32> -> vector<8x32xf32>
    %914 = vector.extract_strided_slice %809 {offsets = [8, 0], sizes = [8, 32], strides = [1, 1]} : vector<16x32xf32> to vector<8x32xf32>
    %915 = vector.extract_strided_slice %815 {offsets = [8, 0], sizes = [8, 32], strides = [1, 1]} : vector<16x32xf32> to vector<8x32xf32>
    %916 = vector.extract_strided_slice %816 {offsets = [8, 0], sizes = [8, 32], strides = [1, 1]} : vector<16x32xf32> to vector<8x32xf32>
    %917 = vector.extract_strided_slice %2 {offsets = [1, 0], sizes = [1, 8], strides = [1, 1]} : vector<2x8xf32> to vector<1x8xf32>
    %918 = vector.extract_strided_slice %914 {offsets = [0, 0], sizes = [8, 8], strides = [1, 1]} : vector<8x32xf32> to vector<8x8xf32>
    %919 = vector.extract_strided_slice %915 {offsets = [0, 0], sizes = [8, 8], strides = [1, 1]} : vector<8x32xf32> to vector<8x8xf32>
    %cst_342 = arith.constant dense<0.000000e+00> : vector<8x8xf32>
    %920 = tpu.matmul %918, %919, %cst_342 {dimension_numbers = #tpu.dot_dimension_numbers<[1], [1], [0], [0], [0, 0, 1, 0], [], []>} : vector<8x8xf32>, vector<8x8xf32>, vector<8x8xf32> -> vector<8x8xf32>
    %cst_343 = arith.constant 0.353553385 : f32
    %921 = vector.broadcast %cst_343 : f32 to vector<8x8xf32>
    %922 = arith.mulf %920, %921 : vector<8x8xf32>
    %cst_344 = arith.constant 5.000000e-01 : f32
    %923 = vector.broadcast %cst_344 : f32 to vector<1x8xf32>
    %924 = arith.cmpf ogt, %917, %923 : vector<1x8xf32>
    %cst_345 = arith.constant -1.000000e+09 : f32
    %925 = vector.shape_cast %924 : vector<1x8xi1> to vector<1x8xi1>
    %926 = vector.broadcast %925 : vector<1x8xi1> to vector<8x8xi1>
    %927 = vector.broadcast %cst_345 : f32 to vector<8x8xf32>
    %928 = arith.select %926, %927, %922 : vector<8x8xi1>, vector<8x8xf32>
    %cst_346 = arith.constant dense<0xFF800000> : vector<8xf32>
    %929 = vector.multi_reduction <maximumf>, %928, %cst_346 [1] : vector<8x8xf32> to vector<8xf32>
    %930 = vector.shape_cast %929 : vector<8xf32> to vector<8x1xf32>
    %931 = vector.broadcast %930 : vector<8x1xf32> to vector<8x8xf32>
    %932 = arith.subf %928, %931 : vector<8x8xf32>
    %933 = math.exp %932 : vector<8x8xf32>
    %cst_347 = arith.constant dense<0.000000e+00> : vector<8xf32>
    %934 = vector.multi_reduction <add>, %933, %cst_347 [1] : vector<8x8xf32> to vector<8xf32>
    %935 = vector.shape_cast %934 : vector<8xf32> to vector<8x1xf32>
    %936 = tpu.reciprocal %935 {approx = true} : vector<8x1xf32> -> vector<8x1xf32>
    %937 = vector.broadcast %936 : vector<8x1xf32> to vector<8x8xf32>
    %938 = arith.mulf %933, %937 : vector<8x8xf32>
    %939 = vector.extract_strided_slice %916 {offsets = [0, 0], sizes = [8, 8], strides = [1, 1]} : vector<8x32xf32> to vector<8x8xf32>
    %cst_348 = arith.constant dense<0.000000e+00> : vector<8x8xf32>
    %940 = tpu.matmul %938, %939, %cst_348 {dimension_numbers = #tpu.dot_dimension_numbers<[1], [0], [0], [1], [0, 0, 1, 1], [], []>} : vector<8x8xf32>, vector<8x8xf32>, vector<8x8xf32> -> vector<8x8xf32>
    %941 = vector.extract_strided_slice %914 {offsets = [0, 8], sizes = [8, 8], strides = [1, 1]} : vector<8x32xf32> to vector<8x8xf32>
    %942 = vector.extract_strided_slice %915 {offsets = [0, 8], sizes = [8, 8], strides = [1, 1]} : vector<8x32xf32> to vector<8x8xf32>
    %cst_349 = arith.constant dense<0.000000e+00> : vector<8x8xf32>
    %943 = tpu.matmul %941, %942, %cst_349 {dimension_numbers = #tpu.dot_dimension_numbers<[1], [1], [0], [0], [0, 0, 1, 0], [], []>} : vector<8x8xf32>, vector<8x8xf32>, vector<8x8xf32> -> vector<8x8xf32>
    %cst_350 = arith.constant 0.353553385 : f32
    %944 = vector.broadcast %cst_350 : f32 to vector<8x8xf32>
    %945 = arith.mulf %943, %944 : vector<8x8xf32>
    %cst_351 = arith.constant 5.000000e-01 : f32
    %946 = vector.broadcast %cst_351 : f32 to vector<1x8xf32>
    %947 = arith.cmpf ogt, %917, %946 : vector<1x8xf32>
    %cst_352 = arith.constant -1.000000e+09 : f32
    %948 = vector.shape_cast %947 : vector<1x8xi1> to vector<1x8xi1>
    %949 = vector.broadcast %948 : vector<1x8xi1> to vector<8x8xi1>
    %950 = vector.broadcast %cst_352 : f32 to vector<8x8xf32>
    %951 = arith.select %949, %950, %945 : vector<8x8xi1>, vector<8x8xf32>
    %cst_353 = arith.constant dense<0xFF800000> : vector<8xf32>
    %952 = vector.multi_reduction <maximumf>, %951, %cst_353 [1] : vector<8x8xf32> to vector<8xf32>
    %953 = vector.shape_cast %952 : vector<8xf32> to vector<8x1xf32>
    %954 = vector.broadcast %953 : vector<8x1xf32> to vector<8x8xf32>
    %955 = arith.subf %951, %954 : vector<8x8xf32>
    %956 = math.exp %955 : vector<8x8xf32>
    %cst_354 = arith.constant dense<0.000000e+00> : vector<8xf32>
    %957 = vector.multi_reduction <add>, %956, %cst_354 [1] : vector<8x8xf32> to vector<8xf32>
    %958 = vector.shape_cast %957 : vector<8xf32> to vector<8x1xf32>
    %959 = tpu.reciprocal %958 {approx = true} : vector<8x1xf32> -> vector<8x1xf32>
    %960 = vector.broadcast %959 : vector<8x1xf32> to vector<8x8xf32>
    %961 = arith.mulf %956, %960 : vector<8x8xf32>
    %962 = vector.extract_strided_slice %916 {offsets = [0, 8], sizes = [8, 8], strides = [1, 1]} : vector<8x32xf32> to vector<8x8xf32>
    %cst_355 = arith.constant dense<0.000000e+00> : vector<8x8xf32>
    %963 = tpu.matmul %961, %962, %cst_355 {dimension_numbers = #tpu.dot_dimension_numbers<[1], [0], [0], [1], [0, 0, 1, 1], [], []>} : vector<8x8xf32>, vector<8x8xf32>, vector<8x8xf32> -> vector<8x8xf32>
    %964 = vector.extract_strided_slice %914 {offsets = [0, 16], sizes = [8, 8], strides = [1, 1]} : vector<8x32xf32> to vector<8x8xf32>
    %965 = vector.extract_strided_slice %915 {offsets = [0, 16], sizes = [8, 8], strides = [1, 1]} : vector<8x32xf32> to vector<8x8xf32>
    %cst_356 = arith.constant dense<0.000000e+00> : vector<8x8xf32>
    %966 = tpu.matmul %964, %965, %cst_356 {dimension_numbers = #tpu.dot_dimension_numbers<[1], [1], [0], [0], [0, 0, 1, 0], [], []>} : vector<8x8xf32>, vector<8x8xf32>, vector<8x8xf32> -> vector<8x8xf32>
    %cst_357 = arith.constant 0.353553385 : f32
    %967 = vector.broadcast %cst_357 : f32 to vector<8x8xf32>
    %968 = arith.mulf %966, %967 : vector<8x8xf32>
    %cst_358 = arith.constant 5.000000e-01 : f32
    %969 = vector.broadcast %cst_358 : f32 to vector<1x8xf32>
    %970 = arith.cmpf ogt, %917, %969 : vector<1x8xf32>
    %cst_359 = arith.constant -1.000000e+09 : f32
    %971 = vector.shape_cast %970 : vector<1x8xi1> to vector<1x8xi1>
    %972 = vector.broadcast %971 : vector<1x8xi1> to vector<8x8xi1>
    %973 = vector.broadcast %cst_359 : f32 to vector<8x8xf32>
    %974 = arith.select %972, %973, %968 : vector<8x8xi1>, vector<8x8xf32>
    %cst_360 = arith.constant dense<0xFF800000> : vector<8xf32>
    %975 = vector.multi_reduction <maximumf>, %974, %cst_360 [1] : vector<8x8xf32> to vector<8xf32>
    %976 = vector.shape_cast %975 : vector<8xf32> to vector<8x1xf32>
    %977 = vector.broadcast %976 : vector<8x1xf32> to vector<8x8xf32>
    %978 = arith.subf %974, %977 : vector<8x8xf32>
    %979 = math.exp %978 : vector<8x8xf32>
    %cst_361 = arith.constant dense<0.000000e+00> : vector<8xf32>
    %980 = vector.multi_reduction <add>, %979, %cst_361 [1] : vector<8x8xf32> to vector<8xf32>
    %981 = vector.shape_cast %980 : vector<8xf32> to vector<8x1xf32>
    %982 = tpu.reciprocal %981 {approx = true} : vector<8x1xf32> -> vector<8x1xf32>
    %983 = vector.broadcast %982 : vector<8x1xf32> to vector<8x8xf32>
    %984 = arith.mulf %979, %983 : vector<8x8xf32>
    %985 = vector.extract_strided_slice %916 {offsets = [0, 16], sizes = [8, 8], strides = [1, 1]} : vector<8x32xf32> to vector<8x8xf32>
    %cst_362 = arith.constant dense<0.000000e+00> : vector<8x8xf32>
    %986 = tpu.matmul %984, %985, %cst_362 {dimension_numbers = #tpu.dot_dimension_numbers<[1], [0], [0], [1], [0, 0, 1, 1], [], []>} : vector<8x8xf32>, vector<8x8xf32>, vector<8x8xf32> -> vector<8x8xf32>
    %987 = vector.extract_strided_slice %914 {offsets = [0, 24], sizes = [8, 8], strides = [1, 1]} : vector<8x32xf32> to vector<8x8xf32>
    %988 = vector.extract_strided_slice %915 {offsets = [0, 24], sizes = [8, 8], strides = [1, 1]} : vector<8x32xf32> to vector<8x8xf32>
    %cst_363 = arith.constant dense<0.000000e+00> : vector<8x8xf32>
    %989 = tpu.matmul %987, %988, %cst_363 {dimension_numbers = #tpu.dot_dimension_numbers<[1], [1], [0], [0], [0, 0, 1, 0], [], []>} : vector<8x8xf32>, vector<8x8xf32>, vector<8x8xf32> -> vector<8x8xf32>
    %cst_364 = arith.constant 0.353553385 : f32
    %990 = vector.broadcast %cst_364 : f32 to vector<8x8xf32>
    %991 = arith.mulf %989, %990 : vector<8x8xf32>
    %cst_365 = arith.constant 5.000000e-01 : f32
    %992 = vector.broadcast %cst_365 : f32 to vector<1x8xf32>
    %993 = arith.cmpf ogt, %917, %992 : vector<1x8xf32>
    %cst_366 = arith.constant -1.000000e+09 : f32
    %994 = vector.shape_cast %993 : vector<1x8xi1> to vector<1x8xi1>
    %995 = vector.broadcast %994 : vector<1x8xi1> to vector<8x8xi1>
    %996 = vector.broadcast %cst_366 : f32 to vector<8x8xf32>
    %997 = arith.select %995, %996, %991 : vector<8x8xi1>, vector<8x8xf32>
    %cst_367 = arith.constant dense<0xFF800000> : vector<8xf32>
    %998 = vector.multi_reduction <maximumf>, %997, %cst_367 [1] : vector<8x8xf32> to vector<8xf32>
    %999 = vector.shape_cast %998 : vector<8xf32> to vector<8x1xf32>
    %1000 = vector.broadcast %999 : vector<8x1xf32> to vector<8x8xf32>
    %1001 = arith.subf %997, %1000 : vector<8x8xf32>
    %1002 = math.exp %1001 : vector<8x8xf32>
    %cst_368 = arith.constant dense<0.000000e+00> : vector<8xf32>
    %1003 = vector.multi_reduction <add>, %1002, %cst_368 [1] : vector<8x8xf32> to vector<8xf32>
    %1004 = vector.shape_cast %1003 : vector<8xf32> to vector<8x1xf32>
    %1005 = tpu.reciprocal %1004 {approx = true} : vector<8x1xf32> -> vector<8x1xf32>
    %1006 = vector.broadcast %1005 : vector<8x1xf32> to vector<8x8xf32>
    %1007 = arith.mulf %1002, %1006 : vector<8x8xf32>
    %1008 = vector.extract_strided_slice %916 {offsets = [0, 24], sizes = [8, 8], strides = [1, 1]} : vector<8x32xf32> to vector<8x8xf32>
    %cst_369 = arith.constant dense<0.000000e+00> : vector<8x8xf32>
    %1009 = tpu.matmul %1007, %1008, %cst_369 {dimension_numbers = #tpu.dot_dimension_numbers<[1], [0], [0], [1], [0, 0, 1, 1], [], []>} : vector<8x8xf32>, vector<8x8xf32>, vector<8x8xf32> -> vector<8x8xf32>
    %1010 = tpu.concatenate %940, %963, %986, %1009 in 1 : vector<8x8xf32>, vector<8x8xf32>, vector<8x8xf32>, vector<8x8xf32> -> vector<8x32xf32>
    %1011 = tpu.concatenate %913, %1010 in 0 : vector<8x32xf32>, vector<8x32xf32> -> vector<16x32xf32>
    %cst_370 = arith.constant dense<0.000000e+00> : vector<16x32xf32>
    %1012 = tpu.matmul %1011, %802, %cst_370 {dimension_numbers = #tpu.dot_dimension_numbers<[1], [0], [0], [1], [0, 0, 1, 1], [], []>} : vector<16x32xf32>, vector<32x32xf32>, vector<16x32xf32> -> vector<16x32xf32>
    %1013 = vector.broadcast %804 : vector<1x32xf32> to vector<16x32xf32>
    %1014 = arith.addf %1012, %1013 : vector<16x32xf32>
    %c0_371 = arith.constant 0 : index
    %c0_372 = arith.constant 0 : index
    %c0_373 = arith.constant 0 : index
    %1015 = vector.load %arg25[%c0_371, %c0_372, %c0_373] : memref<2x1x32xf32, #tpu.memory_space<vmem>>, vector<1x1x32xf32>
    %1016 = vector.shape_cast %1015 : vector<1x1x32xf32> to vector<1x32xf32>
    %c0_374 = arith.constant 0 : index
    %c0_375 = arith.constant 0 : index
    %c0_376 = arith.constant 0 : index
    %1017 = vector.load %arg24[%c0_374, %c0_375, %c0_376] : memref<2x1x32xf32, #tpu.memory_space<vmem>>, vector<1x1x32xf32>
    %1018 = vector.shape_cast %1017 : vector<1x1x32xf32> to vector<1x32xf32>
    %1019 = arith.addf %796, %1014 : vector<16x32xf32>
    %cst_377 = arith.constant dense<0.000000e+00> : vector<16xf32>
    %1020 = vector.multi_reduction <add>, %1019, %cst_377 [1] : vector<16x32xf32> to vector<16xf32>
    %1021 = vector.shape_cast %1020 : vector<16xf32> to vector<16x1xf32>
    %cst_378 = arith.constant 3.200000e+01 : f32
    %1022 = vector.broadcast %cst_378 : f32 to vector<16x1xf32>
    %1023 = arith.divf %1021, %1022 : vector<16x1xf32>
    %1024 = vector.broadcast %1023 : vector<16x1xf32> to vector<16x32xf32>
    %1025 = arith.subf %1019, %1024 : vector<16x32xf32>
    %1026 = arith.mulf %1025, %1025 : vector<16x32xf32>
    %cst_379 = arith.constant dense<0.000000e+00> : vector<16xf32>
    %1027 = vector.multi_reduction <add>, %1026, %cst_379 [1] : vector<16x32xf32> to vector<16xf32>
    %1028 = vector.shape_cast %1027 : vector<16xf32> to vector<16x1xf32>
    %cst_380 = arith.constant 3.100000e+01 : f32
    %1029 = vector.broadcast %cst_380 : f32 to vector<16x1xf32>
    %1030 = arith.divf %1028, %1029 : vector<16x1xf32>
    %1031 = math.sqrt %1030 : vector<16x1xf32>
    %1032 = vector.broadcast %1016 : vector<1x32xf32> to vector<16x32xf32>
    %1033 = arith.mulf %1032, %1025 : vector<16x32xf32>
    %cst_381 = arith.constant 9.99999997E-7 : f32
    %1034 = vector.broadcast %cst_381 : f32 to vector<16x1xf32>
    %1035 = arith.addf %1031, %1034 : vector<16x1xf32>
    %1036 = vector.broadcast %1035 : vector<16x1xf32> to vector<16x32xf32>
    %1037 = arith.divf %1033, %1036 : vector<16x32xf32>
    %1038 = vector.broadcast %1018 : vector<1x32xf32> to vector<16x32xf32>
    %1039 = arith.addf %1037, %1038 : vector<16x32xf32>
    %c0_382 = arith.constant 0 : index
    %c0_383 = arith.constant 0 : index
    %c0_384 = arith.constant 0 : index
    %1040 = vector.load %arg28[%c0_382, %c0_383, %c0_384] : memref<2x32x64xf32, #tpu.memory_space<vmem>>, vector<1x32x64xf32>
    %1041 = vector.shape_cast %1040 : vector<1x32x64xf32> to vector<32x64xf32>
    %c0_385 = arith.constant 0 : index
    %c0_386 = arith.constant 0 : index
    %c0_387 = arith.constant 0 : index
    %1042 = vector.load %arg16[%c0_385, %c0_386, %c0_387] : memref<2x1x64xf32, #tpu.memory_space<vmem>>, vector<1x1x64xf32>
    %1043 = vector.shape_cast %1042 : vector<1x1x64xf32> to vector<1x64xf32>
    %c0_388 = arith.constant 0 : index
    %c0_389 = arith.constant 0 : index
    %c0_390 = arith.constant 0 : index
    %1044 = vector.load %arg29[%c0_388, %c0_389, %c0_390] : memref<2x64x32xf32, #tpu.memory_space<vmem>>, vector<1x64x32xf32>
    %1045 = vector.shape_cast %1044 : vector<1x64x32xf32> to vector<64x32xf32>
    %c0_391 = arith.constant 0 : index
    %c0_392 = arith.constant 0 : index
    %c0_393 = arith.constant 0 : index
    %1046 = vector.load %arg17[%c0_391, %c0_392, %c0_393] : memref<2x1x32xf32, #tpu.memory_space<vmem>>, vector<1x1x32xf32>
    %1047 = vector.shape_cast %1046 : vector<1x1x32xf32> to vector<1x32xf32>
    %cst_394 = arith.constant dense<0.000000e+00> : vector<16x64xf32>
    %1048 = tpu.matmul %1039, %1041, %cst_394 {dimension_numbers = #tpu.dot_dimension_numbers<[1], [0], [0], [1], [0, 0, 1, 1], [], []>} : vector<16x32xf32>, vector<32x64xf32>, vector<16x64xf32> -> vector<16x64xf32>
    %1049 = vector.broadcast %1043 : vector<1x64xf32> to vector<16x64xf32>
    %1050 = arith.addf %1048, %1049 : vector<16x64xf32>
    %cst_395 = arith.constant 0.000000e+00 : f32
    %1051 = vector.broadcast %cst_395 : f32 to vector<16x64xf32>
    %1052 = arith.maximumf %1050, %1051 : vector<16x64xf32>
    %cst_396 = arith.constant dense<0.000000e+00> : vector<16x32xf32>
    %1053 = tpu.matmul %1052, %1045, %cst_396 {dimension_numbers = #tpu.dot_dimension_numbers<[1], [0], [0], [1], [0, 0, 1, 1], [], []>} : vector<16x64xf32>, vector<64x32xf32>, vector<16x32xf32> -> vector<16x32xf32>
    %1054 = vector.broadcast %1047 : vector<1x32xf32> to vector<16x32xf32>
    %1055 = arith.addf %1053, %1054 : vector<16x32xf32>
    %c0_397 = arith.constant 0 : index
    %c0_398 = arith.constant 0 : index
    %c0_399 = arith.constant 0 : index
    %1056 = vector.load %arg27[%c0_397, %c0_398, %c0_399] : memref<2x1x32xf32, #tpu.memory_space<vmem>>, vector<1x1x32xf32>
    %1057 = vector.shape_cast %1056 : vector<1x1x32xf32> to vector<1x32xf32>
    %c0_400 = arith.constant 0 : index
    %c0_401 = arith.constant 0 : index
    %c0_402 = arith.constant 0 : index
    %1058 = vector.load %arg26[%c0_400, %c0_401, %c0_402] : memref<2x1x32xf32, #tpu.memory_space<vmem>>, vector<1x1x32xf32>
    %1059 = vector.shape_cast %1058 : vector<1x1x32xf32> to vector<1x32xf32>
    %1060 = arith.addf %1039, %1055 : vector<16x32xf32>
    %cst_403 = arith.constant dense<0.000000e+00> : vector<16xf32>
    %1061 = vector.multi_reduction <add>, %1060, %cst_403 [1] : vector<16x32xf32> to vector<16xf32>
    %1062 = vector.shape_cast %1061 : vector<16xf32> to vector<16x1xf32>
    %cst_404 = arith.constant 3.200000e+01 : f32
    %1063 = vector.broadcast %cst_404 : f32 to vector<16x1xf32>
    %1064 = arith.divf %1062, %1063 : vector<16x1xf32>
    %1065 = vector.broadcast %1064 : vector<16x1xf32> to vector<16x32xf32>
    %1066 = arith.subf %1060, %1065 : vector<16x32xf32>
    %1067 = arith.mulf %1066, %1066 : vector<16x32xf32>
    %cst_405 = arith.constant dense<0.000000e+00> : vector<16xf32>
    %1068 = vector.multi_reduction <add>, %1067, %cst_405 [1] : vector<16x32xf32> to vector<16xf32>
    %1069 = vector.shape_cast %1068 : vector<16xf32> to vector<16x1xf32>
    %cst_406 = arith.constant 3.100000e+01 : f32
    %1070 = vector.broadcast %cst_406 : f32 to vector<16x1xf32>
    %1071 = arith.divf %1069, %1070 : vector<16x1xf32>
    %1072 = math.sqrt %1071 : vector<16x1xf32>
    %1073 = vector.broadcast %1057 : vector<1x32xf32> to vector<16x32xf32>
    %1074 = arith.mulf %1073, %1066 : vector<16x32xf32>
    %cst_407 = arith.constant 9.99999997E-7 : f32
    %1075 = vector.broadcast %cst_407 : f32 to vector<16x1xf32>
    %1076 = arith.addf %1072, %1075 : vector<16x1xf32>
    %1077 = vector.broadcast %1076 : vector<16x1xf32> to vector<16x32xf32>
    %1078 = arith.divf %1074, %1077 : vector<16x32xf32>
    %1079 = vector.broadcast %1059 : vector<1x32xf32> to vector<16x32xf32>
    %1080 = arith.addf %1078, %1079 : vector<16x32xf32>
    %c1_408 = arith.constant 1 : index
    %c0_409 = arith.constant 0 : index
    %c0_410 = arith.constant 0 : index
    %1081 = vector.load %arg32[%c1_408, %c0_409, %c0_410] : memref<2x32x96xf32, #tpu.memory_space<vmem>>, vector<1x32x96xf32>
    %1082 = vector.shape_cast %1081 : vector<1x32x96xf32> to vector<32x96xf32>
    %c1_411 = arith.constant 1 : index
    %c0_412 = arith.constant 0 : index
    %c0_413 = arith.constant 0 : index
    %1083 = vector.load %arg20[%c1_411, %c0_412, %c0_413] : memref<2x1x96xf32, #tpu.memory_space<vmem>>, vector<1x1x96xf32>
    %1084 = vector.shape_cast %1083 : vector<1x1x96xf32> to vector<1x96xf32>
    %c1_414 = arith.constant 1 : index
    %c0_415 = arith.constant 0 : index
    %c0_416 = arith.constant 0 : index
    %1085 = vector.load %arg30[%c1_414, %c0_415, %c0_416] : memref<2x32x32xf32, #tpu.memory_space<vmem>>, vector<1x32x32xf32>
    %1086 = vector.shape_cast %1085 : vector<1x32x32xf32> to vector<32x32xf32>
    %c1_417 = arith.constant 1 : index
    %c0_418 = arith.constant 0 : index
    %c0_419 = arith.constant 0 : index
    %1087 = vector.load %arg18[%c1_417, %c0_418, %c0_419] : memref<2x1x32xf32, #tpu.memory_space<vmem>>, vector<1x1x32xf32>
    %1088 = vector.shape_cast %1087 : vector<1x1x32xf32> to vector<1x32xf32>
    %cst_420 = arith.constant dense<0.000000e+00> : vector<16x96xf32>
    %1089 = tpu.matmul %1080, %1082, %cst_420 {dimension_numbers = #tpu.dot_dimension_numbers<[1], [0], [0], [1], [0, 0, 1, 1], [], []>} : vector<16x32xf32>, vector<32x96xf32>, vector<16x96xf32> -> vector<16x96xf32>
    %1090 = vector.broadcast %1084 : vector<1x96xf32> to vector<16x96xf32>
    %1091 = arith.addf %1089, %1090 : vector<16x96xf32>
    %1092 = vector.extract_strided_slice %1091 {offsets = [0, 0], sizes = [16, 32], strides = [1, 1]} : vector<16x96xf32> to vector<16x32xf32>
    %1093 = vector.extract_strided_slice %1091 {offsets = [0, 32], sizes = [16, 32], strides = [1, 1]} : vector<16x96xf32> to vector<16x32xf32>
    %1094 = vector.extract_strided_slice %1091 {offsets = [0, 64], sizes = [16, 32], strides = [1, 1]} : vector<16x96xf32> to vector<16x32xf32>
    %1095 = vector.extract_strided_slice %1092 {offsets = [0, 0], sizes = [8, 32], strides = [1, 1]} : vector<16x32xf32> to vector<8x32xf32>
    %1096 = vector.extract_strided_slice %1093 {offsets = [0, 0], sizes = [8, 32], strides = [1, 1]} : vector<16x32xf32> to vector<8x32xf32>
    %1097 = vector.extract_strided_slice %1094 {offsets = [0, 0], sizes = [8, 32], strides = [1, 1]} : vector<16x32xf32> to vector<8x32xf32>
    %1098 = vector.extract_strided_slice %3 {offsets = [0, 0], sizes = [1, 8], strides = [1, 1]} : vector<2x8xf32> to vector<1x8xf32>
    %1099 = vector.extract_strided_slice %1095 {offsets = [0, 0], sizes = [8, 8], strides = [1, 1]} : vector<8x32xf32> to vector<8x8xf32>
    %1100 = vector.extract_strided_slice %1096 {offsets = [0, 0], sizes = [8, 8], strides = [1, 1]} : vector<8x32xf32> to vector<8x8xf32>
    %cst_421 = arith.constant dense<0.000000e+00> : vector<8x8xf32>
    %1101 = tpu.matmul %1099, %1100, %cst_421 {dimension_numbers = #tpu.dot_dimension_numbers<[1], [1], [0], [0], [0, 0, 1, 0], [], []>} : vector<8x8xf32>, vector<8x8xf32>, vector<8x8xf32> -> vector<8x8xf32>
    %cst_422 = arith.constant 0.353553385 : f32
    %1102 = vector.broadcast %cst_422 : f32 to vector<8x8xf32>
    %1103 = arith.mulf %1101, %1102 : vector<8x8xf32>
    %cst_423 = arith.constant 5.000000e-01 : f32
    %1104 = vector.broadcast %cst_423 : f32 to vector<1x8xf32>
    %1105 = arith.cmpf ogt, %1098, %1104 : vector<1x8xf32>
    %cst_424 = arith.constant -1.000000e+09 : f32
    %1106 = vector.shape_cast %1105 : vector<1x8xi1> to vector<1x8xi1>
    %1107 = vector.broadcast %1106 : vector<1x8xi1> to vector<8x8xi1>
    %1108 = vector.broadcast %cst_424 : f32 to vector<8x8xf32>
    %1109 = arith.select %1107, %1108, %1103 : vector<8x8xi1>, vector<8x8xf32>
    %cst_425 = arith.constant dense<0xFF800000> : vector<8xf32>
    %1110 = vector.multi_reduction <maximumf>, %1109, %cst_425 [1] : vector<8x8xf32> to vector<8xf32>
    %1111 = vector.shape_cast %1110 : vector<8xf32> to vector<8x1xf32>
    %1112 = vector.broadcast %1111 : vector<8x1xf32> to vector<8x8xf32>
    %1113 = arith.subf %1109, %1112 : vector<8x8xf32>
    %1114 = math.exp %1113 : vector<8x8xf32>
    %cst_426 = arith.constant dense<0.000000e+00> : vector<8xf32>
    %1115 = vector.multi_reduction <add>, %1114, %cst_426 [1] : vector<8x8xf32> to vector<8xf32>
    %1116 = vector.shape_cast %1115 : vector<8xf32> to vector<8x1xf32>
    %1117 = tpu.reciprocal %1116 {approx = true} : vector<8x1xf32> -> vector<8x1xf32>
    %1118 = vector.broadcast %1117 : vector<8x1xf32> to vector<8x8xf32>
    %1119 = arith.mulf %1114, %1118 : vector<8x8xf32>
    %1120 = vector.extract_strided_slice %1097 {offsets = [0, 0], sizes = [8, 8], strides = [1, 1]} : vector<8x32xf32> to vector<8x8xf32>
    %cst_427 = arith.constant dense<0.000000e+00> : vector<8x8xf32>
    %1121 = tpu.matmul %1119, %1120, %cst_427 {dimension_numbers = #tpu.dot_dimension_numbers<[1], [0], [0], [1], [0, 0, 1, 1], [], []>} : vector<8x8xf32>, vector<8x8xf32>, vector<8x8xf32> -> vector<8x8xf32>
    %1122 = vector.extract_strided_slice %1095 {offsets = [0, 8], sizes = [8, 8], strides = [1, 1]} : vector<8x32xf32> to vector<8x8xf32>
    %1123 = vector.extract_strided_slice %1096 {offsets = [0, 8], sizes = [8, 8], strides = [1, 1]} : vector<8x32xf32> to vector<8x8xf32>
    %cst_428 = arith.constant dense<0.000000e+00> : vector<8x8xf32>
    %1124 = tpu.matmul %1122, %1123, %cst_428 {dimension_numbers = #tpu.dot_dimension_numbers<[1], [1], [0], [0], [0, 0, 1, 0], [], []>} : vector<8x8xf32>, vector<8x8xf32>, vector<8x8xf32> -> vector<8x8xf32>
    %cst_429 = arith.constant 0.353553385 : f32
    %1125 = vector.broadcast %cst_429 : f32 to vector<8x8xf32>
    %1126 = arith.mulf %1124, %1125 : vector<8x8xf32>
    %cst_430 = arith.constant 5.000000e-01 : f32
    %1127 = vector.broadcast %cst_430 : f32 to vector<1x8xf32>
    %1128 = arith.cmpf ogt, %1098, %1127 : vector<1x8xf32>
    %cst_431 = arith.constant -1.000000e+09 : f32
    %1129 = vector.shape_cast %1128 : vector<1x8xi1> to vector<1x8xi1>
    %1130 = vector.broadcast %1129 : vector<1x8xi1> to vector<8x8xi1>
    %1131 = vector.broadcast %cst_431 : f32 to vector<8x8xf32>
    %1132 = arith.select %1130, %1131, %1126 : vector<8x8xi1>, vector<8x8xf32>
    %cst_432 = arith.constant dense<0xFF800000> : vector<8xf32>
    %1133 = vector.multi_reduction <maximumf>, %1132, %cst_432 [1] : vector<8x8xf32> to vector<8xf32>
    %1134 = vector.shape_cast %1133 : vector<8xf32> to vector<8x1xf32>
    %1135 = vector.broadcast %1134 : vector<8x1xf32> to vector<8x8xf32>
    %1136 = arith.subf %1132, %1135 : vector<8x8xf32>
    %1137 = math.exp %1136 : vector<8x8xf32>
    %cst_433 = arith.constant dense<0.000000e+00> : vector<8xf32>
    %1138 = vector.multi_reduction <add>, %1137, %cst_433 [1] : vector<8x8xf32> to vector<8xf32>
    %1139 = vector.shape_cast %1138 : vector<8xf32> to vector<8x1xf32>
    %1140 = tpu.reciprocal %1139 {approx = true} : vector<8x1xf32> -> vector<8x1xf32>
    %1141 = vector.broadcast %1140 : vector<8x1xf32> to vector<8x8xf32>
    %1142 = arith.mulf %1137, %1141 : vector<8x8xf32>
    %1143 = vector.extract_strided_slice %1097 {offsets = [0, 8], sizes = [8, 8], strides = [1, 1]} : vector<8x32xf32> to vector<8x8xf32>
    %cst_434 = arith.constant dense<0.000000e+00> : vector<8x8xf32>
    %1144 = tpu.matmul %1142, %1143, %cst_434 {dimension_numbers = #tpu.dot_dimension_numbers<[1], [0], [0], [1], [0, 0, 1, 1], [], []>} : vector<8x8xf32>, vector<8x8xf32>, vector<8x8xf32> -> vector<8x8xf32>
    %1145 = vector.extract_strided_slice %1095 {offsets = [0, 16], sizes = [8, 8], strides = [1, 1]} : vector<8x32xf32> to vector<8x8xf32>
    %1146 = vector.extract_strided_slice %1096 {offsets = [0, 16], sizes = [8, 8], strides = [1, 1]} : vector<8x32xf32> to vector<8x8xf32>
    %cst_435 = arith.constant dense<0.000000e+00> : vector<8x8xf32>
    %1147 = tpu.matmul %1145, %1146, %cst_435 {dimension_numbers = #tpu.dot_dimension_numbers<[1], [1], [0], [0], [0, 0, 1, 0], [], []>} : vector<8x8xf32>, vector<8x8xf32>, vector<8x8xf32> -> vector<8x8xf32>
    %cst_436 = arith.constant 0.353553385 : f32
    %1148 = vector.broadcast %cst_436 : f32 to vector<8x8xf32>
    %1149 = arith.mulf %1147, %1148 : vector<8x8xf32>
    %cst_437 = arith.constant 5.000000e-01 : f32
    %1150 = vector.broadcast %cst_437 : f32 to vector<1x8xf32>
    %1151 = arith.cmpf ogt, %1098, %1150 : vector<1x8xf32>
    %cst_438 = arith.constant -1.000000e+09 : f32
    %1152 = vector.shape_cast %1151 : vector<1x8xi1> to vector<1x8xi1>
    %1153 = vector.broadcast %1152 : vector<1x8xi1> to vector<8x8xi1>
    %1154 = vector.broadcast %cst_438 : f32 to vector<8x8xf32>
    %1155 = arith.select %1153, %1154, %1149 : vector<8x8xi1>, vector<8x8xf32>
    %cst_439 = arith.constant dense<0xFF800000> : vector<8xf32>
    %1156 = vector.multi_reduction <maximumf>, %1155, %cst_439 [1] : vector<8x8xf32> to vector<8xf32>
    %1157 = vector.shape_cast %1156 : vector<8xf32> to vector<8x1xf32>
    %1158 = vector.broadcast %1157 : vector<8x1xf32> to vector<8x8xf32>
    %1159 = arith.subf %1155, %1158 : vector<8x8xf32>
    %1160 = math.exp %1159 : vector<8x8xf32>
    %cst_440 = arith.constant dense<0.000000e+00> : vector<8xf32>
    %1161 = vector.multi_reduction <add>, %1160, %cst_440 [1] : vector<8x8xf32> to vector<8xf32>
    %1162 = vector.shape_cast %1161 : vector<8xf32> to vector<8x1xf32>
    %1163 = tpu.reciprocal %1162 {approx = true} : vector<8x1xf32> -> vector<8x1xf32>
    %1164 = vector.broadcast %1163 : vector<8x1xf32> to vector<8x8xf32>
    %1165 = arith.mulf %1160, %1164 : vector<8x8xf32>
    %1166 = vector.extract_strided_slice %1097 {offsets = [0, 16], sizes = [8, 8], strides = [1, 1]} : vector<8x32xf32> to vector<8x8xf32>
    %cst_441 = arith.constant dense<0.000000e+00> : vector<8x8xf32>
    %1167 = tpu.matmul %1165, %1166, %cst_441 {dimension_numbers = #tpu.dot_dimension_numbers<[1], [0], [0], [1], [0, 0, 1, 1], [], []>} : vector<8x8xf32>, vector<8x8xf32>, vector<8x8xf32> -> vector<8x8xf32>
    %1168 = vector.extract_strided_slice %1095 {offsets = [0, 24], sizes = [8, 8], strides = [1, 1]} : vector<8x32xf32> to vector<8x8xf32>
    %1169 = vector.extract_strided_slice %1096 {offsets = [0, 24], sizes = [8, 8], strides = [1, 1]} : vector<8x32xf32> to vector<8x8xf32>
    %cst_442 = arith.constant dense<0.000000e+00> : vector<8x8xf32>
    %1170 = tpu.matmul %1168, %1169, %cst_442 {dimension_numbers = #tpu.dot_dimension_numbers<[1], [1], [0], [0], [0, 0, 1, 0], [], []>} : vector<8x8xf32>, vector<8x8xf32>, vector<8x8xf32> -> vector<8x8xf32>
    %cst_443 = arith.constant 0.353553385 : f32
    %1171 = vector.broadcast %cst_443 : f32 to vector<8x8xf32>
    %1172 = arith.mulf %1170, %1171 : vector<8x8xf32>
    %cst_444 = arith.constant 5.000000e-01 : f32
    %1173 = vector.broadcast %cst_444 : f32 to vector<1x8xf32>
    %1174 = arith.cmpf ogt, %1098, %1173 : vector<1x8xf32>
    %cst_445 = arith.constant -1.000000e+09 : f32
    %1175 = vector.shape_cast %1174 : vector<1x8xi1> to vector<1x8xi1>
    %1176 = vector.broadcast %1175 : vector<1x8xi1> to vector<8x8xi1>
    %1177 = vector.broadcast %cst_445 : f32 to vector<8x8xf32>
    %1178 = arith.select %1176, %1177, %1172 : vector<8x8xi1>, vector<8x8xf32>
    %cst_446 = arith.constant dense<0xFF800000> : vector<8xf32>
    %1179 = vector.multi_reduction <maximumf>, %1178, %cst_446 [1] : vector<8x8xf32> to vector<8xf32>
    %1180 = vector.shape_cast %1179 : vector<8xf32> to vector<8x1xf32>
    %1181 = vector.broadcast %1180 : vector<8x1xf32> to vector<8x8xf32>
    %1182 = arith.subf %1178, %1181 : vector<8x8xf32>
    %1183 = math.exp %1182 : vector<8x8xf32>
    %cst_447 = arith.constant dense<0.000000e+00> : vector<8xf32>
    %1184 = vector.multi_reduction <add>, %1183, %cst_447 [1] : vector<8x8xf32> to vector<8xf32>
    %1185 = vector.shape_cast %1184 : vector<8xf32> to vector<8x1xf32>
    %1186 = tpu.reciprocal %1185 {approx = true} : vector<8x1xf32> -> vector<8x1xf32>
    %1187 = vector.broadcast %1186 : vector<8x1xf32> to vector<8x8xf32>
    %1188 = arith.mulf %1183, %1187 : vector<8x8xf32>
    %1189 = vector.extract_strided_slice %1097 {offsets = [0, 24], sizes = [8, 8], strides = [1, 1]} : vector<8x32xf32> to vector<8x8xf32>
    %cst_448 = arith.constant dense<0.000000e+00> : vector<8x8xf32>
    %1190 = tpu.matmul %1188, %1189, %cst_448 {dimension_numbers = #tpu.dot_dimension_numbers<[1], [0], [0], [1], [0, 0, 1, 1], [], []>} : vector<8x8xf32>, vector<8x8xf32>, vector<8x8xf32> -> vector<8x8xf32>
    %1191 = tpu.concatenate %1121, %1144, %1167, %1190 in 1 : vector<8x8xf32>, vector<8x8xf32>, vector<8x8xf32>, vector<8x8xf32> -> vector<8x32xf32>
    %1192 = vector.extract_strided_slice %1092 {offsets = [8, 0], sizes = [8, 32], strides = [1, 1]} : vector<16x32xf32> to vector<8x32xf32>
    %1193 = vector.extract_strided_slice %1093 {offsets = [8, 0], sizes = [8, 32], strides = [1, 1]} : vector<16x32xf32> to vector<8x32xf32>
    %1194 = vector.extract_strided_slice %1094 {offsets = [8, 0], sizes = [8, 32], strides = [1, 1]} : vector<16x32xf32> to vector<8x32xf32>
    %1195 = vector.extract_strided_slice %3 {offsets = [1, 0], sizes = [1, 8], strides = [1, 1]} : vector<2x8xf32> to vector<1x8xf32>
    %1196 = vector.extract_strided_slice %1192 {offsets = [0, 0], sizes = [8, 8], strides = [1, 1]} : vector<8x32xf32> to vector<8x8xf32>
    %1197 = vector.extract_strided_slice %1193 {offsets = [0, 0], sizes = [8, 8], strides = [1, 1]} : vector<8x32xf32> to vector<8x8xf32>
    %cst_449 = arith.constant dense<0.000000e+00> : vector<8x8xf32>
    %1198 = tpu.matmul %1196, %1197, %cst_449 {dimension_numbers = #tpu.dot_dimension_numbers<[1], [1], [0], [0], [0, 0, 1, 0], [], []>} : vector<8x8xf32>, vector<8x8xf32>, vector<8x8xf32> -> vector<8x8xf32>
    %cst_450 = arith.constant 0.353553385 : f32
    %1199 = vector.broadcast %cst_450 : f32 to vector<8x8xf32>
    %1200 = arith.mulf %1198, %1199 : vector<8x8xf32>
    %cst_451 = arith.constant 5.000000e-01 : f32
    %1201 = vector.broadcast %cst_451 : f32 to vector<1x8xf32>
    %1202 = arith.cmpf ogt, %1195, %1201 : vector<1x8xf32>
    %cst_452 = arith.constant -1.000000e+09 : f32
    %1203 = vector.shape_cast %1202 : vector<1x8xi1> to vector<1x8xi1>
    %1204 = vector.broadcast %1203 : vector<1x8xi1> to vector<8x8xi1>
    %1205 = vector.broadcast %cst_452 : f32 to vector<8x8xf32>
    %1206 = arith.select %1204, %1205, %1200 : vector<8x8xi1>, vector<8x8xf32>
    %cst_453 = arith.constant dense<0xFF800000> : vector<8xf32>
    %1207 = vector.multi_reduction <maximumf>, %1206, %cst_453 [1] : vector<8x8xf32> to vector<8xf32>
    %1208 = vector.shape_cast %1207 : vector<8xf32> to vector<8x1xf32>
    %1209 = vector.broadcast %1208 : vector<8x1xf32> to vector<8x8xf32>
    %1210 = arith.subf %1206, %1209 : vector<8x8xf32>
    %1211 = math.exp %1210 : vector<8x8xf32>
    %cst_454 = arith.constant dense<0.000000e+00> : vector<8xf32>
    %1212 = vector.multi_reduction <add>, %1211, %cst_454 [1] : vector<8x8xf32> to vector<8xf32>
    %1213 = vector.shape_cast %1212 : vector<8xf32> to vector<8x1xf32>
    %1214 = tpu.reciprocal %1213 {approx = true} : vector<8x1xf32> -> vector<8x1xf32>
    %1215 = vector.broadcast %1214 : vector<8x1xf32> to vector<8x8xf32>
    %1216 = arith.mulf %1211, %1215 : vector<8x8xf32>
    %1217 = vector.extract_strided_slice %1194 {offsets = [0, 0], sizes = [8, 8], strides = [1, 1]} : vector<8x32xf32> to vector<8x8xf32>
    %cst_455 = arith.constant dense<0.000000e+00> : vector<8x8xf32>
    %1218 = tpu.matmul %1216, %1217, %cst_455 {dimension_numbers = #tpu.dot_dimension_numbers<[1], [0], [0], [1], [0, 0, 1, 1], [], []>} : vector<8x8xf32>, vector<8x8xf32>, vector<8x8xf32> -> vector<8x8xf32>
    %1219 = vector.extract_strided_slice %1192 {offsets = [0, 8], sizes = [8, 8], strides = [1, 1]} : vector<8x32xf32> to vector<8x8xf32>
    %1220 = vector.extract_strided_slice %1193 {offsets = [0, 8], sizes = [8, 8], strides = [1, 1]} : vector<8x32xf32> to vector<8x8xf32>
    %cst_456 = arith.constant dense<0.000000e+00> : vector<8x8xf32>
    %1221 = tpu.matmul %1219, %1220, %cst_456 {dimension_numbers = #tpu.dot_dimension_numbers<[1], [1], [0], [0], [0, 0, 1, 0], [], []>} : vector<8x8xf32>, vector<8x8xf32>, vector<8x8xf32> -> vector<8x8xf32>
    %cst_457 = arith.constant 0.353553385 : f32
    %1222 = vector.broadcast %cst_457 : f32 to vector<8x8xf32>
    %1223 = arith.mulf %1221, %1222 : vector<8x8xf32>
    %cst_458 = arith.constant 5.000000e-01 : f32
    %1224 = vector.broadcast %cst_458 : f32 to vector<1x8xf32>
    %1225 = arith.cmpf ogt, %1195, %1224 : vector<1x8xf32>
    %cst_459 = arith.constant -1.000000e+09 : f32
    %1226 = vector.shape_cast %1225 : vector<1x8xi1> to vector<1x8xi1>
    %1227 = vector.broadcast %1226 : vector<1x8xi1> to vector<8x8xi1>
    %1228 = vector.broadcast %cst_459 : f32 to vector<8x8xf32>
    %1229 = arith.select %1227, %1228, %1223 : vector<8x8xi1>, vector<8x8xf32>
    %cst_460 = arith.constant dense<0xFF800000> : vector<8xf32>
    %1230 = vector.multi_reduction <maximumf>, %1229, %cst_460 [1] : vector<8x8xf32> to vector<8xf32>
    %1231 = vector.shape_cast %1230 : vector<8xf32> to vector<8x1xf32>
    %1232 = vector.broadcast %1231 : vector<8x1xf32> to vector<8x8xf32>
    %1233 = arith.subf %1229, %1232 : vector<8x8xf32>
    %1234 = math.exp %1233 : vector<8x8xf32>
    %cst_461 = arith.constant dense<0.000000e+00> : vector<8xf32>
    %1235 = vector.multi_reduction <add>, %1234, %cst_461 [1] : vector<8x8xf32> to vector<8xf32>
    %1236 = vector.shape_cast %1235 : vector<8xf32> to vector<8x1xf32>
    %1237 = tpu.reciprocal %1236 {approx = true} : vector<8x1xf32> -> vector<8x1xf32>
    %1238 = vector.broadcast %1237 : vector<8x1xf32> to vector<8x8xf32>
    %1239 = arith.mulf %1234, %1238 : vector<8x8xf32>
    %1240 = vector.extract_strided_slice %1194 {offsets = [0, 8], sizes = [8, 8], strides = [1, 1]} : vector<8x32xf32> to vector<8x8xf32>
    %cst_462 = arith.constant dense<0.000000e+00> : vector<8x8xf32>
    %1241 = tpu.matmul %1239, %1240, %cst_462 {dimension_numbers = #tpu.dot_dimension_numbers<[1], [0], [0], [1], [0, 0, 1, 1], [], []>} : vector<8x8xf32>, vector<8x8xf32>, vector<8x8xf32> -> vector<8x8xf32>
    %1242 = vector.extract_strided_slice %1192 {offsets = [0, 16], sizes = [8, 8], strides = [1, 1]} : vector<8x32xf32> to vector<8x8xf32>
    %1243 = vector.extract_strided_slice %1193 {offsets = [0, 16], sizes = [8, 8], strides = [1, 1]} : vector<8x32xf32> to vector<8x8xf32>
    %cst_463 = arith.constant dense<0.000000e+00> : vector<8x8xf32>
    %1244 = tpu.matmul %1242, %1243, %cst_463 {dimension_numbers = #tpu.dot_dimension_numbers<[1], [1], [0], [0], [0, 0, 1, 0], [], []>} : vector<8x8xf32>, vector<8x8xf32>, vector<8x8xf32> -> vector<8x8xf32>
    %cst_464 = arith.constant 0.353553385 : f32
    %1245 = vector.broadcast %cst_464 : f32 to vector<8x8xf32>
    %1246 = arith.mulf %1244, %1245 : vector<8x8xf32>
    %cst_465 = arith.constant 5.000000e-01 : f32
    %1247 = vector.broadcast %cst_465 : f32 to vector<1x8xf32>
    %1248 = arith.cmpf ogt, %1195, %1247 : vector<1x8xf32>
    %cst_466 = arith.constant -1.000000e+09 : f32
    %1249 = vector.shape_cast %1248 : vector<1x8xi1> to vector<1x8xi1>
    %1250 = vector.broadcast %1249 : vector<1x8xi1> to vector<8x8xi1>
    %1251 = vector.broadcast %cst_466 : f32 to vector<8x8xf32>
    %1252 = arith.select %1250, %1251, %1246 : vector<8x8xi1>, vector<8x8xf32>
    %cst_467 = arith.constant dense<0xFF800000> : vector<8xf32>
    %1253 = vector.multi_reduction <maximumf>, %1252, %cst_467 [1] : vector<8x8xf32> to vector<8xf32>
    %1254 = vector.shape_cast %1253 : vector<8xf32> to vector<8x1xf32>
    %1255 = vector.broadcast %1254 : vector<8x1xf32> to vector<8x8xf32>
    %1256 = arith.subf %1252, %1255 : vector<8x8xf32>
    %1257 = math.exp %1256 : vector<8x8xf32>
    %cst_468 = arith.constant dense<0.000000e+00> : vector<8xf32>
    %1258 = vector.multi_reduction <add>, %1257, %cst_468 [1] : vector<8x8xf32> to vector<8xf32>
    %1259 = vector.shape_cast %1258 : vector<8xf32> to vector<8x1xf32>
    %1260 = tpu.reciprocal %1259 {approx = true} : vector<8x1xf32> -> vector<8x1xf32>
    %1261 = vector.broadcast %1260 : vector<8x1xf32> to vector<8x8xf32>
    %1262 = arith.mulf %1257, %1261 : vector<8x8xf32>
    %1263 = vector.extract_strided_slice %1194 {offsets = [0, 16], sizes = [8, 8], strides = [1, 1]} : vector<8x32xf32> to vector<8x8xf32>
    %cst_469 = arith.constant dense<0.000000e+00> : vector<8x8xf32>
    %1264 = tpu.matmul %1262, %1263, %cst_469 {dimension_numbers = #tpu.dot_dimension_numbers<[1], [0], [0], [1], [0, 0, 1, 1], [], []>} : vector<8x8xf32>, vector<8x8xf32>, vector<8x8xf32> -> vector<8x8xf32>
    %1265 = vector.extract_strided_slice %1192 {offsets = [0, 24], sizes = [8, 8], strides = [1, 1]} : vector<8x32xf32> to vector<8x8xf32>
    %1266 = vector.extract_strided_slice %1193 {offsets = [0, 24], sizes = [8, 8], strides = [1, 1]} : vector<8x32xf32> to vector<8x8xf32>
    %cst_470 = arith.constant dense<0.000000e+00> : vector<8x8xf32>
    %1267 = tpu.matmul %1265, %1266, %cst_470 {dimension_numbers = #tpu.dot_dimension_numbers<[1], [1], [0], [0], [0, 0, 1, 0], [], []>} : vector<8x8xf32>, vector<8x8xf32>, vector<8x8xf32> -> vector<8x8xf32>
    %cst_471 = arith.constant 0.353553385 : f32
    %1268 = vector.broadcast %cst_471 : f32 to vector<8x8xf32>
    %1269 = arith.mulf %1267, %1268 : vector<8x8xf32>
    %cst_472 = arith.constant 5.000000e-01 : f32
    %1270 = vector.broadcast %cst_472 : f32 to vector<1x8xf32>
    %1271 = arith.cmpf ogt, %1195, %1270 : vector<1x8xf32>
    %cst_473 = arith.constant -1.000000e+09 : f32
    %1272 = vector.shape_cast %1271 : vector<1x8xi1> to vector<1x8xi1>
    %1273 = vector.broadcast %1272 : vector<1x8xi1> to vector<8x8xi1>
    %1274 = vector.broadcast %cst_473 : f32 to vector<8x8xf32>
    %1275 = arith.select %1273, %1274, %1269 : vector<8x8xi1>, vector<8x8xf32>
    %cst_474 = arith.constant dense<0xFF800000> : vector<8xf32>
    %1276 = vector.multi_reduction <maximumf>, %1275, %cst_474 [1] : vector<8x8xf32> to vector<8xf32>
    %1277 = vector.shape_cast %1276 : vector<8xf32> to vector<8x1xf32>
    %1278 = vector.broadcast %1277 : vector<8x1xf32> to vector<8x8xf32>
    %1279 = arith.subf %1275, %1278 : vector<8x8xf32>
    %1280 = math.exp %1279 : vector<8x8xf32>
    %cst_475 = arith.constant dense<0.000000e+00> : vector<8xf32>
    %1281 = vector.multi_reduction <add>, %1280, %cst_475 [1] : vector<8x8xf32> to vector<8xf32>
    %1282 = vector.shape_cast %1281 : vector<8xf32> to vector<8x1xf32>
    %1283 = tpu.reciprocal %1282 {approx = true} : vector<8x1xf32> -> vector<8x1xf32>
    %1284 = vector.broadcast %1283 : vector<8x1xf32> to vector<8x8xf32>
    %1285 = arith.mulf %1280, %1284 : vector<8x8xf32>
    %1286 = vector.extract_strided_slice %1194 {offsets = [0, 24], sizes = [8, 8], strides = [1, 1]} : vector<8x32xf32> to vector<8x8xf32>
    %cst_476 = arith.constant dense<0.000000e+00> : vector<8x8xf32>
    %1287 = tpu.matmul %1285, %1286, %cst_476 {dimension_numbers = #tpu.dot_dimension_numbers<[1], [0], [0], [1], [0, 0, 1, 1], [], []>} : vector<8x8xf32>, vector<8x8xf32>, vector<8x8xf32> -> vector<8x8xf32>
    %1288 = tpu.concatenate %1218, %1241, %1264, %1287 in 1 : vector<8x8xf32>, vector<8x8xf32>, vector<8x8xf32>, vector<8x8xf32> -> vector<8x32xf32>
    %1289 = tpu.concatenate %1191, %1288 in 0 : vector<8x32xf32>, vector<8x32xf32> -> vector<16x32xf32>
    %cst_477 = arith.constant dense<0.000000e+00> : vector<16x32xf32>
    %1290 = tpu.matmul %1289, %1086, %cst_477 {dimension_numbers = #tpu.dot_dimension_numbers<[1], [0], [0], [1], [0, 0, 1, 1], [], []>} : vector<16x32xf32>, vector<32x32xf32>, vector<16x32xf32> -> vector<16x32xf32>
    %1291 = vector.broadcast %1088 : vector<1x32xf32> to vector<16x32xf32>
    %1292 = arith.addf %1290, %1291 : vector<16x32xf32>
    %c1_478 = arith.constant 1 : index
    %c0_479 = arith.constant 0 : index
    %c0_480 = arith.constant 0 : index
    %1293 = vector.load %arg23[%c1_478, %c0_479, %c0_480] : memref<2x1x32xf32, #tpu.memory_space<vmem>>, vector<1x1x32xf32>
    %1294 = vector.shape_cast %1293 : vector<1x1x32xf32> to vector<1x32xf32>
    %c1_481 = arith.constant 1 : index
    %c0_482 = arith.constant 0 : index
    %c0_483 = arith.constant 0 : index
    %1295 = vector.load %arg22[%c1_481, %c0_482, %c0_483] : memref<2x1x32xf32, #tpu.memory_space<vmem>>, vector<1x1x32xf32>
    %1296 = vector.shape_cast %1295 : vector<1x1x32xf32> to vector<1x32xf32>
    %1297 = arith.addf %1080, %1292 : vector<16x32xf32>
    %cst_484 = arith.constant dense<0.000000e+00> : vector<16xf32>
    %1298 = vector.multi_reduction <add>, %1297, %cst_484 [1] : vector<16x32xf32> to vector<16xf32>
    %1299 = vector.shape_cast %1298 : vector<16xf32> to vector<16x1xf32>
    %cst_485 = arith.constant 3.200000e+01 : f32
    %1300 = vector.broadcast %cst_485 : f32 to vector<16x1xf32>
    %1301 = arith.divf %1299, %1300 : vector<16x1xf32>
    %1302 = vector.broadcast %1301 : vector<16x1xf32> to vector<16x32xf32>
    %1303 = arith.subf %1297, %1302 : vector<16x32xf32>
    %1304 = arith.mulf %1303, %1303 : vector<16x32xf32>
    %cst_486 = arith.constant dense<0.000000e+00> : vector<16xf32>
    %1305 = vector.multi_reduction <add>, %1304, %cst_486 [1] : vector<16x32xf32> to vector<16xf32>
    %1306 = vector.shape_cast %1305 : vector<16xf32> to vector<16x1xf32>
    %cst_487 = arith.constant 3.100000e+01 : f32
    %1307 = vector.broadcast %cst_487 : f32 to vector<16x1xf32>
    %1308 = arith.divf %1306, %1307 : vector<16x1xf32>
    %1309 = math.sqrt %1308 : vector<16x1xf32>
    %1310 = vector.broadcast %1294 : vector<1x32xf32> to vector<16x32xf32>
    %1311 = arith.mulf %1310, %1303 : vector<16x32xf32>
    %cst_488 = arith.constant 9.99999997E-7 : f32
    %1312 = vector.broadcast %cst_488 : f32 to vector<16x1xf32>
    %1313 = arith.addf %1309, %1312 : vector<16x1xf32>
    %1314 = vector.broadcast %1313 : vector<16x1xf32> to vector<16x32xf32>
    %1315 = arith.divf %1311, %1314 : vector<16x32xf32>
    %1316 = vector.broadcast %1296 : vector<1x32xf32> to vector<16x32xf32>
    %1317 = arith.addf %1315, %1316 : vector<16x32xf32>
    %c1_489 = arith.constant 1 : index
    %c0_490 = arith.constant 0 : index
    %c0_491 = arith.constant 0 : index
    %1318 = vector.load %arg33[%c1_489, %c0_490, %c0_491] : memref<2x32x96xf32, #tpu.memory_space<vmem>>, vector<1x32x96xf32>
    %1319 = vector.shape_cast %1318 : vector<1x32x96xf32> to vector<32x96xf32>
    %c1_492 = arith.constant 1 : index
    %c0_493 = arith.constant 0 : index
    %c0_494 = arith.constant 0 : index
    %1320 = vector.load %arg21[%c1_492, %c0_493, %c0_494] : memref<2x1x96xf32, #tpu.memory_space<vmem>>, vector<1x1x96xf32>
    %1321 = vector.shape_cast %1320 : vector<1x1x96xf32> to vector<1x96xf32>
    %c1_495 = arith.constant 1 : index
    %c0_496 = arith.constant 0 : index
    %c0_497 = arith.constant 0 : index
    %1322 = vector.load %arg31[%c1_495, %c0_496, %c0_497] : memref<2x32x32xf32, #tpu.memory_space<vmem>>, vector<1x32x32xf32>
    %1323 = vector.shape_cast %1322 : vector<1x32x32xf32> to vector<32x32xf32>
    %c1_498 = arith.constant 1 : index
    %c0_499 = arith.constant 0 : index
    %c0_500 = arith.constant 0 : index
    %1324 = vector.load %arg19[%c1_498, %c0_499, %c0_500] : memref<2x1x32xf32, #tpu.memory_space<vmem>>, vector<1x1x32xf32>
    %1325 = vector.shape_cast %1324 : vector<1x1x32xf32> to vector<1x32xf32>
    %1326 = vector.extract_strided_slice %1319 {offsets = [0, 0], sizes = [32, 32], strides = [1, 1]} : vector<32x96xf32> to vector<32x32xf32>
    %cst_501 = arith.constant dense<0.000000e+00> : vector<16x32xf32>
    %1327 = tpu.matmul %1317, %1326, %cst_501 {dimension_numbers = #tpu.dot_dimension_numbers<[1], [0], [0], [1], [0, 0, 1, 1], [], []>} : vector<16x32xf32>, vector<32x32xf32>, vector<16x32xf32> -> vector<16x32xf32>
    %1328 = vector.extract_strided_slice %1321 {offsets = [0, 0], sizes = [1, 32], strides = [1, 1]} : vector<1x96xf32> to vector<1x32xf32>
    %1329 = vector.broadcast %1328 : vector<1x32xf32> to vector<16x32xf32>
    %1330 = arith.addf %1327, %1329 : vector<16x32xf32>
    %1331 = vector.extract_strided_slice %1319 {offsets = [0, 32], sizes = [32, 64], strides = [1, 1]} : vector<32x96xf32> to vector<32x64xf32>
    %cst_502 = arith.constant dense<0.000000e+00> : vector<16x64xf32>
    %1332 = tpu.matmul %559, %1331, %cst_502 {dimension_numbers = #tpu.dot_dimension_numbers<[1], [0], [0], [1], [0, 0, 1, 1], [], []>} : vector<16x32xf32>, vector<32x64xf32>, vector<16x64xf32> -> vector<16x64xf32>
    %1333 = vector.extract_strided_slice %1321 {offsets = [0, 32], sizes = [1, 64], strides = [1, 1]} : vector<1x96xf32> to vector<1x64xf32>
    %1334 = vector.broadcast %1333 : vector<1x64xf32> to vector<16x64xf32>
    %1335 = arith.addf %1332, %1334 : vector<16x64xf32>
    %1336 = vector.extract_strided_slice %1335 {offsets = [0, 0], sizes = [16, 32], strides = [1, 1]} : vector<16x64xf32> to vector<16x32xf32>
    %1337 = vector.extract_strided_slice %1335 {offsets = [0, 32], sizes = [16, 32], strides = [1, 1]} : vector<16x64xf32> to vector<16x32xf32>
    %1338 = vector.extract_strided_slice %1330 {offsets = [0, 0], sizes = [8, 32], strides = [1, 1]} : vector<16x32xf32> to vector<8x32xf32>
    %1339 = vector.extract_strided_slice %1336 {offsets = [0, 0], sizes = [8, 32], strides = [1, 1]} : vector<16x32xf32> to vector<8x32xf32>
    %1340 = vector.extract_strided_slice %1337 {offsets = [0, 0], sizes = [8, 32], strides = [1, 1]} : vector<16x32xf32> to vector<8x32xf32>
    %1341 = vector.extract_strided_slice %2 {offsets = [0, 0], sizes = [1, 8], strides = [1, 1]} : vector<2x8xf32> to vector<1x8xf32>
    %1342 = vector.extract_strided_slice %1338 {offsets = [0, 0], sizes = [8, 8], strides = [1, 1]} : vector<8x32xf32> to vector<8x8xf32>
    %1343 = vector.extract_strided_slice %1339 {offsets = [0, 0], sizes = [8, 8], strides = [1, 1]} : vector<8x32xf32> to vector<8x8xf32>
    %cst_503 = arith.constant dense<0.000000e+00> : vector<8x8xf32>
    %1344 = tpu.matmul %1342, %1343, %cst_503 {dimension_numbers = #tpu.dot_dimension_numbers<[1], [1], [0], [0], [0, 0, 1, 0], [], []>} : vector<8x8xf32>, vector<8x8xf32>, vector<8x8xf32> -> vector<8x8xf32>
    %cst_504 = arith.constant 0.353553385 : f32
    %1345 = vector.broadcast %cst_504 : f32 to vector<8x8xf32>
    %1346 = arith.mulf %1344, %1345 : vector<8x8xf32>
    %cst_505 = arith.constant 5.000000e-01 : f32
    %1347 = vector.broadcast %cst_505 : f32 to vector<1x8xf32>
    %1348 = arith.cmpf ogt, %1341, %1347 : vector<1x8xf32>
    %cst_506 = arith.constant -1.000000e+09 : f32
    %1349 = vector.shape_cast %1348 : vector<1x8xi1> to vector<1x8xi1>
    %1350 = vector.broadcast %1349 : vector<1x8xi1> to vector<8x8xi1>
    %1351 = vector.broadcast %cst_506 : f32 to vector<8x8xf32>
    %1352 = arith.select %1350, %1351, %1346 : vector<8x8xi1>, vector<8x8xf32>
    %cst_507 = arith.constant dense<0xFF800000> : vector<8xf32>
    %1353 = vector.multi_reduction <maximumf>, %1352, %cst_507 [1] : vector<8x8xf32> to vector<8xf32>
    %1354 = vector.shape_cast %1353 : vector<8xf32> to vector<8x1xf32>
    %1355 = vector.broadcast %1354 : vector<8x1xf32> to vector<8x8xf32>
    %1356 = arith.subf %1352, %1355 : vector<8x8xf32>
    %1357 = math.exp %1356 : vector<8x8xf32>
    %cst_508 = arith.constant dense<0.000000e+00> : vector<8xf32>
    %1358 = vector.multi_reduction <add>, %1357, %cst_508 [1] : vector<8x8xf32> to vector<8xf32>
    %1359 = vector.shape_cast %1358 : vector<8xf32> to vector<8x1xf32>
    %1360 = tpu.reciprocal %1359 {approx = true} : vector<8x1xf32> -> vector<8x1xf32>
    %1361 = vector.broadcast %1360 : vector<8x1xf32> to vector<8x8xf32>
    %1362 = arith.mulf %1357, %1361 : vector<8x8xf32>
    %1363 = vector.extract_strided_slice %1340 {offsets = [0, 0], sizes = [8, 8], strides = [1, 1]} : vector<8x32xf32> to vector<8x8xf32>
    %cst_509 = arith.constant dense<0.000000e+00> : vector<8x8xf32>
    %1364 = tpu.matmul %1362, %1363, %cst_509 {dimension_numbers = #tpu.dot_dimension_numbers<[1], [0], [0], [1], [0, 0, 1, 1], [], []>} : vector<8x8xf32>, vector<8x8xf32>, vector<8x8xf32> -> vector<8x8xf32>
    %1365 = vector.extract_strided_slice %1338 {offsets = [0, 8], sizes = [8, 8], strides = [1, 1]} : vector<8x32xf32> to vector<8x8xf32>
    %1366 = vector.extract_strided_slice %1339 {offsets = [0, 8], sizes = [8, 8], strides = [1, 1]} : vector<8x32xf32> to vector<8x8xf32>
    %cst_510 = arith.constant dense<0.000000e+00> : vector<8x8xf32>
    %1367 = tpu.matmul %1365, %1366, %cst_510 {dimension_numbers = #tpu.dot_dimension_numbers<[1], [1], [0], [0], [0, 0, 1, 0], [], []>} : vector<8x8xf32>, vector<8x8xf32>, vector<8x8xf32> -> vector<8x8xf32>
    %cst_511 = arith.constant 0.353553385 : f32
    %1368 = vector.broadcast %cst_511 : f32 to vector<8x8xf32>
    %1369 = arith.mulf %1367, %1368 : vector<8x8xf32>
    %cst_512 = arith.constant 5.000000e-01 : f32
    %1370 = vector.broadcast %cst_512 : f32 to vector<1x8xf32>
    %1371 = arith.cmpf ogt, %1341, %1370 : vector<1x8xf32>
    %cst_513 = arith.constant -1.000000e+09 : f32
    %1372 = vector.shape_cast %1371 : vector<1x8xi1> to vector<1x8xi1>
    %1373 = vector.broadcast %1372 : vector<1x8xi1> to vector<8x8xi1>
    %1374 = vector.broadcast %cst_513 : f32 to vector<8x8xf32>
    %1375 = arith.select %1373, %1374, %1369 : vector<8x8xi1>, vector<8x8xf32>
    %cst_514 = arith.constant dense<0xFF800000> : vector<8xf32>
    %1376 = vector.multi_reduction <maximumf>, %1375, %cst_514 [1] : vector<8x8xf32> to vector<8xf32>
    %1377 = vector.shape_cast %1376 : vector<8xf32> to vector<8x1xf32>
    %1378 = vector.broadcast %1377 : vector<8x1xf32> to vector<8x8xf32>
    %1379 = arith.subf %1375, %1378 : vector<8x8xf32>
    %1380 = math.exp %1379 : vector<8x8xf32>
    %cst_515 = arith.constant dense<0.000000e+00> : vector<8xf32>
    %1381 = vector.multi_reduction <add>, %1380, %cst_515 [1] : vector<8x8xf32> to vector<8xf32>
    %1382 = vector.shape_cast %1381 : vector<8xf32> to vector<8x1xf32>
    %1383 = tpu.reciprocal %1382 {approx = true} : vector<8x1xf32> -> vector<8x1xf32>
    %1384 = vector.broadcast %1383 : vector<8x1xf32> to vector<8x8xf32>
    %1385 = arith.mulf %1380, %1384 : vector<8x8xf32>
    %1386 = vector.extract_strided_slice %1340 {offsets = [0, 8], sizes = [8, 8], strides = [1, 1]} : vector<8x32xf32> to vector<8x8xf32>
    %cst_516 = arith.constant dense<0.000000e+00> : vector<8x8xf32>
    %1387 = tpu.matmul %1385, %1386, %cst_516 {dimension_numbers = #tpu.dot_dimension_numbers<[1], [0], [0], [1], [0, 0, 1, 1], [], []>} : vector<8x8xf32>, vector<8x8xf32>, vector<8x8xf32> -> vector<8x8xf32>
    %1388 = vector.extract_strided_slice %1338 {offsets = [0, 16], sizes = [8, 8], strides = [1, 1]} : vector<8x32xf32> to vector<8x8xf32>
    %1389 = vector.extract_strided_slice %1339 {offsets = [0, 16], sizes = [8, 8], strides = [1, 1]} : vector<8x32xf32> to vector<8x8xf32>
    %cst_517 = arith.constant dense<0.000000e+00> : vector<8x8xf32>
    %1390 = tpu.matmul %1388, %1389, %cst_517 {dimension_numbers = #tpu.dot_dimension_numbers<[1], [1], [0], [0], [0, 0, 1, 0], [], []>} : vector<8x8xf32>, vector<8x8xf32>, vector<8x8xf32> -> vector<8x8xf32>
    %cst_518 = arith.constant 0.353553385 : f32
    %1391 = vector.broadcast %cst_518 : f32 to vector<8x8xf32>
    %1392 = arith.mulf %1390, %1391 : vector<8x8xf32>
    %cst_519 = arith.constant 5.000000e-01 : f32
    %1393 = vector.broadcast %cst_519 : f32 to vector<1x8xf32>
    %1394 = arith.cmpf ogt, %1341, %1393 : vector<1x8xf32>
    %cst_520 = arith.constant -1.000000e+09 : f32
    %1395 = vector.shape_cast %1394 : vector<1x8xi1> to vector<1x8xi1>
    %1396 = vector.broadcast %1395 : vector<1x8xi1> to vector<8x8xi1>
    %1397 = vector.broadcast %cst_520 : f32 to vector<8x8xf32>
    %1398 = arith.select %1396, %1397, %1392 : vector<8x8xi1>, vector<8x8xf32>
    %cst_521 = arith.constant dense<0xFF800000> : vector<8xf32>
    %1399 = vector.multi_reduction <maximumf>, %1398, %cst_521 [1] : vector<8x8xf32> to vector<8xf32>
    %1400 = vector.shape_cast %1399 : vector<8xf32> to vector<8x1xf32>
    %1401 = vector.broadcast %1400 : vector<8x1xf32> to vector<8x8xf32>
    %1402 = arith.subf %1398, %1401 : vector<8x8xf32>
    %1403 = math.exp %1402 : vector<8x8xf32>
    %cst_522 = arith.constant dense<0.000000e+00> : vector<8xf32>
    %1404 = vector.multi_reduction <add>, %1403, %cst_522 [1] : vector<8x8xf32> to vector<8xf32>
    %1405 = vector.shape_cast %1404 : vector<8xf32> to vector<8x1xf32>
    %1406 = tpu.reciprocal %1405 {approx = true} : vector<8x1xf32> -> vector<8x1xf32>
    %1407 = vector.broadcast %1406 : vector<8x1xf32> to vector<8x8xf32>
    %1408 = arith.mulf %1403, %1407 : vector<8x8xf32>
    %1409 = vector.extract_strided_slice %1340 {offsets = [0, 16], sizes = [8, 8], strides = [1, 1]} : vector<8x32xf32> to vector<8x8xf32>
    %cst_523 = arith.constant dense<0.000000e+00> : vector<8x8xf32>
    %1410 = tpu.matmul %1408, %1409, %cst_523 {dimension_numbers = #tpu.dot_dimension_numbers<[1], [0], [0], [1], [0, 0, 1, 1], [], []>} : vector<8x8xf32>, vector<8x8xf32>, vector<8x8xf32> -> vector<8x8xf32>
    %1411 = vector.extract_strided_slice %1338 {offsets = [0, 24], sizes = [8, 8], strides = [1, 1]} : vector<8x32xf32> to vector<8x8xf32>
    %1412 = vector.extract_strided_slice %1339 {offsets = [0, 24], sizes = [8, 8], strides = [1, 1]} : vector<8x32xf32> to vector<8x8xf32>
    %cst_524 = arith.constant dense<0.000000e+00> : vector<8x8xf32>
    %1413 = tpu.matmul %1411, %1412, %cst_524 {dimension_numbers = #tpu.dot_dimension_numbers<[1], [1], [0], [0], [0, 0, 1, 0], [], []>} : vector<8x8xf32>, vector<8x8xf32>, vector<8x8xf32> -> vector<8x8xf32>
    %cst_525 = arith.constant 0.353553385 : f32
    %1414 = vector.broadcast %cst_525 : f32 to vector<8x8xf32>
    %1415 = arith.mulf %1413, %1414 : vector<8x8xf32>
    %cst_526 = arith.constant 5.000000e-01 : f32
    %1416 = vector.broadcast %cst_526 : f32 to vector<1x8xf32>
    %1417 = arith.cmpf ogt, %1341, %1416 : vector<1x8xf32>
    %cst_527 = arith.constant -1.000000e+09 : f32
    %1418 = vector.shape_cast %1417 : vector<1x8xi1> to vector<1x8xi1>
    %1419 = vector.broadcast %1418 : vector<1x8xi1> to vector<8x8xi1>
    %1420 = vector.broadcast %cst_527 : f32 to vector<8x8xf32>
    %1421 = arith.select %1419, %1420, %1415 : vector<8x8xi1>, vector<8x8xf32>
    %cst_528 = arith.constant dense<0xFF800000> : vector<8xf32>
    %1422 = vector.multi_reduction <maximumf>, %1421, %cst_528 [1] : vector<8x8xf32> to vector<8xf32>
    %1423 = vector.shape_cast %1422 : vector<8xf32> to vector<8x1xf32>
    %1424 = vector.broadcast %1423 : vector<8x1xf32> to vector<8x8xf32>
    %1425 = arith.subf %1421, %1424 : vector<8x8xf32>
    %1426 = math.exp %1425 : vector<8x8xf32>
    %cst_529 = arith.constant dense<0.000000e+00> : vector<8xf32>
    %1427 = vector.multi_reduction <add>, %1426, %cst_529 [1] : vector<8x8xf32> to vector<8xf32>
    %1428 = vector.shape_cast %1427 : vector<8xf32> to vector<8x1xf32>
    %1429 = tpu.reciprocal %1428 {approx = true} : vector<8x1xf32> -> vector<8x1xf32>
    %1430 = vector.broadcast %1429 : vector<8x1xf32> to vector<8x8xf32>
    %1431 = arith.mulf %1426, %1430 : vector<8x8xf32>
    %1432 = vector.extract_strided_slice %1340 {offsets = [0, 24], sizes = [8, 8], strides = [1, 1]} : vector<8x32xf32> to vector<8x8xf32>
    %cst_530 = arith.constant dense<0.000000e+00> : vector<8x8xf32>
    %1433 = tpu.matmul %1431, %1432, %cst_530 {dimension_numbers = #tpu.dot_dimension_numbers<[1], [0], [0], [1], [0, 0, 1, 1], [], []>} : vector<8x8xf32>, vector<8x8xf32>, vector<8x8xf32> -> vector<8x8xf32>
    %1434 = tpu.concatenate %1364, %1387, %1410, %1433 in 1 : vector<8x8xf32>, vector<8x8xf32>, vector<8x8xf32>, vector<8x8xf32> -> vector<8x32xf32>
    %1435 = vector.extract_strided_slice %1330 {offsets = [8, 0], sizes = [8, 32], strides = [1, 1]} : vector<16x32xf32> to vector<8x32xf32>
    %1436 = vector.extract_strided_slice %1336 {offsets = [8, 0], sizes = [8, 32], strides = [1, 1]} : vector<16x32xf32> to vector<8x32xf32>
    %1437 = vector.extract_strided_slice %1337 {offsets = [8, 0], sizes = [8, 32], strides = [1, 1]} : vector<16x32xf32> to vector<8x32xf32>
    %1438 = vector.extract_strided_slice %2 {offsets = [1, 0], sizes = [1, 8], strides = [1, 1]} : vector<2x8xf32> to vector<1x8xf32>
    %1439 = vector.extract_strided_slice %1435 {offsets = [0, 0], sizes = [8, 8], strides = [1, 1]} : vector<8x32xf32> to vector<8x8xf32>
    %1440 = vector.extract_strided_slice %1436 {offsets = [0, 0], sizes = [8, 8], strides = [1, 1]} : vector<8x32xf32> to vector<8x8xf32>
    %cst_531 = arith.constant dense<0.000000e+00> : vector<8x8xf32>
    %1441 = tpu.matmul %1439, %1440, %cst_531 {dimension_numbers = #tpu.dot_dimension_numbers<[1], [1], [0], [0], [0, 0, 1, 0], [], []>} : vector<8x8xf32>, vector<8x8xf32>, vector<8x8xf32> -> vector<8x8xf32>
    %cst_532 = arith.constant 0.353553385 : f32
    %1442 = vector.broadcast %cst_532 : f32 to vector<8x8xf32>
    %1443 = arith.mulf %1441, %1442 : vector<8x8xf32>
    %cst_533 = arith.constant 5.000000e-01 : f32
    %1444 = vector.broadcast %cst_533 : f32 to vector<1x8xf32>
    %1445 = arith.cmpf ogt, %1438, %1444 : vector<1x8xf32>
    %cst_534 = arith.constant -1.000000e+09 : f32
    %1446 = vector.shape_cast %1445 : vector<1x8xi1> to vector<1x8xi1>
    %1447 = vector.broadcast %1446 : vector<1x8xi1> to vector<8x8xi1>
    %1448 = vector.broadcast %cst_534 : f32 to vector<8x8xf32>
    %1449 = arith.select %1447, %1448, %1443 : vector<8x8xi1>, vector<8x8xf32>
    %cst_535 = arith.constant dense<0xFF800000> : vector<8xf32>
    %1450 = vector.multi_reduction <maximumf>, %1449, %cst_535 [1] : vector<8x8xf32> to vector<8xf32>
    %1451 = vector.shape_cast %1450 : vector<8xf32> to vector<8x1xf32>
    %1452 = vector.broadcast %1451 : vector<8x1xf32> to vector<8x8xf32>
    %1453 = arith.subf %1449, %1452 : vector<8x8xf32>
    %1454 = math.exp %1453 : vector<8x8xf32>
    %cst_536 = arith.constant dense<0.000000e+00> : vector<8xf32>
    %1455 = vector.multi_reduction <add>, %1454, %cst_536 [1] : vector<8x8xf32> to vector<8xf32>
    %1456 = vector.shape_cast %1455 : vector<8xf32> to vector<8x1xf32>
    %1457 = tpu.reciprocal %1456 {approx = true} : vector<8x1xf32> -> vector<8x1xf32>
    %1458 = vector.broadcast %1457 : vector<8x1xf32> to vector<8x8xf32>
    %1459 = arith.mulf %1454, %1458 : vector<8x8xf32>
    %1460 = vector.extract_strided_slice %1437 {offsets = [0, 0], sizes = [8, 8], strides = [1, 1]} : vector<8x32xf32> to vector<8x8xf32>
    %cst_537 = arith.constant dense<0.000000e+00> : vector<8x8xf32>
    %1461 = tpu.matmul %1459, %1460, %cst_537 {dimension_numbers = #tpu.dot_dimension_numbers<[1], [0], [0], [1], [0, 0, 1, 1], [], []>} : vector<8x8xf32>, vector<8x8xf32>, vector<8x8xf32> -> vector<8x8xf32>
    %1462 = vector.extract_strided_slice %1435 {offsets = [0, 8], sizes = [8, 8], strides = [1, 1]} : vector<8x32xf32> to vector<8x8xf32>
    %1463 = vector.extract_strided_slice %1436 {offsets = [0, 8], sizes = [8, 8], strides = [1, 1]} : vector<8x32xf32> to vector<8x8xf32>
    %cst_538 = arith.constant dense<0.000000e+00> : vector<8x8xf32>
    %1464 = tpu.matmul %1462, %1463, %cst_538 {dimension_numbers = #tpu.dot_dimension_numbers<[1], [1], [0], [0], [0, 0, 1, 0], [], []>} : vector<8x8xf32>, vector<8x8xf32>, vector<8x8xf32> -> vector<8x8xf32>
    %cst_539 = arith.constant 0.353553385 : f32
    %1465 = vector.broadcast %cst_539 : f32 to vector<8x8xf32>
    %1466 = arith.mulf %1464, %1465 : vector<8x8xf32>
    %cst_540 = arith.constant 5.000000e-01 : f32
    %1467 = vector.broadcast %cst_540 : f32 to vector<1x8xf32>
    %1468 = arith.cmpf ogt, %1438, %1467 : vector<1x8xf32>
    %cst_541 = arith.constant -1.000000e+09 : f32
    %1469 = vector.shape_cast %1468 : vector<1x8xi1> to vector<1x8xi1>
    %1470 = vector.broadcast %1469 : vector<1x8xi1> to vector<8x8xi1>
    %1471 = vector.broadcast %cst_541 : f32 to vector<8x8xf32>
    %1472 = arith.select %1470, %1471, %1466 : vector<8x8xi1>, vector<8x8xf32>
    %cst_542 = arith.constant dense<0xFF800000> : vector<8xf32>
    %1473 = vector.multi_reduction <maximumf>, %1472, %cst_542 [1] : vector<8x8xf32> to vector<8xf32>
    %1474 = vector.shape_cast %1473 : vector<8xf32> to vector<8x1xf32>
    %1475 = vector.broadcast %1474 : vector<8x1xf32> to vector<8x8xf32>
    %1476 = arith.subf %1472, %1475 : vector<8x8xf32>
    %1477 = math.exp %1476 : vector<8x8xf32>
    %cst_543 = arith.constant dense<0.000000e+00> : vector<8xf32>
    %1478 = vector.multi_reduction <add>, %1477, %cst_543 [1] : vector<8x8xf32> to vector<8xf32>
    %1479 = vector.shape_cast %1478 : vector<8xf32> to vector<8x1xf32>
    %1480 = tpu.reciprocal %1479 {approx = true} : vector<8x1xf32> -> vector<8x1xf32>
    %1481 = vector.broadcast %1480 : vector<8x1xf32> to vector<8x8xf32>
    %1482 = arith.mulf %1477, %1481 : vector<8x8xf32>
    %1483 = vector.extract_strided_slice %1437 {offsets = [0, 8], sizes = [8, 8], strides = [1, 1]} : vector<8x32xf32> to vector<8x8xf32>
    %cst_544 = arith.constant dense<0.000000e+00> : vector<8x8xf32>
    %1484 = tpu.matmul %1482, %1483, %cst_544 {dimension_numbers = #tpu.dot_dimension_numbers<[1], [0], [0], [1], [0, 0, 1, 1], [], []>} : vector<8x8xf32>, vector<8x8xf32>, vector<8x8xf32> -> vector<8x8xf32>
    %1485 = vector.extract_strided_slice %1435 {offsets = [0, 16], sizes = [8, 8], strides = [1, 1]} : vector<8x32xf32> to vector<8x8xf32>
    %1486 = vector.extract_strided_slice %1436 {offsets = [0, 16], sizes = [8, 8], strides = [1, 1]} : vector<8x32xf32> to vector<8x8xf32>
    %cst_545 = arith.constant dense<0.000000e+00> : vector<8x8xf32>
    %1487 = tpu.matmul %1485, %1486, %cst_545 {dimension_numbers = #tpu.dot_dimension_numbers<[1], [1], [0], [0], [0, 0, 1, 0], [], []>} : vector<8x8xf32>, vector<8x8xf32>, vector<8x8xf32> -> vector<8x8xf32>
    %cst_546 = arith.constant 0.353553385 : f32
    %1488 = vector.broadcast %cst_546 : f32 to vector<8x8xf32>
    %1489 = arith.mulf %1487, %1488 : vector<8x8xf32>
    %cst_547 = arith.constant 5.000000e-01 : f32
    %1490 = vector.broadcast %cst_547 : f32 to vector<1x8xf32>
    %1491 = arith.cmpf ogt, %1438, %1490 : vector<1x8xf32>
    %cst_548 = arith.constant -1.000000e+09 : f32
    %1492 = vector.shape_cast %1491 : vector<1x8xi1> to vector<1x8xi1>
    %1493 = vector.broadcast %1492 : vector<1x8xi1> to vector<8x8xi1>
    %1494 = vector.broadcast %cst_548 : f32 to vector<8x8xf32>
    %1495 = arith.select %1493, %1494, %1489 : vector<8x8xi1>, vector<8x8xf32>
    %cst_549 = arith.constant dense<0xFF800000> : vector<8xf32>
    %1496 = vector.multi_reduction <maximumf>, %1495, %cst_549 [1] : vector<8x8xf32> to vector<8xf32>
    %1497 = vector.shape_cast %1496 : vector<8xf32> to vector<8x1xf32>
    %1498 = vector.broadcast %1497 : vector<8x1xf32> to vector<8x8xf32>
    %1499 = arith.subf %1495, %1498 : vector<8x8xf32>
    %1500 = math.exp %1499 : vector<8x8xf32>
    %cst_550 = arith.constant dense<0.000000e+00> : vector<8xf32>
    %1501 = vector.multi_reduction <add>, %1500, %cst_550 [1] : vector<8x8xf32> to vector<8xf32>
    %1502 = vector.shape_cast %1501 : vector<8xf32> to vector<8x1xf32>
    %1503 = tpu.reciprocal %1502 {approx = true} : vector<8x1xf32> -> vector<8x1xf32>
    %1504 = vector.broadcast %1503 : vector<8x1xf32> to vector<8x8xf32>
    %1505 = arith.mulf %1500, %1504 : vector<8x8xf32>
    %1506 = vector.extract_strided_slice %1437 {offsets = [0, 16], sizes = [8, 8], strides = [1, 1]} : vector<8x32xf32> to vector<8x8xf32>
    %cst_551 = arith.constant dense<0.000000e+00> : vector<8x8xf32>
    %1507 = tpu.matmul %1505, %1506, %cst_551 {dimension_numbers = #tpu.dot_dimension_numbers<[1], [0], [0], [1], [0, 0, 1, 1], [], []>} : vector<8x8xf32>, vector<8x8xf32>, vector<8x8xf32> -> vector<8x8xf32>
    %1508 = vector.extract_strided_slice %1435 {offsets = [0, 24], sizes = [8, 8], strides = [1, 1]} : vector<8x32xf32> to vector<8x8xf32>
    %1509 = vector.extract_strided_slice %1436 {offsets = [0, 24], sizes = [8, 8], strides = [1, 1]} : vector<8x32xf32> to vector<8x8xf32>
    %cst_552 = arith.constant dense<0.000000e+00> : vector<8x8xf32>
    %1510 = tpu.matmul %1508, %1509, %cst_552 {dimension_numbers = #tpu.dot_dimension_numbers<[1], [1], [0], [0], [0, 0, 1, 0], [], []>} : vector<8x8xf32>, vector<8x8xf32>, vector<8x8xf32> -> vector<8x8xf32>
    %cst_553 = arith.constant 0.353553385 : f32
    %1511 = vector.broadcast %cst_553 : f32 to vector<8x8xf32>
    %1512 = arith.mulf %1510, %1511 : vector<8x8xf32>
    %cst_554 = arith.constant 5.000000e-01 : f32
    %1513 = vector.broadcast %cst_554 : f32 to vector<1x8xf32>
    %1514 = arith.cmpf ogt, %1438, %1513 : vector<1x8xf32>
    %cst_555 = arith.constant -1.000000e+09 : f32
    %1515 = vector.shape_cast %1514 : vector<1x8xi1> to vector<1x8xi1>
    %1516 = vector.broadcast %1515 : vector<1x8xi1> to vector<8x8xi1>
    %1517 = vector.broadcast %cst_555 : f32 to vector<8x8xf32>
    %1518 = arith.select %1516, %1517, %1512 : vector<8x8xi1>, vector<8x8xf32>
    %cst_556 = arith.constant dense<0xFF800000> : vector<8xf32>
    %1519 = vector.multi_reduction <maximumf>, %1518, %cst_556 [1] : vector<8x8xf32> to vector<8xf32>
    %1520 = vector.shape_cast %1519 : vector<8xf32> to vector<8x1xf32>
    %1521 = vector.broadcast %1520 : vector<8x1xf32> to vector<8x8xf32>
    %1522 = arith.subf %1518, %1521 : vector<8x8xf32>
    %1523 = math.exp %1522 : vector<8x8xf32>
    %cst_557 = arith.constant dense<0.000000e+00> : vector<8xf32>
    %1524 = vector.multi_reduction <add>, %1523, %cst_557 [1] : vector<8x8xf32> to vector<8xf32>
    %1525 = vector.shape_cast %1524 : vector<8xf32> to vector<8x1xf32>
    %1526 = tpu.reciprocal %1525 {approx = true} : vector<8x1xf32> -> vector<8x1xf32>
    %1527 = vector.broadcast %1526 : vector<8x1xf32> to vector<8x8xf32>
    %1528 = arith.mulf %1523, %1527 : vector<8x8xf32>
    %1529 = vector.extract_strided_slice %1437 {offsets = [0, 24], sizes = [8, 8], strides = [1, 1]} : vector<8x32xf32> to vector<8x8xf32>
    %cst_558 = arith.constant dense<0.000000e+00> : vector<8x8xf32>
    %1530 = tpu.matmul %1528, %1529, %cst_558 {dimension_numbers = #tpu.dot_dimension_numbers<[1], [0], [0], [1], [0, 0, 1, 1], [], []>} : vector<8x8xf32>, vector<8x8xf32>, vector<8x8xf32> -> vector<8x8xf32>
    %1531 = tpu.concatenate %1461, %1484, %1507, %1530 in 1 : vector<8x8xf32>, vector<8x8xf32>, vector<8x8xf32>, vector<8x8xf32> -> vector<8x32xf32>
    %1532 = tpu.concatenate %1434, %1531 in 0 : vector<8x32xf32>, vector<8x32xf32> -> vector<16x32xf32>
    %cst_559 = arith.constant dense<0.000000e+00> : vector<16x32xf32>
    %1533 = tpu.matmul %1532, %1323, %cst_559 {dimension_numbers = #tpu.dot_dimension_numbers<[1], [0], [0], [1], [0, 0, 1, 1], [], []>} : vector<16x32xf32>, vector<32x32xf32>, vector<16x32xf32> -> vector<16x32xf32>
    %1534 = vector.broadcast %1325 : vector<1x32xf32> to vector<16x32xf32>
    %1535 = arith.addf %1533, %1534 : vector<16x32xf32>
    %c1_560 = arith.constant 1 : index
    %c0_561 = arith.constant 0 : index
    %c0_562 = arith.constant 0 : index
    %1536 = vector.load %arg25[%c1_560, %c0_561, %c0_562] : memref<2x1x32xf32, #tpu.memory_space<vmem>>, vector<1x1x32xf32>
    %1537 = vector.shape_cast %1536 : vector<1x1x32xf32> to vector<1x32xf32>
    %c1_563 = arith.constant 1 : index
    %c0_564 = arith.constant 0 : index
    %c0_565 = arith.constant 0 : index
    %1538 = vector.load %arg24[%c1_563, %c0_564, %c0_565] : memref<2x1x32xf32, #tpu.memory_space<vmem>>, vector<1x1x32xf32>
    %1539 = vector.shape_cast %1538 : vector<1x1x32xf32> to vector<1x32xf32>
    %1540 = arith.addf %1317, %1535 : vector<16x32xf32>
    %cst_566 = arith.constant dense<0.000000e+00> : vector<16xf32>
    %1541 = vector.multi_reduction <add>, %1540, %cst_566 [1] : vector<16x32xf32> to vector<16xf32>
    %1542 = vector.shape_cast %1541 : vector<16xf32> to vector<16x1xf32>
    %cst_567 = arith.constant 3.200000e+01 : f32
    %1543 = vector.broadcast %cst_567 : f32 to vector<16x1xf32>
    %1544 = arith.divf %1542, %1543 : vector<16x1xf32>
    %1545 = vector.broadcast %1544 : vector<16x1xf32> to vector<16x32xf32>
    %1546 = arith.subf %1540, %1545 : vector<16x32xf32>
    %1547 = arith.mulf %1546, %1546 : vector<16x32xf32>
    %cst_568 = arith.constant dense<0.000000e+00> : vector<16xf32>
    %1548 = vector.multi_reduction <add>, %1547, %cst_568 [1] : vector<16x32xf32> to vector<16xf32>
    %1549 = vector.shape_cast %1548 : vector<16xf32> to vector<16x1xf32>
    %cst_569 = arith.constant 3.100000e+01 : f32
    %1550 = vector.broadcast %cst_569 : f32 to vector<16x1xf32>
    %1551 = arith.divf %1549, %1550 : vector<16x1xf32>
    %1552 = math.sqrt %1551 : vector<16x1xf32>
    %1553 = vector.broadcast %1537 : vector<1x32xf32> to vector<16x32xf32>
    %1554 = arith.mulf %1553, %1546 : vector<16x32xf32>
    %cst_570 = arith.constant 9.99999997E-7 : f32
    %1555 = vector.broadcast %cst_570 : f32 to vector<16x1xf32>
    %1556 = arith.addf %1552, %1555 : vector<16x1xf32>
    %1557 = vector.broadcast %1556 : vector<16x1xf32> to vector<16x32xf32>
    %1558 = arith.divf %1554, %1557 : vector<16x32xf32>
    %1559 = vector.broadcast %1539 : vector<1x32xf32> to vector<16x32xf32>
    %1560 = arith.addf %1558, %1559 : vector<16x32xf32>
    %c1_571 = arith.constant 1 : index
    %c0_572 = arith.constant 0 : index
    %c0_573 = arith.constant 0 : index
    %1561 = vector.load %arg28[%c1_571, %c0_572, %c0_573] : memref<2x32x64xf32, #tpu.memory_space<vmem>>, vector<1x32x64xf32>
    %1562 = vector.shape_cast %1561 : vector<1x32x64xf32> to vector<32x64xf32>
    %c1_574 = arith.constant 1 : index
    %c0_575 = arith.constant 0 : index
    %c0_576 = arith.constant 0 : index
    %1563 = vector.load %arg16[%c1_574, %c0_575, %c0_576] : memref<2x1x64xf32, #tpu.memory_space<vmem>>, vector<1x1x64xf32>
    %1564 = vector.shape_cast %1563 : vector<1x1x64xf32> to vector<1x64xf32>
    %c1_577 = arith.constant 1 : index
    %c0_578 = arith.constant 0 : index
    %c0_579 = arith.constant 0 : index
    %1565 = vector.load %arg29[%c1_577, %c0_578, %c0_579] : memref<2x64x32xf32, #tpu.memory_space<vmem>>, vector<1x64x32xf32>
    %1566 = vector.shape_cast %1565 : vector<1x64x32xf32> to vector<64x32xf32>
    %c1_580 = arith.constant 1 : index
    %c0_581 = arith.constant 0 : index
    %c0_582 = arith.constant 0 : index
    %1567 = vector.load %arg17[%c1_580, %c0_581, %c0_582] : memref<2x1x32xf32, #tpu.memory_space<vmem>>, vector<1x1x32xf32>
    %1568 = vector.shape_cast %1567 : vector<1x1x32xf32> to vector<1x32xf32>
    %cst_583 = arith.constant dense<0.000000e+00> : vector<16x64xf32>
    %1569 = tpu.matmul %1560, %1562, %cst_583 {dimension_numbers = #tpu.dot_dimension_numbers<[1], [0], [0], [1], [0, 0, 1, 1], [], []>} : vector<16x32xf32>, vector<32x64xf32>, vector<16x64xf32> -> vector<16x64xf32>
    %1570 = vector.broadcast %1564 : vector<1x64xf32> to vector<16x64xf32>
    %1571 = arith.addf %1569, %1570 : vector<16x64xf32>
    %cst_584 = arith.constant 0.000000e+00 : f32
    %1572 = vector.broadcast %cst_584 : f32 to vector<16x64xf32>
    %1573 = arith.maximumf %1571, %1572 : vector<16x64xf32>
    %cst_585 = arith.constant dense<0.000000e+00> : vector<16x32xf32>
    %1574 = tpu.matmul %1573, %1566, %cst_585 {dimension_numbers = #tpu.dot_dimension_numbers<[1], [0], [0], [1], [0, 0, 1, 1], [], []>} : vector<16x64xf32>, vector<64x32xf32>, vector<16x32xf32> -> vector<16x32xf32>
    %1575 = vector.broadcast %1568 : vector<1x32xf32> to vector<16x32xf32>
    %1576 = arith.addf %1574, %1575 : vector<16x32xf32>
    %c1_586 = arith.constant 1 : index
    %c0_587 = arith.constant 0 : index
    %c0_588 = arith.constant 0 : index
    %1577 = vector.load %arg27[%c1_586, %c0_587, %c0_588] : memref<2x1x32xf32, #tpu.memory_space<vmem>>, vector<1x1x32xf32>
    %1578 = vector.shape_cast %1577 : vector<1x1x32xf32> to vector<1x32xf32>
    %c1_589 = arith.constant 1 : index
    %c0_590 = arith.constant 0 : index
    %c0_591 = arith.constant 0 : index
    %1579 = vector.load %arg26[%c1_589, %c0_590, %c0_591] : memref<2x1x32xf32, #tpu.memory_space<vmem>>, vector<1x1x32xf32>
    %1580 = vector.shape_cast %1579 : vector<1x1x32xf32> to vector<1x32xf32>
    %1581 = arith.addf %1560, %1576 : vector<16x32xf32>
    %cst_592 = arith.constant dense<0.000000e+00> : vector<16xf32>
    %1582 = vector.multi_reduction <add>, %1581, %cst_592 [1] : vector<16x32xf32> to vector<16xf32>
    %1583 = vector.shape_cast %1582 : vector<16xf32> to vector<16x1xf32>
    %cst_593 = arith.constant 3.200000e+01 : f32
    %1584 = vector.broadcast %cst_593 : f32 to vector<16x1xf32>
    %1585 = arith.divf %1583, %1584 : vector<16x1xf32>
    %1586 = vector.broadcast %1585 : vector<16x1xf32> to vector<16x32xf32>
    %1587 = arith.subf %1581, %1586 : vector<16x32xf32>
    %1588 = arith.mulf %1587, %1587 : vector<16x32xf32>
    %cst_594 = arith.constant dense<0.000000e+00> : vector<16xf32>
    %1589 = vector.multi_reduction <add>, %1588, %cst_594 [1] : vector<16x32xf32> to vector<16xf32>
    %1590 = vector.shape_cast %1589 : vector<16xf32> to vector<16x1xf32>
    %cst_595 = arith.constant 3.100000e+01 : f32
    %1591 = vector.broadcast %cst_595 : f32 to vector<16x1xf32>
    %1592 = arith.divf %1590, %1591 : vector<16x1xf32>
    %1593 = math.sqrt %1592 : vector<16x1xf32>
    %1594 = vector.broadcast %1578 : vector<1x32xf32> to vector<16x32xf32>
    %1595 = arith.mulf %1594, %1587 : vector<16x32xf32>
    %cst_596 = arith.constant 9.99999997E-7 : f32
    %1596 = vector.broadcast %cst_596 : f32 to vector<16x1xf32>
    %1597 = arith.addf %1593, %1596 : vector<16x1xf32>
    %1598 = vector.broadcast %1597 : vector<16x1xf32> to vector<16x32xf32>
    %1599 = arith.divf %1595, %1598 : vector<16x32xf32>
    %1600 = vector.broadcast %1580 : vector<1x32xf32> to vector<16x32xf32>
    %1601 = arith.addf %1599, %1600 : vector<16x32xf32>
    %c0_597 = arith.constant 0 : index
    %c0_598 = arith.constant 0 : index
    %1602 = vector.load %arg34[%c0_597, %c0_598] : memref<16x32xf32, #tpu.memory_space<vmem>>, vector<16x32xf32>
    tpu.vector_store %arg34[%c0_597, %c0_598], %559 {strides = array<i32>} : memref<16x32xf32, #tpu.memory_space<vmem>>, vector<16x32xf32>,
    %c0_599 = arith.constant 0 : index
    %c0_600 = arith.constant 0 : index
    %1603 = vector.load %arg35[%c0_599, %c0_600] : memref<16x32xf32, #tpu.memory_space<vmem>>, vector<16x32xf32>
    tpu.vector_store %arg35[%c0_599, %c0_600], %1601 {strides = array<i32>} : memref<16x32xf32, #tpu.memory_space<vmem>>, vector<16x32xf32>,
    return
  }
}

</mosaic_0001>

<bundles_post_ra>
// kernel: mca_ed.1
= control target key start
LH: loop header
LB: loop body
LE: loop exit
PB: predicated region body
PF: predicated region fallthrough
CT: control target
= control target key end

     0   :  { %s13852_s6 = smov 1   ;;  %s13853_s10 = smov 2   ;;  %s15698_s0 = inlined_call_operand.smem [shape: u32[36], index: -1, kind: input, shape index: {}] }
   0x1   :  { %s13936_s5 = sld [smem:[%s15698_s0]]   ;;  %s13854_s14 = smov 3  }
   0x2   :  { %s13941_s9 = sld [smem:[%s15698_s0 + %s13852_s6]]   ;;  %s13855_s18 = smov 4  }
   0x3   :  { %s13946_s13 = sld [smem:[%s15698_s0 + %s13853_s10]]   ;;  %s13856_s22 = smov 5  }
   0x4   :  { %s13951_s17 = sld [smem:[%s15698_s0 + %s13854_s14]]   ;;  %s13857_s26 = smov 6  }
   0x5   :  { %s13956_s21 = sld [smem:[%s15698_s0 + %s13855_s18]]   ;;  %s13858_s30 = smov 7  }
   0x6   :  { %s13961_s25 = sld [smem:[%s15698_s0 + %s13856_s22]]   ;;  %s13859_s4 = smov 8  }
   0x7   :  { %15715 = sst [smem:[#allocation50_spill]] %s13936_s5  ;;  %s13860_s10 = smov 9  }
   0x8   :  { %15716 = sst [smem:[#allocation51_spill]] %s13941_s9  ;;  %s13861_s15 = smov 10  }
   0x9   :  { %15717 = sst [smem:[#allocation52_spill]] %s13946_s13  ;;  %s13862_s20 = smov 11  }
   0xa   :  { %15718 = sst [smem:[#allocation53_spill]] %s13951_s17  ;;  %s13864_s1 = smov 13  }
   0xb   :  { %15719 = sst [smem:[#allocation54_spill]] %s13956_s21  ;;  %s13865_s7 = smov 14  }
   0xc   :  { %s13966_s29 = sld [smem:[%s15698_s0 + %s13857_s26]]   ;;  %s13863_s26 = smov 12  }
   0xd   :  { %s13971_s3 = sld [smem:[%s15698_s0 + %s13858_s30]]   ;;  %s13867_s22 = smov 16  }
   0xe   :  { %s13976_s8 = sld [smem:[%s15698_s0 + %s13859_s4]]   ;;  %s13868_s28 = smov 17  }
   0xf   :  { %s13981_s14 = sld [smem:[%s15698_s0 + %s13860_s10]]  }
  0x10   :  { %s13986_s19 = sld [smem:[%s15698_s0 + %s13861_s15]]   ;;  %s13866_s15 = smov 15  }
  0x11   :  { %s13991_s24 = sld [smem:[%s15698_s0 + %s13862_s20]]  }
  0x12   :  { %s13996_s30 = sld [smem:[%s15698_s0 + %s13863_s26]]  }
  0x13   :  { %s14001_s6 = sld [smem:[%s15698_s0 + %s13864_s1]]  }
  0x14   :  { %s14006_s12 = sld [smem:[%s15698_s0 + %s13865_s7]]   ;;  %s13869_s7 = smov 18  }
  0x15   :  { %s14011_s20 = sld [smem:[%s15698_s0 + %s13866_s15]]   ;;  %s13870_s15 = smov 19  }
  0x16   :  { %15720 = sst [smem:[#allocation55_spill]] %s13986_s19 }
  0x17   :  { %15721 = sst [smem:[#allocation56_spill]] %s13991_s24 }
  0x18   :  { %15722 = sst [smem:[#allocation57_spill]] %s13996_s30 }
  0x19   :  { %15723 = sst [smem:[#allocation58_spill]] %s14001_s6 }
  0x1a   :  { %15724 = sst [smem:[#allocation59_spill]] %s14006_s12 }
  0x1b   :  { %15725 = sst [smem:[#allocation60_spill]] %s14011_s20 }
  0x1c   :  { %s14016_s27 = sld [smem:[%s15698_s0 + %s13867_s22]]   ;;  %s13871_s22 = smov 20  }
  0x1d   :  { %s14021_s4 = sld [smem:[%s15698_s0 + %s13868_s28]]   ;;  %s13872_s28 = smov 21  }
  0x1e   :  { %s14026_s17 = sld [smem:[%s15698_s0 + %s13869_s7]]   ;;  %s13873_s7 = smov 22  }
  0x1f   :  { %s14031_s9 = sld [smem:[%s15698_s0 + %s13870_s15]]   ;;  %s13874_s15 = smov 23  }
  0x20   :  { %s14036_s19 = sld [smem:[%s15698_s0 + %s13871_s22]]   ;;  %s13875_s22 = smov 24  }
  0x21   :  { %s14041_s24 = sld [smem:[%s15698_s0 + %s13872_s28]]   ;;  %s13876_s28 = smov 25  }
  0x22   :  { %s14046_s21 = sld [smem:[%s15698_s0 + %s13873_s7]]   ;;  %s13877_s7 = smov 26  }
  0x23   :  { %s14051_s6 = sld [smem:[%s15698_s0 + %s13874_s15]]   ;;  %s13878_s15 = smov 27  }
  0x24   :  { %s14056_s30 = sld [smem:[%s15698_s0 + %s13875_s22]]   ;;  %s13879_s22 = smov 28  }
  0x25   :  { %s14061_s12 = sld [smem:[%s15698_s0 + %s13876_s28]]   ;;  %s13880_s28 = smov 29  }
  0x26   :  { %s14066_s13 = sld [smem:[%s15698_s0 + %s13877_s7]]   ;;  %s13881_s7 = smov 30  }
  0x27   :  { %15726 = sst [smem:[#allocation61_spill]] %s14041_s24 }
  0x28   :  { %s14071_s5 = sld [smem:[%s15698_s0 + %s13878_s15]]   ;;  %s13882_s15 = smov 31  }
  0x29   :  { %15727 = sst [smem:[#allocation62_spill]] %s14051_s6 }
  0x2a   :  { %s14076_s20 = sld [smem:[%s15698_s0 + %s13879_s22]]   ;;  %s13883_s22 = smov 32  }
  0x2b   :  { %15728 = sst [smem:[#allocation63_spill]] %s14061_s12 }
  0x2c   :  { %s14081_s12 = sld [smem:[%s15698_s0 + %s13880_s28]]   ;;  %s13884_s28 = smov 33  }
  0x2d   :  { %s14086_s6 = sld [smem:[%s15698_s0 + %s13881_s7]]   ;;  %s13885_s7 = smov 34  }
  0x2e   :  { %15729 = sst [smem:[#allocation64_spill]] %s14071_s5 }
  0x2f   :  { %s14091_s5 = sld [smem:[%s15698_s0 + %s13882_s15]]   ;;  %s13886_s15 = smov 35  }
  0x30   :  { %15730 = sst [smem:[#allocation65_spill]] %s14076_s20 }
  0x31   :  { %s14096_s20 = sld [smem:[%s15698_s0 + %s13883_s22]]  }
  0x32   :  { %15731 = sst [smem:[#allocation66_spill]] %s14081_s12 }
  0x33   :  { %15732 = sst [smem:[#allocation67_spill]] %s14086_s6 }
  0x34   :  { %s14101_s12 = sld [smem:[%s15698_s0 + %s13884_s28]]  }
  0x35   :  { %s14106_s6 = sld [smem:[%s15698_s0 + %s13885_s7]]  }
  0x36   :  { %s14111_s24 = sld [smem:[%s15698_s0 + %s13886_s15]]  }
  0x37   :  { %77 = vsyncpa [#allocation3], 0 }
  0x38   :  { %78 = vsyncpa [#allocation6], 0 }
  0x39   :  { %79 = vsyncpa [#allocation9], 0 }
  0x3a   :  { %80 = vsyncpa [#allocation12], 0 }
  0x3b   :  { %81 = vsyncpa [#allocation15], 0 }
  0x3c   :  { %82 = vsyncpa [#allocation18], 0 }
  0x3d   :  { %83 = vsyncpa [#allocation21], 0 }
  0x3e   :  { %84 = vsyncpa [#allocation24], 0 }
  0x3f   :  { %85 = vsyncpa [#allocation27], 0 }
  0x40   :  { %86 = vsyncpa [#allocation30], 0 }
  0x41   :  { %87 = vsyncpa [#allocation33], 0 }
  0x42   :  { %88 = vsyncpa [#allocation4], 0 }
  0x43   :  { %89 = vsyncpa [#allocation36], 0  ;;  %s13887_s22 = smov [#allocation5]   ;;  %s13888_s0 = smov [#allocation8]  }
  0x44   :  { %s117_s23 = sshll.u32 %s13887_s22, 4  ;;  %s141_s26 = sshll.u32 %s13888_s0, 4  ;;  %s118_s23 = int_to_ptr.vmem [resolvable:$true] %s117_s23  ;;  %s14113_s26 = int_to_ptr.vmem [resolvable:$true] %s141_s26 }
  0x45   :  { %s13342_s28 = scalar_lea.hbm %s13966_s29, 32 }
  0x46   :  { %p13343_p0 = scmp.ne.s32.totalorder %s13966_s29, %s13342_s28  ;;  %p13346_p1 = scmp.lt.u32.totalorder %s13342_s28, %s13966_s29 }
  0x48   :  { %p13348_p2 = pnand %p13346_p1, %p13343_p0 }
  0x4a   :  { %13351 = shalt.err (!%p13348_p2)
}
  0x4b   :  { %s13352_s1 = scalar_lea.vmem %s118_s23, 32  ;;  %p13357_p4 = scmp.lt.s32.totalorder %s118_s23, %s118_s23 }
  0x4c   :  { %p13353_p3 = scmp.ne.s32.totalorder %s118_s23, %s13352_s1  ;;  %p13358_p5 = scmp.lt.s32.totalorder %s13352_s1, %s13352_s1 }
  0x4e   :  { %p13359_p6 = por %p13358_p5, %p13357_p4 }
  0x50   :  { %p13360_p7 = pnand %p13359_p6, %p13353_p3 }
  0x52   :  { %13363 = shalt.err (!%p13360_p7)
}
  0x53   :  { %s13889_s2 = smov 16   ;;  %s13890_s7 = smov 1  }
  0x54   :  { %123 = dma.hbm_to_vmem [thread:$0]  %s13966_s29, 32, %s118_s23, [#allocation6], %s13889_s2, %s13889_s2, %s13890_s7  }
  0x55   :  { %s13364_s10 = scalar_lea.hbm %s13976_s8, 32 }
  0x56   :  { %p13365_p8 = scmp.ne.s32.totalorder %s13976_s8, %s13364_s10  ;;  %p13368_p9 = scmp.lt.u32.totalorder %s13364_s10, %s13976_s8 }
  0x58   :  { %p13370_p10 = pnand %p13368_p9, %p13365_p8 }
  0x5a   :  { %13373 = shalt.err (!%p13370_p10)
}
  0x5b   :  { %s13374_s11 = scalar_lea.vmem %s14113_s26, 32  ;;  %p13379_p12 = scmp.lt.s32.totalorder %s14113_s26, %s14113_s26 }
  0x5c   :  { %p13375_p11 = scmp.ne.s32.totalorder %s14113_s26, %s13374_s11  ;;  %p13380_p13 = scmp.lt.s32.totalorder %s13374_s11, %s13374_s11 }
  0x5e   :  { %p13381_p0 = por %p13380_p13, %p13379_p12 }
  0x60   :  { %p13382_p1 = pnand %p13381_p0, %p13375_p11 }
  0x62   :  { %13385 = shalt.err (!%p13382_p1)
}
  0x63   :  { %147 = dma.hbm_to_vmem [thread:$0]  %s13976_s8, 32, %s14113_s26, [#allocation9], %s13889_s2, %s13889_s2, %s13890_s7  }
  0x64   :  { %s13891_s29 = smov [#allocation11]   ;;  %s13892_s16 = smov [#allocation14]  }
  0x65   :  { %s177_s15 = sshll.u32 %s13891_s29, 4  ;;  %s201_s18 = sshll.u32 %s13892_s16, 4  ;;  %s178_s15 = int_to_ptr.vmem [resolvable:$true] %s177_s15  ;;  %s14134_s18 = int_to_ptr.vmem [resolvable:$true] %s201_s18 }
  0x66   :  { %s13386_s22 = scalar_lea.hbm %s14016_s27, 32 }
  0x67   :  { %p13387_p2 = scmp.ne.s32.totalorder %s14016_s27, %s13386_s22  ;;  %p13390_p3 = scmp.lt.u32.totalorder %s13386_s22, %s14016_s27 }
  0x69   :  { %p13392_p4 = pnand %p13390_p3, %p13387_p2 }
  0x6b   :  { %13395 = shalt.err (!%p13392_p4)
}
  0x6c   :  { %s13396_s23 = scalar_lea.vmem %s178_s15, 32  ;;  %p13401_p6 = scmp.lt.s32.totalorder %s178_s15, %s178_s15 }
  0x6d   :  { %p13397_p5 = scmp.ne.s32.totalorder %s178_s15, %s13396_s23  ;;  %p13402_p7 = scmp.lt.s32.totalorder %s13396_s23, %s13396_s23 }
  0x6f   :  { %p13403_p8 = por %p13402_p7, %p13401_p6 }
  0x71   :  { %p13404_p9 = pnand %p13403_p8, %p13397_p5 }
  0x73   :  { %13407 = shalt.err (!%p13404_p9)
}
  0x74   :  { %183 = dma.hbm_to_vmem [thread:$0]  %s14016_s27, 32, %s178_s15, [#allocation12], %s13889_s2, %s13889_s2, %s13890_s7  }
  0x75   :  { %s13408_s8 = scalar_lea.hbm %s14026_s17, 32 }
  0x76   :  { %p13409_p10 = scmp.ne.s32.totalorder %s14026_s17, %s13408_s8  ;;  %p13412_p11 = scmp.lt.u32.totalorder %s13408_s8, %s14026_s17 }
  0x78   :  { %p13414_p12 = pnand %p13412_p11, %p13409_p10 }
  0x7a   :  { %13417 = shalt.err (!%p13414_p12)
}
  0x7b   :  { %s13418_s0 = scalar_lea.vmem %s14134_s18, 32  ;;  %p13423_p0 = scmp.lt.s32.totalorder %s14134_s18, %s14134_s18 }
  0x7c   :  { %p13419_p13 = scmp.ne.s32.totalorder %s14134_s18, %s13418_s0  ;;  %p13424_p1 = scmp.lt.s32.totalorder %s13418_s0, %s13418_s0 }
  0x7e   :  { %p13425_p2 = por %p13424_p1, %p13423_p0 }
  0x80   :  { %p13426_p3 = pnand %p13425_p2, %p13419_p13 }
  0x82   :  { %13429 = shalt.err (!%p13426_p3)
}
  0x83   :  { %207 = dma.hbm_to_vmem [thread:$0]  %s14026_s17, 32, %s14134_s18, [#allocation15], %s13889_s2, %s13889_s2, %s13890_s7  }
  0x84   :  { %s13893_s27 = smov [#allocation17]   ;;  %s13894_s28 = smov [#allocation20]  }
  0x85   :  { %s225_s26 = sshll.u32 %s13893_s27, 4  ;;  %s249_s1 = sshll.u32 %s13894_s28, 4  ;;  %s226_s26 = int_to_ptr.vmem [resolvable:$true] %s225_s26  ;;  %s14155_s1 = int_to_ptr.vmem [resolvable:$true] %s249_s1 }
  0x86   :  { %s13430_s10 = scalar_lea.hbm %s14036_s19, 32 }
  0x87   :  { %p13431_p4 = scmp.ne.s32.totalorder %s14036_s19, %s13430_s10  ;;  %p13434_p5 = scmp.lt.u32.totalorder %s13430_s10, %s14036_s19 }
  0x89   :  { %p13436_p6 = pnand %p13434_p5, %p13431_p4 }
  0x8b   :  { %13439 = shalt.err (!%p13436_p6)
}
  0x8c   :  { %s13440_s11 = scalar_lea.vmem %s226_s26, 32  ;;  %p13445_p8 = scmp.lt.s32.totalorder %s226_s26, %s226_s26 }
  0x8d   :  { %p13441_p7 = scmp.ne.s32.totalorder %s226_s26, %s13440_s11  ;;  %p13446_p9 = scmp.lt.s32.totalorder %s13440_s11, %s13440_s11 }
  0x8f   :  { %p13447_p10 = por %p13446_p9, %p13445_p8 }
  0x91   :  { %p13448_p11 = pnand %p13447_p10, %p13441_p7 }
  0x93   :  { %13451 = shalt.err (!%p13448_p11)
}
  0x94   :  { %231 = dma.hbm_to_vmem [thread:$0]  %s14036_s19, 32, %s226_s26, [#allocation18], %s13889_s2, %s13889_s2, %s13890_s7  }
  0x95   :  { %s13452_s17 = scalar_lea.hbm %s14046_s21, 32 }
  0x96   :  { %p13453_p12 = scmp.ne.s32.totalorder %s14046_s21, %s13452_s17  ;;  %p13456_p13 = scmp.lt.u32.totalorder %s13452_s17, %s14046_s21 }
  0x98   :  { %p13458_p0 = pnand %p13456_p13, %p13453_p12 }
  0x9a   :  { %13461 = shalt.err (!%p13458_p0)
}
  0x9b   :  { %s13462_s29 = scalar_lea.vmem %s14155_s1, 32  ;;  %p13467_p2 = scmp.lt.s32.totalorder %s14155_s1, %s14155_s1 }
  0x9c   :  { %p13463_p1 = scmp.ne.s32.totalorder %s14155_s1, %s13462_s29  ;;  %p13468_p3 = scmp.lt.s32.totalorder %s13462_s29, %s13462_s29 }
  0x9e   :  { %p13469_p4 = por %p13468_p3, %p13467_p2 }
  0xa0   :  { %p13470_p5 = pnand %p13469_p4, %p13463_p1 }
  0xa2   :  { %13473 = shalt.err (!%p13470_p5)
}
  0xa3   :  { %255 = dma.hbm_to_vmem [thread:$0]  %s14046_s21, 32, %s14155_s1, [#allocation21], %s13889_s2, %s13889_s2, %s13890_s7  }
  0xa4   :  { %s13895_s19 = smov [#allocation23]   ;;  %s13896_s16 = smov [#allocation26]  }
  0xa5   :  { %s273_s15 = sshll.u32 %s13895_s19, 4  ;;  %s297_s18 = sshll.u32 %s13896_s16, 4  ;;  %s274_s15 = int_to_ptr.vmem [resolvable:$true] %s273_s15  ;;  %s14176_s18 = int_to_ptr.vmem [resolvable:$true] %s297_s18 }
  0xa6   :  { %s13474_s22 = scalar_lea.hbm %s14056_s30, 32 }
  0xa7   :  { %p13475_p6 = scmp.ne.s32.totalorder %s14056_s30, %s13474_s22  ;;  %p13478_p7 = scmp.lt.u32.totalorder %s13474_s22, %s14056_s30 }
  0xa9   :  { %p13480_p8 = pnand %p13478_p7, %p13475_p6 }
  0xab   :  { %13483 = shalt.err (!%p13480_p8)
}
  0xac   :  { %s13484_s23 = scalar_lea.vmem %s274_s15, 32  ;;  %p13489_p10 = scmp.lt.s32.totalorder %s274_s15, %s274_s15 }
  0xad   :  { %p13485_p9 = scmp.ne.s32.totalorder %s274_s15, %s13484_s23  ;;  %p13490_p11 = scmp.lt.s32.totalorder %s13484_s23, %s13484_s23 }
  0xaf   :  { %p13491_p12 = por %p13490_p11, %p13489_p10 }
  0xb1   :  { %p13492_p13 = pnand %p13491_p12, %p13485_p9 }
  0xb3   :  { %13495 = shalt.err (!%p13492_p13)
}
  0xb4   :  { %279 = dma.hbm_to_vmem [thread:$0]  %s14056_s30, 32, %s274_s15, [#allocation24], %s13889_s2, %s13889_s2, %s13890_s7  }
  0xb5   :  { %s13496_s21 = scalar_lea.hbm %s14066_s13, 32 }
  0xb6   :  { %p13497_p0 = scmp.ne.s32.totalorder %s14066_s13, %s13496_s21  ;;  %p13500_p1 = scmp.lt.u32.totalorder %s13496_s21, %s14066_s13 }
  0xb8   :  { %p13502_p2 = pnand %p13500_p1, %p13497_p0 }
  0xba   :  { %13505 = shalt.err (!%p13502_p2)
}
  0xbb   :  { %s13506_s8 = scalar_lea.vmem %s14176_s18, 32  ;;  %p13511_p4 = scmp.lt.s32.totalorder %s14176_s18, %s14176_s18 }
  0xbc   :  { %p13507_p3 = scmp.ne.s32.totalorder %s14176_s18, %s13506_s8  ;;  %p13512_p5 = scmp.lt.s32.totalorder %s13506_s8, %s13506_s8 }
  0xbe   :  { %p13513_p6 = por %p13512_p5, %p13511_p4 }
  0xc0   :  { %p13514_p7 = pnand %p13513_p6, %p13507_p3 }
  0xc2   :  { %13517 = shalt.err (!%p13514_p7)
}
  0xc3   :  { %303 = dma.hbm_to_vmem [thread:$0]  %s14066_s13, 32, %s14176_s18, [#allocation27], %s13889_s2, %s13889_s2, %s13890_s7  }
  0xc4   :  { %s13897_s30 = smov [#allocation29]   ;;  %s13518_s27 = scalar_lea.hbm %s14091_s5, 1024 }
  0xc5   :  { %s327_s0 = sshll.u32 %s13897_s30, 4  ;;  %p13519_p8 = scmp.ne.s32.totalorder %s14091_s5, %s13518_s27  ;;  %s328_s0 = int_to_ptr.vmem [resolvable:$true] %s327_s0 }
  0xc6   :  { %p13522_p9 = scmp.lt.u32.totalorder %s13518_s27, %s14091_s5 }
  0xc8   :  { %p13524_p10 = pnand %p13522_p9, %p13519_p8 }
  0xca   :  { %13527 = shalt.err (!%p13524_p10)
}
  0xcb   :  { %s13528_s26 = scalar_lea.vmem %s328_s0, 1024  ;;  %p13533_p12 = scmp.lt.s32.totalorder %s328_s0, %s328_s0 }
  0xcc   :  { %p13529_p11 = scmp.ne.s32.totalorder %s328_s0, %s13528_s26  ;;  %p13534_p13 = scmp.lt.s32.totalorder %s13528_s26, %s13528_s26 }
  0xce   :  { %p13535_p0 = por %p13534_p13, %p13533_p12 }
  0xd0   :  { %p13536_p1 = pnand %p13535_p0, %p13529_p11 }
  0xd2   :  { %13539 = shalt.err (!%p13536_p1)
}
  0xd3   :  { %s13898_s28 = smov 128   ;;  %s13899_s13 = smov 8  }
  0xd4   :  { %333 = dma.hbm_to_vmem [thread:$0]  %s14091_s5, 1024, %s328_s0, [#allocation30], %s13898_s28, %s13898_s28, %s13899_s13  }
  0xd5   :  { %s13900_s1 = smov [#allocation2]   ;;  %s13901_s11 = smov [#allocation7]  }
  0xd6   :  { %s105_s10 = sshll.u32 %s13900_s1, 4  ;;  %s129_s17 = sshll.u32 %s13901_s11, 4  ;;  %s106_s10 = int_to_ptr.vmem [resolvable:$true] %s105_s10  ;;  %s130_s17 = int_to_ptr.vmem [resolvable:$true] %s129_s17 }
  0xd7   :  { %s13540_s29 = scalar_lea.hbm %s13961_s25, 32 }
  0xd8   :  { %p13541_p2 = scmp.ne.s32.totalorder %s13961_s25, %s13540_s29  ;;  %p13544_p3 = scmp.lt.u32.totalorder %s13540_s29, %s13961_s25 }
  0xda   :  { %p13546_p4 = pnand %p13544_p3, %p13541_p2 }
  0xdc   :  { %13549 = shalt.err (!%p13546_p4)
}
  0xdd   :  { %s13550_s19 = scalar_lea.vmem %s106_s10, 32  ;;  %p13555_p6 = scmp.lt.s32.totalorder %s106_s10, %s106_s10 }
  0xde   :  { %p13551_p5 = scmp.ne.s32.totalorder %s106_s10, %s13550_s19  ;;  %p13556_p7 = scmp.lt.s32.totalorder %s13550_s19, %s13550_s19 }
  0xe0   :  { %p13557_p8 = por %p13556_p7, %p13555_p6 }
  0xe2   :  { %p13558_p9 = pnand %p13557_p8, %p13551_p5 }
  0xe4   :  { %13561 = shalt.err (!%p13558_p9)
}
  0xe5   :  { %111 = dma.hbm_to_vmem [thread:$0]  %s13961_s25, 32, %s106_s10, [#allocation3], %s13889_s2, %s13889_s2, %s13890_s7  }
  0xe6   :  { %s13562_s5 = scalar_lea.hbm %s13971_s3, 32 }
  0xe7   :  { %p13563_p10 = scmp.ne.s32.totalorder %s13971_s3, %s13562_s5  ;;  %p13566_p11 = scmp.lt.u32.totalorder %s13562_s5, %s13971_s3 }
  0xe9   :  { %p13568_p12 = pnand %p13566_p11, %p13563_p10 }
  0xeb   :  { %13571 = shalt.err (!%p13568_p12)
}
  0xec   :  { %s13572_s15 = scalar_lea.vmem %s130_s17, 32  ;;  %p13577_p0 = scmp.lt.s32.totalorder %s130_s17, %s130_s17 }
  0xed   :  { %p13573_p13 = scmp.ne.s32.totalorder %s130_s17, %s13572_s15  ;;  %p13578_p1 = scmp.lt.s32.totalorder %s13572_s15, %s13572_s15 }
  0xef   :  { %p13579_p2 = por %p13578_p1, %p13577_p0 }
  0xf1   :  { %p13580_p3 = pnand %p13579_p2, %p13573_p13 }
  0xf3   :  { %13583 = shalt.err (!%p13580_p3)
}
  0xf4   :  { %135 = dma.hbm_to_vmem [thread:$0]  %s13971_s3, 32, %s130_s17, [#allocation6], %s13889_s2, %s13889_s2, %s13890_s7  }
  0xf5   :  { %s13902_s25 = smov [#allocation10]   ;;  %s13903_s18 = smov [#allocation13]  }
  0xf6   :  { %s153_s16 = sshll.u32 %s13902_s25, 4  ;;  %s189_s22 = sshll.u32 %s13903_s18, 4  ;;  %s154_s16 = int_to_ptr.vmem [resolvable:$true] %s153_s16  ;;  %s190_s22 = int_to_ptr.vmem [resolvable:$true] %s189_s22 }
  0xf7   :  { %s13584_s23 = scalar_lea.hbm %s13981_s14, 32 }
  0xf8   :  { %p13585_p4 = scmp.ne.s32.totalorder %s13981_s14, %s13584_s23  ;;  %p13588_p5 = scmp.lt.u32.totalorder %s13584_s23, %s13981_s14 }
  0xfa   :  { %p13590_p6 = pnand %p13588_p5, %p13585_p4 }
  0xfc   :  { %13593 = shalt.err (!%p13590_p6)
}
  0xfd   :  { %s13594_s21 = scalar_lea.vmem %s154_s16, 32  ;;  %p13599_p8 = scmp.lt.s32.totalorder %s154_s16, %s154_s16 }
  0xfe   :  { %p13595_p7 = scmp.ne.s32.totalorder %s154_s16, %s13594_s21  ;;  %p13600_p9 = scmp.lt.s32.totalorder %s13594_s21, %s13594_s21 }
 0x100   :  { %p13601_p10 = por %p13600_p9, %p13599_p8 }
 0x102   :  { %p13602_p11 = pnand %p13601_p10, %p13595_p7 }
 0x104   :  { %13605 = shalt.err (!%p13602_p11)
}
 0x105   :  { %159 = dma.hbm_to_vmem [thread:$0]  %s13981_s14, 32, %s154_s16, [#allocation9], %s13889_s2, %s13889_s2, %s13890_s7  }
 0x106   :  { %s13606_s3 = scalar_lea.hbm %s14021_s4, 32 }
 0x107   :  { %p13607_p12 = scmp.ne.s32.totalorder %s14021_s4, %s13606_s3  ;;  %p13610_p13 = scmp.lt.u32.totalorder %s13606_s3, %s14021_s4 }
 0x109   :  { %p13612_p0 = pnand %p13610_p13, %p13607_p12 }
 0x10b   :  { %13615 = shalt.err (!%p13612_p0)
}
 0x10c   :  { %s13616_s8 = scalar_lea.vmem %s190_s22, 32  ;;  %p13621_p2 = scmp.lt.s32.totalorder %s190_s22, %s190_s22 }
 0x10d   :  { %p13617_p1 = scmp.ne.s32.totalorder %s190_s22, %s13616_s8  ;;  %p13622_p3 = scmp.lt.s32.totalorder %s13616_s8, %s13616_s8 }
 0x10f   :  { %p13623_p4 = por %p13622_p3, %p13621_p2 }
 0x111   :  { %p13624_p5 = pnand %p13623_p4, %p13617_p1 }
 0x113   :  { %13627 = shalt.err (!%p13624_p5)
}
 0x114   :  { %195 = dma.hbm_to_vmem [thread:$0]  %s14021_s4, 32, %s190_s22, [#allocation12], %s13889_s2, %s13889_s2, %s13890_s7  }
 0x115   :  { %s13904_s14 = smov [#allocation16]   ;;  %s13905_s0 = smov [#allocation19]  }
 0x116   :  { %s213_s30 = sshll.u32 %s13904_s14, 4  ;;  %s237_s27 = sshll.u32 %s13905_s0, 4  ;;  %s214_s30 = int_to_ptr.vmem [resolvable:$true] %s213_s30  ;;  %s238_s27 = int_to_ptr.vmem [resolvable:$true] %s237_s27 }
 0x117   :  { %s13628_s26 = scalar_lea.hbm %s14031_s9, 32 }
 0x118   :  { %p13629_p6 = scmp.ne.s32.totalorder %s14031_s9, %s13628_s26  ;;  %p13632_p7 = scmp.lt.u32.totalorder %s13628_s26, %s14031_s9 }
 0x11a   :  { %p13634_p8 = pnand %p13632_p7, %p13629_p6 }
 0x11c   :  { %13637 = shalt.err (!%p13634_p8)
}
 0x11d   :  { %s13638_s1 = scalar_lea.vmem %s214_s30, 32  ;;  %p13643_p10 = scmp.lt.s32.totalorder %s214_s30, %s214_s30 }
 0x11e   :  { %p13639_p9 = scmp.ne.s32.totalorder %s214_s30, %s13638_s1  ;;  %p13644_p11 = scmp.lt.s32.totalorder %s13638_s1, %s13638_s1 }
 0x120   :  { %p13645_p12 = por %p13644_p11, %p13643_p10 }
 0x122   :  { %p13646_p13 = pnand %p13645_p12, %p13639_p9 }
 0x124   :  { %13649 = shalt.err (!%p13646_p13)
}
 0x125   :  { %s15733_s4 = sld [smem:[#allocation61_spill]] }
 0x126   :  { %219 = dma.hbm_to_vmem [thread:$0]  %s14031_s9, 32, %s214_s30, [#allocation15], %s13889_s2, %s13889_s2, %s13890_s7  }
 0x12b   :  { %s13650_s10 = scalar_lea.hbm %s15733_s4, 32 }
 0x12c   :  { %p13651_p0 = scmp.ne.s32.totalorder %s15733_s4, %s13650_s10  ;;  %p13654_p1 = scmp.lt.u32.totalorder %s13650_s10, %s15733_s4 }
 0x12e   :  { %p13656_p2 = pnand %p13654_p1, %p13651_p0 }
 0x130   :  { %13659 = shalt.err (!%p13656_p2)
}
 0x131   :  { %s13660_s11 = scalar_lea.vmem %s238_s27, 32  ;;  %p13665_p4 = scmp.lt.s32.totalorder %s238_s27, %s238_s27 }
 0x132   :  { %p13661_p3 = scmp.ne.s32.totalorder %s238_s27, %s13660_s11  ;;  %p13666_p5 = scmp.lt.s32.totalorder %s13660_s11, %s13660_s11 }
 0x134   :  { %p13667_p6 = por %p13666_p5, %p13665_p4 }
 0x136   :  { %p13668_p7 = pnand %p13667_p6, %p13661_p3 }
 0x138   :  { %13671 = shalt.err (!%p13668_p7)
}
 0x139   :  { %s15734_s17 = sld [smem:[#allocation62_spill]]  ;;  %s13906_s9 = smov [#allocation22]  }
 0x13a   :  { %243 = dma.hbm_to_vmem [thread:$0]  %s15733_s4, 32, %s238_s27, [#allocation18], %s13889_s2, %s13889_s2, %s13890_s7  }
 0x13b   :  { %s261_s29 = sshll.u32 %s13906_s9, 4  ;;  %s13907_s19 = smov [#allocation25]   ;;  %s262_s29 = int_to_ptr.vmem [resolvable:$true] %s261_s29 }
 0x13c   :  { %s285_s5 = sshll.u32 %s13907_s19, 4  ;;  %s286_s5 = int_to_ptr.vmem [resolvable:$true] %s285_s5 }
 0x13f   :  { %s13672_s15 = scalar_lea.hbm %s15734_s17, 32 }
 0x140   :  { %p13673_p8 = scmp.ne.s32.totalorder %s15734_s17, %s13672_s15  ;;  %p13676_p9 = scmp.lt.u32.totalorder %s13672_s15, %s15734_s17 }
 0x142   :  { %p13678_p10 = pnand %p13676_p9, %p13673_p8 }
 0x144   :  { %13681 = shalt.err (!%p13678_p10)
}
 0x145   :  { %s13682_s25 = scalar_lea.vmem %s262_s29, 32  ;;  %p13687_p12 = scmp.lt.s32.totalorder %s262_s29, %s262_s29 }
 0x146   :  { %p13683_p11 = scmp.ne.s32.totalorder %s262_s29, %s13682_s25  ;;  %p13688_p13 = scmp.lt.s32.totalorder %s13682_s25, %s13682_s25 }
 0x148   :  { %p13689_p0 = por %p13688_p13, %p13687_p12 }
 0x14a   :  { %p13690_p1 = pnand %p13689_p0, %p13683_p11 }
 0x14c   :  { %13693 = shalt.err (!%p13690_p1)
}
 0x14d   :  { %s15735_s16 = sld [smem:[#allocation63_spill]] }
 0x14e   :  { %267 = dma.hbm_to_vmem [thread:$0]  %s15734_s17, 32, %s262_s29, [#allocation21], %s13889_s2, %s13889_s2, %s13890_s7  }
 0x153   :  { %s13694_s18 = scalar_lea.hbm %s15735_s16, 32 }
 0x154   :  { %p13695_p2 = scmp.ne.s32.totalorder %s15735_s16, %s13694_s18  ;;  %p13698_p3 = scmp.lt.u32.totalorder %s13694_s18, %s15735_s16 }
 0x156   :  { %p13700_p4 = pnand %p13698_p3, %p13695_p2 }
 0x158   :  { %13703 = shalt.err (!%p13700_p4)
}
 0x159   :  { %s13704_s22 = scalar_lea.vmem %s286_s5, 32  ;;  %p13709_p6 = scmp.lt.s32.totalorder %s286_s5, %s286_s5 }
 0x15a   :  { %p13705_p5 = scmp.ne.s32.totalorder %s286_s5, %s13704_s22  ;;  %p13710_p7 = scmp.lt.s32.totalorder %s13704_s22, %s13704_s22 }
 0x15c   :  { %p13711_p8 = por %p13710_p7, %p13709_p6 }
 0x15e   :  { %p13712_p9 = pnand %p13711_p8, %p13705_p5 }
 0x160   :  { %13715 = shalt.err (!%p13712_p9)
}
 0x161   :  { %s15736_s23 = sld [smem:[#allocation64_spill]]  ;;  %s13908_s21 = smov [#allocation28]  }
 0x162   :  { %291 = dma.hbm_to_vmem [thread:$0]  %s15735_s16, 32, %s286_s5, [#allocation24], %s13889_s2, %s13889_s2, %s13890_s7  }
 0x163   :  { %s309_s3 = sshll.u32 %s13908_s21, 4  ;;  %s13909_s8 = smov [#allocation31]   ;;  %s310_s3 = int_to_ptr.vmem [resolvable:$true] %s309_s3 }
 0x164   :  { %s339_s14 = sshll.u32 %s13909_s8, 4  ;;  %s340_s14 = int_to_ptr.vmem [resolvable:$true] %s339_s14 }
 0x167   :  { %s13716_s30 = scalar_lea.hbm %s15736_s23, 32 }
 0x168   :  { %p13717_p10 = scmp.ne.s32.totalorder %s15736_s23, %s13716_s30  ;;  %p13720_p11 = scmp.lt.u32.totalorder %s13716_s30, %s15736_s23 }
 0x16a   :  { %p13722_p12 = pnand %p13720_p11, %p13717_p10 }
 0x16c   :  { %13725 = shalt.err (!%p13722_p12)
}
 0x16d   :  { %s13726_s0 = scalar_lea.vmem %s310_s3, 32  ;;  %p13731_p0 = scmp.lt.s32.totalorder %s310_s3, %s310_s3 }
 0x16e   :  { %p13727_p13 = scmp.ne.s32.totalorder %s310_s3, %s13726_s0  ;;  %p13732_p1 = scmp.lt.s32.totalorder %s13726_s0, %s13726_s0 }
 0x170   :  { %p13733_p2 = por %p13732_p1, %p13731_p0 }
 0x172   :  { %p13734_p3 = pnand %p13733_p2, %p13727_p13 }
 0x174   :  { %13737 = shalt.err (!%p13734_p3)
}
 0x175   :  { %315 = dma.hbm_to_vmem [thread:$0]  %s15736_s23, 32, %s310_s3, [#allocation27], %s13889_s2, %s13889_s2, %s13890_s7  }
 0x176   :  { %s13738_s27 = scalar_lea.hbm %s14096_s20, 1024 }
 0x177   :  { %p13739_p4 = scmp.ne.s32.totalorder %s14096_s20, %s13738_s27  ;;  %p13742_p5 = scmp.lt.u32.totalorder %s13738_s27, %s14096_s20 }
 0x179   :  { %p13744_p6 = pnand %p13742_p5, %p13739_p4 }
 0x17b   :  { %13747 = shalt.err (!%p13744_p6)
}
 0x17c   :  { %s13748_s26 = scalar_lea.vmem %s340_s14, 1024  ;;  %p13753_p8 = scmp.lt.s32.totalorder %s340_s14, %s340_s14 }
 0x17d   :  { %p13749_p7 = scmp.ne.s32.totalorder %s340_s14, %s13748_s26  ;;  %p13754_p9 = scmp.lt.s32.totalorder %s13748_s26, %s13748_s26 }
 0x17f   :  { %p13755_p10 = por %p13754_p9, %p13753_p8 }
 0x181   :  { %p13756_p11 = pnand %p13755_p10, %p13749_p7 }
 0x183   :  { %13759 = shalt.err (!%p13756_p11)
}
 0x184   :  { %345 = dma.hbm_to_vmem [thread:$0]  %s14096_s20, 1024, %s340_s14, [#allocation30], %s13898_s28, %s13898_s28, %s13899_s13  }
 0x185   :  { %s13910_s7 = smov [#allocation32]   ;;  %s13760_s4 = scalar_lea.hbm %s14101_s12, 1024 }
 0x186   :  { %s351_s1 = sshll.u32 %s13910_s7, 4  ;;  %p13761_p12 = scmp.ne.s32.totalorder %s14101_s12, %s13760_s4  ;;  %s352_s1 = int_to_ptr.vmem [resolvable:$true] %s351_s1 }
 0x187   :  { %p13764_p13 = scmp.lt.u32.totalorder %s13760_s4, %s14101_s12 }
 0x189   :  { %p13766_p0 = pnand %p13764_p13, %p13761_p12 }
 0x18b   :  { %13769 = shalt.err (!%p13766_p0)
}
 0x18c   :  { %s13770_s10 = scalar_lea.vmem %s352_s1, 1024  ;;  %p13775_p2 = scmp.lt.s32.totalorder %s352_s1, %s352_s1 }
 0x18d   :  { %p13771_p1 = scmp.ne.s32.totalorder %s352_s1, %s13770_s10  ;;  %p13776_p3 = scmp.lt.s32.totalorder %s13770_s10, %s13770_s10 }
 0x18f   :  { %p13777_p4 = por %p13776_p3, %p13775_p2 }
 0x191   :  { %p13778_p5 = pnand %p13777_p4, %p13771_p1 }
 0x193   :  { %13781 = shalt.err (!%p13778_p5)
}
 0x194   :  { %357 = dma.hbm_to_vmem [thread:$0]  %s14101_s12, 1024, %s352_s1, [#allocation33], %s13898_s28, %s13898_s28, %s13899_s13  }
 0x195   :  { %13826 = dma.done.wait [#allocation3], 32  }
 0x196   :  { %13827 = vsyncadd [#allocation3], 4294967264 }
 0x197   :  { %13828 = dma.done.wait [#allocation6], 64  }
 0x198   :  { %13829 = vsyncadd [#allocation6], 4294967232 }
 0x199   :  { %13830 = dma.done.wait [#allocation9], 64  }
 0x19a   :  { %13831 = vsyncadd [#allocation9], 4294967232 }
 0x19b   :  { %13832 = dma.done.wait [#allocation12], 64  }
 0x19c   :  { %13833 = vsyncadd [#allocation12], 4294967232 }
 0x19d   :  { %13834 = dma.done.wait [#allocation15], 64  }
 0x19e   :  { %13835 = vsyncadd [#allocation15], 4294967232 }
 0x19f   :  { %13836 = dma.done.wait [#allocation18], 64  }
 0x1a0   :  { %13837 = vsyncadd [#allocation18], 4294967232 }
 0x1a1   :  { %13838 = dma.done.wait [#allocation21], 64  }
 0x1a2   :  { %13839 = vsyncadd [#allocation21], 4294967232 }
 0x1a3   :  { %13840 = dma.done.wait [#allocation24], 64  }
 0x1a4   :  { %13841 = vsyncadd [#allocation24], 4294967232 }
 0x1a5   :  { %13842 = dma.done.wait [#allocation27], 64  }
 0x1a6   :  { %13843 = vsyncadd [#allocation27], 4294967232 }
 0x1a7   :  { %13844 = dma.done.wait [#allocation30], 2048  }
 0x1a8   :  { %13845 = vsyncadd [#allocation30], 4294965248 }
 0x1a9   :  { %13846 = dma.done.wait [#allocation33], 1024  }
 0x1aa   :  { %13847 = vsyncadd [#allocation33], 4294966272  ;;  %s15737_s12 = sld [smem:[#allocation60_spill]]  ;;  %s15738_s20 = sld [smem:[#allocation50_spill]]  ;;  %vm440_vm0 = vcmask 261120   ;;  %v13911_v8 = vmov 0.0   ;;  %v603_v29 = vlaneseq }
 0x1ab   :  { %12033 = vmatprep.subr.mxu0 %v13911_v8  ;;  %vm13912_vm1 = vmmov 0   ;;  %v11405_v9 = vld [vmem:[#allocation7] ss:$0 sm:$0xff]  ;;  %s13913_s11 = smov 120   ;;  %s13914_s17 = smov 96   ;;  %vm525_vm2 = vcmask 64512  }
 0x1ac   :  { %12035 = vmatprep.mubr.msk.f32.mxu0 %vm13912_vm1, %v13911_v8  ;;  %s13915_s9 = smov 80   ;;  %s13916_s29 = smov 88   ;;  %v14378_v31 = vshrl.u32 %v603_v29, 7  ;;  %v13922_v33 = vmov 0   ;;  %vm1210_vm6 = vcmask 130048   ;;  %vm1212_vm7 = vcmask 195584  }
 0x1ad   :  { %s13917_s19 = smov 72   ;;  %s13918_s5 = smov 112   ;;  %vm2159_vm12 = vcmask 523264  }
 0x1ae   :  { %s13919_s15 = smov 104   ;;  %s13920_s25 = smov 56   ;;  %v605_v32 = vsub.s32 0, %v14378_v31  ;;  %v1294_v47 = vsub.s32 1, %v14378_v31 }
 0x1af   :  { %s13921_s16 = smov 64   ;;  %s15739_s18 = sld [smem:[#allocation52_spill]] }
 0x1b0   :  { %v424_v0 = vld [vmem:[%s15737_s12] sm:$0xff]  ;;  %v425_v1 = vld [vmem:[%s15737_s12 + $0x8] sm:$0xff]  ;;  %v426_v2 = vld [vmem:[%s15737_s12 + $0x10] sm:$0xff]  ;;  %s13923_s22 = smov 40   ;;  %s13924_s23 = smov 48  }
 0x1b1   :  { %v12766_v3 = vpack.c.bf16 %v425_v1, %v424_v0  ;;  %v427_v4 = vld [vmem:[%s15737_s12 + $0x18] sm:$0xff]  ;;  %v14286_v5 = vld [vmem:[%s15738_s20] sm:$0xff]  ;;  %v14291_v7 = vld [vmem:[%s15738_s20 + $0x8] sm:$0xff]  ;;  %s15740_s21 = sld [smem:[#allocation59_spill]]  ;;  %s13925_s3 = smov 24  }
 0x1b2   :  { %v12770_v6 = vpack.c.bf16 %v427_v4, %v426_v2  ;;  %12020 = vmatprep.mubr.msk.f32.mxu1 %vm440_vm0, %v14286_v5  ;;  %s15741_s8 = sld [smem:[#allocation57_spill]]  ;;  %s15742_s14 = sld [smem:[#allocation58_spill]] }
 0x1b3   :  { %12767 = vmatprep.subr.bf16.mxu1 %v12766_v3  ;;  %s15743_s30 = sld [smem:[#allocation54_spill]]  ;;  %s15744_s0 = sld [smem:[#allocation56_spill]] }
 0x1b4   :  { %12769 = vmatpush3.bf16.msra.mxu1 %v12766_v3  ;;  %s15745_s27 = sld [smem:[#allocation55_spill]]  ;;  %s15746_s26 = sld [smem:[#allocation51_spill]] }
 0x1b5   :  { %12771 = vmatprep.subr.bf16.mxu1 %v12770_v6  ;;  %v422_v30 = vld [vmem:[%s15739_s18] sm:$0x3]  ;;  %s15747_s7 = sld [smem:[#allocation53_spill]]  ;;  %s15748_s1 = sld [smem:[#allocation67_spill]] }
 0x1b6   :  { %vm601_vm3 = vcmp.gt.f32.partialorder %v422_v30, 0.5  ;;  %s15749_s4 = sld [smem:[#allocation65_spill]]  ;;  %s15750_s10 = sld [smem:[#allocation66_spill]] }
 0x1b7   :  { %v602_v34 = vsel %vm601_vm3, 1, %v13922_v33 }
 0x1b8   :  { %12773 = vmatpush3.bf16.msra.mxu1 %v12770_v6  ;;  %v14384_v35 = vrot.slane %v602_v34, %v605_v32  ;;  %v14399_v53 = vrot.slane %v602_v34, %v1294_v47 }
 0x1b9   :  { %12023 = vmatprep.subr.mxu1 %v13911_v8 }
 0x1ba   :  { %vm607_vm4 = vcmp.eq.s32.totalorder %v14384_v35, 1  ;;  %vm1296_vm5 = vcmp.eq.s32.totalorder %v14399_v53, 1 }
 0x1bb   :  { %12021 = vmatmul.mubr.msk.f32.vlgmr.msra.gmra.mrb[0].mxu1 %vm440_vm0, %v14291_v7 }
 0x1bc   :  { %12025 = vmatprep.mubr.msk.f32.mxu1 %vm13912_vm1, %v13911_v8 }
 0x28e   :  { %v12022_v10 = vpop.f32.mrb[0].mxu1 }
 0x28f   :  { %v513_v11 = vpop.f32.mrb[1].mxu1  ;;  %v14315_v13 = vadd.f32 %v12022_v10, %v11405_v9 }
 0x290   :  { %v14301_v12 = vadd.f32 %v11405_v9, %v513_v11 }
 0x292   :  { %696 = vrot.lane.b32.xlu1 %v14301_v12, %s13913_s11  ;;  %523 = vrot.lane.b32.xlu0 %v14301_v12, %s13914_s17 }
 0x296   :  { %865 = vrot.lane.b32.xlu1 %v14301_v12, %s13915_s9  ;;  %698 = vrot.lane.b32.xlu0 %v14301_v12, %s13916_s29 }
 0x29a   :  { %1032 = vrot.lane.b32.xlu1 %v14301_v12, %s13917_s19  ;;  %863 = vrot.lane.b32.xlu0 %v14301_v12, %s13918_s5 }
 0x29e   :  { %1215 = vrot.lane.b32.xlu1 %v14315_v13, %s13914_s17  ;;  %1030 = vrot.lane.b32.xlu0 %v14301_v12, %s13919_s15 }
 0x2a2   :  { %1385 = vrot.lane.b32.xlu1 %v14315_v13, %s13913_s11  ;;  %1387 = vrot.lane.b32.xlu0 %v14315_v13, %s13916_s29 }
 0x2a6   :  { %1552 = vrot.lane.b32.xlu1 %v14315_v13, %s13918_s5  ;;  %1554 = vrot.lane.b32.xlu0 %v14315_v13, %s13915_s9 }
 0x2aa   :  { %1719 = vrot.lane.b32.xlu1 %v14315_v13, %s13919_s15  ;;  %1721 = vrot.lane.b32.xlu0 %v14315_v13, %s13917_s19 }
 0x2ae   :  { %787 = vrot.lane.b32.xlu1 %v14301_v12, %s13920_s25  ;;  %620 = vrot.lane.b32.xlu0 %v14301_v12, %s13921_s16 }
 0x304   :  { %v697_v14 = vpop.permute.xlu1 %696  ;;  %v524_v15 = vpop.permute.xlu0 %523 }
 0x305   :  { %12024 = vmatpush3.xpose.msk.msra.mxu1 %vm525_vm2, %v524_v15 }
 0x306   :  { %12028 = vmatprep.subr.mxu1 %v13911_v8 }
 0x308   :  { %v866_v16 = vpop.permute.xlu1 %865  ;;  %12026 = vmatmul.mubr.msk.f32.vlgmr.msra.gmra.mrb[2].mxu1 %vm525_vm2, %v14301_v12  ;;  %v699_v17 = vpop.permute.xlu0 %698 }
 0x309   :  { %12034 = vmatpush3.xpose.msk.msra.mxu0 %vm525_vm2, %v699_v17  ;;  %12030 = vmatprep.mubr.msk.f32.mxu1 %vm13912_vm1, %v13911_v8 }
 0x30a   :  { %12043 = vmatprep.subr.mxu0 %v13911_v8 }
 0x30c   :  { %v1033_v18 = vpop.permute.xlu1 %1032  ;;  %12036 = vmatmul.mubr.msk.f32.vlgmr.msra.gmra.mrb[0].mxu0 %vm525_vm2, %v697_v14  ;;  %v864_v19 = vpop.permute.xlu0 %863 }
 0x30d   :  { %12044 = vmatpush3.xpose.msk.msra.mxu0 %vm525_vm2, %v866_v16  ;;  %12045 = vmatprep.mubr.msk.f32.mxu0 %vm13912_vm1, %v13911_v8 }
 0x30e   :  { %12053 = vmatprep.subr.mxu0 %v13911_v8 }
 0x310   :  { %12046 = vmatmul.mubr.msk.f32.vlgmr.msra.gmra.mrb[2].mxu0 %vm525_vm2, %v864_v19  ;;  %v1031_v20 = vpop.permute.xlu0 %1030  ;;  %v1216_v21 = vpop.permute.xlu1 %1215 }
 0x311   :  { %12054 = vmatpush3.xpose.msk.msra.mxu0 %vm525_vm2, %v1033_v18  ;;  %12055 = vmatprep.mubr.msk.f32.mxu0 %vm13912_vm1, %v13911_v8 }
 0x312   :  { %12063 = vmatprep.subr.mxu0 %v13911_v8 }
 0x314   :  { %12056 = vmatmul.mubr.msk.f32.vlgmr.msra.gmra.mrb[4].mxu0 %vm525_vm2, %v1031_v20  ;;  %v1388_v22 = vpop.permute.xlu0 %1387  ;;  %v1386_v23 = vpop.permute.xlu1 %1385 }
 0x315   :  { %12064 = vmatpush3.xpose.msk.msra.mxu0 %vm525_vm2, %v1216_v21  ;;  %12065 = vmatprep.mubr.msk.f32.mxu0 %vm13912_vm1, %v13911_v8 }
 0x316   :  { %12073 = vmatprep.subr.mxu0 %v13911_v8 }
 0x318   :  { %12066 = vmatmul.mubr.msk.f32.vlgmr.msra.gmra.mrb[6].mxu0 %vm525_vm2, %v14315_v13  ;;  %v1555_v24 = vpop.permute.xlu0 %1554  ;;  %v1553_v26 = vpop.permute.xlu1 %1552 }
 0x319   :  { %12074 = vmatpush3.xpose.msk.msra.mxu0 %vm525_vm2, %v1388_v22  ;;  %12075 = vmatprep.mubr.msk.f32.mxu0 %vm13912_vm1, %v13911_v8 }
 0x31a   :  { %12083 = vmatprep.subr.mxu0 %v13911_v8 }
 0x31c   :  { %12076 = vmatmul.mubr.msk.f32.vlgmr.msra.gmra.mrb[8].mxu0 %vm525_vm2, %v1386_v23  ;;  %v1722_v25 = vpop.permute.xlu0 %1721  ;;  %v1720_v28 = vpop.permute.xlu1 %1719 }
 0x31d   :  { %12084 = vmatpush3.xpose.msk.msra.mxu0 %vm525_vm2, %v1555_v24  ;;  %12085 = vmatprep.mubr.msk.f32.mxu0 %vm13912_vm1, %v13911_v8 }
 0x31e   :  { %12093 = vmatprep.subr.mxu0 %v13911_v8 }
 0x320   :  { %12086 = vmatmul.mubr.msk.f32.vlgmr.msra.gmra.mrb[10].mxu0 %vm525_vm2, %v1553_v26  ;;  %v621_v27 = vpop.permute.xlu0 %620  ;;  %v14421_v19 = vpop.permute.xlu1 %787 }
 0x321   :  { %12029 = vmatpush3.msra.mxu1 %v621_v27  ;;  %12094 = vmatpush3.xpose.msk.msra.mxu0 %vm525_vm2, %v1722_v25 }
 0x322   :  { %12095 = vmatprep.mubr.msk.f32.mxu0 %vm13912_vm1, %v13911_v8  ;;  %12038 = vmatprep.subr.mxu1 %v13911_v8 }
 0x324   :  { %12096 = vmatmul.mubr.msk.f32.vlgmr.msra.gmra.mrb[12].mxu0 %vm525_vm2, %v1720_v28 }
 0x3db   :  { %v596_v36 = vpop.f32.mrb[2].mxu1 }
 0x3dc   :  { %v600_v37 = vmul.f32 0.35355338, %v596_v36  ;;  %v12027_v38 = vpop.f32.mrb[3].mxu1 }
 0x3de   :  { %v608_v39 = vsel %vm607_vm4, -1e+09, %v600_v37 }
 0x3df   :  { %v770_v40 = vpop.f32.mrb[0].mxu0  ;;  %v609_v41 = vsel %vm525_vm2, %v608_v39, -inf }
 0x3e0   :  { %v774_v42 = vmul.f32 0.35355338, %v770_v40  ;;  %610 = vmax.xlane.f32.xlu0 %v609_v41  ;;  %v12037_v43 = vpop.f32.mrb[1].mxu0 }
 0x3e2   :  { %v775_v44 = vsel %vm607_vm4, -1e+09, %v774_v42 }
 0x3e3   :  { %v937_v45 = vpop.f32.mrb[2].mxu0  ;;  %v776_v46 = vsel %vm525_vm2, %v775_v44, -inf }
 0x3e4   :  { %v941_v48 = vmul.f32 0.35355338, %v937_v45  ;;  %777 = vmax.xlane.f32.xlu1 %v776_v46  ;;  %v12047_v49 = vpop.f32.mrb[3].mxu0 }
 0x3e6   :  { %v942_v50 = vsel %vm607_vm4, -1e+09, %v941_v48 }
 0x3e7   :  { %v1104_v51 = vpop.f32.mrb[4].mxu0  ;;  %v943_v52 = vsel %vm525_vm2, %v942_v50, -inf }
 0x3e8   :  { %v1108_v54 = vmul.f32 0.35355338, %v1104_v51  ;;  %944 = vmax.xlane.f32.xlu0 %v943_v52  ;;  %v12057_v55 = vpop.f32.mrb[5].mxu0 }
 0x3ea   :  { %v1109_v56 = vsel %vm607_vm4, -1e+09, %v1108_v54 }
 0x3eb   :  { %v1287_v57 = vpop.f32.mrb[6].mxu0  ;;  %v1110_v58 = vsel %vm525_vm2, %v1109_v56, -inf }
 0x3ec   :  { %v1291_v59 = vmul.f32 0.35355338, %v1287_v57  ;;  %1111 = vmax.xlane.f32.xlu0 %v1110_v58  ;;  %v12067_v60 = vpop.f32.mrb[7].mxu0 }
 0x3ee   :  { %v1297_v61 = vsel %vm1296_vm5, -1e+09, %v1291_v59 }
 0x3ef   :  { %v1459_v62 = vpop.f32.mrb[8].mxu0  ;;  %v1298_v63 = vsel %vm525_vm2, %v1297_v61, -inf }
 0x3f0   :  { %v1463_v0 = vmul.f32 0.35355338, %v1459_v62  ;;  %1299 = vmax.xlane.f32.xlu1 %v1298_v63  ;;  %v12077_v1 = vpop.f32.mrb[9].mxu0 }
 0x3f2   :  { %v1464_v2 = vsel %vm1296_vm5, -1e+09, %v1463_v0 }
 0x3f3   :  { %v1626_v3 = vpop.f32.mrb[10].mxu0  ;;  %v1465_v4 = vsel %vm525_vm2, %v1464_v2, -inf }
 0x3f4   :  { %v1630_v6 = vmul.f32 0.35355338, %v1626_v3  ;;  %1466 = vmax.xlane.f32.xlu0 %v1465_v4  ;;  %v12087_v9 = vpop.f32.mrb[11].mxu0 }
 0x3f6   :  { %v1631_v10 = vsel %vm1296_vm5, -1e+09, %v1630_v6 }
 0x3f7   :  { %v1793_v11 = vpop.f32.mrb[12].mxu0  ;;  %v1632_v14 = vsel %vm525_vm2, %v1631_v10, -inf }
 0x3f8   :  { %v1797_v15 = vmul.f32 0.35355338, %v1793_v11  ;;  %1633 = vmax.xlane.f32.xlu1 %v1632_v14  ;;  %v12097_v16 = vpop.f32.mrb[13].mxu0 }
 0x3fa   :  { %v1798_v17 = vsel %vm1296_vm5, -1e+09, %v1797_v15 }
 0x3fb   :  { %v1799_v18 = vsel %vm525_vm2, %v1798_v17, -inf }
 0x3fc   :  { %1800 = vmax.xlane.f32.xlu0 %v1799_v18 }
 0x409   :  { %1121 = vrot.lane.b32.xlu1 %v14301_v12, %s13923_s22 }
 0x412   :  { %954 = vrot.lane.b32.xlu0 %v14301_v12, %s13924_s23 }
 0x46d   :  { %v611_v20 = vpop.xlane.xlu0 %610 }
 0x46e   :  { %v612_v21 = vsub.f32 %v608_v39, %v611_v20 }
 0x470   :  { %v613_v22 = vmul.f32 1.442695, %v612_v21 }
 0x471   :  { %v778_v23 = vpop.xlane.xlu1 %777 }
 0x472   :  { %13070 = vpow2.f32 %v613_v22  ;;  %v779_v24 = vsub.f32 %v775_v44, %v778_v23 }
 0x474   :  { %v780_v25 = vmul.f32 1.442695, %v779_v24 }
 0x475   :  { %v945_v26 = vpop.xlane.xlu0 %944 }
 0x476   :  { %13072 = vpow2.f32 %v780_v25  ;;  %v946_v27 = vsub.f32 %v942_v50, %v945_v26 }
 0x478   :  { %v947_v28 = vmul.f32 1.442695, %v946_v27 }
 0x479   :  { %v1112_v29 = vpop.xlane.xlu0 %1111 }
 0x47a   :  { %13074 = vpow2.f32 %v947_v28  ;;  %v1113_v30 = vsub.f32 %v1109_v56, %v1112_v29 }
 0x47c   :  { %v13071_v34 = vpop.eup %13070  ;;  %v1114_v36 = vmul.f32 1.442695, %v1113_v30 }
 0x47d   :  { %v615_v12 = vsel %vm525_vm2, %v13071_v34, 0.0  ;;  %v1300_v43 = vpop.xlane.xlu1 %1299 }
 0x47e   :  { %13076 = vpow2.f32 %v1114_v36  ;;  %616 = vadd.xlane.f32.xlu1 %v615_v12  ;;  %v1301_v44 = vsub.f32 %v1297_v61, %v1300_v43 }
 0x480   :  { %v13073_v37 = vpop.eup %13072  ;;  %v1302_v49 = vmul.f32 1.442695, %v1301_v44 }
 0x481   :  { %v782_v38 = vsel %vm525_vm2, %v13073_v37, 0.0  ;;  %v1467_v45 = vpop.xlane.xlu0 %1466 }
 0x482   :  { %783 = vadd.xlane.f32.xlu0 %v782_v38  ;;  %v1468_v48 = vsub.f32 %v1464_v2, %v1467_v45  ;;  %13078 = vpow2.f32 %v1302_v49 }
 0x484   :  { %v13075_v39 = vpop.eup %13074  ;;  %v1469_v52 = vmul.f32 1.442695, %v1468_v48  ;;  %v430_v48 = vld [vmem:[%s15740_s21 + $0x8] sm:$0xff] }
 0x485   :  { %v949_v40 = vsel %vm525_vm2, %v13075_v39, 0.0  ;;  %v1634_v46 = vpop.xlane.xlu1 %1633 }
 0x486   :  { %950 = vadd.xlane.f32.xlu1 %v949_v40  ;;  %v1635_v50 = vsub.f32 %v1631_v10, %v1634_v46  ;;  %13080 = vpow2.f32 %v1469_v52  ;;  %v429_v46 = vld [vmem:[%s15740_s21] sm:$0xff] }
 0x487   :  { %v12774_v49 = vpack.c.bf16 %v430_v48, %v429_v46  ;;  %v2059_v46 = vld [vmem:[%s15742_s14 + $0x20] sm:$0xff]  ;;  %v2060_v48 = vld [vmem:[%s15742_s14 + $0x28] sm:$0xff] }
 0x488   :  { %v14426_v41 = vpop.eup %13076  ;;  %v1636_v54 = vmul.f32 1.442695, %v1635_v50  ;;  %v431_v50 = vld [vmem:[%s15740_s21 + $0x10] sm:$0xff] }
 0x489   :  { %v1116_v42 = vsel %vm525_vm2, %v14426_v41, 0.0  ;;  %v1801_v51 = vpop.xlane.xlu0 %1800  ;;  %v1122_v1 = vpop.permute.xlu1 %1121  ;;  %12775 = vmatprep.subr.bf16.mxu0 %v12774_v49 }
 0x48a   :  { %1117 = vadd.xlane.f32.xlu0 %v1116_v42  ;;  %v1802_v55 = vsub.f32 %v1798_v17, %v1801_v51  ;;  %13082 = vpow2.f32 %v1636_v54  ;;  %12777 = vmatpush3.bf16.msra.mxu0 %v12774_v49  ;;  %v432_v51 = vld [vmem:[%s15740_s21 + $0x18] sm:$0xff]  ;;  %v12798_v49 = vpack.c.bf16 %v2060_v48, %v2059_v46  ;;  %v11445_v48 = vld [vmem:[%s15737_s12 + $0x20] sm:$0xff] }
 0x48b   :  { %v12778_v52 = vpack.c.bf16 %v432_v51, %v431_v50 }
 0x48c   :  { %v1803_v56 = vmul.f32 1.442695, %v1802_v55  ;;  %v13079_v57 = vpop.eup %13078 }
 0x48d   :  { %v1304_v59 = vsel %vm525_vm2, %v13079_v57, 0.0  ;;  %v955_v2 = vpop.permute.xlu0 %954  ;;  %12779 = vmatprep.subr.bf16.mxu0 %v12778_v52 }
 0x48e   :  { %13084 = vpow2.f32 %v1803_v56  ;;  %12781 = vmatpush3.bf16.msra.mxu0 %v12778_v52 }
 0x490   :  { %v14434_v58 = vpop.eup %13080 }
 0x491   :  { %v1471_v62 = vsel %vm525_vm2, %v14434_v58, 0.0 }
 0x494   :  { %v14437_v60 = vpop.eup %13082 }
 0x495   :  { %v1638_v61 = vsel %vm525_vm2, %v14437_v60, 0.0 }
 0x497   :  { %1476 = vrot.lane.b32.xlu1 %v14315_v13, %s13920_s25 }
 0x498   :  { %v14443_v63 = vpop.eup %13084 }
 0x499   :  { %v1805_v0 = vsel %vm525_vm2, %v14443_v63, 0.0 }
 0x4a0   :  { %1309 = vrot.lane.b32.xlu0 %v14315_v13, %s13921_s16 }
 0x4bb   :  { %1305 = vadd.xlane.f32.xlu1 %v1304_v59 }
 0x4bf   :  { %1639 = vadd.xlane.f32.xlu1 %v1638_v61  ;;  %1472 = vadd.xlane.f32.xlu0 %v1471_v62 }
 0x4c3   :  { %1806 = vadd.xlane.f32.xlu1 %v1805_v0 }
 0x4d4   :  { %1810 = vrot.lane.b32.xlu1 %v14315_v13, %s13923_s22 }
 0x4d5   :  { %1643 = vrot.lane.b32.xlu0 %v14315_v13, %s13924_s23 }
 0x50b   :  { %v617_v3 = vpop.xlane.xlu1 %616 }
 0x50c   :  { %13086 = vrcp.f32 %v617_v3 }
 0x50f   :  { %v784_v4 = vpop.xlane.xlu0 %783 }
 0x510   :  { %13088 = vrcp.f32 %v784_v4 }
 0x513   :  { %v951_v6 = vpop.xlane.xlu1 %950 }
 0x514   :  { %13090 = vrcp.f32 %v951_v6 }
 0x516   :  { %v13087_v9 = vpop.eup %13086 }
 0x517   :  { %v1118_v10 = vpop.xlane.xlu0 %1117  ;;  %v619_v11 = vmul.f32 %v13087_v9, %v13071_v34  ;;  %v1477_v20 = vpop.permute.xlu1 %1476 }
 0x518   :  { %13092 = vrcp.f32 %v1118_v10 }
 0x519   :  { %12031 = vmatmul.mubr.msk.f32.vlgmr.msra.gmra.mrb[4].mxu1 %vm525_vm2, %v619_v11 }
 0x51a   :  { %v13089_v14 = vpop.eup %13088  ;;  %12039 = vmatpush3.msra.mxu1 %v14421_v19  ;;  %12040 = vmatprep.mubr.msk.f32.mxu1 %vm13912_vm1, %v13911_v8 }
 0x51b   :  { %12048 = vmatprep.subr.mxu1 %v13911_v8  ;;  %v786_v13 = vmul.f32 %v13089_v14, %v13073_v37  ;;  %v1310_v19 = vpop.permute.xlu0 %1309 }
 0x51d   :  { %12041 = vmatmul.mubr.msk.f32.vlgmr.msra.gmra.mrb[6].mxu1 %vm525_vm2, %v786_v13  ;;  %v11432_v13 = vld [vmem:[#allocation5] ss:$0 sm:$0xff] }
 0x51e   :  { %v13091_v15 = vpop.eup %13090  ;;  %12049 = vmatpush3.msra.mxu1 %v955_v2  ;;  %12050 = vmatprep.mubr.msk.f32.mxu1 %vm13912_vm1, %v13911_v8 }
 0x51f   :  { %12058 = vmatprep.subr.mxu1 %v13911_v8  ;;  %v953_v16 = vmul.f32 %v13091_v15, %v13075_v39 }
 0x521   :  { %12051 = vmatmul.mubr.msk.f32.vlgmr.msra.gmra.mrb[8].mxu1 %vm525_vm2, %v953_v16 }
 0x522   :  { %v13093_v17 = vpop.eup %13092  ;;  %12059 = vmatpush3.msra.mxu1 %v1122_v1  ;;  %12060 = vmatprep.mubr.msk.f32.mxu1 %vm13912_vm1, %v13911_v8 }
 0x523   :  { %12068 = vmatprep.subr.mxu1 %v13911_v8  ;;  %v1120_v18 = vmul.f32 %v13093_v17, %v14426_v41 }
 0x525   :  { %12061 = vmatmul.mubr.msk.f32.vlgmr.msra.gmra.mrb[10].mxu1 %vm525_vm2, %v1120_v18 }
 0x526   :  { %12069 = vmatpush3.msra.mxu1 %v1310_v19  ;;  %12070 = vmatprep.mubr.msk.f32.mxu1 %vm13912_vm1, %v13911_v8 }
 0x527   :  { %12078 = vmatprep.subr.mxu1 %v13911_v8 }
 0x548   :  { %v1306_v21 = vpop.xlane.xlu1 %1305 }
 0x549   :  { %13094 = vrcp.f32 %v1306_v21 }
 0x54c   :  { %v1640_v22 = vpop.xlane.xlu1 %1639  ;;  %v1473_v23 = vpop.xlane.xlu0 %1472 }
 0x54d   :  { %13096 = vrcp.f32 %v1473_v23 }
 0x54e   :  { %13098 = vrcp.f32 %v1640_v22 }
 0x550   :  { %v1807_v24 = vpop.xlane.xlu1 %1806  ;;  %v1644_v30 = vpop.permute.xlu0 %1643 }
 0x551   :  { %13100 = vrcp.f32 %v1807_v24 }
 0x553   :  { %v13095_v25 = vpop.eup %13094 }
 0x554   :  { %v1308_v26 = vmul.f32 %v13095_v25, %v13079_v57  ;;  %v1811_v12 = vpop.permute.xlu1 %1810 }
 0x556   :  { %12071 = vmatmul.mubr.msk.f32.vlgmr.msra.gmra.mrb[12].mxu1 %vm525_vm2, %v1308_v26 }
 0x557   :  { %12079 = vmatpush3.msra.mxu1 %v1477_v20  ;;  %12080 = vmatprep.mubr.msk.f32.mxu1 %vm13912_vm1, %v13911_v8  ;;  %v13097_v27 = vpop.eup %13096 }
 0x558   :  { %12088 = vmatprep.subr.mxu1 %v13911_v8  ;;  %v1475_v28 = vmul.f32 %v13097_v27, %v14434_v58  ;;  %v13099_v29 = vpop.eup %13098 }
 0x559   :  { %v1642_v34 = vmul.f32 %v13099_v29, %v14437_v60 }
 0x55a   :  { %12081 = vmatmul.mubr.msk.f32.vlgmr.msra.gmra.mrb[14].mxu1 %vm525_vm2, %v1475_v28 }
 0x55b   :  { %12089 = vmatpush3.msra.mxu1 %v1644_v30  ;;  %12090 = vmatprep.mubr.msk.f32.mxu1 %vm13912_vm1, %v13911_v8  ;;  %v13101_v36 = vpop.eup %13100 }
 0x55c   :  { %12098 = vmatprep.subr.mxu1 %v13911_v8  ;;  %v1809_v37 = vmul.f32 %v13101_v36, %v14443_v63  ;;  %v2051_v36 = vld [vmem:[%s15741_s8 + $0x8] sm:$0xff] }
 0x55e   :  { %12091 = vmatmul.mubr.msk.f32.vlgmr.msra.gmra.mrb[16].mxu1 %vm525_vm2, %v1642_v34  ;;  %v2050_v34 = vld [vmem:[%s15741_s8] sm:$0xff] }
 0x55f   :  { %12099 = vmatpush3.msra.mxu1 %v1811_v12  ;;  %12100 = vmatprep.mubr.msk.f32.mxu1 %vm13912_vm1, %v13911_v8  ;;  %v2052_v12 = vld [vmem:[%s15741_s8 + $0x10] sm:$0xff] }
 0x562   :  { %12101 = vmatmul.mubr.msk.f32.vlgmr.msra.gmra.mrb[18].mxu1 %vm525_vm2, %v1809_v37  ;;  %v12782_v37 = vpack.c.bf16 %v2051_v36, %v2050_v34 }
 0x564   :  { %12783 = vmatprep.subr.bf16.mxu1 %v12782_v37 }
 0x565   :  { %12785 = vmatpush3.bf16.msra.mxu1 %v12782_v37 }
 0x5ec   :  { %v692_v38 = vpop.f32.mrb[4].mxu1 }
 0x5ed   :  { %v12032_v39 = vpop.f32.mrb[5].mxu1 }
 0x5f0   :  { %v859_v40 = vpop.f32.mrb[6].mxu1 }
 0x5f1   :  { %1198 = vrot.lane.b32.xlu0 %v859_v40, %s13899_s13  ;;  %v12042_v41 = vpop.f32.mrb[7].mxu1  ;;  %v2055_v40 = vld [vmem:[%s15742_s14] sm:$0xff] }
 0x5f2   :  { %v2056_v41 = vld [vmem:[%s15742_s14 + $0x8] sm:$0xff] }
 0x5f4   :  { %v1026_v42 = vpop.f32.mrb[8].mxu1 }
 0x5f5   :  { %1202 = vrot.lane.b32.xlu1 %v1026_v42, %s13889_s2  ;;  %v12052_v43 = vpop.f32.mrb[9].mxu1  ;;  %v2057_v42 = vld [vmem:[%s15742_s14 + $0x10] sm:$0xff] }
 0x5f6   :  { %v12790_v43 = vpack.c.bf16 %v2056_v41, %v2055_v40 }
 0x5f8   :  { %v1193_v44 = vpop.f32.mrb[10].mxu1  ;;  %12791 = vmatprep.subr.bf16.mxu0 %v12790_v43 }
 0x5f9   :  { %1206 = vrot.lane.b32.xlu1 %v1193_v44, %s13925_s3  ;;  %v12062_v45 = vpop.f32.mrb[11].mxu1  ;;  %v2058_v44 = vld [vmem:[%s15742_s14 + $0x18] sm:$0xff] }
 0x5fa   :  { %v12794_v45 = vpack.c.bf16 %v2058_v44, %v2057_v42 }
 0x629   :  { %v1381_v54 = vpop.f32.mrb[12].mxu1 }
 0x62a   :  { %v12072_v55 = vpop.f32.mrb[13].mxu1 }
 0x62d   :  { %v1548_v56 = vpop.f32.mrb[14].mxu1 }
 0x62e   :  { %1887 = vrot.lane.b32.xlu0 %v1548_v56, %s13899_s13  ;;  %v12082_v57 = vpop.f32.mrb[15].mxu1 }
 0x631   :  { %v1715_v58 = vpop.f32.mrb[16].mxu1 }
 0x632   :  { %1891 = vrot.lane.b32.xlu0 %v1715_v58, %s13889_s2  ;;  %v12092_v59 = vpop.f32.mrb[17].mxu1 }
 0x635   :  { %v1882_v60 = vpop.f32.mrb[18].mxu1 }
 0x636   :  { %1895 = vrot.lane.b32.xlu1 %v1882_v60, %s13925_s3  ;;  %v12102_v61 = vpop.f32.mrb[19].mxu1 }
 0x663   :  { %v1199_v62 = vpop.permute.xlu0 %1198 }
 0x664   :  { %v1209_v0 = vsel %vm525_vm2, %v692_v38, %v1199_v62  ;;  %v2053_v38 = vld [vmem:[%s15741_s8 + $0x18] sm:$0xff] }
 0x665   :  { %v12786_v39 = vpack.c.bf16 %v2053_v38, %v2052_v12 }
 0x667   :  { %v1203_v63 = vpop.permute.xlu1 %1202  ;;  %12787 = vmatprep.subr.bf16.mxu1 %v12786_v39 }
 0x668   :  { %v1211_v1 = vsel %vm1210_vm6, %v1209_v0, %v1203_v63  ;;  %12789 = vmatpush3.bf16.msra.mxu1 %v12786_v39 }
 0x66b   :  { %v1207_v2 = vpop.permute.xlu1 %1206 }
 0x66c   :  { %v1213_v3 = vsel %vm1212_vm7, %v1211_v1, %v1207_v2 }
 0x66d   :  { %12111 = vmatprep.mubr.msk.f32.mxu0 %vm440_vm0, %v1213_v3  ;;  %v11435_v3 = vld [vmem:[#allocation10] ss:$0 sm:$0xff] }
 0x6a0   :  { %v1888_v4 = vpop.permute.xlu0 %1887 }
 0x6a1   :  { %v1898_v9 = vsel %vm525_vm2, %v1381_v54, %v1888_v4 }
 0x6a4   :  { %v1892_v6 = vpop.permute.xlu0 %1891 }
 0x6a5   :  { %v1899_v10 = vsel %vm1210_vm6, %v1898_v9, %v1892_v6  ;;  %v11436_v9 = vld [vmem:[#allocation8] ss:$0 sm:$0xff] }
 0x6a8   :  { %v1896_v11 = vpop.permute.xlu1 %1895 }
 0x6a9   :  { %v1900_v14 = vsel %vm1212_vm7, %v1899_v10, %v1896_v11 }
 0x6aa   :  { %12112 = vmatmul.mubr.msk.f32.vlgmr.msra.gmra.mrb[14].mxu0 %vm440_vm0, %v1900_v14 }
 0x6ab   :  { %12793 = vmatpush3.bf16.msra.mxu0 %v12790_v43 }
 0x6ac   :  { %12795 = vmatprep.subr.bf16.mxu0 %v12794_v45 }
 0x6af   :  { %12797 = vmatpush3.bf16.msra.mxu0 %v12794_v45 }
 0x6b0   :  { %12799 = vmatprep.subr.bf16.mxu0 %v12798_v49 }
 0x6b3   :  { %12801 = vmatpush3.bf16.msra.mxu0 %v12798_v49  ;;  %v11446_v49 = vld [vmem:[%s15737_s12 + $0x28] sm:$0xff] }
 0x77d   :  { %v12113_v15 = vpop.f32.mrb[14].mxu0 }
 0x77e   :  { %v1985_v16 = vadd.f32 %v12113_v15, %v11432_v13  ;;  %v1979_v17 = vpop.f32.mrb[15].mxu0 }
 0x77f   :  { %v1980_v18 = vadd.f32 %v11432_v13, %v1979_v17  ;;  %v2061_v17 = vld [vmem:[%s15742_s14 + $0x30] sm:$0xff] }
 0x780   :  { %v1991_v19 = vadd.f32 %v1985_v16, %v14291_v7 }
 0x781   :  { %v1990_v20 = vadd.f32 %v1980_v18, %v14286_v5  ;;  %v2062_v18 = vld [vmem:[%s15742_s14 + $0x38] sm:$0xff] }
 0x782   :  { %v1995_v21 = vsel %vm440_vm0, %v1991_v19, 0.0 }
 0x783   :  { %1996 = vadd.xlane.f32.xlu1 %v1995_v21  ;;  %v1992_v22 = vsel %vm440_vm0, %v1990_v20, 0.0 }
 0x784   :  { %1993 = vadd.xlane.f32.xlu0 %v1992_v22 }
 0x810   :  { %v1997_v23 = vpop.xlane.xlu1 %1996 }
 0x811   :  { %v2000_v24 = vmul.f32 0.03125, %v1997_v23  ;;  %v1994_v25 = vpop.xlane.xlu0 %1993 }
 0x812   :  { %v1999_v26 = vmul.f32 0.03125, %v1994_v25 }
 0x813   :  { %v2002_v27 = vsub.f32 %v1991_v19, %v2000_v24  ;;  %v12802_v19 = vpack.c.bf16 %v2062_v18, %v2061_v17 }
 0x814   :  { %v2001_v28 = vsub.f32 %v1990_v20, %v1999_v26  ;;  %v11437_v20 = vld [vmem:[%s15743_s30] ss:$0 sm:$0xff] }
 0x815   :  { %v2004_v7 = vmul.f32 %v2002_v27, %v2002_v27  ;;  %v2035_v11 = vmul.f32 %v11435_v3, %v2002_v27  ;;  %12803 = vmatprep.subr.bf16.mxu0 %v12802_v19  ;;  %v11440_v27 = vld [vmem:[#allocation2] ss:$0 sm:$0xff] }
 0x816   :  { %v2003_v29 = vmul.f32 %v2001_v28, %v2001_v28  ;;  %v2034_v4 = vmul.f32 %v11435_v3, %v2001_v28  ;;  %12805 = vmatpush3.bf16.msra.mxu0 %v12802_v19 }
 0x817   :  { %v2008_v30 = vsel %vm440_vm0, %v2004_v7, 0.0  ;;  %12165 = vmatprep.subr.mxu0 %v13911_v8 }
 0x818   :  { %v2005_v5 = vsel %vm440_vm0, %v2003_v29, 0.0 }
 0x819   :  { %2006 = vadd.xlane.f32.xlu0 %v2005_v5 }
 0x81d   :  { %2009 = vadd.xlane.f32.xlu0 %v2008_v30 }
 0x8a6   :  { %v2007_v50 = vpop.xlane.xlu0 %2006 }
 0x8a7   :  { %v2012_v51 = vmul.f32 0.032258064, %v2007_v50  ;;  %v11447_v50 = vld [vmem:[%s15737_s12 + $0x30] sm:$0xff] }
 0x8a9   :  { %13102 = vrsqrt.f32 %v2012_v51  ;;  %vm2016_vm8 = vcmp.eq.f32.partialorder %v2012_v51, inf  ;;  %v2019_v57 = vand.u32 2147483648, %v2012_v51  ;;  %vm2018_vm9 = vcmp.eq.f32.partialorder %v2012_v51, 0.0 }
 0x8aa   :  { %v2010_v52 = vpop.xlane.xlu0 %2009 }
 0x8ab   :  { %v2013_v54 = vmul.f32 0.032258064, %v2010_v52  ;;  %v11448_v52 = vld [vmem:[%s15737_s12 + $0x38] sm:$0xff] }
 0x8ad   :  { %13104 = vrsqrt.f32 %v2013_v54  ;;  %vm2023_vm10 = vcmp.eq.f32.partialorder %v2013_v54, inf  ;;  %v2026_v63 = vand.u32 2147483648, %v2013_v54  ;;  %vm2025_vm11 = vcmp.eq.f32.partialorder %v2013_v54, 0.0 }
 0x8b3   :  { %v13103_v55 = vpop.eup %13102 }
 0x8b4   :  { %v2015_v56 = vmul.f32 %v13103_v55, %v2012_v51 }
 0x8b6   :  { %v2017_v58 = vsel %vm2016_vm8, %v2012_v51, %v2015_v56  ;;  %v12806_v51 = vpack.c.bf16 %v11446_v49, %v11445_v48 }
 0x8b7   :  { %v13105_v59 = vpop.eup %13104  ;;  %v2020_v60 = vsel %vm2018_vm9, %v2019_v57, %v2017_v58 }
 0x8b8   :  { %v2022_v61 = vmul.f32 %v13105_v59, %v2013_v54  ;;  %v2036_v62 = vadd.f32 1e-06, %v2020_v60  ;;  %12807 = vmatprep.subr.bf16.mxu1 %v12806_v51 }
 0x8ba   :  { %v2024_v0 = vsel %vm2023_vm10, %v2013_v54, %v2022_v61  ;;  %13106 = vrcp.f32 %v2036_v62  ;;  %v12810_v54 = vpack.c.bf16 %v11448_v52, %v11447_v50 }
 0x8bb   :  { %v2027_v1 = vsel %vm2025_vm11, %v2026_v63, %v2024_v0 }
 0x8bc   :  { %v2037_v2 = vadd.f32 1e-06, %v2027_v1 }
 0x8be   :  { %13108 = vrcp.f32 %v2037_v2 }
 0x8c4   :  { %v13107_v6 = vpop.eup %13106 }
 0x8c5   :  { %v2039_v10 = vmul.f32 %v13107_v6, %v2034_v4 }
 0x8c7   :  { %v2048_v14 = vadd.f32 %v11436_v9, %v2039_v10  ;;  %v11443_v10 = vld [vmem:[%s15744_s0] ss:$0 sm:$0xff] }
 0x8c8   :  { %v13109_v13 = vpop.eup %13108 }
 0x8c9   :  { %v2041_v15 = vmul.f32 %v13109_v13, %v2035_v11  ;;  %12122 = vmatprep.mubr.msk.f32.mxu1 %vm440_vm0, %v2048_v14 }
 0x8cb   :  { %v2049_v16 = vadd.f32 %v11436_v9, %v2041_v15 }
 0x8cd   :  { %12123 = vmatmul.mubr.msk.f32.vlgmr.msra.gmra.mrb[20].mxu1 %vm440_vm0, %v2049_v16 }
 0x8ce   :  { %12809 = vmatpush3.bf16.msra.mxu1 %v12806_v51 }
 0x8cf   :  { %12811 = vmatprep.subr.bf16.mxu1 %v12810_v54 }
 0x8d2   :  { %12813 = vmatpush3.bf16.msra.mxu1 %v12810_v54 }
 0x8d3   :  { %12155 = vmatprep.subr.mxu1 %v13911_v8 }
 0x9a0   :  { %v12124_v21 = vpop.f32.mrb[20].mxu1 }
 0x9a1   :  { %v2148_v22 = vadd.f32 %v12124_v21, %v11437_v20  ;;  %v2142_v23 = vpop.f32.mrb[21].mxu1  ;;  %v11453_v21 = vld [vmem:[#allocation7 + $0x1] ss:$0 sm:$0xff] }
 0x9a2   :  { %v2143_v24 = vadd.f32 %v11437_v20, %v2142_v23 }
 0x9a3   :  { %v2152_v26 = vmax.f32 %v2148_v22, 0.0 }
 0x9a4   :  { %v2151_v25 = vmax.f32 %v2143_v24, 0.0 }
 0x9a6   :  { %12141 = vmatprep.mubr.msk.f32.mxu0 %vm2159_vm12, %v2151_v25 }
 0x9a7   :  { %12142 = vmatmul.mubr.msk.f32.vlgmr.msra.gmra.mrb[16].mxu0 %vm2159_vm12, %v2152_v26 }
 0x9a8   :  { %12167 = vmatprep.mubr.msk.f32.mxu0 %vm13912_vm1, %v13911_v8 }
 0xa7a   :  { %v12143_v28 = vpop.f32.mrb[16].mxu0 }
 0xa7b   :  { %v2238_v29 = vadd.f32 %v12143_v28, %v11440_v27  ;;  %v2232_v5 = vpop.f32.mrb[17].mxu0 }
 0xa7c   :  { %v2233_v7 = vadd.f32 %v11440_v27, %v2232_v5 }
 0xa7d   :  { %v2244_v30 = vadd.f32 %v2238_v29, %v2049_v16  ;;  %v11444_v16 = vld [vmem:[%s15745_s27] ss:$0 sm:$0xff] }
 0xa7e   :  { %v2243_v34 = vadd.f32 %v2233_v7, %v2048_v14 }
 0xa7f   :  { %v2248_v36 = vsel %vm440_vm0, %v2244_v30, 0.0 }
 0xa80   :  { %2249 = vadd.xlane.f32.xlu0 %v2248_v36  ;;  %v2245_v12 = vsel %vm440_vm0, %v2243_v34, 0.0 }
 0xa81   :  { %2246 = vadd.xlane.f32.xlu1 %v2245_v12 }
 0xb0d   :  { %v2250_v37 = vpop.xlane.xlu0 %2249 }
 0xb0e   :  { %v2252_v38 = vmul.f32 0.03125, %v2250_v37  ;;  %v2247_v39 = vpop.xlane.xlu1 %2246 }
 0xb0f   :  { %v2251_v40 = vmul.f32 0.03125, %v2247_v39 }
 0xb10   :  { %v2254_v41 = vsub.f32 %v2244_v30, %v2252_v38 }
 0xb11   :  { %v2253_v42 = vsub.f32 %v2243_v34, %v2251_v40 }
 0xb12   :  { %v2256_v43 = vmul.f32 %v2254_v41, %v2254_v41  ;;  %v2286_v11 = vmul.f32 %v11443_v10, %v2254_v41 }
 0xb13   :  { %v2255_v44 = vmul.f32 %v2253_v42, %v2253_v42  ;;  %v2285_v13 = vmul.f32 %v11443_v10, %v2253_v42 }
 0xb14   :  { %v2260_v45 = vsel %vm440_vm0, %v2256_v43, 0.0 }
 0xb15   :  { %2261 = vadd.xlane.f32.xlu0 %v2260_v45  ;;  %v2257_v46 = vsel %vm440_vm0, %v2255_v44, 0.0 }
 0xb16   :  { %2258 = vadd.xlane.f32.xlu1 %v2257_v46 }
 0xba2   :  { %v2262_v55 = vpop.xlane.xlu0 %2261 }
 0xba3   :  { %v2264_v56 = vmul.f32 0.032258064, %v2262_v55  ;;  %v2259_v57 = vpop.xlane.xlu1 %2258 }
 0xba4   :  { %v2263_v58 = vmul.f32 0.032258064, %v2259_v57 }
 0xba5   :  { %13110 = vrsqrt.f32 %v2264_v56  ;;  %vm2274_vm13 = vcmp.eq.f32.partialorder %v2264_v56, inf  ;;  %v2277_v62 = vand.u32 2147483648, %v2264_v56  ;;  %vm2276_vm14 = vcmp.eq.f32.partialorder %v2264_v56, 0.0 }
 0xba6   :  { %13112 = vrsqrt.f32 %v2263_v58  ;;  %vm2267_vm15 = vcmp.eq.f32.partialorder %v2263_v58, inf  ;;  %v2270_v1 = vand.u32 2147483648, %v2263_v58  ;;  %vm2269_vm3 = vcmp.eq.f32.partialorder %v2263_v58, 0.0 }
 0xbaf   :  { %v13111_v59 = vpop.eup %13110 }
 0xbb0   :  { %v13113_v60 = vpop.eup %13112  ;;  %v2273_v61 = vmul.f32 %v13111_v59, %v2264_v56 }
 0xbb1   :  { %v2266_v63 = vmul.f32 %v13113_v60, %v2263_v58 }
 0xbb2   :  { %v2275_v0 = vsel %vm2274_vm13, %v2264_v56, %v2273_v61 }
 0xbb3   :  { %v2278_v2 = vsel %vm2276_vm14, %v2277_v62, %v2275_v0  ;;  %v2268_v3 = vsel %vm2267_vm15, %v2263_v58, %v2266_v63 }
 0xbb4   :  { %v2288_v4 = vadd.f32 1e-06, %v2278_v2  ;;  %v2271_v6 = vsel %vm2269_vm3, %v2270_v1, %v2268_v3 }
 0xbb5   :  { %v2287_v9 = vadd.f32 1e-06, %v2271_v6 }
 0xbb6   :  { %13114 = vrcp.f32 %v2288_v4 }
 0xbb7   :  { %13116 = vrcp.f32 %v2287_v9 }
 0xbc0   :  { %v13115_v14 = vpop.eup %13114 }
 0xbc1   :  { %v13117_v15 = vpop.eup %13116  ;;  %v2292_v17 = vmul.f32 %v13115_v14, %v2286_v11 }
 0xbc2   :  { %v2290_v18 = vmul.f32 %v13117_v15, %v2285_v13 }
 0xbc3   :  { %v14541_v20 = vadd.f32 %v11444_v16, %v2292_v17 }
 0xbc4   :  { %v14539_v19 = vadd.f32 %v11444_v16, %v2290_v18 }
 0xbc6   :  { %12152 = vmatprep.mubr.msk.f32.mxu1 %vm440_vm0, %v14539_v19 }
 0xbc7   :  { %12153 = vmatmul.mubr.msk.f32.vlgmr.msra.gmra.mrb[22].mxu1 %vm440_vm0, %v14541_v20 }
 0xbc8   :  { %12157 = vmatprep.mubr.msk.f32.mxu1 %vm13912_vm1, %v13911_v8 }
 0xc9a   :  { %v12154_v22 = vpop.f32.mrb[22].mxu1 }
 0xc9b   :  { %v2393_v23 = vpop.f32.mrb[23].mxu1  ;;  %v14563_v25 = vadd.f32 %v12154_v22, %v11453_v21 }
 0xc9c   :  { %v14549_v24 = vadd.f32 %v11453_v21, %v2393_v23 }
 0xc9e   :  { %2570 = vrot.lane.b32.xlu0 %v14549_v24, %s13916_s29  ;;  %2403 = vrot.lane.b32.xlu1 %v14549_v24, %s13914_s17 }
 0xca2   :  { %2735 = vrot.lane.b32.xlu0 %v14549_v24, %s13918_s5  ;;  %2568 = vrot.lane.b32.xlu1 %v14549_v24, %s13913_s11 }
 0xca6   :  { %2902 = vrot.lane.b32.xlu0 %v14549_v24, %s13919_s15  ;;  %2737 = vrot.lane.b32.xlu1 %v14549_v24, %s13915_s9 }
 0xcaa   :  { %3252 = vrot.lane.b32.xlu0 %v14563_v25, %s13916_s29  ;;  %2904 = vrot.lane.b32.xlu1 %v14549_v24, %s13917_s19 }
 0xcae   :  { %3419 = vrot.lane.b32.xlu0 %v14563_v25, %s13915_s9  ;;  %3085 = vrot.lane.b32.xlu1 %v14563_v25, %s13914_s17 }
 0xcb2   :  { %3586 = vrot.lane.b32.xlu0 %v14563_v25, %s13917_s19  ;;  %3250 = vrot.lane.b32.xlu1 %v14563_v25, %s13913_s11 }
 0xcb6   :  { %2492 = vrot.lane.b32.xlu0 %v14549_v24, %s13921_s16  ;;  %3417 = vrot.lane.b32.xlu1 %v14563_v25, %s13918_s5 }
 0xcba   :  { %3584 = vrot.lane.b32.xlu1 %v14563_v25, %s13919_s15 }
 0xcbe   :  { %2659 = vrot.lane.b32.xlu1 %v14549_v24, %s13920_s25 }
 0xd10   :  { %v2571_v26 = vpop.permute.xlu0 %2570  ;;  %v2404_v27 = vpop.permute.xlu1 %2403 }
 0xd11   :  { %12156 = vmatpush3.xpose.msk.msra.mxu1 %vm525_vm2, %v2404_v27  ;;  %12166 = vmatpush3.xpose.msk.msra.mxu0 %vm525_vm2, %v2571_v26 }
 0xd12   :  { %12175 = vmatprep.subr.mxu0 %v13911_v8  ;;  %12160 = vmatprep.subr.mxu1 %v13911_v8 }
 0xd14   :  { %v2736_v28 = vpop.permute.xlu0 %2735  ;;  %12158 = vmatmul.mubr.msk.f32.vlgmr.msra.gmra.mrb[24].mxu1 %vm525_vm2, %v14549_v24  ;;  %v2569_v29 = vpop.permute.xlu1 %2568 }
 0xd15   :  { %12168 = vmatmul.mubr.msk.f32.vlgmr.msra.gmra.mrb[18].mxu0 %vm525_vm2, %v2569_v29  ;;  %12162 = vmatprep.mubr.msk.f32.mxu1 %vm13912_vm1, %v13911_v8 }
 0xd16   :  { %12177 = vmatprep.mubr.msk.f32.mxu0 %vm13912_vm1, %v13911_v8 }
 0xd18   :  { %v2903_v5 = vpop.permute.xlu0 %2902  ;;  %v2738_v7 = vpop.permute.xlu1 %2737 }
 0xd19   :  { %12176 = vmatpush3.xpose.msk.msra.mxu0 %vm525_vm2, %v2738_v7 }
 0xd1a   :  { %12185 = vmatprep.subr.mxu0 %v13911_v8 }
 0xd1c   :  { %v3253_v30 = vpop.permute.xlu0 %3252  ;;  %12178 = vmatmul.mubr.msk.f32.vlgmr.msra.gmra.mrb[20].mxu0 %vm525_vm2, %v2736_v28  ;;  %v2905_v34 = vpop.permute.xlu1 %2904 }
 0xd1d   :  { %12186 = vmatpush3.xpose.msk.msra.mxu0 %vm525_vm2, %v2905_v34  ;;  %12187 = vmatprep.mubr.msk.f32.mxu0 %vm13912_vm1, %v13911_v8 }
 0xd1e   :  { %12195 = vmatprep.subr.mxu0 %v13911_v8 }
 0xd20   :  { %v3420_v36 = vpop.permute.xlu0 %3419  ;;  %12188 = vmatmul.mubr.msk.f32.vlgmr.msra.gmra.mrb[22].mxu0 %vm525_vm2, %v2903_v5  ;;  %v3086_v12 = vpop.permute.xlu1 %3085 }
 0xd21   :  { %12196 = vmatpush3.xpose.msk.msra.mxu0 %vm525_vm2, %v3086_v12  ;;  %12197 = vmatprep.mubr.msk.f32.mxu0 %vm13912_vm1, %v13911_v8 }
 0xd22   :  { %12205 = vmatprep.subr.mxu0 %v13911_v8 }
 0xd24   :  { %v3587_v37 = vpop.permute.xlu0 %3586  ;;  %12198 = vmatmul.mubr.msk.f32.vlgmr.msra.gmra.mrb[24].mxu0 %vm525_vm2, %v14563_v25  ;;  %v3251_v38 = vpop.permute.xlu1 %3250 }
 0xd25   :  { %12206 = vmatpush3.xpose.msk.msra.mxu0 %vm525_vm2, %v3253_v30  ;;  %12207 = vmatprep.mubr.msk.f32.mxu0 %vm13912_vm1, %v13911_v8 }
 0xd26   :  { %12215 = vmatprep.subr.mxu0 %v13911_v8 }
 0xd28   :  { %v2493_v39 = vpop.permute.xlu0 %2492  ;;  %12208 = vmatmul.mubr.msk.f32.vlgmr.msra.gmra.mrb[26].mxu0 %vm525_vm2, %v3251_v38  ;;  %v3418_v40 = vpop.permute.xlu1 %3417 }
 0xd29   :  { %12161 = vmatpush3.msra.mxu1 %v2493_v39  ;;  %12216 = vmatpush3.xpose.msk.msra.mxu0 %vm525_vm2, %v3420_v36 }
 0xd2a   :  { %12217 = vmatprep.mubr.msk.f32.mxu0 %vm13912_vm1, %v13911_v8  ;;  %12225 = vmatprep.subr.mxu0 %v13911_v8 }
 0xd2b   :  { %12170 = vmatprep.subr.mxu1 %v13911_v8 }
 0xd2c   :  { %12218 = vmatmul.mubr.msk.f32.vlgmr.msra.gmra.mrb[28].mxu0 %vm525_vm2, %v3418_v40  ;;  %v3585_v41 = vpop.permute.xlu1 %3584 }
 0xd2d   :  { %12226 = vmatpush3.xpose.msk.msra.mxu0 %vm525_vm2, %v3587_v37  ;;  %12227 = vmatprep.mubr.msk.f32.mxu0 %vm13912_vm1, %v13911_v8 }
 0xd30   :  { %12228 = vmatmul.mubr.msk.f32.vlgmr.msra.gmra.mrb[30].mxu0 %vm525_vm2, %v3585_v41  ;;  %v14653_v28 = vpop.permute.xlu1 %2659 }
 0xde7   :  { %v2475_v42 = vpop.f32.mrb[24].mxu1 }
 0xde8   :  { %v2479_v43 = vmul.f32 0.35355338, %v2475_v42  ;;  %v12159_v44 = vpop.f32.mrb[25].mxu1  ;;  %v2642_v45 = vpop.f32.mrb[18].mxu0 }
 0xde9   :  { %v2646_v46 = vmul.f32 0.35355338, %v2642_v45  ;;  %v12169_v48 = vpop.f32.mrb[19].mxu0 }
 0xdea   :  { %v2480_v49 = vsel %vm607_vm4, -1e+09, %v2479_v43 }
 0xdeb   :  { %v2481_v50 = vsel %vm525_vm2, %v2480_v49, -inf  ;;  %v2647_v51 = vsel %vm607_vm4, -1e+09, %v2646_v46 }
 0xdec   :  { %2482 = vmax.xlane.f32.xlu0 %v2481_v50  ;;  %v2648_v52 = vsel %vm525_vm2, %v2647_v51, -inf }
 0xded   :  { %2649 = vmax.xlane.f32.xlu1 %v2648_v52 }
 0xdef   :  { %v2809_v54 = vpop.f32.mrb[20].mxu0 }
 0xdf0   :  { %v2813_v55 = vmul.f32 0.35355338, %v2809_v54  ;;  %v12179_v56 = vpop.f32.mrb[21].mxu0 }
 0xdf2   :  { %v2814_v57 = vsel %vm607_vm4, -1e+09, %v2813_v55 }
 0xdf3   :  { %v2976_v58 = vpop.f32.mrb[22].mxu0  ;;  %v2815_v59 = vsel %vm525_vm2, %v2814_v57, -inf }
 0xdf4   :  { %v2980_v60 = vmul.f32 0.35355338, %v2976_v58  ;;  %2816 = vmax.xlane.f32.xlu0 %v2815_v59  ;;  %v12189_v61 = vpop.f32.mrb[23].mxu0 }
 0xdf6   :  { %v2981_v62 = vsel %vm607_vm4, -1e+09, %v2980_v60 }
 0xdf7   :  { %v3157_v63 = vpop.f32.mrb[24].mxu0  ;;  %v2982_v0 = vsel %vm525_vm2, %v2981_v62, -inf }
 0xdf8   :  { %v3161_v1 = vmul.f32 0.35355338, %v3157_v63  ;;  %2983 = vmax.xlane.f32.xlu0 %v2982_v0  ;;  %v12199_v2 = vpop.f32.mrb[25].mxu0 }
 0xdfa   :  { %v3162_v3 = vsel %vm1296_vm5, -1e+09, %v3161_v1 }
 0xdfb   :  { %v3324_v4 = vpop.f32.mrb[26].mxu0  ;;  %v3163_v6 = vsel %vm525_vm2, %v3162_v3, -inf }
 0xdfc   :  { %v3328_v9 = vmul.f32 0.35355338, %v3324_v4  ;;  %3164 = vmax.xlane.f32.xlu1 %v3163_v6  ;;  %v12209_v10 = vpop.f32.mrb[27].mxu0 }
 0xdfe   :  { %v3329_v11 = vsel %vm1296_vm5, -1e+09, %v3328_v9 }
 0xdff   :  { %v3491_v14 = vpop.f32.mrb[28].mxu0  ;;  %v3330_v13 = vsel %vm525_vm2, %v3329_v11, -inf }
 0xe00   :  { %v3495_v15 = vmul.f32 0.35355338, %v3491_v14  ;;  %3331 = vmax.xlane.f32.xlu0 %v3330_v13  ;;  %v12219_v16 = vpop.f32.mrb[29].mxu0 }
 0xe02   :  { %v3496_v17 = vsel %vm1296_vm5, -1e+09, %v3495_v15 }
 0xe03   :  { %v3658_v18 = vpop.f32.mrb[30].mxu0  ;;  %v3497_v21 = vsel %vm525_vm2, %v3496_v17, -inf }
 0xe04   :  { %v3662_v22 = vmul.f32 0.35355338, %v3658_v18  ;;  %3498 = vmax.xlane.f32.xlu1 %v3497_v21  ;;  %v12229_v23 = vpop.f32.mrb[31].mxu0 }
 0xe06   :  { %v3663_v26 = vsel %vm1296_vm5, -1e+09, %v3662_v22 }
 0xe07   :  { %v3664_v27 = vsel %vm525_vm2, %v3663_v26, -inf }
 0xe08   :  { %3665 = vmax.xlane.f32.xlu0 %v3664_v27 }
 0xe15   :  { %2993 = vrot.lane.b32.xlu1 %v14549_v24, %s13923_s22 }
 0xe1e   :  { %2826 = vrot.lane.b32.xlu0 %v14549_v24, %s13924_s23 }
 0xe79   :  { %v2483_v29 = vpop.xlane.xlu0 %2482 }
 0xe7a   :  { %v2484_v5 = vsub.f32 %v2480_v49, %v2483_v29  ;;  %v2650_v7 = vpop.xlane.xlu1 %2649 }
 0xe7b   :  { %v2651_v30 = vsub.f32 %v2647_v51, %v2650_v7 }
 0xe7c   :  { %v2485_v34 = vmul.f32 1.442695, %v2484_v5 }
 0xe7d   :  { %v2652_v36 = vmul.f32 1.442695, %v2651_v30 }
 0xe7e   :  { %13118 = vpow2.f32 %v2485_v34 }
 0xe7f   :  { %13120 = vpow2.f32 %v2652_v36 }
 0xe81   :  { %v2817_v12 = vpop.xlane.xlu0 %2816 }
 0xe82   :  { %v2818_v37 = vsub.f32 %v2814_v57, %v2817_v12 }
 0xe84   :  { %v2819_v38 = vmul.f32 1.442695, %v2818_v37 }
 0xe85   :  { %v2984_v39 = vpop.xlane.xlu0 %2983 }
 0xe86   :  { %13122 = vpow2.f32 %v2819_v38  ;;  %v2985_v40 = vsub.f32 %v2981_v62, %v2984_v39 }
 0xe88   :  { %v13119_v41 = vpop.eup %13118  ;;  %v2986_v42 = vmul.f32 1.442695, %v2985_v40 }
 0xe89   :  { %v13121_v43 = vpop.eup %13120  ;;  %v2487_v24 = vsel %vm525_vm2, %v13119_v41, 0.0  ;;  %v3165_v50 = vpop.xlane.xlu1 %3164 }
 0xe8a   :  { %13124 = vpow2.f32 %v2986_v42  ;;  %2488 = vadd.xlane.f32.xlu1 %v2487_v24  ;;  %v2654_v44 = vsel %vm525_vm2, %v13121_v43, 0.0  ;;  %v3166_v51 = vsub.f32 %v3162_v3, %v3165_v50 }
 0xe8b   :  { %2655 = vadd.xlane.f32.xlu0 %v2654_v44 }
 0xe8c   :  { %v3167_v56 = vmul.f32 1.442695, %v3166_v51 }
 0xe8d   :  { %v3332_v52 = vpop.xlane.xlu0 %3331 }
 0xe8e   :  { %v3333_v55 = vsub.f32 %v3329_v11, %v3332_v52  ;;  %13126 = vpow2.f32 %v3167_v56 }
 0xe90   :  { %v13123_v45 = vpop.eup %13122  ;;  %v3334_v59 = vmul.f32 1.442695, %v3333_v55  ;;  %v11450_v55 = vld [vmem:[%s15740_s21 + $0x28] sm:$0xff] }
 0xe91   :  { %v2821_v46 = vsel %vm525_vm2, %v13123_v45, 0.0  ;;  %v3499_v54 = vpop.xlane.xlu1 %3498 }
 0xe92   :  { %2822 = vadd.xlane.f32.xlu1 %v2821_v46  ;;  %v3500_v57 = vsub.f32 %v3496_v17, %v3499_v54  ;;  %13128 = vpow2.f32 %v3334_v59  ;;  %v11449_v54 = vld [vmem:[%s15740_s21 + $0x20] sm:$0xff] }
 0xe93   :  { %v12814_v56 = vpack.c.bf16 %v11450_v55, %v11449_v54  ;;  %v11493_v55 = vld [vmem:[%s15742_s14 + $0x58] sm:$0xff] }
 0xe94   :  { %v14658_v48 = vpop.eup %13124  ;;  %v3501_v60 = vmul.f32 1.442695, %v3500_v57  ;;  %v11451_v57 = vld [vmem:[%s15740_s21 + $0x30] sm:$0xff] }
 0xe95   :  { %v2988_v49 = vsel %vm525_vm2, %v14658_v48, 0.0  ;;  %v3666_v58 = vpop.xlane.xlu0 %3665  ;;  %v2994_v10 = vpop.permute.xlu1 %2993  ;;  %12815 = vmatprep.subr.bf16.mxu0 %v12814_v56 }
 0xe96   :  { %2989 = vadd.xlane.f32.xlu0 %v2988_v49  ;;  %v3667_v61 = vsub.f32 %v3663_v26, %v3666_v58  ;;  %13130 = vpow2.f32 %v3501_v60  ;;  %12817 = vmatpush3.bf16.msra.mxu0 %v12814_v56  ;;  %v11452_v58 = vld [vmem:[%s15740_s21 + $0x38] sm:$0xff] }
 0xe97   :  { %v12818_v59 = vpack.c.bf16 %v11452_v58, %v11451_v57  ;;  %v11494_v57 = vld [vmem:[%s15742_s14 + $0x60] sm:$0xff]  ;;  %v11495_v58 = vld [vmem:[%s15742_s14 + $0x68] sm:$0xff] }
 0xe98   :  { %v3668_v62 = vmul.f32 1.442695, %v3667_v61  ;;  %v13127_v63 = vpop.eup %13126 }
 0xe99   :  { %v3169_v1 = vsel %vm525_vm2, %v13127_v63, 0.0  ;;  %v2827_v11 = vpop.permute.xlu0 %2826  ;;  %12819 = vmatprep.subr.bf16.mxu0 %v12818_v59 }
 0xe9a   :  { %13132 = vpow2.f32 %v3668_v62  ;;  %12821 = vmatpush3.bf16.msra.mxu0 %v12818_v59  ;;  %v12838_v59 = vpack.c.bf16 %v11495_v58, %v11494_v57 }
 0xe9c   :  { %v14666_v0 = vpop.eup %13128 }
 0xe9d   :  { %v3336_v3 = vsel %vm525_vm2, %v14666_v0, 0.0 }
 0xea0   :  { %v14669_v2 = vpop.eup %13130 }
 0xea1   :  { %v3503_v4 = vsel %vm525_vm2, %v14669_v2, 0.0 }
 0xea3   :  { %3341 = vrot.lane.b32.xlu1 %v14563_v25, %s13920_s25 }
 0xea4   :  { %v14675_v6 = vpop.eup %13132 }
 0xea5   :  { %v3670_v9 = vsel %vm525_vm2, %v14675_v6, 0.0 }
 0xeac   :  { %3174 = vrot.lane.b32.xlu0 %v14563_v25, %s13921_s16 }
 0xec7   :  { %3170 = vadd.xlane.f32.xlu1 %v3169_v1 }
 0xecb   :  { %3337 = vadd.xlane.f32.xlu0 %v3336_v3  ;;  %3504 = vadd.xlane.f32.xlu1 %v3503_v4 }
 0xecf   :  { %3671 = vadd.xlane.f32.xlu1 %v3670_v9 }
 0xee0   :  { %3675 = vrot.lane.b32.xlu1 %v14563_v25, %s13923_s22 }
 0xee1   :  { %3508 = vrot.lane.b32.xlu0 %v14563_v25, %s13924_s23 }
 0xf17   :  { %v2489_v14 = vpop.xlane.xlu1 %2488 }
 0xf18   :  { %13134 = vrcp.f32 %v2489_v14  ;;  %v2656_v13 = vpop.xlane.xlu0 %2655 }
 0xf19   :  { %13136 = vrcp.f32 %v2656_v13 }
 0xf1f   :  { %v2823_v15 = vpop.xlane.xlu1 %2822 }
 0xf20   :  { %13138 = vrcp.f32 %v2823_v15 }
 0xf22   :  { %v13135_v16 = vpop.eup %13134 }
 0xf23   :  { %v2990_v17 = vpop.xlane.xlu0 %2989  ;;  %v2491_v18 = vmul.f32 %v13135_v16, %v13119_v41  ;;  %v13137_v21 = vpop.eup %13136 }
 0xf24   :  { %13140 = vrcp.f32 %v2990_v17  ;;  %v2658_v25 = vmul.f32 %v13137_v21, %v13121_v43  ;;  %v3342_v29 = vpop.permute.xlu1 %3341 }
 0xf25   :  { %12163 = vmatmul.mubr.msk.f32.vlgmr.msra.gmra.mrb[26].mxu1 %vm525_vm2, %v2491_v18 }
 0xf26   :  { %12171 = vmatpush3.msra.mxu1 %v14653_v28  ;;  %12172 = vmatprep.mubr.msk.f32.mxu1 %vm13912_vm1, %v13911_v8 }
 0xf27   :  { %12180 = vmatprep.subr.mxu1 %v13911_v8  ;;  %v3175_v28 = vpop.permute.xlu0 %3174 }
 0xf29   :  { %12173 = vmatmul.mubr.msk.f32.vlgmr.msra.gmra.mrb[28].mxu1 %vm525_vm2, %v2658_v25  ;;  %v11480_v25 = vld [vmem:[#allocation5 + $0x1] ss:$0 sm:$0xff] }
 0xf2a   :  { %v13139_v22 = vpop.eup %13138  ;;  %12181 = vmatpush3.msra.mxu1 %v2827_v11  ;;  %12182 = vmatprep.mubr.msk.f32.mxu1 %vm13912_vm1, %v13911_v8 }
 0xf2b   :  { %12190 = vmatprep.subr.mxu1 %v13911_v8  ;;  %v2825_v23 = vmul.f32 %v13139_v22, %v13123_v45 }
 0xf2d   :  { %12183 = vmatmul.mubr.msk.f32.vlgmr.msra.gmra.mrb[30].mxu1 %vm525_vm2, %v2825_v23 }
 0xf2e   :  { %v13141_v26 = vpop.eup %13140  ;;  %12191 = vmatpush3.msra.mxu1 %v2994_v10  ;;  %12192 = vmatprep.mubr.msk.f32.mxu1 %vm13912_vm1, %v13911_v8 }
 0xf2f   :  { %12200 = vmatprep.subr.mxu1 %v13911_v8  ;;  %v2992_v27 = vmul.f32 %v13141_v26, %v14658_v48 }
 0xf31   :  { %12193 = vmatmul.mubr.msk.f32.vlgmr.msra.gmra.mrb[32].mxu1 %vm525_vm2, %v2992_v27 }
 0xf32   :  { %12201 = vmatpush3.msra.mxu1 %v3175_v28  ;;  %12202 = vmatprep.mubr.msk.f32.mxu1 %vm13912_vm1, %v13911_v8 }
 0xf33   :  { %12210 = vmatprep.subr.mxu1 %v13911_v8 }
 0xf54   :  { %v3171_v5 = vpop.xlane.xlu1 %3170 }
 0xf55   :  { %13142 = vrcp.f32 %v3171_v5 }
 0xf58   :  { %v3338_v7 = vpop.xlane.xlu0 %3337  ;;  %v3505_v30 = vpop.xlane.xlu1 %3504 }
 0xf59   :  { %13144 = vrcp.f32 %v3338_v7 }
 0xf5a   :  { %13146 = vrcp.f32 %v3505_v30 }
 0xf5c   :  { %v3672_v34 = vpop.xlane.xlu1 %3671  ;;  %v3509_v40 = vpop.permute.xlu0 %3508 }
 0xf5d   :  { %13148 = vrcp.f32 %v3672_v34 }
 0xf5f   :  { %v13143_v36 = vpop.eup %13142 }
 0xf60   :  { %v3173_v12 = vmul.f32 %v13143_v36, %v13127_v63  ;;  %v3676_v43 = vpop.permute.xlu1 %3675 }
 0xf62   :  { %12203 = vmatmul.mubr.msk.f32.vlgmr.msra.gmra.mrb[34].mxu1 %vm525_vm2, %v3173_v12 }
 0xf63   :  { %v13145_v37 = vpop.eup %13144  ;;  %12211 = vmatpush3.msra.mxu1 %v3342_v29  ;;  %12212 = vmatprep.mubr.msk.f32.mxu1 %vm13912_vm1, %v13911_v8 }
 0xf64   :  { %12220 = vmatprep.subr.mxu1 %v13911_v8  ;;  %v3340_v38 = vmul.f32 %v13145_v37, %v14666_v0  ;;  %v13147_v39 = vpop.eup %13146 }
 0xf65   :  { %v3507_v41 = vmul.f32 %v13147_v39, %v14669_v2 }
 0xf66   :  { %12213 = vmatmul.mubr.msk.f32.vlgmr.msra.gmra.mrb[36].mxu1 %vm525_vm2, %v3340_v38 }
 0xf67   :  { %12221 = vmatpush3.msra.mxu1 %v3509_v40  ;;  %12222 = vmatprep.mubr.msk.f32.mxu1 %vm13912_vm1, %v13911_v8  ;;  %v13149_v42 = vpop.eup %13148 }
 0xf68   :  { %12230 = vmatprep.subr.mxu1 %v13911_v8  ;;  %v3674_v24 = vmul.f32 %v13149_v42, %v14675_v6  ;;  %v11486_v42 = vld [vmem:[%s15741_s8 + $0x28] sm:$0xff] }
 0xf6a   :  { %12223 = vmatmul.mubr.msk.f32.vlgmr.msra.gmra.mrb[38].mxu1 %vm525_vm2, %v3507_v41  ;;  %v11485_v41 = vld [vmem:[%s15741_s8 + $0x20] sm:$0xff] }
 0xf6b   :  { %12231 = vmatpush3.msra.mxu1 %v3676_v43  ;;  %12232 = vmatprep.mubr.msk.f32.mxu1 %vm13912_vm1, %v13911_v8  ;;  %v11487_v43 = vld [vmem:[%s15741_s8 + $0x30] sm:$0xff] }
 0xf6e   :  { %12233 = vmatmul.mubr.msk.f32.vlgmr.msra.gmra.mrb[40].mxu1 %vm525_vm2, %v3674_v24  ;;  %v12822_v24 = vpack.c.bf16 %v11486_v42, %v11485_v41 }
 0xf70   :  { %12823 = vmatprep.subr.bf16.mxu1 %v12822_v24 }
 0xf71   :  { %12825 = vmatpush3.bf16.msra.mxu1 %v12822_v24 }
 0xff8   :  { %v2564_v44 = vpop.f32.mrb[26].mxu1 }
 0xff9   :  { %v12164_v45 = vpop.f32.mrb[27].mxu1 }
 0xffc   :  { %v2731_v46 = vpop.f32.mrb[28].mxu1 }
 0xffd   :  { %3070 = vrot.lane.b32.xlu0 %v2731_v46, %s13899_s13  ;;  %v12174_v48 = vpop.f32.mrb[29].mxu1  ;;  %v4171_v46 = vld [vmem:[#allocation31] sm:$0xff] }
 0xffe   :  { %v4172_v48 = vld [vmem:[#allocation31 + $0x8] sm:$0xff] }
0x1000   :  { %v2898_v49 = vpop.f32.mrb[30].mxu1 }
0x1001   :  { %3074 = vrot.lane.b32.xlu1 %v2898_v49, %s13889_s2  ;;  %v12184_v50 = vpop.f32.mrb[31].mxu1  ;;  %v12846_v49 = vpack.c.bf16 %v4172_v48, %v4171_v46 }
0x1002   :  { %v11490_v50 = vld [vmem:[%s15742_s14 + $0x40] sm:$0xff] }
0x1004   :  { %v3065_v51 = vpop.f32.mrb[32].mxu1 }
0x1005   :  { %3078 = vrot.lane.b32.xlu1 %v3065_v51, %s13925_s3  ;;  %v12194_v52 = vpop.f32.mrb[33].mxu1  ;;  %v11491_v51 = vld [vmem:[%s15742_s14 + $0x48] sm:$0xff] }
0x1006   :  { %v11492_v52 = vld [vmem:[%s15742_s14 + $0x50] sm:$0xff]  ;;  %v12830_v54 = vpack.c.bf16 %v11491_v51, %v11490_v50 }
0x1007   :  { %v12834_v56 = vpack.c.bf16 %v11493_v55, %v11492_v52 }
0x1008   :  { %12831 = vmatprep.subr.bf16.mxu0 %v12830_v54 }
0x1035   :  { %v3246_v60 = vpop.f32.mrb[34].mxu1 }
0x1036   :  { %v12204_v61 = vpop.f32.mrb[35].mxu1 }
0x1039   :  { %v3413_v62 = vpop.f32.mrb[36].mxu1 }
0x103a   :  { %3752 = vrot.lane.b32.xlu0 %v3413_v62, %s13899_s13  ;;  %v12214_v63 = vpop.f32.mrb[37].mxu1 }
0x103d   :  { %v3580_v0 = vpop.f32.mrb[38].mxu1 }
0x103e   :  { %3756 = vrot.lane.b32.xlu0 %v3580_v0, %s13889_s2  ;;  %v12224_v1 = vpop.f32.mrb[39].mxu1 }
0x1041   :  { %v3747_v2 = vpop.f32.mrb[40].mxu1 }
0x1042   :  { %3760 = vrot.lane.b32.xlu1 %v3747_v2, %s13925_s3  ;;  %v12234_v3 = vpop.f32.mrb[41].mxu1 }
0x106f   :  { %v3071_v4 = vpop.permute.xlu0 %3070 }
0x1070   :  { %v3081_v9 = vsel %vm525_vm2, %v2564_v44, %v3071_v4  ;;  %v11488_v44 = vld [vmem:[%s15741_s8 + $0x38] sm:$0xff] }
0x1071   :  { %v12826_v45 = vpack.c.bf16 %v11488_v44, %v11487_v43  ;;  %v11508_v43 = vld [vmem:[#allocation17] ss:$0 sm:$0xff] }
0x1073   :  { %v3075_v6 = vpop.permute.xlu1 %3074  ;;  %12827 = vmatprep.subr.bf16.mxu1 %v12826_v45 }
0x1074   :  { %v3082_v10 = vsel %vm1210_vm6, %v3081_v9, %v3075_v6  ;;  %12829 = vmatpush3.bf16.msra.mxu1 %v12826_v45 }
0x1075   :  { %12847 = vmatprep.subr.bf16.mxu1 %v12846_v49 }
0x1077   :  { %v3079_v11 = vpop.permute.xlu1 %3078 }
0x1078   :  { %v3083_v14 = vsel %vm1212_vm7, %v3082_v10, %v3079_v11 }
0x1079   :  { %12243 = vmatprep.mubr.msk.f32.mxu0 %vm440_vm0, %v3083_v14 }
0x10ac   :  { %v3753_v13 = vpop.permute.xlu0 %3752 }
0x10ad   :  { %v3763_v16 = vsel %vm525_vm2, %v3246_v60, %v3753_v13 }
0x10b0   :  { %v3757_v15 = vpop.permute.xlu0 %3756 }
0x10b1   :  { %v3764_v17 = vsel %vm1210_vm6, %v3763_v16, %v3757_v15  ;;  %v11483_v16 = vld [vmem:[#allocation10 + $0x1] ss:$0 sm:$0xff] }
0x10b4   :  { %v3761_v18 = vpop.permute.xlu1 %3760 }
0x10b5   :  { %v3765_v21 = vsel %vm1212_vm7, %v3764_v17, %v3761_v18 }
0x10b6   :  { %12244 = vmatmul.mubr.msk.f32.vlgmr.msra.gmra.mrb[32].mxu0 %vm440_vm0, %v3765_v21  ;;  %v11484_v21 = vld [vmem:[#allocation8 + $0x1] ss:$0 sm:$0xff] }
0x10b7   :  { %12833 = vmatpush3.bf16.msra.mxu0 %v12830_v54 }
0x10b8   :  { %12835 = vmatprep.subr.bf16.mxu0 %v12834_v56 }
0x10bb   :  { %12837 = vmatpush3.bf16.msra.mxu0 %v12834_v56 }
0x10bc   :  { %12839 = vmatprep.subr.bf16.mxu0 %v12838_v59 }
0x10bf   :  { %12841 = vmatpush3.bf16.msra.mxu0 %v12838_v59 }
0x1189   :  { %v12245_v22 = vpop.f32.mrb[32].mxu0 }
0x118a   :  { %v3850_v23 = vadd.f32 %v12245_v22, %v11480_v25  ;;  %v3844_v26 = vpop.f32.mrb[33].mxu0 }
0x118b   :  { %v3845_v27 = vadd.f32 %v11480_v25, %v3844_v26 }
0x118c   :  { %v3858_v28 = vadd.f32 %v3850_v23, %v14541_v20 }
0x118d   :  { %v3857_v29 = vadd.f32 %v3845_v27, %v14539_v19  ;;  %v4173_v27 = vld [vmem:[#allocation31 + $0x10] sm:$0xff] }
0x118e   :  { %v3862_v5 = vsel %vm440_vm0, %v3858_v28, 0.0 }
0x118f   :  { %3863 = vadd.xlane.f32.xlu1 %v3862_v5  ;;  %v3859_v7 = vsel %vm440_vm0, %v3857_v29, 0.0 }
0x1190   :  { %3860 = vadd.xlane.f32.xlu0 %v3859_v7 }
0x121c   :  { %v3864_v30 = vpop.xlane.xlu1 %3863 }
0x121d   :  { %v3866_v34 = vmul.f32 0.03125, %v3864_v30  ;;  %v3861_v36 = vpop.xlane.xlu0 %3860  ;;  %v14762_v30 = vld [vmem:[%s15746_s26] sm:$0xff] }
0x121e   :  { %v3865_v12 = vmul.f32 0.03125, %v3861_v36  ;;  %v11496_v36 = vld [vmem:[%s15742_s14 + $0x70] sm:$0xff] }
0x121f   :  { %v14738_v37 = vsub.f32 %v3858_v28, %v3866_v34  ;;  %v4174_v28 = vld [vmem:[#allocation31 + $0x18] sm:$0xff]  ;;  %v14769_v34 = vld [vmem:[%s15746_s26 + $0x8] sm:$0xff] }
0x1220   :  { %v3867_v38 = vsub.f32 %v3857_v29, %v3865_v12  ;;  %v12850_v7 = vpack.c.bf16 %v4174_v28, %v4173_v27  ;;  %v11497_v12 = vld [vmem:[%s15742_s14 + $0x78] sm:$0xff] }
0x1221   :  { %v3870_v39 = vmul.f32 %v14738_v37, %v14738_v37  ;;  %v3900_v22 = vmul.f32 %v11483_v16, %v14738_v37  ;;  %v12842_v37 = vpack.c.bf16 %v11497_v12, %v11496_v36 }
0x1222   :  { %v3869_v20 = vmul.f32 %v3867_v38, %v3867_v38  ;;  %v3899_v17 = vmul.f32 %v11483_v16, %v3867_v38  ;;  %v11498_v38 = vld [vmem:[%s15743_s30 + $0x1] ss:$0 sm:$0xff] }
0x1223   :  { %v3874_v40 = vsel %vm440_vm0, %v3870_v39, 0.0  ;;  %12843 = vmatprep.subr.bf16.mxu0 %v12842_v37 }
0x1224   :  { %v3871_v19 = vsel %vm440_vm0, %v3869_v20, 0.0  ;;  %12845 = vmatpush3.bf16.msra.mxu0 %v12842_v37 }
0x1225   :  { %3872 = vadd.xlane.f32.xlu0 %v3871_v19  ;;  %12297 = vmatprep.subr.mxu0 %v13911_v8 }
0x1229   :  { %3875 = vadd.xlane.f32.xlu0 %v3874_v40 }
0x12b2   :  { %v3873_v60 = vpop.xlane.xlu0 %3872 }
0x12b3   :  { %v3877_v61 = vmul.f32 0.032258064, %v3873_v60 }
0x12b5   :  { %13150 = vrsqrt.f32 %v3877_v61  ;;  %vm3881_vm8 = vcmp.eq.f32.partialorder %v3877_v61, inf  ;;  %v3884_v2 = vand.u32 2147483648, %v3877_v61  ;;  %vm3883_vm9 = vcmp.eq.f32.partialorder %v3877_v61, 0.0 }
0x12b6   :  { %v3876_v62 = vpop.xlane.xlu0 %3875 }
0x12b7   :  { %v3878_v63 = vmul.f32 0.032258064, %v3876_v62 }
0x12b9   :  { %13152 = vrsqrt.f32 %v3878_v63  ;;  %vm3888_vm10 = vcmp.eq.f32.partialorder %v3878_v63, inf  ;;  %v3891_v11 = vand.u32 2147483648, %v3878_v63  ;;  %vm3890_vm11 = vcmp.eq.f32.partialorder %v3878_v63, 0.0 }
0x12bf   :  { %v13151_v0 = vpop.eup %13150 }
0x12c0   :  { %v3880_v1 = vmul.f32 %v13151_v0, %v3877_v61 }
0x12c2   :  { %v3882_v3 = vsel %vm3881_vm8, %v3877_v61, %v3880_v1 }
0x12c3   :  { %v13153_v4 = vpop.eup %13152  ;;  %v3885_v6 = vsel %vm3883_vm9, %v3884_v2, %v3882_v3  ;;  %v423_v2 = vld [vmem:[%s15747_s7] sm:$0x3] }
0x12c4   :  { %v3887_v9 = vmul.f32 %v13153_v4, %v3878_v63  ;;  %v3901_v10 = vadd.f32 1e-06, %v3885_v6  ;;  %vm4346_vm13 = vcmp.gt.f32.partialorder %v423_v2, 0.5 }
0x12c5   :  { %v4347_v3 = vsel %vm4346_vm13, 1, %v13922_v33 }
0x12c6   :  { %v3889_v14 = vsel %vm3888_vm10, %v3878_v63, %v3887_v9  ;;  %13154 = vrcp.f32 %v3901_v10  ;;  %v14868_v4 = vrot.slane %v4347_v3, %v605_v32  ;;  %v14882_v27 = vrot.slane %v4347_v3, %v1294_v47 }
0x12c7   :  { %v3892_v13 = vsel %vm3890_vm11, %v3891_v11, %v3889_v14 }
0x12c8   :  { %v3902_v15 = vadd.f32 1e-06, %v3892_v13  ;;  %vm4352_vm14 = vcmp.eq.s32.totalorder %v14868_v4, 1  ;;  %vm5039_vm15 = vcmp.eq.s32.totalorder %v14882_v27, 1 }
0x12ca   :  { %13156 = vrcp.f32 %v3902_v15 }
0x12d0   :  { %v13155_v18 = vpop.eup %13154 }
0x12d1   :  { %v3904_v25 = vmul.f32 %v13155_v18, %v3899_v17 }
0x12d3   :  { %v14755_v23 = vadd.f32 %v11484_v21, %v3904_v25 }
0x12d4   :  { %v13157_v26 = vpop.eup %13156 }
0x12d5   :  { %v3906_v29 = vmul.f32 %v13157_v26, %v3900_v22  ;;  %12254 = vmatprep.mubr.msk.f32.mxu1 %vm440_vm0, %v14755_v23 }
0x12d7   :  { %v14759_v5 = vadd.f32 %v11484_v21, %v3906_v29 }
0x12d9   :  { %12255 = vmatmul.mubr.msk.f32.vlgmr.msra.gmra.mrb[42].mxu1 %vm440_vm0, %v14759_v5 }
0x12da   :  { %12849 = vmatpush3.bf16.msra.mxu1 %v12846_v49  ;;  %12284 = vmatprep.mubr.msk.f32.mxu1 %vm440_vm0, %v14762_v30 }
0x12db   :  { %12851 = vmatprep.subr.bf16.mxu1 %v12850_v7 }
0x12de   :  { %12853 = vmatpush3.bf16.msra.mxu1 %v12850_v7 }
0x12df   :  { %12287 = vmatprep.subr.mxu1 %v13911_v8 }
0x12e1   :  { %12285 = vmatmul.mubr.msk.f32.vlgmr.msra.gmra.mrb[44].mxu1 %vm440_vm0, %v14769_v34 }
0x12e2   :  { %12289 = vmatprep.mubr.msk.f32.mxu1 %vm13912_vm1, %v13911_v8 }
0x13ac   :  { %v12256_v20 = vpop.f32.mrb[42].mxu1 }
0x13ad   :  { %v4017_v19 = vadd.f32 %v12256_v20, %v11498_v38  ;;  %v4011_v39 = vpop.f32.mrb[43].mxu1 }
0x13ae   :  { %v4012_v40 = vadd.f32 %v11498_v38, %v4011_v39 }
0x13af   :  { %v4021_v42 = vmax.f32 %v4017_v19, 0.0 }
0x13b0   :  { %v4020_v41 = vmax.f32 %v4012_v40, 0.0 }
0x13b2   :  { %12273 = vmatprep.mubr.msk.f32.mxu0 %vm2159_vm12, %v4020_v41 }
0x13b3   :  { %12274 = vmatmul.mubr.msk.f32.vlgmr.msra.gmra.mrb[34].mxu0 %vm2159_vm12, %v4021_v42 }
0x13b4   :  { %v12286_v24 = vpop.f32.mrb[44].mxu1  ;;  %12299 = vmatprep.mubr.msk.f32.mxu0 %vm13912_vm1, %v13911_v8 }
0x13b5   :  { %v4259_v44 = vpop.f32.mrb[45].mxu1  ;;  %v14798_v46 = vadd.f32 %v12286_v24, %v11508_v43 }
0x13b6   :  { %v14784_v45 = vadd.f32 %v11508_v43, %v4259_v44 }
0x13b8   :  { %4443 = vrot.lane.b32.xlu0 %v14784_v45, %s13916_s29  ;;  %4269 = vrot.lane.b32.xlu1 %v14784_v45, %s13914_s17 }
0x13bc   :  { %4608 = vrot.lane.b32.xlu0 %v14784_v45, %s13918_s5  ;;  %4441 = vrot.lane.b32.xlu1 %v14784_v45, %s13913_s11 }
0x13c0   :  { %4775 = vrot.lane.b32.xlu0 %v14784_v45, %s13919_s15  ;;  %4610 = vrot.lane.b32.xlu1 %v14784_v45, %s13915_s9 }
0x13c4   :  { %5130 = vrot.lane.b32.xlu0 %v14798_v46, %s13916_s29  ;;  %4777 = vrot.lane.b32.xlu1 %v14784_v45, %s13917_s19 }
0x13c8   :  { %5297 = vrot.lane.b32.xlu0 %v14798_v46, %s13915_s9  ;;  %4958 = vrot.lane.b32.xlu1 %v14798_v46, %s13914_s17 }
0x13cc   :  { %5464 = vrot.lane.b32.xlu0 %v14798_v46, %s13917_s19  ;;  %5128 = vrot.lane.b32.xlu1 %v14798_v46, %s13913_s11 }
0x13d0   :  { %4365 = vrot.lane.b32.xlu0 %v14784_v45, %s13921_s16  ;;  %5295 = vrot.lane.b32.xlu1 %v14798_v46, %s13918_s5 }
0x13d4   :  { %5462 = vrot.lane.b32.xlu1 %v14798_v46, %s13919_s15 }
0x13d8   :  { %4532 = vrot.lane.b32.xlu1 %v14784_v45, %s13920_s25 }
0x142a   :  { %v4444_v48 = vpop.permute.xlu0 %4443  ;;  %v4270_v49 = vpop.permute.xlu1 %4269 }
0x142b   :  { %12288 = vmatpush3.xpose.msk.msra.mxu1 %vm525_vm2, %v4270_v49  ;;  %12298 = vmatpush3.xpose.msk.msra.mxu0 %vm525_vm2, %v4444_v48 }
0x142c   :  { %12307 = vmatprep.subr.mxu0 %v13911_v8  ;;  %12292 = vmatprep.subr.mxu1 %v13911_v8 }
0x142e   :  { %v4609_v50 = vpop.permute.xlu0 %4608  ;;  %12290 = vmatmul.mubr.msk.f32.vlgmr.msra.gmra.mrb[46].mxu1 %vm525_vm2, %v14784_v45  ;;  %v4442_v51 = vpop.permute.xlu1 %4441 }
0x142f   :  { %12300 = vmatmul.mubr.msk.f32.vlgmr.msra.gmra.mrb[36].mxu0 %vm525_vm2, %v4442_v51  ;;  %12294 = vmatprep.mubr.msk.f32.mxu1 %vm13912_vm1, %v13911_v8 }
0x1430   :  { %12309 = vmatprep.mubr.msk.f32.mxu0 %vm13912_vm1, %v13911_v8 }
0x1432   :  { %v4776_v52 = vpop.permute.xlu0 %4775  ;;  %v4611_v54 = vpop.permute.xlu1 %4610 }
0x1433   :  { %12308 = vmatpush3.xpose.msk.msra.mxu0 %vm525_vm2, %v4611_v54 }
0x1434   :  { %12317 = vmatprep.subr.mxu0 %v13911_v8 }
0x1436   :  { %v5131_v55 = vpop.permute.xlu0 %5130  ;;  %v4778_v56 = vpop.permute.xlu1 %4777  ;;  %12310 = vmatmul.mubr.msk.f32.vlgmr.msra.gmra.mrb[38].mxu0 %vm525_vm2, %v4609_v50 }
0x1437   :  { %12318 = vmatpush3.xpose.msk.msra.mxu0 %vm525_vm2, %v4778_v56  ;;  %12319 = vmatprep.mubr.msk.f32.mxu0 %vm13912_vm1, %v13911_v8 }
0x1438   :  { %12327 = vmatprep.subr.mxu0 %v13911_v8 }
0x143a   :  { %v5298_v57 = vpop.permute.xlu0 %5297  ;;  %v4959_v58 = vpop.permute.xlu1 %4958  ;;  %12320 = vmatmul.mubr.msk.f32.vlgmr.msra.gmra.mrb[40].mxu0 %vm525_vm2, %v4776_v52 }
0x143b   :  { %12328 = vmatpush3.xpose.msk.msra.mxu0 %vm525_vm2, %v4959_v58  ;;  %12329 = vmatprep.mubr.msk.f32.mxu0 %vm13912_vm1, %v13911_v8 }
0x143c   :  { %12337 = vmatprep.subr.mxu0 %v13911_v8 }
0x143e   :  { %v5465_v59 = vpop.permute.xlu0 %5464  ;;  %v5129_v60 = vpop.permute.xlu1 %5128  ;;  %12330 = vmatmul.mubr.msk.f32.vlgmr.msra.gmra.mrb[42].mxu0 %vm525_vm2, %v14798_v46 }
0x143f   :  { %12338 = vmatpush3.xpose.msk.msra.mxu0 %vm525_vm2, %v5131_v55  ;;  %12339 = vmatprep.mubr.msk.f32.mxu0 %vm13912_vm1, %v13911_v8 }
0x1440   :  { %12347 = vmatprep.subr.mxu0 %v13911_v8 }
0x1442   :  { %v4366_v61 = vpop.permute.xlu0 %4365  ;;  %12340 = vmatmul.mubr.msk.f32.vlgmr.msra.gmra.mrb[44].mxu0 %vm525_vm2, %v5129_v60  ;;  %v5296_v62 = vpop.permute.xlu1 %5295 }
0x1443   :  { %12293 = vmatpush3.msra.mxu1 %v4366_v61  ;;  %12348 = vmatpush3.xpose.msk.msra.mxu0 %vm525_vm2, %v5298_v57 }
0x1444   :  { %12349 = vmatprep.mubr.msk.f32.mxu0 %vm13912_vm1, %v13911_v8  ;;  %12357 = vmatprep.subr.mxu0 %v13911_v8 }
0x1445   :  { %12302 = vmatprep.subr.mxu1 %v13911_v8 }
0x1446   :  { %12350 = vmatmul.mubr.msk.f32.vlgmr.msra.gmra.mrb[46].mxu0 %vm525_vm2, %v5296_v62  ;;  %v5463_v63 = vpop.permute.xlu1 %5462 }
0x1447   :  { %12358 = vmatpush3.xpose.msk.msra.mxu0 %vm525_vm2, %v5465_v59  ;;  %12359 = vmatprep.mubr.msk.f32.mxu0 %vm13912_vm1, %v13911_v8 }
0x144a   :  { %12360 = vmatmul.mubr.msk.f32.vlgmr.msra.gmra.mrb[48].mxu0 %vm525_vm2, %v5463_v63  ;;  %v14904_v55 = vpop.permute.xlu1 %4532 }
0x1486   :  { %v14860_v0 = vpop.f32.mrb[34].mxu0 }
0x1487   :  { %v14862_v1 = vpop.f32.mrb[35].mxu0 }
0x1501   :  { %v4341_v6 = vpop.f32.mrb[46].mxu1 }
0x1502   :  { %v4345_v9 = vmul.f32 0.35355338, %v4341_v6  ;;  %v12291_v10 = vpop.f32.mrb[47].mxu1  ;;  %v4515_v11 = vpop.f32.mrb[36].mxu0 }
0x1503   :  { %v4519_v14 = vmul.f32 0.35355338, %v4515_v11  ;;  %v12301_v13 = vpop.f32.mrb[37].mxu0 }
0x1504   :  { %v4353_v15 = vsel %vm4352_vm14, -1e+09, %v4345_v9 }
0x1505   :  { %v4520_v16 = vsel %vm4352_vm14, -1e+09, %v4519_v14  ;;  %v4354_v33 = vsel %vm525_vm2, %v4353_v15, -inf }
0x1506   :  { %4355 = vmax.xlane.f32.xlu0 %v4354_v33  ;;  %v4521_v32 = vsel %vm525_vm2, %v4520_v16, -inf }
0x1507   :  { %4522 = vmax.xlane.f32.xlu1 %v4521_v32 }
0x1509   :  { %v4682_v17 = vpop.f32.mrb[38].mxu0 }
0x150a   :  { %v4686_v18 = vmul.f32 0.35355338, %v4682_v17  ;;  %v12311_v21 = vpop.f32.mrb[39].mxu0 }
0x150c   :  { %v4687_v25 = vsel %vm4352_vm14, -1e+09, %v4686_v18 }
0x150d   :  { %v4849_v22 = vpop.f32.mrb[40].mxu0  ;;  %v4688_v26 = vsel %vm525_vm2, %v4687_v25, -inf }
0x150e   :  { %v4853_v28 = vmul.f32 0.35355338, %v4849_v22  ;;  %4689 = vmax.xlane.f32.xlu0 %v4688_v26  ;;  %v12321_v29 = vpop.f32.mrb[41].mxu0 }
0x1510   :  { %v4854_v7 = vsel %vm4352_vm14, -1e+09, %v4853_v28 }
0x1511   :  { %v5030_v36 = vpop.f32.mrb[42].mxu0  ;;  %v4855_v12 = vsel %vm525_vm2, %v4854_v7, -inf }
0x1512   :  { %v5034_v37 = vmul.f32 0.35355338, %v5030_v36  ;;  %4856 = vmax.xlane.f32.xlu0 %v4855_v12  ;;  %v12331_v38 = vpop.f32.mrb[43].mxu0 }
0x1514   :  { %v5040_v20 = vsel %vm5039_vm15, -1e+09, %v5034_v37 }
0x1515   :  { %v5202_v31 = vpop.f32.mrb[44].mxu0  ;;  %v5041_v47 = vsel %vm525_vm2, %v5040_v20, -inf }
0x1516   :  { %v5206_v19 = vmul.f32 0.35355338, %v5202_v31  ;;  %5042 = vmax.xlane.f32.xlu1 %v5041_v47  ;;  %v12341_v39 = vpop.f32.mrb[45].mxu0 }
0x1518   :  { %v5207_v40 = vsel %vm5039_vm15, -1e+09, %v5206_v19 }
0x1519   :  { %v5369_v41 = vpop.f32.mrb[46].mxu0  ;;  %v5208_v42 = vsel %vm525_vm2, %v5207_v40, -inf }
0x151a   :  { %v5373_v43 = vmul.f32 0.35355338, %v5369_v41  ;;  %5209 = vmax.xlane.f32.xlu0 %v5208_v42  ;;  %v12351_v24 = vpop.f32.mrb[47].mxu0 }
0x151c   :  { %v5374_v44 = vsel %vm5039_vm15, -1e+09, %v5373_v43 }
0x151d   :  { %v5536_v48 = vpop.f32.mrb[48].mxu0  ;;  %v5375_v49 = vsel %vm525_vm2, %v5374_v44, -inf }
0x151e   :  { %v5540_v50 = vmul.f32 0.35355338, %v5536_v48  ;;  %5376 = vmax.xlane.f32.xlu1 %v5375_v49  ;;  %v12361_v51 = vpop.f32.mrb[49].mxu0 }
0x1520   :  { %v5541_v52 = vsel %vm5039_vm15, -1e+09, %v5540_v50 }
0x1521   :  { %v5542_v54 = vsel %vm525_vm2, %v5541_v52, -inf }
0x1522   :  { %5543 = vmax.xlane.f32.xlu0 %v5542_v54 }
0x152f   :  { %4866 = vrot.lane.b32.xlu1 %v14784_v45, %s13923_s22 }
0x1538   :  { %4699 = vrot.lane.b32.xlu0 %v14784_v45, %s13924_s23 }
0x1593   :  { %v4356_v56 = vpop.xlane.xlu0 %4355 }
0x1594   :  { %v4357_v57 = vsub.f32 %v4353_v15, %v4356_v56  ;;  %v4523_v58 = vpop.xlane.xlu1 %4522 }
0x1595   :  { %v4524_v59 = vsub.f32 %v4520_v16, %v4523_v58 }
0x1596   :  { %v4358_v60 = vmul.f32 1.442695, %v4357_v57 }
0x1597   :  { %v4525_v61 = vmul.f32 1.442695, %v4524_v59 }
0x1598   :  { %13158 = vpow2.f32 %v4358_v60 }
0x1599   :  { %13160 = vpow2.f32 %v4525_v61 }
0x159b   :  { %v4690_v62 = vpop.xlane.xlu0 %4689 }
0x159c   :  { %v4691_v63 = vsub.f32 %v4687_v25, %v4690_v62 }
0x159e   :  { %v4692_v2 = vmul.f32 1.442695, %v4691_v63 }
0x159f   :  { %v4857_v3 = vpop.xlane.xlu0 %4856 }
0x15a0   :  { %13162 = vpow2.f32 %v4692_v2  ;;  %v4858_v6 = vsub.f32 %v4854_v7, %v4857_v3 }
0x15a2   :  { %v13159_v9 = vpop.eup %13158  ;;  %v4859_v10 = vmul.f32 1.442695, %v4858_v6 }
0x15a3   :  { %v13161_v11 = vpop.eup %13160  ;;  %v4360_v45 = vsel %vm525_vm2, %v13159_v9, 0.0  ;;  %v5043_v32 = vpop.xlane.xlu1 %5042 }
0x15a4   :  { %13164 = vpow2.f32 %v4859_v10  ;;  %4361 = vadd.xlane.f32.xlu1 %v4360_v45  ;;  %v4527_v14 = vsel %vm525_vm2, %v13161_v11, 0.0  ;;  %v5044_v17 = vsub.f32 %v5040_v20, %v5043_v32 }
0x15a5   :  { %4528 = vadd.xlane.f32.xlu0 %v4527_v14 }
0x15a6   :  { %v5045_v22 = vmul.f32 1.442695, %v5044_v17 }
0x15a7   :  { %v5210_v18 = vpop.xlane.xlu0 %5209 }
0x15a8   :  { %v5211_v25 = vsub.f32 %v5207_v40, %v5210_v18  ;;  %13166 = vpow2.f32 %v5045_v22  ;;  %v4176_v22 = vld [vmem:[%s15748_s1] sm:$0xff] }
0x15aa   :  { %v13163_v13 = vpop.eup %13162  ;;  %v5212_v29 = vmul.f32 1.442695, %v5211_v25 }
0x15ab   :  { %v4694_v15 = vsel %vm525_vm2, %v13163_v13, 0.0  ;;  %v5377_v21 = vpop.xlane.xlu1 %5376 }
0x15ac   :  { %4695 = vadd.xlane.f32.xlu1 %v4694_v15  ;;  %v5378_v26 = vsub.f32 %v5374_v44, %v5377_v21  ;;  %13168 = vpow2.f32 %v5212_v29  ;;  %v4178_v29 = vld [vmem:[%s15748_s1 + $0x10] sm:$0xff] }
0x15ae   :  { %v14909_v16 = vpop.eup %13164  ;;  %v5379_v7 = vmul.f32 1.442695, %v5378_v26  ;;  %v4177_v26 = vld [vmem:[%s15748_s1 + $0x8] sm:$0xff] }
0x15af   :  { %v4861_v33 = vsel %vm525_vm2, %v14909_v16, 0.0  ;;  %v5544_v28 = vpop.xlane.xlu0 %5543  ;;  %v4867_v41 = vpop.permute.xlu1 %4866 }
0x15b0   :  { %4862 = vadd.xlane.f32.xlu0 %v4861_v33  ;;  %v5545_v36 = vsub.f32 %v5541_v52, %v5544_v28  ;;  %13170 = vpow2.f32 %v5379_v7  ;;  %v12854_v28 = vpack.c.bf16 %v4177_v26, %v4176_v22  ;;  %v4179_v7 = vld [vmem:[%s15748_s1 + $0x18] sm:$0xff] }
0x15b2   :  { %v5546_v12 = vmul.f32 1.442695, %v5545_v36  ;;  %v13167_v37 = vpop.eup %13166  ;;  %12855 = vmatprep.subr.bf16.mxu0 %v12854_v28  ;;  %v12858_v36 = vpack.c.bf16 %v4179_v7, %v4178_v29 }
0x15b3   :  { %v5047_v31 = vsel %vm525_vm2, %v13167_v37, 0.0  ;;  %v4700_v42 = vpop.permute.xlu0 %4699  ;;  %12857 = vmatpush3.bf16.msra.mxu0 %v12854_v28 }
0x15b4   :  { %13172 = vpow2.f32 %v5546_v12  ;;  %12859 = vmatprep.subr.bf16.mxu0 %v12858_v36 }
0x15b6   :  { %v14917_v38 = vpop.eup %13168 }
0x15b7   :  { %v5214_v19 = vsel %vm525_vm2, %v14917_v38, 0.0  ;;  %12861 = vmatpush3.bf16.msra.mxu0 %v12858_v36 }
0x15ba   :  { %v14920_v20 = vpop.eup %13170 }
0x15bb   :  { %v5381_v47 = vsel %vm525_vm2, %v14920_v20, 0.0 }
0x15bd   :  { %5219 = vrot.lane.b32.xlu1 %v14798_v46, %s13920_s25 }
0x15be   :  { %v14926_v39 = vpop.eup %13172 }
0x15bf   :  { %v5548_v40 = vsel %vm525_vm2, %v14926_v39, 0.0 }
0x15c6   :  { %5052 = vrot.lane.b32.xlu0 %v14798_v46, %s13921_s16 }
0x15e1   :  { %5048 = vadd.xlane.f32.xlu1 %v5047_v31 }
0x15e5   :  { %5382 = vadd.xlane.f32.xlu1 %v5381_v47  ;;  %5215 = vadd.xlane.f32.xlu0 %v5214_v19 }
0x15e9   :  { %5549 = vadd.xlane.f32.xlu1 %v5548_v40  ;;  %v11501_v40 = vld [vmem:[#allocation2 + $0x1] ss:$0 sm:$0xff] }
0x15fa   :  { %5553 = vrot.lane.b32.xlu1 %v14798_v46, %s13923_s22 }
0x15fb   :  { %5386 = vrot.lane.b32.xlu0 %v14798_v46, %s13924_s23 }
0x1631   :  { %v4362_v43 = vpop.xlane.xlu1 %4361 }
0x1632   :  { %13174 = vrcp.f32 %v4362_v43  ;;  %v4529_v24 = vpop.xlane.xlu0 %4528 }
0x1633   :  { %13176 = vrcp.f32 %v4529_v24  ;;  %v4106_v24 = vadd.f32 %v14860_v0, %v11501_v40 }
0x1639   :  { %v4696_v44 = vpop.xlane.xlu1 %4695 }
0x163a   :  { %13178 = vrcp.f32 %v4696_v44  ;;  %v4114_v44 = vadd.f32 %v4106_v24, %v14759_v5 }
0x163c   :  { %v13175_v48 = vpop.eup %13174 }
0x163d   :  { %v4863_v49 = vpop.xlane.xlu0 %4862  ;;  %v4364_v50 = vmul.f32 %v13175_v48, %v13159_v9  ;;  %v13177_v51 = vpop.eup %13176  ;;  %v4118_v48 = vsel %vm440_vm0, %v4114_v44, 0.0 }
0x163e   :  { %13180 = vrcp.f32 %v4863_v49  ;;  %v4531_v46 = vmul.f32 %v13177_v51, %v13161_v11  ;;  %v5220_v58 = vpop.permute.xlu1 %5219 }
0x163f   :  { %12295 = vmatmul.mubr.msk.f32.vlgmr.msra.gmra.mrb[48].mxu1 %vm525_vm2, %v4364_v50 }
0x1640   :  { %12303 = vmatpush3.msra.mxu1 %v14904_v55  ;;  %12304 = vmatprep.mubr.msk.f32.mxu1 %vm13912_vm1, %v13911_v8 }
0x1641   :  { %12312 = vmatprep.subr.mxu1 %v13911_v8  ;;  %v5053_v57 = vpop.permute.xlu0 %5052 }
0x1643   :  { %12305 = vmatmul.mubr.msk.f32.vlgmr.msra.gmra.mrb[50].mxu1 %vm525_vm2, %v4531_v46 }
0x1644   :  { %v13179_v52 = vpop.eup %13178  ;;  %12313 = vmatpush3.msra.mxu1 %v4700_v42  ;;  %12314 = vmatprep.mubr.msk.f32.mxu1 %vm13912_vm1, %v13911_v8 }
0x1645   :  { %12322 = vmatprep.subr.mxu1 %v13911_v8  ;;  %v4698_v54 = vmul.f32 %v13179_v52, %v13163_v13 }
0x1647   :  { %12315 = vmatmul.mubr.msk.f32.vlgmr.msra.gmra.mrb[52].mxu1 %vm525_vm2, %v4698_v54 }
0x1648   :  { %v13181_v56 = vpop.eup %13180  ;;  %12323 = vmatpush3.msra.mxu1 %v4867_v41  ;;  %12324 = vmatprep.mubr.msk.f32.mxu1 %vm13912_vm1, %v13911_v8  ;;  %v4101_v41 = vadd.f32 %v11501_v40, %v14862_v1 }
0x1649   :  { %12332 = vmatprep.subr.mxu1 %v13911_v8  ;;  %v4865_v55 = vmul.f32 %v13181_v56, %v14909_v16 }
0x164a   :  { %v4113_v42 = vadd.f32 %v4101_v41, %v14755_v23 }
0x164b   :  { %12325 = vmatmul.mubr.msk.f32.vlgmr.msra.gmra.mrb[54].mxu1 %vm525_vm2, %v4865_v55 }
0x164c   :  { %12333 = vmatpush3.msra.mxu1 %v5053_v57  ;;  %12334 = vmatprep.mubr.msk.f32.mxu1 %vm13912_vm1, %v13911_v8  ;;  %v4115_v43 = vsel %vm440_vm0, %v4113_v42, 0.0 }
0x164d   :  { %12342 = vmatprep.subr.mxu1 %v13911_v8 }
0x166e   :  { %v5049_v59 = vpop.xlane.xlu1 %5048 }
0x166f   :  { %13182 = vrcp.f32 %v5049_v59 }
0x1672   :  { %v5383_v60 = vpop.xlane.xlu1 %5382  ;;  %v5216_v61 = vpop.xlane.xlu0 %5215 }
0x1673   :  { %13184 = vrcp.f32 %v5216_v61 }
0x1674   :  { %13186 = vrcp.f32 %v5383_v60 }
0x1676   :  { %v5550_v62 = vpop.xlane.xlu1 %5549  ;;  %v5387_v10 = vpop.permute.xlu0 %5386 }
0x1677   :  { %13188 = vrcp.f32 %v5550_v62 }
0x1679   :  { %v13183_v63 = vpop.eup %13182 }
0x167a   :  { %v5051_v2 = vmul.f32 %v13183_v63, %v13167_v37  ;;  %v5554_v14 = vpop.permute.xlu1 %5553 }
0x167c   :  { %12335 = vmatmul.mubr.msk.f32.vlgmr.msra.gmra.mrb[56].mxu1 %vm525_vm2, %v5051_v2 }
0x167d   :  { %12343 = vmatpush3.msra.mxu1 %v5220_v58  ;;  %12344 = vmatprep.mubr.msk.f32.mxu1 %vm13912_vm1, %v13911_v8  ;;  %v13185_v3 = vpop.eup %13184 }
0x167e   :  { %12352 = vmatprep.subr.mxu1 %v13911_v8  ;;  %v5218_v6 = vmul.f32 %v13185_v3, %v14917_v38  ;;  %v13187_v9 = vpop.eup %13186  ;;  %v11506_v3 = vld [vmem:[%s15744_s0 + $0x1] ss:$0 sm:$0xff] }
0x167f   :  { %v5385_v11 = vmul.f32 %v13187_v9, %v14920_v20 }
0x1680   :  { %12345 = vmatmul.mubr.msk.f32.vlgmr.msra.gmra.mrb[58].mxu1 %vm525_vm2, %v5218_v6 }
0x1681   :  { %12353 = vmatpush3.msra.mxu1 %v5387_v10  ;;  %12354 = vmatprep.mubr.msk.f32.mxu1 %vm13912_vm1, %v13911_v8  ;;  %v13189_v45 = vpop.eup %13188 }
0x1682   :  { %12362 = vmatprep.subr.mxu1 %v13911_v8  ;;  %v5552_v13 = vmul.f32 %v13189_v45, %v14926_v39 }
0x1684   :  { %12355 = vmatmul.mubr.msk.f32.vlgmr.msra.gmra.mrb[60].mxu1 %vm525_vm2, %v5385_v11  ;;  %v11535_v11 = vld [vmem:[#allocation14] ss:$0 sm:$0xff] }
0x1685   :  { %12363 = vmatpush3.msra.mxu1 %v5554_v14  ;;  %12364 = vmatprep.mubr.msk.f32.mxu1 %vm13912_vm1, %v13911_v8 }
0x1688   :  { %12365 = vmatmul.mubr.msk.f32.vlgmr.msra.gmra.mrb[62].mxu1 %vm525_vm2, %v5552_v13 }
0x1712   :  { %v4437_v15 = vpop.f32.mrb[48].mxu1 }
0x1713   :  { %v12296_v16 = vpop.f32.mrb[49].mxu1 }
0x1716   :  { %v4604_v33 = vpop.f32.mrb[50].mxu1 }
0x1717   :  { %4943 = vrot.lane.b32.xlu0 %v4604_v33, %s13899_s13  ;;  %v12306_v32 = vpop.f32.mrb[51].mxu1 }
0x171a   :  { %v4771_v17 = vpop.f32.mrb[52].mxu1 }
0x171b   :  { %4947 = vrot.lane.b32.xlu1 %v4771_v17, %s13889_s2  ;;  %v12316_v18 = vpop.f32.mrb[53].mxu1 }
0x171e   :  { %v4938_v21 = vpop.f32.mrb[54].mxu1 }
0x171f   :  { %4951 = vrot.lane.b32.xlu1 %v4938_v21, %s13925_s3  ;;  %v12326_v25 = vpop.f32.mrb[55].mxu1 }
0x174f   :  { %v5124_v12 = vpop.f32.mrb[56].mxu1 }
0x1750   :  { %v12336_v37 = vpop.f32.mrb[57].mxu1 }
0x1753   :  { %v5291_v38 = vpop.f32.mrb[58].mxu1 }
0x1754   :  { %5630 = vrot.lane.b32.xlu0 %v5291_v38, %s13899_s13  ;;  %v12346_v31 = vpop.f32.mrb[59].mxu1 }
0x1757   :  { %v5458_v20 = vpop.f32.mrb[60].mxu1 }
0x1758   :  { %5634 = vrot.lane.b32.xlu0 %v5458_v20, %s13889_s2  ;;  %v12356_v47 = vpop.f32.mrb[61].mxu1 }
0x175b   :  { %v5625_v19 = vpop.f32.mrb[62].mxu1 }
0x175c   :  { %5638 = vrot.lane.b32.xlu1 %v5625_v19, %s13925_s3  ;;  %v12366_v39 = vpop.f32.mrb[63].mxu1 }
0x1777   :  { %4116 = vadd.xlane.f32.xlu0 %v4115_v43 }
0x1780   :  { %4119 = vadd.xlane.f32.xlu1 %v4118_v48  ;;  %v5791_v48 = vld [vmem:[#allocation32] sm:$0xff] }
0x1789   :  { %v4944_v49 = vpop.permute.xlu0 %4943 }
0x178a   :  { %v4954_v51 = vsel %vm525_vm2, %v4437_v15, %v4944_v49  ;;  %v5792_v49 = vld [vmem:[#allocation32 + $0x8] sm:$0xff] }
0x178d   :  { %v4948_v50 = vpop.permute.xlu1 %4947 }
0x178e   :  { %v4955_v46 = vsel %vm1210_vm6, %v4954_v51, %v4948_v50  ;;  %v13050_v51 = vpack.i.bf16 %v5792_v49, %v5791_v48 }
0x1791   :  { %v4952_v52 = vpop.permute.xlu1 %4951 }
0x1792   :  { %v4956_v1 = vsel %vm1212_vm7, %v4955_v46, %v4952_v52 }
0x1793   :  { %12375 = vmatprep.mubr.msk.f32.mxu0 %vm440_vm0, %v4956_v1 }
0x17c6   :  { %v5631_v23 = vpop.permute.xlu0 %5630 }
0x17c7   :  { %v5641_v54 = vsel %vm525_vm2, %v5124_v12, %v5631_v23  ;;  %v11507_v12 = vld [vmem:[%s15745_s27 + $0x1] ss:$0 sm:$0xff] }
0x17ca   :  { %v5635_v0 = vpop.permute.xlu0 %5634 }
0x17cb   :  { %v5642_v5 = vsel %vm1210_vm6, %v5641_v54, %v5635_v0  ;;  %v5793_v54 = vld [vmem:[#allocation32 + $0x10] sm:$0xff] }
0x17ce   :  { %v5639_v56 = vpop.permute.xlu1 %5638 }
0x17cf   :  { %v5643_v55 = vsel %vm1212_vm7, %v5642_v5, %v5639_v56  ;;  %v5794_v5 = vld [vmem:[#allocation32 + $0x18] sm:$0xff] }
0x17d0   :  { %12376 = vmatmul.mubr.msk.f32.vlgmr.msra.gmra.mrb[50].mxu0 %vm440_vm0, %v5643_v55  ;;  %v13055_v56 = vpack.i.bf16 %v5794_v5, %v5793_v54 }
0x1804   :  { %v4117_v57 = vpop.xlane.xlu0 %4116 }
0x1805   :  { %v4121_v58 = vmul.f32 0.03125, %v4117_v57 }
0x1807   :  { %v4123_v59 = vsub.f32 %v4113_v42, %v4121_v58 }
0x1809   :  { %v4125_v60 = vmul.f32 %v4123_v59, %v4123_v59 }
0x180b   :  { %v4127_v61 = vsel %vm440_vm0, %v4125_v60, 0.0  ;;  %v12866_v60 = vpack.c.bf16 %v5794_v5, %v5793_v54 }
0x180c   :  { %4128 = vadd.xlane.f32.xlu1 %v4127_v61  ;;  %v15025_v61 = vld [vmem:[#allocation19] ss:$0 sm:$0xff] }
0x180d   :  { %v4120_v62 = vpop.xlane.xlu1 %4119 }
0x180e   :  { %v4122_v63 = vmul.f32 0.03125, %v4120_v62 }
0x1810   :  { %v4124_v2 = vsub.f32 %v4114_v44, %v4122_v63 }
0x1812   :  { %v14993_v6 = vmul.f32 %v11506_v3, %v4124_v2  ;;  %v4126_v29 = vmul.f32 %v4124_v2, %v4124_v2 }
0x1814   :  { %v4130_v7 = vsel %vm440_vm0, %v4126_v29, 0.0 }
0x1899   :  { %v4129_v9 = vpop.xlane.xlu1 %4128 }
0x189a   :  { %v4133_v10 = vmul.f32 0.032258064, %v4129_v9 }
0x189c   :  { %13190 = vrsqrt.f32 %v4133_v10  ;;  %vm4137_vm3 = vcmp.eq.f32.partialorder %v4133_v10, inf  ;;  %v4140_v17 = vand.u32 2147483648, %v4133_v10  ;;  %vm4139_vm8 = vcmp.eq.f32.partialorder %v4133_v10, 0.0 }
0x18a3   :  { %v12377_v45 = vpop.f32.mrb[50].mxu0 }
0x18a4   :  { %v5722_v14 = vpop.f32.mrb[51].mxu0  ;;  %v5728_v13 = vadd.f32 %v12377_v45, %v11535_v11 }
0x18a5   :  { %v5723_v15 = vadd.f32 %v11535_v11, %v5722_v14 }
0x18a6   :  { %v13191_v16 = vpop.eup %13190  ;;  %v5734_v21 = vadd.f32 %v5728_v13, %v14769_v34 }
0x18a7   :  { %v4136_v33 = vmul.f32 %v13191_v16, %v4133_v10  ;;  %v5733_v32 = vadd.f32 %v5723_v15, %v14762_v30  ;;  %v4155_v30 = vmul.f32 %v11506_v3, %v4123_v59  ;;  %v12862_v59 = vpack.c.bf16 %v5792_v49, %v5791_v48 }
0x18a8   :  { %v5738_v28 = vsel %vm440_vm0, %v5734_v21, 0.0 }
0x18a9   :  { %v4138_v18 = vsel %vm4137_vm3, %v4133_v10, %v4136_v33  ;;  %v5735_v25 = vsel %vm440_vm0, %v5733_v32, 0.0  ;;  %12863 = vmatprep.subr.bf16.mxu1 %v12862_v59 }
0x18aa   :  { %5736 = vadd.xlane.f32.xlu0 %v5735_v25  ;;  %v4141_v22 = vsel %vm4139_vm8, %v4140_v17, %v4138_v18  ;;  %12865 = vmatpush3.bf16.msra.mxu1 %v12862_v59 }
0x18ab   :  { %v4157_v26 = vadd.f32 1e-06, %v4141_v22  ;;  %12867 = vmatprep.subr.bf16.mxu1 %v12866_v60 }
0x18ad   :  { %13192 = vrcp.f32 %v4157_v26 }
0x18ae   :  { %5739 = vadd.xlane.f32.xlu0 %v5738_v28  ;;  %12869 = vmatpush3.bf16.msra.mxu1 %v12866_v60 }
0x18af   :  { %12400 = vmatprep.subr.mxu1 %v13911_v8 }
0x18b2   :  { %4131 = vadd.xlane.f32.xlu0 %v4130_v7 }
0x18b7   :  { %v13193_v36 = vpop.eup %13192 }
0x18b8   :  { %v4160_v37 = vmul.f32 %v13193_v36, %v4155_v30  ;;  %v11538_v30 = vld [vmem:[#allocation22] ss:$0 sm:$0xff] }
0x18ba   :  { %v15001_v38 = vadd.f32 %v11507_v12, %v4160_v37  ;;  %v11539_v37 = vld [vmem:[#allocation20] ss:$0 sm:$0xff] }
0x18bc   :  { %12397 = vmatprep.mubr.msk.f32.mxu0 %vm440_vm0, %v15001_v38  ;;  %11323 = vst.msk [vmem:[#allocation34] sm:$0xff] %vm440_vm0, %v15001_v38 }
0x1937   :  { %v5737_v34 = vpop.xlane.xlu0 %5736 }
0x1938   :  { %v5741_v31 = vmul.f32 0.03125, %v5737_v34 }
0x193a   :  { %v15007_v20 = vsub.f32 %v5733_v32, %v5741_v31 }
0x193b   :  { %v5740_v47 = vpop.xlane.xlu0 %5739 }
0x193c   :  { %v5742_v19 = vmul.f32 0.03125, %v5740_v47  ;;  %v5745_v39 = vmul.f32 %v15007_v20, %v15007_v20  ;;  %v5775_v36 = vmul.f32 %v11538_v30, %v15007_v20 }
0x193e   :  { %v15011_v40 = vsub.f32 %v5734_v21, %v5742_v19  ;;  %v5747_v41 = vsel %vm440_vm0, %v5745_v39, 0.0 }
0x193f   :  { %5748 = vadd.xlane.f32.xlu1 %v5747_v41  ;;  %v4132_v42 = vpop.xlane.xlu0 %4131 }
0x1940   :  { %v4134_v43 = vmul.f32 0.032258064, %v4132_v42  ;;  %v5746_v24 = vmul.f32 %v15011_v40, %v15011_v40  ;;  %v5776_v47 = vmul.f32 %v11538_v30, %v15011_v40 }
0x1942   :  { %13194 = vrsqrt.f32 %v4134_v43  ;;  %v5750_v44 = vsel %vm440_vm0, %v5746_v24, 0.0  ;;  %vm4144_vm9 = vcmp.eq.f32.partialorder %v4134_v43, inf  ;;  %v4147_v52 = vand.u32 2147483648, %v4134_v43 }
0x1943   :  { %5751 = vadd.xlane.f32.xlu0 %v5750_v44  ;;  %vm4146_vm10 = vcmp.eq.f32.partialorder %v4134_v43, 0.0 }
0x194c   :  { %v13195_v50 = vpop.eup %13194 }
0x194d   :  { %v4143_v46 = vmul.f32 %v13195_v50, %v4134_v43 }
0x194f   :  { %v4145_v1 = vsel %vm4144_vm9, %v4134_v43, %v4143_v46 }
0x1950   :  { %v4148_v23 = vsel %vm4146_vm10, %v4147_v52, %v4145_v1  ;;  %13051 = vrot.lane.b32.xlu1 %v13050_v51, %s13914_s17 }
0x1951   :  { %v4158_v0 = vadd.f32 1e-06, %v4148_v23 }
0x1953   :  { %13196 = vrcp.f32 %v4158_v0 }
0x1954   :  { %5904 = vrot.lane.b32.xlu1 %v15025_v61, %s13914_s17 }
0x1959   :  { %13056 = vrot.lane.b32.xlu0 %v13055_v56, %s13914_s17 }
0x195d   :  { %v13197_v55 = vpop.eup %13196 }
0x195e   :  { %v4162_v57 = vmul.f32 %v13197_v55, %v14993_v6 }
0x1960   :  { %v15020_v58 = vadd.f32 %v11507_v12, %v4162_v57 }
0x1962   :  { %11324 = vst.msk [vmem:[#allocation34 + $0x8] sm:$0xff] %vm440_vm0, %v15020_v58 }
0x19cc   :  { %v5749_v62 = vpop.xlane.xlu1 %5748 }
0x19cd   :  { %v5753_v63 = vmul.f32 0.032258064, %v5749_v62 }
0x19cf   :  { %13198 = vrsqrt.f32 %v5753_v63  ;;  %vm5757_vm11 = vcmp.eq.f32.partialorder %v5753_v63, inf  ;;  %v5760_v32 = vand.u32 2147483648, %v5753_v63  ;;  %vm5759_vm13 = vcmp.eq.f32.partialorder %v5753_v63, 0.0 }
0x19d0   :  { %v13052_v2 = vpop.permute.xlu1 %13051  ;;  %v5752_v9 = vpop.xlane.xlu0 %5751 }
0x19d1   :  { %v13054_v3 = vunpack.i.h.bf16 %v13052_v2  ;;  %v13053_v6 = vunpack.i.l.bf16 %v13052_v2  ;;  %v5754_v10 = vmul.f32 0.032258064, %v5752_v9 }
0x19d3   :  { %v12870_v11 = vpack.c.bf16 %v13054_v3, %v13053_v6  ;;  %13200 = vrsqrt.f32 %v5754_v10  ;;  %vm5764_vm3 = vcmp.eq.f32.partialorder %v5754_v10, inf  ;;  %v5767_v26 = vand.u32 2147483648, %v5754_v10 }
0x19d4   :  { %v13057_v45 = vpop.permute.xlu0 %13056  ;;  %vm5766_vm8 = vcmp.eq.f32.partialorder %v5754_v10, 0.0  ;;  %v5905_v20 = vpop.permute.xlu1 %5904 }
0x19d5   :  { %12871 = vmatprep.subr.bf16.mxu0 %v12870_v11  ;;  %v13059_v14 = vunpack.i.h.bf16 %v13057_v45  ;;  %v13058_v13 = vunpack.i.l.bf16 %v13057_v45 }
0x19d6   :  { %12873 = vmatpush3.bf16.msra.mxu0 %v12870_v11 }
0x19d7   :  { %v12874_v15 = vpack.c.bf16 %v13059_v14, %v13058_v13 }
0x19d9   :  { %v13199_v16 = vpop.eup %13198  ;;  %12875 = vmatprep.subr.bf16.mxu0 %v12874_v15 }
0x19da   :  { %v5756_v33 = vmul.f32 %v13199_v16, %v5753_v63  ;;  %12877 = vmatpush3.bf16.msra.mxu0 %v12874_v15 }
0x19db   :  { %12410 = vmatprep.subr.mxu0 %v13911_v8 }
0x19dc   :  { %v5758_v17 = vsel %vm5757_vm11, %v5753_v63, %v5756_v33 }
0x19dd   :  { %v5761_v18 = vsel %vm5759_vm13, %v5760_v32, %v5758_v17  ;;  %v13201_v21 = vpop.eup %13200  ;;  %12398 = vmatmul.mubr.msk.f32.vlgmr.msra.gmra.mrb[52].mxu0 %vm440_vm0, %v15020_v58 }
0x19de   :  { %v5777_v25 = vadd.f32 1e-06, %v5761_v18  ;;  %v5763_v22 = vmul.f32 %v13201_v21, %v5754_v10  ;;  %12412 = vmatprep.mubr.msk.f32.mxu0 %vm13912_vm1, %v13911_v8 }
0x19e0   :  { %13202 = vrcp.f32 %v5777_v25  ;;  %v5765_v28 = vsel %vm5764_vm3, %v5754_v10, %v5763_v22 }
0x19e1   :  { %v5768_v29 = vsel %vm5766_vm8, %v5767_v26, %v5765_v28 }
0x19e2   :  { %v5778_v7 = vadd.f32 1e-06, %v5768_v29 }
0x19e4   :  { %13204 = vrcp.f32 %v5778_v7 }
0x19ea   :  { %v13203_v12 = vpop.eup %13202 }
0x19eb   :  { %v5780_v34 = vmul.f32 %v13203_v12, %v5775_v36 }
0x19ed   :  { %v15035_v31 = vadd.f32 %v11539_v37, %v5780_v34 }
0x19ee   :  { %v13205_v19 = vpop.eup %13204 }
0x19ef   :  { %12386 = vmatprep.mubr.msk.f32.mxu1 %vm440_vm0, %v15035_v31  ;;  %v5782_v39 = vmul.f32 %v13205_v19, %v5776_v47 }
0x19f1   :  { %v15040_v41 = vadd.f32 %v11539_v37, %v5782_v39 }
0x19f3   :  { %12387 = vmatmul.mubr.msk.f32.vlgmr.msra.gmra.mrb[64].mxu1 %vm440_vm0, %v15040_v41 }
0x19f4   :  { %12402 = vmatprep.mubr.msk.f32.mxu1 %vm13912_vm1, %v13911_v8 }
0x1ab0   :  { %v12399_v42 = vpop.f32.mrb[52].mxu0 }
0x1ab1   :  { %v5979_v43 = vpop.f32.mrb[53].mxu0  ;;  %v15057_v40 = vadd.f32 %v12399_v42, %v5905_v20 }
0x1ab2   :  { %v15046_v24 = vadd.f32 %v5979_v43, %v5905_v20 }
0x1ab4   :  { %6155 = vrot.lane.b32.xlu1 %v15046_v24, %s13913_s11  ;;  %12401 = vmatpush3.xpose.msk.msra.mxu1 %vm525_vm2, %v15046_v24 }
0x1ab5   :  { %12405 = vmatprep.subr.mxu1 %v13911_v8 }
0x1ab8   :  { %6322 = vrot.lane.b32.xlu1 %v15046_v24, %s13918_s5 }
0x1abc   :  { %6489 = vrot.lane.b32.xlu1 %v15046_v24, %s13919_s15 }
0x1ac0   :  { %6836 = vrot.lane.b32.xlu1 %v15057_v40, %s13913_s11 }
0x1ac4   :  { %7003 = vrot.lane.b32.xlu1 %v15057_v40, %s13918_s5 }
0x1ac6   :  { %v12388_v44 = vpop.f32.mrb[64].mxu1 }
0x1ac7   :  { %v5879_v48 = vpop.f32.mrb[65].mxu1  ;;  %v5885_v50 = vadd.f32 %v12388_v44, %v15025_v61 }
0x1ac8   :  { %v5880_v49 = vadd.f32 %v15025_v61, %v5879_v48  ;;  %7170 = vrot.lane.b32.xlu1 %v15057_v40, %s13919_s15 }
0x1aca   :  { %6153 = vrot.lane.b32.xlu0 %v5880_v49, %s13913_s11  ;;  %12403 = vmatmul.mubr.msk.f32.vlgmr.msra.gmra.mrb[66].mxu1 %vm525_vm2, %v5880_v49 }
0x1acb   :  { %12407 = vmatprep.mubr.msk.f32.mxu1 %vm13912_vm1, %v13911_v8 }
0x1acc   :  { %6077 = vrot.lane.b32.xlu1 %v15046_v24, %s13914_s17 }
0x1ace   :  { %6320 = vrot.lane.b32.xlu0 %v5880_v49, %s13918_s5 }
0x1ad2   :  { %6487 = vrot.lane.b32.xlu0 %v5880_v49, %s13919_s15 }
0x1ad6   :  { %6834 = vrot.lane.b32.xlu0 %v5885_v50, %s13913_s11 }
0x1ada   :  { %7001 = vrot.lane.b32.xlu0 %v5885_v50, %s13918_s5 }
0x1ade   :  { %7168 = vrot.lane.b32.xlu0 %v5885_v50, %s13919_s15 }
0x1b26   :  { %v6156_v51 = vpop.permute.xlu1 %6155 }
0x1b27   :  { %12411 = vmatpush3.xpose.msk.msra.mxu0 %vm525_vm2, %v6156_v51 }
0x1b28   :  { %12420 = vmatprep.subr.mxu0 %v13911_v8 }
0x1b2a   :  { %v6323_v46 = vpop.permute.xlu1 %6322 }
0x1b2e   :  { %v6490_v52 = vpop.permute.xlu1 %6489 }
0x1b32   :  { %v6837_v1 = vpop.permute.xlu1 %6836 }
0x1b36   :  { %v7004_v23 = vpop.permute.xlu1 %7003 }
0x1b3a   :  { %v7171_v0 = vpop.permute.xlu1 %7170 }
0x1b3c   :  { %v6154_v54 = vpop.permute.xlu0 %6153 }
0x1b3d   :  { %12413 = vmatmul.mubr.msk.f32.vlgmr.msra.gmra.mrb[54].mxu0 %vm525_vm2, %v6154_v54 }
0x1b3e   :  { %12421 = vmatpush3.xpose.msk.msra.mxu0 %vm525_vm2, %v6323_v46  ;;  %v6078_v5 = vpop.permute.xlu1 %6077  ;;  %12422 = vmatprep.mubr.msk.f32.mxu0 %vm13912_vm1, %v13911_v8 }
0x1b3f   :  { %12406 = vmatpush3.msra.mxu1 %v6078_v5  ;;  %12430 = vmatprep.subr.mxu0 %v13911_v8 }
0x1b40   :  { %v6321_v56 = vpop.permute.xlu0 %6320  ;;  %12415 = vmatprep.subr.mxu1 %v13911_v8 }
0x1b41   :  { %12423 = vmatmul.mubr.msk.f32.vlgmr.msra.gmra.mrb[56].mxu0 %vm525_vm2, %v6321_v56 }
0x1b42   :  { %12431 = vmatpush3.xpose.msk.msra.mxu0 %vm525_vm2, %v6490_v52  ;;  %12432 = vmatprep.mubr.msk.f32.mxu0 %vm13912_vm1, %v13911_v8 }
0x1b43   :  { %12440 = vmatprep.subr.mxu0 %v13911_v8 }
0x1b44   :  { %v6488_v55 = vpop.permute.xlu0 %6487 }
0x1b45   :  { %12433 = vmatmul.mubr.msk.f32.vlgmr.msra.gmra.mrb[58].mxu0 %vm525_vm2, %v6488_v55 }
0x1b46   :  { %12441 = vmatpush3.xpose.msk.msra.mxu0 %vm525_vm2, %v15057_v40  ;;  %12442 = vmatprep.mubr.msk.f32.mxu0 %vm13912_vm1, %v13911_v8 }
0x1b47   :  { %12450 = vmatprep.subr.mxu0 %v13911_v8 }
0x1b48   :  { %v6835_v57 = vpop.permute.xlu0 %6834 }
0x1b49   :  { %12443 = vmatmul.mubr.msk.f32.vlgmr.msra.gmra.mrb[60].mxu0 %vm525_vm2, %v5885_v50 }
0x1b4a   :  { %12451 = vmatpush3.xpose.msk.msra.mxu0 %vm525_vm2, %v6837_v1  ;;  %12452 = vmatprep.mubr.msk.f32.mxu0 %vm13912_vm1, %v13911_v8 }
0x1b4b   :  { %12460 = vmatprep.subr.mxu0 %v13911_v8 }
0x1b4c   :  { %v7002_v59 = vpop.permute.xlu0 %7001 }
0x1b4d   :  { %12453 = vmatmul.mubr.msk.f32.vlgmr.msra.gmra.mrb[62].mxu0 %vm525_vm2, %v6835_v57 }
0x1b4e   :  { %12461 = vmatpush3.xpose.msk.msra.mxu0 %vm525_vm2, %v7004_v23  ;;  %12462 = vmatprep.mubr.msk.f32.mxu0 %vm13912_vm1, %v13911_v8 }
0x1b4f   :  { %12470 = vmatprep.subr.mxu0 %v13911_v8 }
0x1b50   :  { %v7169_v60 = vpop.permute.xlu0 %7168 }
0x1b51   :  { %12463 = vmatmul.mubr.msk.f32.vlgmr.msra.gmra.mrb[64].mxu0 %vm525_vm2, %v7002_v59 }
0x1b52   :  { %12471 = vmatpush3.xpose.msk.msra.mxu0 %vm525_vm2, %v7171_v0  ;;  %12472 = vmatprep.mubr.msk.f32.mxu0 %vm13912_vm1, %v13911_v8 }
0x1b55   :  { %12473 = vmatmul.mubr.msk.f32.vlgmr.msra.gmra.mrb[66].mxu0 %vm525_vm2, %v7169_v60 }
0x1b9d   :  { %v6060_v61 = vpop.f32.mrb[66].mxu1 }
0x1b9e   :  { %v6064_v62 = vmul.f32 0.35355338, %v6060_v61  ;;  %v12404_v63 = vpop.f32.mrb[67].mxu1 }
0x1ba0   :  { %v6065_v2 = vsel %vm607_vm4, -1e+09, %v6064_v62 }
0x1ba1   :  { %v6066_v3 = vsel %vm525_vm2, %v6065_v2, -inf }
0x1ba2   :  { %6067 = vmax.xlane.f32.xlu1 %v6066_v3 }
0x1c10   :  { %v6227_v6 = vpop.f32.mrb[54].mxu0 }
0x1c11   :  { %v6231_v9 = vmul.f32 0.35355338, %v6227_v6  ;;  %v12414_v10 = vpop.f32.mrb[55].mxu0 }
0x1c13   :  { %v6232_v11 = vsel %vm607_vm4, -1e+09, %v6231_v9 }
0x1c14   :  { %v6394_v45 = vpop.f32.mrb[56].mxu0  ;;  %v6233_v14 = vsel %vm525_vm2, %v6232_v11, -inf }
0x1c15   :  { %v6398_v13 = vmul.f32 0.35355338, %v6394_v45  ;;  %6234 = vmax.xlane.f32.xlu0 %v6233_v14  ;;  %v12424_v15 = vpop.f32.mrb[57].mxu0 }
0x1c17   :  { %v6399_v16 = vsel %vm607_vm4, -1e+09, %v6398_v13 }
0x1c18   :  { %v6561_v33 = vpop.f32.mrb[58].mxu0  ;;  %v6400_v32 = vsel %vm525_vm2, %v6399_v16, -inf }
0x1c19   :  { %v6565_v17 = vmul.f32 0.35355338, %v6561_v33  ;;  %6401 = vmax.xlane.f32.xlu0 %v6400_v32  ;;  %v12434_v18 = vpop.f32.mrb[59].mxu0 }
0x1c1b   :  { %v6566_v21 = vsel %vm607_vm4, -1e+09, %v6565_v17 }
0x1c1c   :  { %v6741_v25 = vpop.f32.mrb[60].mxu0  ;;  %v6567_v22 = vsel %vm525_vm2, %v6566_v21, -inf }
0x1c1d   :  { %v6745_v26 = vmul.f32 0.35355338, %v6741_v25  ;;  %v12444_v28 = vpop.f32.mrb[61].mxu0  ;;  %6568 = vmax.xlane.f32.xlu1 %v6567_v22 }
0x1c1f   :  { %v6746_v29 = vsel %vm1296_vm5, -1e+09, %v6745_v26 }
0x1c20   :  { %v6908_v7 = vpop.f32.mrb[62].mxu0  ;;  %v6747_v30 = vsel %vm525_vm2, %v6746_v29, -inf }
0x1c21   :  { %v6912_v36 = vmul.f32 0.35355338, %v6908_v7  ;;  %6748 = vmax.xlane.f32.xlu0 %v6747_v30  ;;  %v12454_v12 = vpop.f32.mrb[63].mxu0 }
0x1c23   :  { %v6913_v37 = vsel %vm1296_vm5, -1e+09, %v6912_v36 }
0x1c24   :  { %v7075_v34 = vpop.f32.mrb[64].mxu0  ;;  %v6914_v47 = vsel %vm525_vm2, %v6913_v37, -inf }
0x1c25   :  { %v7079_v19 = vmul.f32 0.35355338, %v7075_v34  ;;  %v12464_v39 = vpop.f32.mrb[65].mxu0  ;;  %6915 = vmax.xlane.f32.xlu1 %v6914_v47 }
0x1c27   :  { %v7080_v20 = vsel %vm1296_vm5, -1e+09, %v7079_v19 }
0x1c28   :  { %v7242_v42 = vpop.f32.mrb[66].mxu0  ;;  %v7081_v43 = vsel %vm525_vm2, %v7080_v20, -inf }
0x1c29   :  { %7082 = vmax.xlane.f32.xlu0 %v7081_v43  ;;  %v12474_v44 = vpop.f32.mrb[67].mxu0  ;;  %v7246_v51 = vmul.f32 0.35355338, %v7242_v42 }
0x1c2b   :  { %v7247_v46 = vsel %vm1296_vm5, -1e+09, %v7246_v51 }
0x1c2c   :  { %v7248_v52 = vsel %vm525_vm2, %v7247_v46, -inf }
0x1c2f   :  { %v6068_v48 = vpop.xlane.xlu1 %6067 }
0x1c30   :  { %v6069_v49 = vsub.f32 %v6065_v2, %v6068_v48 }
0x1c32   :  { %v6070_v50 = vmul.f32 1.442695, %v6069_v49 }
0x1c34   :  { %13206 = vpow2.f32 %v6070_v50 }
0x1c36   :  { %6411 = vrot.lane.b32.xlu1 %v15046_v24, %s13915_s9 }
0x1c3e   :  { %v13207_v1 = vpop.eup %13206 }
0x1c3f   :  { %6244 = vrot.lane.b32.xlu0 %v15046_v24, %s13916_s29  ;;  %v6072_v23 = vsel %vm525_vm2, %v13207_v1, 0.0 }
0x1c5a   :  { %7249 = vmax.xlane.f32.xlu1 %v7248_v52 }
0x1c5e   :  { %6073 = vadd.xlane.f32.xlu0 %v6072_v23 }
0x1c6b   :  { %6578 = vrot.lane.b32.xlu1 %v15046_v24, %s13917_s19 }
0x1ca2   :  { %v6235_v0 = vpop.xlane.xlu0 %6234 }
0x1ca3   :  { %v6236_v54 = vsub.f32 %v6232_v11, %v6235_v0 }
0x1ca5   :  { %v6237_v5 = vmul.f32 1.442695, %v6236_v54 }
0x1ca6   :  { %v6402_v56 = vpop.xlane.xlu0 %6401 }
0x1ca7   :  { %13208 = vpow2.f32 %v6237_v5  ;;  %v6403_v55 = vsub.f32 %v6399_v16, %v6402_v56 }
0x1ca9   :  { %v6404_v57 = vmul.f32 1.442695, %v6403_v55 }
0x1caa   :  { %v6569_v24 = vpop.xlane.xlu1 %6568 }
0x1cab   :  { %13210 = vpow2.f32 %v6404_v57  ;;  %v6570_v63 = vsub.f32 %v6566_v21, %v6569_v24 }
0x1cad   :  { %v6571_v9 = vmul.f32 1.442695, %v6570_v63 }
0x1cae   :  { %v6749_v2 = vpop.xlane.xlu0 %6748 }
0x1caf   :  { %v6750_v6 = vsub.f32 %v6746_v29, %v6749_v2  ;;  %13212 = vpow2.f32 %v6571_v9 }
0x1cb1   :  { %v13209_v59 = vpop.eup %13208  ;;  %v6751_v45 = vmul.f32 1.442695, %v6750_v6 }
0x1cb2   :  { %v6239_v60 = vsel %vm525_vm2, %v13209_v59, 0.0  ;;  %v6916_v3 = vpop.xlane.xlu1 %6915 }
0x1cb3   :  { %6240 = vadd.xlane.f32.xlu1 %v6239_v60  ;;  %v6917_v10 = vsub.f32 %v6913_v37, %v6916_v3  ;;  %13214 = vpow2.f32 %v6751_v45  ;;  %v5797_v45 = vld [vmem:[#allocation29 + $0x8] sm:$0xff] }
0x1cb5   :  { %v15144_v61 = vpop.eup %13210  ;;  %v6918_v14 = vmul.f32 1.442695, %v6917_v10 }
0x1cb6   :  { %v6406_v62 = vsel %vm525_vm2, %v15144_v61, 0.0  ;;  %v7083_v11 = vpop.xlane.xlu0 %7082  ;;  %v6412_v16 = vpop.permute.xlu1 %6411 }
0x1cb7   :  { %6407 = vadd.xlane.f32.xlu0 %v6406_v62  ;;  %v7084_v13 = vsub.f32 %v7080_v20, %v7083_v11  ;;  %13216 = vpow2.f32 %v6918_v14  ;;  %v5796_v11 = vld [vmem:[#allocation29] sm:$0xff] }
0x1cb8   :  { %v12878_v14 = vpack.c.bf16 %v5797_v45, %v5796_v11  ;;  %v7505_v11 = vld [vmem:[%s15750_s10 + $0x18] sm:$0xff] }
0x1cb9   :  { %v7085_v15 = vmul.f32 1.442695, %v7084_v13  ;;  %v13213_v33 = vpop.eup %13212 }
0x1cba   :  { %v6245_v17 = vpop.permute.xlu0 %6244  ;;  %v6573_v21 = vsel %vm525_vm2, %v13213_v33, 0.0  ;;  %12879 = vmatprep.subr.bf16.mxu0 %v12878_v14 }
0x1cbb   :  { %13218 = vpow2.f32 %v7085_v15  ;;  %12881 = vmatpush3.bf16.msra.mxu0 %v12878_v14  ;;  %v5798_v15 = vld [vmem:[#allocation29 + $0x10] sm:$0xff]  ;;  %v7506_v14 = vld [vmem:[%s15750_s10 + $0x20] sm:$0xff] }
0x1cbd   :  { %v15152_v32 = vpop.eup %13214 }
0x1cbe   :  { %v6753_v29 = vsel %vm525_vm2, %v15152_v32, 0.0 }
0x1cc1   :  { %v15155_v25 = vpop.eup %13216 }
0x1cc2   :  { %v6920_v7 = vsel %vm525_vm2, %v15155_v25, 0.0 }
0x1cc4   :  { %6758 = vrot.lane.b32.xlu1 %v15057_v40, %s13914_s17 }
0x1cc5   :  { %v15161_v30 = vpop.eup %13218 }
0x1cc6   :  { %v7087_v36 = vsel %vm525_vm2, %v15161_v30, 0.0 }
0x1ccd   :  { %6925 = vrot.lane.b32.xlu0 %v15057_v40, %s13916_s29 }
0x1ce7   :  { %v7250_v18 = vpop.xlane.xlu1 %7249 }
0x1ce8   :  { %v7251_v22 = vsub.f32 %v7247_v46, %v7250_v18  ;;  %6574 = vadd.xlane.f32.xlu1 %v6573_v21 }
0x1cea   :  { %v7252_v26 = vmul.f32 1.442695, %v7251_v22 }
0x1ceb   :  { %v6074_v28 = vpop.xlane.xlu0 %6073  ;;  %v6579_v19 = vpop.permute.xlu1 %6578 }
0x1cec   :  { %13220 = vpow2.f32 %v7252_v26  ;;  %6754 = vadd.xlane.f32.xlu0 %v6753_v29  ;;  %6921 = vadd.xlane.f32.xlu1 %v6920_v7 }
0x1ced   :  { %13222 = vrcp.f32 %v6074_v28 }
0x1cf0   :  { %7088 = vadd.xlane.f32.xlu0 %v7087_v36 }
0x1cf6   :  { %v15165_v12 = vpop.eup %13220 }
0x1cf7   :  { %v13223_v37 = vpop.eup %13222  ;;  %v7254_v34 = vsel %vm525_vm2, %v15165_v12, 0.0 }
0x1cf8   :  { %7255 = vadd.xlane.f32.xlu0 %v7254_v34  ;;  %v6076_v47 = vmul.f32 %v13223_v37, %v13207_v1 }
0x1cfa   :  { %12408 = vmatmul.mubr.msk.f32.vlgmr.msra.gmra.mrb[68].mxu1 %vm525_vm2, %v6076_v47 }
0x1cfb   :  { %12416 = vmatpush3.msra.mxu1 %v6245_v17  ;;  %12417 = vmatprep.mubr.msk.f32.mxu1 %vm13912_vm1, %v13911_v8 }
0x1cfc   :  { %12425 = vmatprep.subr.mxu1 %v13911_v8 }
0x1cfd   :  { %7092 = vrot.lane.b32.xlu1 %v15057_v40, %s13915_s9 }
0x1d0e   :  { %7259 = vrot.lane.b32.xlu0 %v15057_v40, %s13917_s19 }
0x1d40   :  { %v6241_v39 = vpop.xlane.xlu1 %6240 }
0x1d41   :  { %13224 = vrcp.f32 %v6241_v39 }
0x1d44   :  { %v6408_v20 = vpop.xlane.xlu0 %6407  ;;  %v6759_v40 = vpop.permute.xlu1 %6758 }
0x1d45   :  { %13226 = vrcp.f32 %v6408_v20 }
0x1d48   :  { %v6926_v49 = vpop.permute.xlu0 %6925 }
0x1d4b   :  { %v13225_v42 = vpop.eup %13224 }
0x1d4c   :  { %v6243_v43 = vmul.f32 %v13225_v42, %v13209_v59 }
0x1d4e   :  { %12418 = vmatmul.mubr.msk.f32.vlgmr.msra.gmra.mrb[70].mxu1 %vm525_vm2, %v6243_v43 }
0x1d4f   :  { %v13227_v44 = vpop.eup %13226  ;;  %12426 = vmatpush3.msra.mxu1 %v6412_v16  ;;  %12427 = vmatprep.mubr.msk.f32.mxu1 %vm13912_vm1, %v13911_v8  ;;  %v5799_v16 = vld [vmem:[#allocation29 + $0x18] sm:$0xff] }
0x1d50   :  { %12435 = vmatprep.subr.mxu1 %v13911_v8  ;;  %v6410_v48 = vmul.f32 %v13227_v44, %v15144_v61  ;;  %v11569_v44 = vld [vmem:[#allocation16] ss:$0 sm:$0xff] }
0x1d52   :  { %12428 = vmatmul.mubr.msk.f32.vlgmr.msra.gmra.mrb[72].mxu1 %vm525_vm2, %v6410_v48 }
0x1d53   :  { %12436 = vmatpush3.msra.mxu1 %v6579_v19  ;;  %12437 = vmatprep.mubr.msk.f32.mxu1 %vm13912_vm1, %v13911_v8 }
0x1d54   :  { %12445 = vmatprep.subr.mxu1 %v13911_v8 }
0x1d75   :  { %v6575_v50 = vpop.xlane.xlu1 %6574 }
0x1d76   :  { %13228 = vrcp.f32 %v6575_v50 }
0x1d79   :  { %v6755_v51 = vpop.xlane.xlu0 %6754  ;;  %v6922_v46 = vpop.xlane.xlu1 %6921 }
0x1d7a   :  { %13230 = vrcp.f32 %v6755_v51 }
0x1d7b   :  { %13232 = vrcp.f32 %v6922_v46 }
0x1d7d   :  { %v7089_v52 = vpop.xlane.xlu0 %7088  ;;  %v7093_v59 = vpop.permute.xlu1 %7092 }
0x1d7e   :  { %13234 = vrcp.f32 %v7089_v52 }
0x1d80   :  { %v13229_v1 = vpop.eup %13228 }
0x1d81   :  { %v6577_v23 = vmul.f32 %v13229_v1, %v13213_v33 }
0x1d83   :  { %12438 = vmatmul.mubr.msk.f32.vlgmr.msra.gmra.mrb[74].mxu1 %vm525_vm2, %v6577_v23 }
0x1d84   :  { %v13231_v0 = vpop.eup %13230  ;;  %12446 = vmatpush3.msra.mxu1 %v6759_v40  ;;  %12447 = vmatprep.mubr.msk.f32.mxu1 %vm13912_vm1, %v13911_v8 }
0x1d85   :  { %v7256_v54 = vpop.xlane.xlu0 %7255  ;;  %12455 = vmatprep.subr.mxu1 %v13911_v8  ;;  %v6757_v5 = vmul.f32 %v13231_v0, %v15152_v32  ;;  %v13233_v56 = vpop.eup %13232  ;;  %v12882_v32 = vpack.c.bf16 %v5799_v16, %v5798_v15 }
0x1d86   :  { %13236 = vrcp.f32 %v7256_v54  ;;  %v6924_v55 = vmul.f32 %v13233_v56, %v15155_v25 }
0x1d87   :  { %12448 = vmatmul.mubr.msk.f32.vlgmr.msra.gmra.mrb[76].mxu1 %vm525_vm2, %v6757_v5  ;;  %12883 = vmatprep.subr.bf16.mxu0 %v12882_v32 }
0x1d88   :  { %12456 = vmatpush3.msra.mxu1 %v6926_v49  ;;  %12457 = vmatprep.mubr.msk.f32.mxu1 %vm13912_vm1, %v13911_v8  ;;  %v13235_v57 = vpop.eup %13234 }
0x1d89   :  { %12465 = vmatprep.subr.mxu1 %v13911_v8  ;;  %v7091_v60 = vmul.f32 %v13235_v57, %v15161_v30  ;;  %v7260_v61 = vpop.permute.xlu0 %7259  ;;  %12885 = vmatpush3.bf16.msra.mxu0 %v12882_v32 }
0x1d8b   :  { %12458 = vmatmul.mubr.msk.f32.vlgmr.msra.gmra.mrb[78].mxu1 %vm525_vm2, %v6924_v55 }
0x1d8c   :  { %12466 = vmatpush3.msra.mxu1 %v7093_v59  ;;  %12467 = vmatprep.mubr.msk.f32.mxu1 %vm13912_vm1, %v13911_v8 }
0x1d8d   :  { %12475 = vmatprep.subr.mxu1 %v13911_v8 }
0x1d8f   :  { %12468 = vmatmul.mubr.msk.f32.vlgmr.msra.gmra.mrb[80].mxu1 %vm525_vm2, %v7091_v60  ;;  %v7497_v60 = vld [vmem:[%s15749_s4] sm:$0xff] }
0x1d90   :  { %v13237_v62 = vpop.eup %13236  ;;  %12476 = vmatpush3.msra.mxu1 %v7260_v61  ;;  %12477 = vmatprep.mubr.msk.f32.mxu1 %vm13912_vm1, %v13911_v8  ;;  %v7498_v61 = vld [vmem:[%s15749_s4 + $0x8] sm:$0xff] }
0x1d91   :  { %v7258_v24 = vmul.f32 %v13237_v62, %v15165_v12  ;;  %v7499_v62 = vld [vmem:[%s15749_s4 + $0x10] sm:$0xff] }
0x1d93   :  { %12478 = vmatmul.mubr.msk.f32.vlgmr.msra.gmra.mrb[82].mxu1 %vm525_vm2, %v7258_v24  ;;  %v12886_v24 = vpack.c.bf16 %v7498_v61, %v7497_v60 }
0x1d95   :  { %12887 = vmatprep.subr.bf16.mxu1 %v12886_v24 }
0x1d96   :  { %12889 = vmatpush3.bf16.msra.mxu1 %v12886_v24 }
0x1dcd   :  { %v6149_v63 = vpop.f32.mrb[68].mxu1 }
0x1dce   :  { %v12409_v2 = vpop.f32.mrb[69].mxu1 }
0x1e21   :  { %v6316_v3 = vpop.f32.mrb[70].mxu1 }
0x1e22   :  { %6655 = vrot.lane.b32.xlu1 %v6316_v3, %s13899_s13  ;;  %v12419_v6 = vpop.f32.mrb[71].mxu1  ;;  %v7502_v3 = vld [vmem:[%s15750_s10] sm:$0xff] }
0x1e23   :  { %v7503_v6 = vld [vmem:[%s15750_s10 + $0x8] sm:$0xff] }
0x1e25   :  { %v6483_v9 = vpop.f32.mrb[72].mxu1 }
0x1e26   :  { %6659 = vrot.lane.b32.xlu0 %v6483_v9, %s13889_s2  ;;  %v12429_v10 = vpop.f32.mrb[73].mxu1  ;;  %v7504_v9 = vld [vmem:[%s15750_s10 + $0x10] sm:$0xff] }
0x1e27   :  { %v12894_v10 = vpack.c.bf16 %v7503_v6, %v7502_v3  ;;  %v12898_v45 = vpack.c.bf16 %v7505_v11, %v7504_v9 }
0x1e29   :  { %12895 = vmatprep.subr.bf16.mxu0 %v12894_v10 }
0x1e56   :  { %v6650_v13 = vpop.f32.mrb[74].mxu1 }
0x1e57   :  { %6663 = vrot.lane.b32.xlu0 %v6650_v13, %s13925_s3  ;;  %v12439_v33 = vpop.f32.mrb[75].mxu1  ;;  %v7507_v13 = vld [vmem:[%s15750_s10 + $0x28] sm:$0xff] }
0x1e58   :  { %v12902_v15 = vpack.c.bf16 %v7507_v13, %v7506_v14  ;;  %v7748_v13 = vld [vmem:[#allocation31 + $0x20] sm:$0xff] }
0x1e5a   :  { %v6830_v17 = vpop.f32.mrb[76].mxu1 }
0x1e5b   :  { %v12449_v18 = vpop.f32.mrb[77].mxu1 }
0x1e5e   :  { %v6997_v21 = vpop.f32.mrb[78].mxu1 }
0x1e5f   :  { %7336 = vrot.lane.b32.xlu1 %v6997_v21, %s13899_s13  ;;  %v12459_v25 = vpop.f32.mrb[79].mxu1 }
0x1e62   :  { %v7164_v22 = vpop.f32.mrb[80].mxu1 }
0x1e63   :  { %7340 = vrot.lane.b32.xlu1 %v7164_v22, %s13889_s2  ;;  %v12469_v26 = vpop.f32.mrb[81].mxu1 }
0x1e66   :  { %v7331_v28 = vpop.f32.mrb[82].mxu1 }
0x1e67   :  { %7344 = vrot.lane.b32.xlu0 %v7331_v28, %s13925_s3  ;;  %v12479_v29 = vpop.f32.mrb[83].mxu1 }
0x1e94   :  { %v6656_v7 = vpop.permute.xlu1 %6655 }
0x1e95   :  { %v6666_v36 = vsel %vm525_vm2, %v6149_v63, %v6656_v7  ;;  %v7500_v63 = vld [vmem:[%s15749_s4 + $0x18] sm:$0xff] }
0x1e96   :  { %v12890_v2 = vpack.c.bf16 %v7500_v63, %v7499_v62 }
0x1e98   :  { %v6660_v30 = vpop.permute.xlu0 %6659  ;;  %12891 = vmatprep.subr.bf16.mxu1 %v12890_v2 }
0x1e99   :  { %v6667_v12 = vsel %vm1210_vm6, %v6666_v36, %v6660_v30  ;;  %12893 = vmatpush3.bf16.msra.mxu1 %v12890_v2 }
0x1ec9   :  { %v6664_v37 = vpop.permute.xlu0 %6663 }
0x1eca   :  { %v6668_v34 = vsel %vm1212_vm7, %v6667_v12, %v6664_v37 }
0x1ecb   :  { %12488 = vmatprep.mubr.msk.f32.mxu0 %vm440_vm0, %v6668_v34  ;;  %v11572_v34 = vld [vmem:[#allocation25] ss:$0 sm:$0xff] }
0x1ed1   :  { %v7337_v47 = vpop.permute.xlu1 %7336 }
0x1ed2   :  { %v7347_v39 = vsel %vm525_vm2, %v6830_v17, %v7337_v47 }
0x1ed5   :  { %v7341_v19 = vpop.permute.xlu1 %7340 }
0x1ed6   :  { %v7348_v20 = vsel %vm1210_vm6, %v7347_v39, %v7341_v19 }
0x1ed9   :  { %v7345_v42 = vpop.permute.xlu0 %7344 }
0x1eda   :  { %v7349_v43 = vsel %vm1212_vm7, %v7348_v20, %v7345_v42  ;;  %v11573_v42 = vld [vmem:[#allocation23] ss:$0 sm:$0xff] }
0x1edb   :  { %12489 = vmatmul.mubr.msk.f32.vlgmr.msra.gmra.mrb[68].mxu0 %vm440_vm0, %v7349_v43 }
0x1edc   :  { %12897 = vmatpush3.bf16.msra.mxu0 %v12894_v10 }
0x1edd   :  { %12899 = vmatprep.subr.bf16.mxu0 %v12898_v45 }
0x1ee0   :  { %12901 = vmatpush3.bf16.msra.mxu0 %v12898_v45 }
0x1ee1   :  { %12903 = vmatprep.subr.bf16.mxu0 %v12902_v15 }
0x1ee4   :  { %12905 = vmatpush3.bf16.msra.mxu0 %v12902_v15  ;;  %v7749_v15 = vld [vmem:[#allocation31 + $0x28] sm:$0xff] }
0x1fae   :  { %v12490_v48 = vpop.f32.mrb[68].mxu0 }
0x1faf   :  { %v7434_v40 = vadd.f32 %v12490_v48, %v11569_v44  ;;  %v7428_v49 = vpop.f32.mrb[69].mxu0 }
0x1fb0   :  { %v7429_v50 = vadd.f32 %v11569_v44, %v7428_v49  ;;  %v7508_v49 = vld [vmem:[%s15750_s10 + $0x30] sm:$0xff] }
0x1fb1   :  { %v7440_v51 = vadd.f32 %v7434_v40, %v15040_v41 }
0x1fb2   :  { %v7439_v46 = vadd.f32 %v7429_v50, %v15035_v31  ;;  %v7509_v50 = vld [vmem:[%s15750_s10 + $0x38] sm:$0xff] }
0x1fb3   :  { %v7444_v52 = vsel %vm440_vm0, %v7440_v51, 0.0 }
0x1fb4   :  { %7445 = vadd.xlane.f32.xlu0 %v7444_v52  ;;  %v7441_v1 = vsel %vm440_vm0, %v7439_v46, 0.0 }
0x1fb5   :  { %7442 = vadd.xlane.f32.xlu1 %v7441_v1 }
0x2041   :  { %v7446_v23 = vpop.xlane.xlu0 %7445 }
0x2042   :  { %v7448_v0 = vmul.f32 0.03125, %v7446_v23  ;;  %v7443_v54 = vpop.xlane.xlu1 %7442 }
0x2043   :  { %v7447_v5 = vmul.f32 0.03125, %v7443_v54 }
0x2044   :  { %v7450_v56 = vsub.f32 %v7440_v51, %v7448_v0  ;;  %v12906_v51 = vpack.c.bf16 %v7509_v50, %v7508_v49 }
0x2045   :  { %v7449_v55 = vsub.f32 %v7439_v46, %v7447_v5  ;;  %v11574_v46 = vld [vmem:[#allocation11] ss:$0 sm:$0xff] }
0x2046   :  { %v7452_v57 = vmul.f32 %v7450_v56, %v7450_v56  ;;  %v7482_v47 = vmul.f32 %v11572_v34, %v7450_v56  ;;  %12907 = vmatprep.subr.bf16.mxu0 %v12906_v51  ;;  %v11577_v56 = vld [vmem:[#allocation13] ss:$0 sm:$0xff] }
0x2047   :  { %v7451_v41 = vmul.f32 %v7449_v55, %v7449_v55  ;;  %v7481_v39 = vmul.f32 %v11572_v34, %v7449_v55  ;;  %12909 = vmatpush3.bf16.msra.mxu0 %v12906_v51 }
0x2048   :  { %v7456_v31 = vsel %vm440_vm0, %v7452_v57, 0.0  ;;  %12542 = vmatprep.subr.mxu0 %v13911_v8 }
0x2049   :  { %7457 = vadd.xlane.f32.xlu1 %v7456_v31  ;;  %v7453_v59 = vsel %vm440_vm0, %v7451_v41, 0.0 }
0x204a   :  { %7454 = vadd.xlane.f32.xlu0 %v7453_v59 }
0x20d6   :  { %v7458_v16 = vpop.xlane.xlu1 %7457 }
0x20d7   :  { %v7460_v33 = vmul.f32 0.032258064, %v7458_v16  ;;  %v7455_v32 = vpop.xlane.xlu0 %7454  ;;  %v7750_v16 = vld [vmem:[#allocation31 + $0x30] sm:$0xff] }
0x20d8   :  { %v7459_v17 = vmul.f32 0.032258064, %v7455_v32  ;;  %v7751_v32 = vld [vmem:[#allocation31 + $0x38] sm:$0xff] }
0x20d9   :  { %13238 = vrsqrt.f32 %v7460_v33  ;;  %vm7470_vm9 = vcmp.eq.f32.partialorder %v7460_v33, inf  ;;  %v7473_v22 = vand.u32 2147483648, %v7460_v33  ;;  %vm7472_vm10 = vcmp.eq.f32.partialorder %v7460_v33, 0.0 }
0x20da   :  { %13240 = vrsqrt.f32 %v7459_v17  ;;  %vm7463_vm11 = vcmp.eq.f32.partialorder %v7459_v17, inf  ;;  %v7466_v29 = vand.u32 2147483648, %v7459_v17  ;;  %vm7465_vm13 = vcmp.eq.f32.partialorder %v7459_v17, 0.0 }
0x20e3   :  { %v13239_v18 = vpop.eup %13238 }
0x20e4   :  { %v13241_v21 = vpop.eup %13240  ;;  %v7469_v25 = vmul.f32 %v13239_v18, %v7460_v33 }
0x20e5   :  { %v7462_v26 = vmul.f32 %v13241_v21, %v7459_v17 }
0x20e6   :  { %v7471_v28 = vsel %vm7470_vm9, %v7460_v33, %v7469_v25  ;;  %v12910_v33 = vpack.c.bf16 %v7749_v15, %v7748_v13 }
0x20e7   :  { %v7474_v7 = vsel %vm7472_vm10, %v7473_v22, %v7471_v28  ;;  %v7464_v30 = vsel %vm7463_vm11, %v7459_v17, %v7462_v26  ;;  %v12914_v17 = vpack.c.bf16 %v7751_v32, %v7750_v16 }
0x20e8   :  { %v7484_v36 = vadd.f32 1e-06, %v7474_v7  ;;  %v7467_v12 = vsel %vm7465_vm13, %v7466_v29, %v7464_v30  ;;  %12911 = vmatprep.subr.bf16.mxu1 %v12910_v33 }
0x20e9   :  { %v7483_v37 = vadd.f32 1e-06, %v7467_v12 }
0x20ea   :  { %13242 = vrcp.f32 %v7484_v36 }
0x20eb   :  { %13244 = vrcp.f32 %v7483_v37 }
0x20f4   :  { %v13243_v19 = vpop.eup %13242 }
0x20f5   :  { %v13245_v20 = vpop.eup %13244  ;;  %v7488_v43 = vmul.f32 %v13243_v19, %v7482_v47 }
0x20f6   :  { %v7486_v44 = vmul.f32 %v13245_v20, %v7481_v39  ;;  %v11580_v20 = vld [vmem:[#allocation28] ss:$0 sm:$0xff] }
0x20f7   :  { %v7496_v40 = vadd.f32 %v11573_v42, %v7488_v43 }
0x20f8   :  { %v7495_v48 = vadd.f32 %v11573_v42, %v7486_v44 }
0x20fa   :  { %12499 = vmatprep.mubr.msk.f32.mxu1 %vm440_vm0, %v7495_v48 }
0x20fb   :  { %12500 = vmatmul.mubr.msk.f32.vlgmr.msra.gmra.mrb[84].mxu1 %vm440_vm0, %v7496_v40 }
0x20fc   :  { %12913 = vmatpush3.bf16.msra.mxu1 %v12910_v33 }
0x20fd   :  { %12915 = vmatprep.subr.bf16.mxu1 %v12914_v17 }
0x2100   :  { %12917 = vmatpush3.bf16.msra.mxu1 %v12914_v17 }
0x2101   :  { %12532 = vmatprep.subr.mxu1 %v13911_v8 }
0x21ce   :  { %v12501_v52 = vpop.f32.mrb[84].mxu1 }
0x21cf   :  { %v7595_v1 = vadd.f32 %v12501_v52, %v11574_v46  ;;  %v7589_v23 = vpop.f32.mrb[85].mxu1  ;;  %v11586_v52 = vld [vmem:[#allocation17 + $0x1] ss:$0 sm:$0xff] }
0x21d0   :  { %v7590_v0 = vadd.f32 %v11574_v46, %v7589_v23 }
0x21d1   :  { %v7599_v5 = vmax.f32 %v7595_v1, 0.0 }
0x21d2   :  { %v7598_v54 = vmax.f32 %v7590_v0, 0.0 }
0x21d4   :  { %12518 = vmatprep.mubr.msk.f32.mxu0 %vm2159_vm12, %v7598_v54 }
0x21d5   :  { %12519 = vmatmul.mubr.msk.f32.vlgmr.msra.gmra.mrb[70].mxu0 %vm2159_vm12, %v7599_v5 }
0x21d6   :  { %12544 = vmatprep.mubr.msk.f32.mxu0 %vm13912_vm1, %v13911_v8 }
0x22a8   :  { %v12520_v55 = vpop.f32.mrb[70].mxu0 }
0x22a9   :  { %v7684_v57 = vadd.f32 %v12520_v55, %v11577_v56  ;;  %v7678_v41 = vpop.f32.mrb[71].mxu0 }
0x22aa   :  { %v7679_v31 = vadd.f32 %v11577_v56, %v7678_v41 }
0x22ab   :  { %v7690_v59 = vadd.f32 %v7684_v57, %v7496_v40  ;;  %v11581_v40 = vld [vmem:[#allocation26] ss:$0 sm:$0xff] }
0x22ac   :  { %v7689_v60 = vadd.f32 %v7679_v31, %v7495_v48 }
0x22ad   :  { %v7694_v61 = vsel %vm440_vm0, %v7690_v59, 0.0 }
0x22ae   :  { %7695 = vadd.xlane.f32.xlu1 %v7694_v61  ;;  %v7691_v62 = vsel %vm440_vm0, %v7689_v60, 0.0 }
0x22af   :  { %7692 = vadd.xlane.f32.xlu0 %v7691_v62 }
0x233b   :  { %v7696_v24 = vpop.xlane.xlu1 %7695 }
0x233c   :  { %v7698_v63 = vmul.f32 0.03125, %v7696_v24  ;;  %v7693_v2 = vpop.xlane.xlu0 %7692 }
0x233d   :  { %v7697_v3 = vmul.f32 0.03125, %v7693_v2 }
0x233e   :  { %v7700_v6 = vsub.f32 %v7690_v59, %v7698_v63 }
0x233f   :  { %v7699_v9 = vsub.f32 %v7689_v60, %v7697_v3 }
0x2340   :  { %v7702_v10 = vmul.f32 %v7700_v6, %v7700_v6  ;;  %v7732_v42 = vmul.f32 %v11580_v20, %v7700_v6 }
0x2341   :  { %v7701_v11 = vmul.f32 %v7699_v9, %v7699_v9  ;;  %v7731_v44 = vmul.f32 %v11580_v20, %v7699_v9 }
0x2342   :  { %v7706_v45 = vsel %vm440_vm0, %v7702_v10, 0.0 }
0x2343   :  { %7707 = vadd.xlane.f32.xlu1 %v7706_v45  ;;  %v7703_v14 = vsel %vm440_vm0, %v7701_v11, 0.0 }
0x2344   :  { %7704 = vadd.xlane.f32.xlu0 %v7703_v14 }
0x23d0   :  { %v7708_v18 = vpop.xlane.xlu1 %7707 }
0x23d1   :  { %v7710_v21 = vmul.f32 0.032258064, %v7708_v18  ;;  %v7705_v25 = vpop.xlane.xlu0 %7704 }
0x23d2   :  { %v7709_v22 = vmul.f32 0.032258064, %v7705_v25 }
0x23d3   :  { %13246 = vrsqrt.f32 %v7710_v21  ;;  %vm7720_vm3 = vcmp.eq.f32.partialorder %v7710_v21, inf  ;;  %v7723_v7 = vand.u32 2147483648, %v7710_v21  ;;  %vm7722_vm8 = vcmp.eq.f32.partialorder %v7710_v21, 0.0 }
0x23d4   :  { %13248 = vrsqrt.f32 %v7709_v22  ;;  %vm7713_vm9 = vcmp.eq.f32.partialorder %v7709_v22, inf  ;;  %v7716_v12 = vand.u32 2147483648, %v7709_v22  ;;  %vm7715_vm10 = vcmp.eq.f32.partialorder %v7709_v22, 0.0 }
0x23dd   :  { %v13247_v26 = vpop.eup %13246 }
0x23de   :  { %v13249_v28 = vpop.eup %13248  ;;  %v7719_v29 = vmul.f32 %v13247_v26, %v7710_v21 }
0x23df   :  { %v7712_v30 = vmul.f32 %v13249_v28, %v7709_v22 }
0x23e0   :  { %v7721_v36 = vsel %vm7720_vm3, %v7710_v21, %v7719_v29 }
0x23e1   :  { %v7724_v37 = vsel %vm7722_vm8, %v7723_v7, %v7721_v36  ;;  %v7714_v34 = vsel %vm7713_vm9, %v7709_v22, %v7712_v30 }
0x23e2   :  { %v7734_v47 = vadd.f32 1e-06, %v7724_v37  ;;  %v7717_v19 = vsel %vm7715_vm10, %v7716_v12, %v7714_v34 }
0x23e3   :  { %v7733_v39 = vadd.f32 1e-06, %v7717_v19 }
0x23e4   :  { %13250 = vrcp.f32 %v7734_v47 }
0x23e5   :  { %13252 = vrcp.f32 %v7733_v39 }
0x23ee   :  { %v13251_v43 = vpop.eup %13250 }
0x23ef   :  { %v13253_v48 = vpop.eup %13252  ;;  %v7738_v49 = vmul.f32 %v13251_v43, %v7732_v42 }
0x23f0   :  { %v7736_v50 = vmul.f32 %v13253_v48, %v7731_v44 }
0x23f1   :  { %v15252_v46 = vadd.f32 %v11581_v40, %v7738_v49 }
0x23f2   :  { %v15250_v51 = vadd.f32 %v11581_v40, %v7736_v50 }
0x23f4   :  { %12529 = vmatprep.mubr.msk.f32.mxu1 %vm440_vm0, %v15250_v51 }
0x23f5   :  { %12530 = vmatmul.mubr.msk.f32.vlgmr.msra.gmra.mrb[86].mxu1 %vm440_vm0, %v15252_v46 }
0x23f6   :  { %12534 = vmatprep.mubr.msk.f32.mxu1 %vm13912_vm1, %v13911_v8 }
0x24c8   :  { %v12531_v1 = vpop.f32.mrb[86].mxu1 }
0x24c9   :  { %v7839_v23 = vpop.f32.mrb[87].mxu1  ;;  %v15274_v54 = vadd.f32 %v12531_v1, %v11586_v52 }
0x24ca   :  { %v15260_v0 = vadd.f32 %v11586_v52, %v7839_v23 }
0x24cc   :  { %8016 = vrot.lane.b32.xlu1 %v15260_v0, %s13916_s29  ;;  %7849 = vrot.lane.b32.xlu0 %v15260_v0, %s13914_s17 }
0x24d0   :  { %8014 = vrot.lane.b32.xlu1 %v15260_v0, %s13913_s11  ;;  %8183 = vrot.lane.b32.xlu0 %v15260_v0, %s13915_s9 }
0x24d4   :  { %8181 = vrot.lane.b32.xlu1 %v15260_v0, %s13918_s5  ;;  %8350 = vrot.lane.b32.xlu0 %v15260_v0, %s13917_s19 }
0x24d8   :  { %8348 = vrot.lane.b32.xlu1 %v15260_v0, %s13919_s15  ;;  %8531 = vrot.lane.b32.xlu0 %v15274_v54, %s13914_s17 }
0x24dc   :  { %8698 = vrot.lane.b32.xlu1 %v15274_v54, %s13916_s29  ;;  %8696 = vrot.lane.b32.xlu0 %v15274_v54, %s13913_s11 }
0x24e0   :  { %8865 = vrot.lane.b32.xlu1 %v15274_v54, %s13915_s9  ;;  %8863 = vrot.lane.b32.xlu0 %v15274_v54, %s13918_s5 }
0x24e4   :  { %9032 = vrot.lane.b32.xlu1 %v15274_v54, %s13917_s19  ;;  %9030 = vrot.lane.b32.xlu0 %v15274_v54, %s13919_s15 }
0x24e8   :  { %7938 = vrot.lane.b32.xlu1 %v15260_v0, %s13921_s16 }
0x253e   :  { %v8017_v5 = vpop.permute.xlu1 %8016  ;;  %v7850_v56 = vpop.permute.xlu0 %7849 }
0x253f   :  { %12533 = vmatpush3.xpose.msk.msra.mxu1 %vm525_vm2, %v7850_v56  ;;  %12543 = vmatpush3.xpose.msk.msra.mxu0 %vm525_vm2, %v8017_v5 }
0x2540   :  { %12552 = vmatprep.subr.mxu0 %v13911_v8  ;;  %12537 = vmatprep.subr.mxu1 %v13911_v8 }
0x2542   :  { %v8015_v55 = vpop.permute.xlu1 %8014  ;;  %12535 = vmatmul.mubr.msk.f32.vlgmr.msra.gmra.mrb[88].mxu1 %vm525_vm2, %v15260_v0  ;;  %v8184_v57 = vpop.permute.xlu0 %8183 }
0x2543   :  { %12545 = vmatmul.mubr.msk.f32.vlgmr.msra.gmra.mrb[72].mxu0 %vm525_vm2, %v8015_v55  ;;  %12539 = vmatprep.mubr.msk.f32.mxu1 %vm13912_vm1, %v13911_v8 }
0x2544   :  { %12553 = vmatpush3.xpose.msk.msra.mxu0 %vm525_vm2, %v8184_v57  ;;  %12554 = vmatprep.mubr.msk.f32.mxu0 %vm13912_vm1, %v13911_v8 }
0x2545   :  { %12562 = vmatprep.subr.mxu0 %v13911_v8 }
0x2546   :  { %v8182_v41 = vpop.permute.xlu1 %8181  ;;  %v8351_v31 = vpop.permute.xlu0 %8350 }
0x2547   :  { %12555 = vmatmul.mubr.msk.f32.vlgmr.msra.gmra.mrb[74].mxu0 %vm525_vm2, %v8182_v41 }
0x2548   :  { %12563 = vmatpush3.xpose.msk.msra.mxu0 %vm525_vm2, %v8351_v31  ;;  %12564 = vmatprep.mubr.msk.f32.mxu0 %vm13912_vm1, %v13911_v8 }
0x2549   :  { %12572 = vmatprep.subr.mxu0 %v13911_v8 }
0x254a   :  { %v8349_v59 = vpop.permute.xlu1 %8348  ;;  %v8532_v60 = vpop.permute.xlu0 %8531 }
0x254b   :  { %12565 = vmatmul.mubr.msk.f32.vlgmr.msra.gmra.mrb[76].mxu0 %vm525_vm2, %v8349_v59 }
0x254c   :  { %12573 = vmatpush3.xpose.msk.msra.mxu0 %vm525_vm2, %v8532_v60  ;;  %12574 = vmatprep.mubr.msk.f32.mxu0 %vm13912_vm1, %v13911_v8 }
0x254d   :  { %12582 = vmatprep.subr.mxu0 %v13911_v8 }
0x254e   :  { %v8699_v61 = vpop.permute.xlu1 %8698  ;;  %v8697_v62 = vpop.permute.xlu0 %8696 }
0x254f   :  { %12575 = vmatmul.mubr.msk.f32.vlgmr.msra.gmra.mrb[78].mxu0 %vm525_vm2, %v15274_v54 }
0x2550   :  { %12583 = vmatpush3.xpose.msk.msra.mxu0 %vm525_vm2, %v8699_v61  ;;  %12584 = vmatprep.mubr.msk.f32.mxu0 %vm13912_vm1, %v13911_v8 }
0x2551   :  { %12592 = vmatprep.subr.mxu0 %v13911_v8 }
0x2552   :  { %v8866_v24 = vpop.permute.xlu1 %8865  ;;  %v8864_v63 = vpop.permute.xlu0 %8863 }
0x2553   :  { %12585 = vmatmul.mubr.msk.f32.vlgmr.msra.gmra.mrb[80].mxu0 %vm525_vm2, %v8697_v62 }
0x2554   :  { %12593 = vmatpush3.xpose.msk.msra.mxu0 %vm525_vm2, %v8866_v24  ;;  %12594 = vmatprep.mubr.msk.f32.mxu0 %vm13912_vm1, %v13911_v8 }
0x2555   :  { %12602 = vmatprep.subr.mxu0 %v13911_v8 }
0x2556   :  { %v9033_v2 = vpop.permute.xlu1 %9032  ;;  %v9031_v3 = vpop.permute.xlu0 %9030 }
0x2557   :  { %12595 = vmatmul.mubr.msk.f32.vlgmr.msra.gmra.mrb[82].mxu0 %vm525_vm2, %v8864_v63 }
0x2558   :  { %12603 = vmatpush3.xpose.msk.msra.mxu0 %vm525_vm2, %v9033_v2  ;;  %12604 = vmatprep.mubr.msk.f32.mxu0 %vm13912_vm1, %v13911_v8 }
0x255a   :  { %v7939_v6 = vpop.permute.xlu1 %7938 }
0x255b   :  { %12538 = vmatpush3.msra.mxu1 %v7939_v6  ;;  %12605 = vmatmul.mubr.msk.f32.vlgmr.msra.gmra.mrb[84].mxu0 %vm525_vm2, %v9031_v3 }
0x255c   :  { %12547 = vmatprep.subr.mxu1 %v13911_v8 }
0x2615   :  { %v7921_v9 = vpop.f32.mrb[88].mxu1 }
0x2616   :  { %v7925_v10 = vmul.f32 0.35355338, %v7921_v9  ;;  %v12536_v11 = vpop.f32.mrb[89].mxu1  ;;  %v8088_v45 = vpop.f32.mrb[72].mxu0 }
0x2617   :  { %v8092_v14 = vmul.f32 0.35355338, %v8088_v45  ;;  %v12546_v13 = vpop.f32.mrb[73].mxu0 }
0x2618   :  { %v7926_v15 = vsel %vm4352_vm14, -1e+09, %v7925_v10 }
0x2619   :  { %v8093_v16 = vsel %vm4352_vm14, -1e+09, %v8092_v14  ;;  %v7927_v33 = vsel %vm525_vm2, %v7926_v15, -inf }
0x261a   :  { %7928 = vmax.xlane.f32.xlu1 %v7927_v33  ;;  %v8255_v32 = vpop.f32.mrb[74].mxu0  ;;  %v8094_v17 = vsel %vm525_vm2, %v8093_v16, -inf }
0x261b   :  { %v8259_v18 = vmul.f32 0.35355338, %v8255_v32  ;;  %8095 = vmax.xlane.f32.xlu0 %v8094_v17  ;;  %v12556_v21 = vpop.f32.mrb[75].mxu0 }
0x261d   :  { %v8260_v25 = vsel %vm4352_vm14, -1e+09, %v8259_v18 }
0x261e   :  { %v8422_v22 = vpop.f32.mrb[76].mxu0  ;;  %v8261_v26 = vsel %vm525_vm2, %v8260_v25, -inf }
0x261f   :  { %v8426_v28 = vmul.f32 0.35355338, %v8422_v22  ;;  %8262 = vmax.xlane.f32.xlu0 %v8261_v26  ;;  %v12566_v29 = vpop.f32.mrb[77].mxu0 }
0x2621   :  { %v8427_v7 = vsel %vm4352_vm14, -1e+09, %v8426_v28 }
0x2622   :  { %v8603_v30 = vpop.f32.mrb[78].mxu0  ;;  %v8428_v36 = vsel %vm525_vm2, %v8427_v7, -inf }
0x2623   :  { %v8607_v12 = vmul.f32 0.35355338, %v8603_v30  ;;  %8429 = vmax.xlane.f32.xlu1 %v8428_v36  ;;  %v12576_v37 = vpop.f32.mrb[79].mxu0 }
0x2625   :  { %v8608_v34 = vsel %vm5039_vm15, -1e+09, %v8607_v12 }
0x2626   :  { %v8770_v47 = vpop.f32.mrb[80].mxu0  ;;  %v8609_v19 = vsel %vm525_vm2, %v8608_v34, -inf }
0x2627   :  { %v8774_v39 = vmul.f32 0.35355338, %v8770_v47  ;;  %8610 = vmax.xlane.f32.xlu0 %v8609_v19  ;;  %v12586_v20 = vpop.f32.mrb[81].mxu0 }
0x2629   :  { %v8775_v42 = vsel %vm5039_vm15, -1e+09, %v8774_v39 }
0x262a   :  { %v8937_v4 = vpop.f32.mrb[82].mxu0  ;;  %v8776_v43 = vsel %vm525_vm2, %v8775_v42, -inf }
0x262b   :  { %v8941_v44 = vmul.f32 0.35355338, %v8937_v4  ;;  %8777 = vmax.xlane.f32.xlu1 %v8776_v43  ;;  %v12596_v48 = vpop.f32.mrb[83].mxu0 }
0x262d   :  { %v8942_v40 = vsel %vm5039_vm15, -1e+09, %v8941_v44 }
0x262e   :  { %v9104_v49 = vpop.f32.mrb[84].mxu0  ;;  %v8943_v50 = vsel %vm525_vm2, %v8942_v40, -inf }
0x262f   :  { %8944 = vmax.xlane.f32.xlu0 %v8943_v50  ;;  %v12606_v52 = vpop.f32.mrb[85].mxu0  ;;  %v9108_v1 = vmul.f32 0.35355338, %v9104_v49 }
0x2631   :  { %v9109_v23 = vsel %vm5039_vm15, -1e+09, %v9108_v1 }
0x2632   :  { %v9110_v5 = vsel %vm525_vm2, %v9109_v23, -inf }
0x263c   :  { %8272 = vrot.lane.b32.xlu1 %v15260_v0, %s13924_s23 }
0x2645   :  { %8105 = vrot.lane.b32.xlu0 %v15260_v0, %s13920_s25 }
0x2660   :  { %9111 = vmax.xlane.f32.xlu1 %v9110_v5 }
0x2671   :  { %8439 = vrot.lane.b32.xlu1 %v15260_v0, %s13923_s22 }
0x26a7   :  { %v7929_v56 = vpop.xlane.xlu1 %7928 }
0x26a8   :  { %v7930_v55 = vsub.f32 %v7926_v15, %v7929_v56  ;;  %v8096_v57 = vpop.xlane.xlu0 %8095 }
0x26a9   :  { %v8097_v41 = vsub.f32 %v8093_v16, %v8096_v57 }
0x26aa   :  { %v7931_v31 = vmul.f32 1.442695, %v7930_v55 }
0x26ab   :  { %v8098_v59 = vmul.f32 1.442695, %v8097_v41 }
0x26ac   :  { %13254 = vpow2.f32 %v7931_v31  ;;  %v8263_v60 = vpop.xlane.xlu0 %8262 }
0x26ad   :  { %13256 = vpow2.f32 %v8098_v59  ;;  %v8264_v61 = vsub.f32 %v8260_v25, %v8263_v60 }
0x26af   :  { %v8265_v62 = vmul.f32 1.442695, %v8264_v61 }
0x26b0   :  { %v8430_v6 = vpop.xlane.xlu1 %8429 }
0x26b1   :  { %13258 = vpow2.f32 %v8265_v62  ;;  %v8431_v9 = vsub.f32 %v8427_v7, %v8430_v6 }
0x26b3   :  { %v8432_v14 = vmul.f32 1.442695, %v8431_v9 }
0x26b4   :  { %v8611_v10 = vpop.xlane.xlu0 %8610 }
0x26b5   :  { %v8612_v45 = vsub.f32 %v8608_v34, %v8611_v10  ;;  %13260 = vpow2.f32 %v8432_v14  ;;  %v11582_v14 = vld [vmem:[%s15748_s1 + $0x20] sm:$0xff] }
0x26b6   :  { %v13255_v27 = vpop.eup %13254 }
0x26b7   :  { %v13257_v24 = vpop.eup %13256  ;;  %v7933_v63 = vsel %vm525_vm2, %v13255_v27, 0.0  ;;  %v8613_v16 = vmul.f32 1.442695, %v8612_v45 }
0x26b8   :  { %7934 = vadd.xlane.f32.xlu0 %v7933_v63  ;;  %v8100_v2 = vsel %vm525_vm2, %v13257_v24, 0.0  ;;  %v8778_v11 = vpop.xlane.xlu1 %8777 }
0x26b9   :  { %8101 = vadd.xlane.f32.xlu1 %v8100_v2  ;;  %v8779_v13 = vsub.f32 %v8775_v42, %v8778_v11  ;;  %13262 = vpow2.f32 %v8613_v16 }
0x26bb   :  { %v15366_v0 = vpop.eup %13258  ;;  %v8780_v33 = vmul.f32 1.442695, %v8779_v13  ;;  %v11583_v13 = vld [vmem:[%s15748_s1 + $0x28] sm:$0xff] }
0x26bc   :  { %v8267_v3 = vsel %vm525_vm2, %v15366_v0, 0.0  ;;  %v8945_v15 = vpop.xlane.xlu0 %8944  ;;  %v8273_v18 = vpop.permute.xlu1 %8272 }
0x26bd   :  { %8268 = vadd.xlane.f32.xlu0 %v8267_v3  ;;  %v8946_v32 = vsub.f32 %v8942_v40, %v8945_v15  ;;  %13264 = vpow2.f32 %v8780_v33  ;;  %v12918_v15 = vpack.c.bf16 %v11583_v13, %v11582_v14  ;;  %v11584_v33 = vld [vmem:[%s15748_s1 + $0x30] sm:$0xff] }
0x26bf   :  { %v8947_v17 = vmul.f32 1.442695, %v8946_v32  ;;  %v13261_v21 = vpop.eup %13260  ;;  %12919 = vmatprep.subr.bf16.mxu0 %v12918_v15  ;;  %v11585_v32 = vld [vmem:[%s15748_s1 + $0x38] sm:$0xff] }
0x26c0   :  { %v8434_v26 = vsel %vm525_vm2, %v13261_v21, 0.0  ;;  %v8106_v19 = vpop.permute.xlu0 %8105  ;;  %12921 = vmatpush3.bf16.msra.mxu0 %v12918_v15 }
0x26c1   :  { %13266 = vpow2.f32 %v8947_v17 }
0x26c3   :  { %v15374_v25 = vpop.eup %13262 }
0x26c4   :  { %v8615_v36 = vsel %vm525_vm2, %v15374_v25, 0.0 }
0x26c7   :  { %v15377_v28 = vpop.eup %13264 }
0x26c8   :  { %v8782_v30 = vsel %vm525_vm2, %v15377_v28, 0.0 }
0x26ca   :  { %8620 = vrot.lane.b32.xlu1 %v15274_v54, %s13921_s16 }
0x26cb   :  { %v15383_v12 = vpop.eup %13266 }
0x26cc   :  { %v8949_v37 = vsel %vm525_vm2, %v15383_v12, 0.0 }
0x26d3   :  { %8787 = vrot.lane.b32.xlu0 %v15274_v54, %s13920_s25 }
0x26ed   :  { %v9112_v22 = vpop.xlane.xlu1 %9111 }
0x26ee   :  { %v9113_v29 = vsub.f32 %v9109_v23, %v9112_v22  ;;  %8435 = vadd.xlane.f32.xlu1 %v8434_v26 }
0x26f0   :  { %v9114_v7 = vmul.f32 1.442695, %v9113_v29 }
0x26f1   :  { %v8440_v39 = vpop.permute.xlu1 %8439 }
0x26f2   :  { %13268 = vpow2.f32 %v9114_v7  ;;  %8783 = vadd.xlane.f32.xlu1 %v8782_v30  ;;  %8616 = vadd.xlane.f32.xlu0 %v8615_v36 }
0x26f6   :  { %8950 = vadd.xlane.f32.xlu0 %v8949_v37 }
0x26fc   :  { %v15387_v34 = vpop.eup %13268 }
0x26fd   :  { %v9116_v47 = vsel %vm525_vm2, %v15387_v34, 0.0 }
0x26fe   :  { %9117 = vadd.xlane.f32.xlu0 %v9116_v47 }
0x2703   :  { %8954 = vrot.lane.b32.xlu1 %v15274_v54, %s13924_s23 }
0x2714   :  { %9121 = vrot.lane.b32.xlu0 %v15274_v54, %s13923_s22 }
0x2745   :  { %v7935_v20 = vpop.xlane.xlu0 %7934 }
0x2746   :  { %13270 = vrcp.f32 %v7935_v20  ;;  %v8102_v42 = vpop.xlane.xlu1 %8101 }
0x2747   :  { %13272 = vrcp.f32 %v8102_v42 }
0x274a   :  { %v8269_v4 = vpop.xlane.xlu0 %8268  ;;  %v8621_v50 = vpop.permute.xlu1 %8620 }
0x274b   :  { %13274 = vrcp.f32 %v8269_v4 }
0x274e   :  { %v8788_v52 = vpop.permute.xlu0 %8787 }
0x2750   :  { %v13271_v43 = vpop.eup %13270 }
0x2751   :  { %v7937_v44 = vmul.f32 %v13271_v43, %v13255_v27  ;;  %v13273_v48 = vpop.eup %13272 }
0x2752   :  { %v8104_v40 = vmul.f32 %v13273_v48, %v13257_v24  ;;  %v11613_v48 = vld [vmem:[#allocation14 + $0x1] ss:$0 sm:$0xff] }
0x2753   :  { %12540 = vmatmul.mubr.msk.f32.vlgmr.msra.gmra.mrb[90].mxu1 %vm525_vm2, %v7937_v44 }
0x2754   :  { %12548 = vmatpush3.msra.mxu1 %v8106_v19  ;;  %12549 = vmatprep.mubr.msk.f32.mxu1 %vm13912_vm1, %v13911_v8 }
0x2755   :  { %12557 = vmatprep.subr.mxu1 %v13911_v8  ;;  %v13275_v54 = vpop.eup %13274 }
0x2756   :  { %v8271_v49 = vmul.f32 %v13275_v54, %v15366_v0 }
0x2757   :  { %12550 = vmatmul.mubr.msk.f32.vlgmr.msra.gmra.mrb[92].mxu1 %vm525_vm2, %v8104_v40 }
0x2758   :  { %12558 = vmatpush3.msra.mxu1 %v8273_v18  ;;  %12559 = vmatprep.mubr.msk.f32.mxu1 %vm13912_vm1, %v13911_v8  ;;  %v12922_v18 = vpack.c.bf16 %v11585_v32, %v11584_v33 }
0x2759   :  { %12567 = vmatprep.subr.mxu1 %v13911_v8 }
0x275a   :  { %12923 = vmatprep.subr.bf16.mxu0 %v12922_v18 }
0x275b   :  { %12560 = vmatmul.mubr.msk.f32.vlgmr.msra.gmra.mrb[94].mxu1 %vm525_vm2, %v8271_v49  ;;  %12925 = vmatpush3.bf16.msra.mxu0 %v12922_v18 }
0x275c   :  { %12568 = vmatpush3.msra.mxu1 %v8440_v39  ;;  %12569 = vmatprep.mubr.msk.f32.mxu1 %vm13912_vm1, %v13911_v8 }
0x275d   :  { %12577 = vmatprep.subr.mxu1 %v13911_v8 }
0x277b   :  { %v8436_v1 = vpop.xlane.xlu1 %8435 }
0x277c   :  { %13276 = vrcp.f32 %v8436_v1 }
0x277f   :  { %v8617_v23 = vpop.xlane.xlu0 %8616  ;;  %v8784_v5 = vpop.xlane.xlu1 %8783 }
0x2780   :  { %13278 = vrcp.f32 %v8617_v23 }
0x2781   :  { %13280 = vrcp.f32 %v8784_v5 }
0x2783   :  { %v8951_v56 = vpop.xlane.xlu0 %8950  ;;  %v8955_v27 = vpop.permute.xlu1 %8954 }
0x2784   :  { %13282 = vrcp.f32 %v8951_v56 }
0x2786   :  { %v13277_v55 = vpop.eup %13276 }
0x2787   :  { %v8438_v57 = vmul.f32 %v13277_v55, %v13261_v21 }
0x2789   :  { %12570 = vmatmul.mubr.msk.f32.vlgmr.msra.gmra.mrb[96].mxu1 %vm525_vm2, %v8438_v57 }
0x278a   :  { %12578 = vmatpush3.msra.mxu1 %v8621_v50  ;;  %12579 = vmatprep.mubr.msk.f32.mxu1 %vm13912_vm1, %v13911_v8  ;;  %v13279_v41 = vpop.eup %13278 }
0x278b   :  { %v9118_v31 = vpop.xlane.xlu0 %9117  ;;  %12587 = vmatprep.subr.mxu1 %v13911_v8  ;;  %v8619_v59 = vmul.f32 %v13279_v41, %v15374_v25  ;;  %v13281_v60 = vpop.eup %13280 }
0x278c   :  { %13284 = vrcp.f32 %v9118_v31  ;;  %v8786_v61 = vmul.f32 %v13281_v60, %v15377_v28 }
0x278d   :  { %12580 = vmatmul.mubr.msk.f32.vlgmr.msra.gmra.mrb[98].mxu1 %vm525_vm2, %v8619_v59 }
0x278e   :  { %12588 = vmatpush3.msra.mxu1 %v8788_v52  ;;  %12589 = vmatprep.mubr.msk.f32.mxu1 %vm13912_vm1, %v13911_v8  ;;  %v13283_v62 = vpop.eup %13282 }
0x278f   :  { %12597 = vmatprep.subr.mxu1 %v13911_v8  ;;  %v8953_v24 = vmul.f32 %v13283_v62, %v15383_v12  ;;  %v9122_v2 = vpop.permute.xlu0 %9121  ;;  %v9365_v62 = vld [vmem:[#allocation32 + $0x38] sm:$0xff] }
0x2791   :  { %12590 = vmatmul.mubr.msk.f32.vlgmr.msra.gmra.mrb[100].mxu1 %vm525_vm2, %v8786_v61  ;;  %v9364_v61 = vld [vmem:[#allocation32 + $0x30] sm:$0xff] }
0x2792   :  { %12598 = vmatpush3.msra.mxu1 %v8955_v27  ;;  %12599 = vmatprep.mubr.msk.f32.mxu1 %vm13912_vm1, %v13911_v8  ;;  %v13065_v27 = vpack.i.bf16 %v9365_v62, %v9364_v61 }
0x2793   :  { %12607 = vmatprep.subr.mxu1 %v13911_v8 }
0x2795   :  { %12600 = vmatmul.mubr.msk.f32.vlgmr.msra.gmra.mrb[102].mxu1 %vm525_vm2, %v8953_v24  ;;  %v9362_v24 = vld [vmem:[#allocation32 + $0x20] sm:$0xff] }
0x2796   :  { %v13285_v63 = vpop.eup %13284  ;;  %12608 = vmatpush3.msra.mxu1 %v9122_v2  ;;  %12609 = vmatprep.mubr.msk.f32.mxu1 %vm13912_vm1, %v13911_v8 }
0x2797   :  { %v9120_v0 = vmul.f32 %v13285_v63, %v15387_v34  ;;  %v9363_v63 = vld [vmem:[#allocation32 + $0x28] sm:$0xff] }
0x2798   :  { %v13060_v2 = vpack.i.bf16 %v9363_v63, %v9362_v24 }
0x2799   :  { %12610 = vmatmul.mubr.msk.f32.vlgmr.msra.gmra.mrb[104].mxu1 %vm525_vm2, %v9120_v0  ;;  %v12926_v0 = vpack.c.bf16 %v9363_v63, %v9362_v24 }
0x279b   :  { %12927 = vmatprep.subr.bf16.mxu1 %v12926_v0 }
0x279c   :  { %12929 = vmatpush3.bf16.msra.mxu1 %v12926_v0 }
0x2826   :  { %v8010_v3 = vpop.f32.mrb[90].mxu1 }
0x2827   :  { %v12541_v6 = vpop.f32.mrb[91].mxu1 }
0x2828   :  { %v15465_v6 = vld [vmem:[#allocation19 + $0x1] ss:$0 sm:$0xff] }
0x282a   :  { %v8177_v9 = vpop.f32.mrb[92].mxu1 }
0x282b   :  { %8516 = vrot.lane.b32.xlu1 %v8177_v9, %s13899_s13  ;;  %v12551_v10 = vpop.f32.mrb[93].mxu1 }
0x282e   :  { %v8344_v11 = vpop.f32.mrb[94].mxu1 }
0x282f   :  { %8520 = vrot.lane.b32.xlu0 %v8344_v11, %s13889_s2  ;;  %v12561_v45 = vpop.f32.mrb[95].mxu1 }
0x285c   :  { %v8511_v16 = vpop.f32.mrb[96].mxu1 }
0x285d   :  { %8524 = vrot.lane.b32.xlu0 %v8511_v16, %s13925_s3  ;;  %v12571_v17 = vpop.f32.mrb[97].mxu1 }
0x2860   :  { %v8692_v21 = vpop.f32.mrb[98].mxu1 }
0x2861   :  { %v12581_v25 = vpop.f32.mrb[99].mxu1 }
0x2864   :  { %v8859_v22 = vpop.f32.mrb[100].mxu1 }
0x2865   :  { %9198 = vrot.lane.b32.xlu1 %v8859_v22, %s13899_s13  ;;  %v12591_v26 = vpop.f32.mrb[101].mxu1 }
0x2868   :  { %v9026_v28 = vpop.f32.mrb[102].mxu1 }
0x2869   :  { %9202 = vrot.lane.b32.xlu1 %v9026_v28, %s13889_s2  ;;  %v12601_v29 = vpop.f32.mrb[103].mxu1 }
0x286c   :  { %v9193_v7 = vpop.f32.mrb[104].mxu1 }
0x286d   :  { %9206 = vrot.lane.b32.xlu0 %v9193_v7, %s13925_s3  ;;  %v12611_v30 = vpop.f32.mrb[105].mxu1 }
0x289d   :  { %v8517_v36 = vpop.permute.xlu1 %8516 }
0x289e   :  { %v8527_v37 = vsel %vm525_vm2, %v8010_v3, %v8517_v36  ;;  %v12930_v3 = vpack.c.bf16 %v9365_v62, %v9364_v61 }
0x28a0   :  { %12931 = vmatprep.subr.bf16.mxu1 %v12930_v3 }
0x28a1   :  { %v8521_v12 = vpop.permute.xlu0 %8520  ;;  %12933 = vmatpush3.bf16.msra.mxu1 %v12930_v3 }
0x28a2   :  { %v8528_v34 = vsel %vm1210_vm6, %v8527_v37, %v8521_v12  ;;  %12645 = vmatprep.subr.mxu1 %v13911_v8 }
0x28cf   :  { %v8525_v47 = vpop.permute.xlu0 %8524 }
0x28d0   :  { %v8529_v19 = vsel %vm1212_vm7, %v8528_v34, %v8525_v47  ;;  %v11616_v47 = vld [vmem:[#allocation22 + $0x1] ss:$0 sm:$0xff] }
0x28d1   :  { %12620 = vmatprep.mubr.msk.f32.mxu0 %vm440_vm0, %v8529_v19 }
0x28d7   :  { %v9199_v39 = vpop.permute.xlu1 %9198 }
0x28d8   :  { %v9209_v42 = vsel %vm525_vm2, %v8692_v21, %v9199_v39 }
0x28db   :  { %v9203_v20 = vpop.permute.xlu1 %9202 }
0x28dc   :  { %v9210_v4 = vsel %vm1210_vm6, %v9209_v42, %v9203_v20 }
0x28df   :  { %v9207_v43 = vpop.permute.xlu0 %9206 }
0x28e0   :  { %v9211_v44 = vsel %vm1212_vm7, %v9210_v4, %v9207_v43  ;;  %v11617_v4 = vld [vmem:[#allocation20 + $0x1] ss:$0 sm:$0xff] }
0x28e1   :  { %12621 = vmatmul.mubr.msk.f32.vlgmr.msra.gmra.mrb[86].mxu0 %vm440_vm0, %v9211_v44 }
0x28e2   :  { %12642 = vmatprep.mubr.msk.f32.mxu0 %vm440_vm0, %v15001_v38 }
0x29b4   :  { %v12622_v40 = vpop.f32.mrb[86].mxu0 }
0x29b5   :  { %v9296_v54 = vadd.f32 %v12622_v40, %v11613_v48  ;;  %v9290_v49 = vpop.f32.mrb[87].mxu0 }
0x29b6   :  { %v9291_v50 = vadd.f32 %v11613_v48, %v9290_v49 }
0x29b7   :  { %v9304_v52 = vadd.f32 %v9296_v54, %v15252_v46 }
0x29b8   :  { %v9303_v1 = vadd.f32 %v9291_v50, %v15250_v51 }
0x29b9   :  { %v9308_v23 = vsel %vm440_vm0, %v9304_v52, 0.0 }
0x29ba   :  { %9309 = vadd.xlane.f32.xlu0 %v9308_v23  ;;  %v9305_v5 = vsel %vm440_vm0, %v9303_v1, 0.0 }
0x29bb   :  { %9306 = vadd.xlane.f32.xlu1 %v9305_v5 }
0x2a47   :  { %v9310_v56 = vpop.xlane.xlu0 %9309 }
0x2a48   :  { %v9312_v55 = vmul.f32 0.03125, %v9310_v56  ;;  %v9307_v57 = vpop.xlane.xlu1 %9306 }
0x2a49   :  { %v9311_v41 = vmul.f32 0.03125, %v9307_v57 }
0x2a4a   :  { %v15452_v38 = vsub.f32 %v9304_v52, %v9312_v55 }
0x2a4b   :  { %v15454_v31 = vsub.f32 %v9303_v1, %v9311_v41 }
0x2a4c   :  { %v9316_v59 = vmul.f32 %v15452_v38, %v15452_v38  ;;  %v9346_v19 = vmul.f32 %v11616_v47, %v15452_v38 }
0x2a4d   :  { %v9315_v51 = vmul.f32 %v15454_v31, %v15454_v31  ;;  %v9345_v20 = vmul.f32 %v11616_v47, %v15454_v31 }
0x2a4e   :  { %v9320_v46 = vsel %vm440_vm0, %v9316_v59, 0.0 }
0x2a4f   :  { %9321 = vadd.xlane.f32.xlu1 %v9320_v46  ;;  %v9317_v60 = vsel %vm440_vm0, %v9315_v51, 0.0 }
0x2a50   :  { %9318 = vadd.xlane.f32.xlu0 %v9317_v60 }
0x2a60   :  { %13066 = vrot.lane.b32.xlu1 %v13065_v27, %s13914_s17 }
0x2a64   :  { %9478 = vrot.lane.b32.xlu1 %v15465_v6, %s13914_s17 }
0x2a66   :  { %13061 = vrot.lane.b32.xlu0 %v13060_v2, %s13914_s17 }
0x2adc   :  { %v9322_v9 = vpop.xlane.xlu1 %9321 }
0x2add   :  { %v9324_v10 = vmul.f32 0.032258064, %v9322_v9  ;;  %v9319_v11 = vpop.xlane.xlu0 %9318 }
0x2ade   :  { %v9323_v45 = vmul.f32 0.032258064, %v9319_v11 }
0x2adf   :  { %13286 = vrsqrt.f32 %v9324_v10  ;;  %vm9334_vm14 = vcmp.eq.f32.partialorder %v9324_v10, inf  ;;  %v9337_v26 = vand.u32 2147483648, %v9324_v10  ;;  %vm9336_vm15 = vcmp.eq.f32.partialorder %v9324_v10, 0.0 }
0x2ae0   :  { %13288 = vrsqrt.f32 %v9323_v45  ;;  %v13067_v14 = vpop.permute.xlu1 %13066  ;;  %vm9327_vm11 = vcmp.eq.f32.partialorder %v9323_v45, inf  ;;  %v9330_v7 = vand.u32 2147483648, %v9323_v45  ;;  %vm9329_vm13 = vcmp.eq.f32.partialorder %v9323_v45, 0.0 }
0x2ae1   :  { %v13062_v13 = vpop.permute.xlu0 %13061  ;;  %v13069_v15 = vunpack.i.h.bf16 %v13067_v14  ;;  %v13068_v16 = vunpack.i.l.bf16 %v13067_v14 }
0x2ae2   :  { %v13064_v33 = vunpack.i.h.bf16 %v13062_v13  ;;  %v13063_v32 = vunpack.i.l.bf16 %v13062_v13 }
0x2ae3   :  { %v12938_v18 = vpack.c.bf16 %v13069_v15, %v13068_v16 }
0x2ae4   :  { %v12934_v17 = vpack.c.bf16 %v13064_v33, %v13063_v32 }
0x2ae6   :  { %12935 = vmatprep.subr.bf16.mxu0 %v12934_v17 }
0x2ae7   :  { %12937 = vmatpush3.bf16.msra.mxu0 %v12934_v17 }
0x2ae8   :  { %12939 = vmatprep.subr.bf16.mxu0 %v12938_v18 }
0x2ae9   :  { %v13287_v21 = vpop.eup %13286 }
0x2aea   :  { %v13289_v25 = vpop.eup %13288  ;;  %v9333_v22 = vmul.f32 %v13287_v21, %v9324_v10 }
0x2aeb   :  { %v9326_v28 = vmul.f32 %v13289_v25, %v9323_v45  ;;  %12941 = vmatpush3.bf16.msra.mxu0 %v12938_v18 }
0x2aec   :  { %v9335_v29 = vsel %vm9334_vm14, %v9324_v10, %v9333_v22  ;;  %12655 = vmatprep.subr.mxu0 %v13911_v8 }
0x2aed   :  { %v9338_v30 = vsel %vm9336_vm15, %v9337_v26, %v9335_v29  ;;  %v9328_v36 = vsel %vm9327_vm11, %v9323_v45, %v9326_v28 }
0x2aee   :  { %v9348_v12 = vadd.f32 1e-06, %v9338_v30  ;;  %v9331_v37 = vsel %vm9329_vm13, %v9330_v7, %v9328_v36  ;;  %12643 = vmatmul.mubr.msk.f32.vlgmr.msra.gmra.mrb[88].mxu0 %vm440_vm0, %v15020_v58  ;;  %v9479_v58 = vpop.permute.xlu1 %9478 }
0x2aef   :  { %v9347_v34 = vadd.f32 1e-06, %v9331_v37  ;;  %12657 = vmatprep.mubr.msk.f32.mxu0 %vm13912_vm1, %v13911_v8 }
0x2af0   :  { %13290 = vrcp.f32 %v9348_v12 }
0x2af1   :  { %13292 = vrcp.f32 %v9347_v34 }
0x2afa   :  { %v13291_v39 = vpop.eup %13290 }
0x2afb   :  { %v13293_v42 = vpop.eup %13292  ;;  %v9352_v43 = vmul.f32 %v13291_v39, %v9346_v19 }
0x2afc   :  { %v9350_v44 = vmul.f32 %v13293_v42, %v9345_v20 }
0x2afd   :  { %v15478_v40 = vadd.f32 %v11617_v4, %v9352_v43 }
0x2afe   :  { %v15476_v48 = vadd.f32 %v11617_v4, %v9350_v44 }
0x2b00   :  { %12631 = vmatprep.mubr.msk.f32.mxu1 %vm440_vm0, %v15476_v48 }
0x2b01   :  { %12632 = vmatmul.mubr.msk.f32.vlgmr.msra.gmra.mrb[106].mxu1 %vm440_vm0, %v15478_v40 }
0x2b02   :  { %12647 = vmatprep.mubr.msk.f32.mxu1 %vm13912_vm1, %v13911_v8 }
0x2bc1   :  { %v12644_v54 = vpop.f32.mrb[88].mxu0 }
0x2bc2   :  { %v9547_v49 = vpop.f32.mrb[89].mxu0  ;;  %v15497_v52 = vadd.f32 %v12644_v54, %v9479_v58 }
0x2bc3   :  { %v15486_v50 = vadd.f32 %v9547_v49, %v9479_v58 }
0x2bc5   :  { %9723 = vrot.lane.b32.xlu0 %v15486_v50, %s13913_s11  ;;  %12646 = vmatpush3.xpose.msk.msra.mxu1 %vm525_vm2, %v15486_v50 }
0x2bc6   :  { %12650 = vmatprep.subr.mxu1 %v13911_v8 }
0x2bc9   :  { %9890 = vrot.lane.b32.xlu0 %v15486_v50, %s13918_s5 }
0x2bcd   :  { %10057 = vrot.lane.b32.xlu0 %v15486_v50, %s13919_s15 }
0x2bd1   :  { %10404 = vrot.lane.b32.xlu0 %v15497_v52, %s13913_s11 }
0x2bd4   :  { %v12633_v1 = vpop.f32.mrb[106].mxu1 }
0x2bd5   :  { %v9453_v23 = vpop.f32.mrb[107].mxu1  ;;  %10571 = vrot.lane.b32.xlu0 %v15497_v52, %s13918_s5  ;;  %v9459_v56 = vadd.f32 %v12633_v1, %v15465_v6 }
0x2bd6   :  { %v9454_v5 = vadd.f32 %v15465_v6, %v9453_v23 }
0x2bd8   :  { %9721 = vrot.lane.b32.xlu1 %v9454_v5, %s13913_s11  ;;  %12648 = vmatmul.mubr.msk.f32.vlgmr.msra.gmra.mrb[108].mxu1 %vm525_vm2, %v9454_v5 }
0x2bd9   :  { %10738 = vrot.lane.b32.xlu0 %v15497_v52, %s13919_s15  ;;  %12652 = vmatprep.mubr.msk.f32.mxu1 %vm13912_vm1, %v13911_v8 }
0x2bdc   :  { %9888 = vrot.lane.b32.xlu1 %v9454_v5, %s13918_s5 }
0x2bdd   :  { %9645 = vrot.lane.b32.xlu0 %v15486_v50, %s13914_s17 }
0x2be0   :  { %10055 = vrot.lane.b32.xlu1 %v9454_v5, %s13919_s15 }
0x2be4   :  { %10402 = vrot.lane.b32.xlu1 %v9459_v56, %s13913_s11 }
0x2be8   :  { %10569 = vrot.lane.b32.xlu1 %v9459_v56, %s13918_s5 }
0x2bec   :  { %10736 = vrot.lane.b32.xlu1 %v9459_v56, %s13919_s15 }
0x2bf0   :  { %9812 = vrot.lane.b32.xlu1 %v15486_v50, %s13916_s29 }
0x2c37   :  { %v9724_v55 = vpop.permute.xlu0 %9723 }
0x2c38   :  { %12656 = vmatpush3.xpose.msk.msra.mxu0 %vm525_vm2, %v9724_v55 }
0x2c39   :  { %12665 = vmatprep.subr.mxu0 %v13911_v8 }
0x2c3b   :  { %v9891_v57 = vpop.permute.xlu0 %9890 }
0x2c3f   :  { %v10058_v41 = vpop.permute.xlu0 %10057 }
0x2c43   :  { %v10405_v38 = vpop.permute.xlu0 %10404 }
0x2c47   :  { %v10572_v31 = vpop.permute.xlu0 %10571 }
0x2c4a   :  { %v9722_v59 = vpop.permute.xlu1 %9721 }
0x2c4b   :  { %12658 = vmatmul.mubr.msk.f32.vlgmr.msra.gmra.mrb[90].mxu0 %vm525_vm2, %v9722_v59  ;;  %v10739_v51 = vpop.permute.xlu0 %10738 }
0x2c4c   :  { %12666 = vmatpush3.xpose.msk.msra.mxu0 %vm525_vm2, %v9891_v57  ;;  %12667 = vmatprep.mubr.msk.f32.mxu0 %vm13912_vm1, %v13911_v8 }
0x2c4d   :  { %12675 = vmatprep.subr.mxu0 %v13911_v8 }
0x2c4e   :  { %v9889_v46 = vpop.permute.xlu1 %9888 }
0x2c4f   :  { %12668 = vmatmul.mubr.msk.f32.vlgmr.msra.gmra.mrb[92].mxu0 %vm525_vm2, %v9889_v46  ;;  %v9646_v60 = vpop.permute.xlu0 %9645 }
0x2c50   :  { %12676 = vmatpush3.xpose.msk.msra.mxu0 %vm525_vm2, %v10058_v41  ;;  %12651 = vmatpush3.msra.mxu1 %v9646_v60 }
0x2c51   :  { %12677 = vmatprep.mubr.msk.f32.mxu0 %vm13912_vm1, %v13911_v8  ;;  %12685 = vmatprep.subr.mxu0 %v13911_v8 }
0x2c52   :  { %v10056_v61 = vpop.permute.xlu1 %10055  ;;  %12660 = vmatprep.subr.mxu1 %v13911_v8 }
0x2c53   :  { %12678 = vmatmul.mubr.msk.f32.vlgmr.msra.gmra.mrb[94].mxu0 %vm525_vm2, %v10056_v61 }
0x2c54   :  { %12686 = vmatpush3.xpose.msk.msra.mxu0 %vm525_vm2, %v15497_v52  ;;  %12687 = vmatprep.mubr.msk.f32.mxu0 %vm13912_vm1, %v13911_v8 }
0x2c55   :  { %12695 = vmatprep.subr.mxu0 %v13911_v8 }
0x2c56   :  { %v10403_v62 = vpop.permute.xlu1 %10402 }
0x2c57   :  { %12688 = vmatmul.mubr.msk.f32.vlgmr.msra.gmra.mrb[96].mxu0 %vm525_vm2, %v9459_v56 }
0x2c58   :  { %12696 = vmatpush3.xpose.msk.msra.mxu0 %vm525_vm2, %v10405_v38  ;;  %12697 = vmatprep.mubr.msk.f32.mxu0 %vm13912_vm1, %v13911_v8 }
0x2c59   :  { %12705 = vmatprep.subr.mxu0 %v13911_v8 }
0x2c5a   :  { %v10570_v27 = vpop.permute.xlu1 %10569 }
0x2c5b   :  { %12698 = vmatmul.mubr.msk.f32.vlgmr.msra.gmra.mrb[98].mxu0 %vm525_vm2, %v10403_v62 }
0x2c5c   :  { %12706 = vmatpush3.xpose.msk.msra.mxu0 %vm525_vm2, %v10572_v31  ;;  %12707 = vmatprep.mubr.msk.f32.mxu0 %vm13912_vm1, %v13911_v8 }
0x2c5d   :  { %12715 = vmatprep.subr.mxu0 %v13911_v8 }
0x2c5e   :  { %v10737_v24 = vpop.permute.xlu1 %10736 }
0x2c5f   :  { %12708 = vmatmul.mubr.msk.f32.vlgmr.msra.gmra.mrb[100].mxu0 %vm525_vm2, %v10570_v27 }
0x2c60   :  { %12716 = vmatpush3.xpose.msk.msra.mxu0 %vm525_vm2, %v10739_v51  ;;  %12717 = vmatprep.mubr.msk.f32.mxu0 %vm13912_vm1, %v13911_v8 }
0x2c62   :  { %v9813_v55 = vpop.permute.xlu1 %9812 }
0x2c63   :  { %12718 = vmatmul.mubr.msk.f32.vlgmr.msra.gmra.mrb[102].mxu0 %vm525_vm2, %v10737_v24 }
0x2cab   :  { %v9628_v63 = vpop.f32.mrb[108].mxu1 }
0x2cac   :  { %v9632_v2 = vmul.f32 0.35355338, %v9628_v63  ;;  %v12649_v0 = vpop.f32.mrb[109].mxu1 }
0x2cae   :  { %v9633_v3 = vsel %vm607_vm4, -1e+09, %v9632_v2 }
0x2caf   :  { %v9634_v6 = vsel %vm525_vm2, %v9633_v3, -inf }
0x2cb0   :  { %9635 = vmax.xlane.f32.xlu0 %v9634_v6 }
0x2d1e   :  { %v9795_v9 = vpop.f32.mrb[90].mxu0 }
0x2d1f   :  { %v9799_v10 = vmul.f32 0.35355338, %v9795_v9  ;;  %v12659_v11 = vpop.f32.mrb[91].mxu0 }
0x2d21   :  { %v9800_v45 = vsel %vm607_vm4, -1e+09, %v9799_v10 }
0x2d22   :  { %v9962_v14 = vpop.f32.mrb[92].mxu0  ;;  %v9801_v13 = vsel %vm525_vm2, %v9800_v45, -inf }
0x2d23   :  { %v9966_v15 = vmul.f32 0.35355338, %v9962_v14  ;;  %9802 = vmax.xlane.f32.xlu1 %v9801_v13  ;;  %v12669_v16 = vpop.f32.mrb[93].mxu0 }
0x2d25   :  { %v9967_v33 = vsel %vm607_vm4, -1e+09, %v9966_v15 }
0x2d26   :  { %v10129_v32 = vpop.f32.mrb[94].mxu0  ;;  %v9968_v17 = vsel %vm525_vm2, %v9967_v33, -inf }
0x2d27   :  { %v10133_v18 = vmul.f32 0.35355338, %v10129_v32  ;;  %v12679_v21 = vpop.f32.mrb[95].mxu0  ;;  %9969 = vmax.xlane.f32.xlu0 %v9968_v17 }
0x2d29   :  { %v10134_v25 = vsel %vm607_vm4, -1e+09, %v10133_v18 }
0x2d2a   :  { %v10309_v22 = vpop.f32.mrb[96].mxu0  ;;  %v10135_v26 = vsel %vm525_vm2, %v10134_v25, -inf }
0x2d2b   :  { %v10313_v28 = vmul.f32 0.35355338, %v10309_v22  ;;  %v12689_v29 = vpop.f32.mrb[97].mxu0  ;;  %10136 = vmax.xlane.f32.xlu0 %v10135_v26 }
0x2d2d   :  { %v10314_v7 = vsel %vm1296_vm5, -1e+09, %v10313_v28 }
0x2d2e   :  { %v10476_v30 = vpop.f32.mrb[98].mxu0  ;;  %v10315_v36 = vsel %vm525_vm2, %v10314_v7, -inf }
0x2d2f   :  { %v10480_v12 = vmul.f32 0.35355338, %v10476_v30  ;;  %10316 = vmax.xlane.f32.xlu1 %v10315_v36  ;;  %v12699_v37 = vpop.f32.mrb[99].mxu0 }
0x2d31   :  { %v10481_v34 = vsel %vm1296_vm5, -1e+09, %v10480_v12 }
0x2d32   :  { %v10643_v35 = vpop.f32.mrb[100].mxu0  ;;  %v10482_v47 = vsel %vm525_vm2, %v10481_v34, -inf }
0x2d33   :  { %v10647_v19 = vmul.f32 0.35355338, %v10643_v35  ;;  %v12709_v39 = vpop.f32.mrb[101].mxu0  ;;  %10483 = vmax.xlane.f32.xlu0 %v10482_v47 }
0x2d35   :  { %v10648_v20 = vsel %vm1296_vm5, -1e+09, %v10647_v19 }
0x2d36   :  { %v10810_v42 = vpop.f32.mrb[102].mxu0  ;;  %v10649_v4 = vsel %vm525_vm2, %v10648_v20, -inf }
0x2d37   :  { %v10814_v43 = vmul.f32 0.35355338, %v10810_v42  ;;  %10650 = vmax.xlane.f32.xlu1 %v10649_v4  ;;  %v12719_v44 = vpop.f32.mrb[103].mxu0 }
0x2d39   :  { %v10815_v58 = vsel %vm1296_vm5, -1e+09, %v10814_v43 }
0x2d3a   :  { %v10816_v54 = vsel %vm525_vm2, %v10815_v58, -inf }
0x2d3b   :  { %10817 = vmax.xlane.f32.xlu0 %v10816_v54 }
0x2d3d   :  { %v9636_v49 = vpop.xlane.xlu0 %9635 }
0x2d3e   :  { %v9637_v1 = vsub.f32 %v9633_v3, %v9636_v49 }
0x2d40   :  { %v9638_v23 = vmul.f32 1.442695, %v9637_v1 }
0x2d42   :  { %13294 = vpow2.f32 %v9638_v23 }
0x2d48   :  { %10146 = vrot.lane.b32.xlu1 %v15486_v50, %s13917_s19 }
0x2d4c   :  { %v13295_v5 = vpop.eup %13294 }
0x2d4d   :  { %v9640_v56 = vsel %vm525_vm2, %v13295_v5, 0.0 }
0x2d51   :  { %9979 = vrot.lane.b32.xlu0 %v15486_v50, %s13915_s9 }
0x2d6c   :  { %9641 = vadd.xlane.f32.xlu1 %v9640_v56 }
0x2db0   :  { %v9803_v53 = vpop.xlane.xlu1 %9802 }
0x2db1   :  { %v9804_v57 = vsub.f32 %v9800_v45, %v9803_v53 }
0x2db3   :  { %v9805_v41 = vmul.f32 1.442695, %v9804_v57 }
0x2db4   :  { %v9970_v38 = vpop.xlane.xlu0 %9969 }
0x2db5   :  { %13296 = vpow2.f32 %v9805_v41  ;;  %v9971_v31 = vsub.f32 %v9967_v33, %v9970_v38 }
0x2db7   :  { %v9972_v59 = vmul.f32 1.442695, %v9971_v31 }
0x2db8   :  { %v10137_v51 = vpop.xlane.xlu0 %10136 }
0x2db9   :  { %13298 = vpow2.f32 %v9972_v59  ;;  %v10138_v46 = vsub.f32 %v10134_v25, %v10137_v51 }
0x2dbb   :  { %v10139_v50 = vmul.f32 1.442695, %v10138_v46 }
0x2dbc   :  { %v10317_v2 = vpop.xlane.xlu1 %10316 }
0x2dbd   :  { %13300 = vpow2.f32 %v10139_v50  ;;  %v10318_v0 = vsub.f32 %v10314_v7, %v10317_v2  ;;  %v9372_v2 = vld [vmem:[#allocation29 + $0x38] sm:$0xff] }
0x2dbf   :  { %v13297_v60 = vpop.eup %13296  ;;  %v10319_v10 = vmul.f32 1.442695, %v10318_v0 }
0x2dc0   :  { %v9807_v61 = vsel %vm525_vm2, %v13297_v60, 0.0  ;;  %v10484_v3 = vpop.xlane.xlu0 %10483 }
0x2dc1   :  { %9808 = vadd.xlane.f32.xlu0 %v9807_v61  ;;  %v10485_v9 = vsub.f32 %v10481_v34, %v10484_v3  ;;  %13302 = vpow2.f32 %v10319_v10 }
0x2dc3   :  { %v13299_v62 = vpop.eup %13298  ;;  %v10486_v14 = vmul.f32 1.442695, %v10485_v9 }
0x2dc4   :  { %v9974_v27 = vsel %vm525_vm2, %v13299_v62, 0.0  ;;  %v10651_v6 = vpop.xlane.xlu1 %10650 }
0x2dc5   :  { %9975 = vadd.xlane.f32.xlu1 %v9974_v27  ;;  %v10652_v11 = vsub.f32 %v10648_v20, %v10651_v6  ;;  %13304 = vpow2.f32 %v10486_v14  ;;  %v9369_v27 = vld [vmem:[#allocation29 + $0x20] sm:$0xff] }
0x2dc7   :  { %v15585_v24 = vpop.eup %13300  ;;  %v10653_v13 = vmul.f32 1.442695, %v10652_v11 }
0x2dc8   :  { %v10141_v63 = vsel %vm525_vm2, %v15585_v24, 0.0  ;;  %v10818_v45 = vpop.xlane.xlu0 %10817  ;;  %v10147_v33 = vpop.permute.xlu1 %10146 }
0x2dc9   :  { %10142 = vadd.xlane.f32.xlu0 %v10141_v63  ;;  %v10819_v15 = vsub.f32 %v10815_v58, %v10818_v45  ;;  %13306 = vpow2.f32 %v10653_v13  ;;  %v9371_v63 = vld [vmem:[#allocation29 + $0x30] sm:$0xff] }
0x2dca   :  { %v12946_v0 = vpack.c.bf16 %v9372_v2, %v9371_v63 }
0x2dcb   :  { %v10820_v16 = vmul.f32 1.442695, %v10819_v15  ;;  %v13303_v32 = vpop.eup %13302 }
0x2dcc   :  { %v10321_v21 = vsel %vm525_vm2, %v13303_v32, 0.0  ;;  %v9980_v36 = vpop.permute.xlu0 %9979 }
0x2dcd   :  { %13308 = vpow2.f32 %v10820_v16 }
0x2dcf   :  { %v15593_v17 = vpop.eup %13304 }
0x2dd0   :  { %v10488_v26 = vsel %vm525_vm2, %v15593_v17, 0.0 }
0x2dd3   :  { %v15596_v25 = vpop.eup %13306 }
0x2dd4   :  { %v10655_v22 = vsel %vm525_vm2, %v15596_v25, 0.0 }
0x2dd6   :  { %10493 = vrot.lane.b32.xlu1 %v15497_v52, %s13916_s29 }
0x2dd7   :  { %v15602_v28 = vpop.eup %13308 }
0x2dd8   :  { %v10822_v29 = vsel %vm525_vm2, %v15602_v28, 0.0 }
0x2ddf   :  { %10326 = vrot.lane.b32.xlu0 %v15497_v52, %s13914_s17 }
0x2df9   :  { %v9642_v18 = vpop.xlane.xlu1 %9641 }
0x2dfa   :  { %13310 = vrcp.f32 %v9642_v18  ;;  %10322 = vadd.xlane.f32.xlu1 %v10321_v21 }
0x2dfe   :  { %10656 = vadd.xlane.f32.xlu1 %v10655_v22  ;;  %10489 = vadd.xlane.f32.xlu0 %v10488_v26 }
0x2e02   :  { %10823 = vadd.xlane.f32.xlu1 %v10822_v29 }
0x2e04   :  { %v13311_v7 = vpop.eup %13310 }
0x2e05   :  { %v9644_v30 = vmul.f32 %v13311_v7, %v13295_v5  ;;  %v11647_v7 = vld [vmem:[#allocation16 + $0x1] ss:$0 sm:$0xff] }
0x2e07   :  { %12653 = vmatmul.mubr.msk.f32.vlgmr.msra.gmra.mrb[110].mxu1 %vm525_vm2, %v9644_v30 }
0x2e08   :  { %12661 = vmatpush3.msra.mxu1 %v9813_v55  ;;  %12662 = vmatprep.mubr.msk.f32.mxu1 %vm13912_vm1, %v13911_v8 }
0x2e09   :  { %12670 = vmatprep.subr.mxu1 %v13911_v8 }
0x2e13   :  { %10827 = vrot.lane.b32.xlu1 %v15497_v52, %s13917_s19 }
0x2e14   :  { %10660 = vrot.lane.b32.xlu0 %v15497_v52, %s13915_s9 }
0x2e4e   :  { %v9809_v12 = vpop.xlane.xlu0 %9808 }
0x2e4f   :  { %13312 = vrcp.f32 %v9809_v12 }
0x2e52   :  { %v9976_v37 = vpop.xlane.xlu1 %9975 }
0x2e53   :  { %13314 = vrcp.f32 %v9976_v37 }
0x2e56   :  { %v10143_v34 = vpop.xlane.xlu0 %10142  ;;  %v10494_v4 = vpop.permute.xlu1 %10493 }
0x2e57   :  { %13316 = vrcp.f32 %v10143_v34 }
0x2e59   :  { %v13313_v35 = vpop.eup %13312 }
0x2e5a   :  { %v9811_v47 = vmul.f32 %v13313_v35, %v13297_v60  ;;  %v10327_v42 = vpop.permute.xlu0 %10326 }
0x2e5c   :  { %12663 = vmatmul.mubr.msk.f32.vlgmr.msra.gmra.mrb[112].mxu1 %vm525_vm2, %v9811_v47 }
0x2e5d   :  { %v13315_v19 = vpop.eup %13314  ;;  %12671 = vmatpush3.msra.mxu1 %v9980_v36  ;;  %12672 = vmatprep.mubr.msk.f32.mxu1 %vm13912_vm1, %v13911_v8 }
0x2e5e   :  { %v9978_v39 = vmul.f32 %v13315_v19, %v13299_v62  ;;  %12680 = vmatprep.subr.mxu1 %v13911_v8 }
0x2e60   :  { %12673 = vmatmul.mubr.msk.f32.vlgmr.msra.gmra.mrb[114].mxu1 %vm525_vm2, %v9978_v39 }
0x2e61   :  { %v13317_v52 = vpop.eup %13316  ;;  %12681 = vmatpush3.msra.mxu1 %v10147_v33  ;;  %12682 = vmatprep.mubr.msk.f32.mxu1 %vm13912_vm1, %v13911_v8 }
0x2e62   :  { %v10145_v20 = vmul.f32 %v13317_v52, %v15585_v24  ;;  %12690 = vmatprep.subr.mxu1 %v13911_v8 }
0x2e64   :  { %12683 = vmatmul.mubr.msk.f32.vlgmr.msra.gmra.mrb[116].mxu1 %vm525_vm2, %v10145_v20 }
0x2e65   :  { %12691 = vmatpush3.msra.mxu1 %v10327_v42  ;;  %12692 = vmatprep.mubr.msk.f32.mxu1 %vm13912_vm1, %v13911_v8 }
0x2e66   :  { %12700 = vmatprep.subr.mxu1 %v13911_v8 }
0x2e87   :  { %v10323_v43 = vpop.xlane.xlu1 %10322 }
0x2e88   :  { %13318 = vrcp.f32 %v10323_v43 }
0x2e8b   :  { %v10657_v44 = vpop.xlane.xlu1 %10656  ;;  %v10490_v58 = vpop.xlane.xlu0 %10489 }
0x2e8c   :  { %13320 = vrcp.f32 %v10490_v58 }
0x2e8d   :  { %13322 = vrcp.f32 %v10657_v44 }
0x2e8f   :  { %v10824_v54 = vpop.xlane.xlu1 %10823  ;;  %v10661_v55 = vpop.permute.xlu0 %10660 }
0x2e90   :  { %13324 = vrcp.f32 %v10824_v54  ;;  %v11652_v54 = vld [vmem:[%s15749_s4 + $0x20] sm:$0xff] }
0x2e92   :  { %v13319_v49 = vpop.eup %13318 }
0x2e93   :  { %v10325_v1 = vmul.f32 %v13319_v49, %v13303_v32  ;;  %v10828_v41 = vpop.permute.xlu1 %10827  ;;  %v11653_v49 = vld [vmem:[%s15749_s4 + $0x28] sm:$0xff] }
0x2e95   :  { %12693 = vmatmul.mubr.msk.f32.vlgmr.msra.gmra.mrb[118].mxu1 %vm525_vm2, %v10325_v1  ;;  %v11654_v1 = vld [vmem:[%s15749_s4 + $0x30] sm:$0xff] }
0x2e96   :  { %12701 = vmatpush3.msra.mxu1 %v10494_v4  ;;  %12702 = vmatprep.mubr.msk.f32.mxu1 %vm13912_vm1, %v13911_v8  ;;  %v13321_v23 = vpop.eup %13320 }
0x2e97   :  { %12710 = vmatprep.subr.mxu1 %v13911_v8  ;;  %v10492_v5 = vmul.f32 %v13321_v23, %v15593_v17  ;;  %v13323_v56 = vpop.eup %13322  ;;  %v12950_v23 = vpack.c.bf16 %v11653_v49, %v11652_v54 }
0x2e98   :  { %v10659_v53 = vmul.f32 %v13323_v56, %v15596_v25 }
0x2e99   :  { %12703 = vmatmul.mubr.msk.f32.vlgmr.msra.gmra.mrb[120].mxu1 %vm525_vm2, %v10492_v5  ;;  %v11655_v5 = vld [vmem:[%s15749_s4 + $0x38] sm:$0xff] }
0x2e9a   :  { %12711 = vmatpush3.msra.mxu1 %v10661_v55  ;;  %12712 = vmatprep.mubr.msk.f32.mxu1 %vm13912_vm1, %v13911_v8  ;;  %v13325_v57 = vpop.eup %13324  ;;  %v12954_v56 = vpack.c.bf16 %v11655_v5, %v11654_v1  ;;  %v11656_v55 = vld [vmem:[%s15750_s10 + $0x40] sm:$0xff] }
0x2e9b   :  { %12720 = vmatprep.subr.mxu1 %v13911_v8  ;;  %v10826_v38 = vmul.f32 %v13325_v57, %v15602_v28  ;;  %v11658_v57 = vld [vmem:[%s15750_s10 + $0x50] sm:$0xff] }
0x2e9d   :  { %12713 = vmatmul.mubr.msk.f32.vlgmr.msra.gmra.mrb[122].mxu1 %vm525_vm2, %v10659_v53  ;;  %v11657_v53 = vld [vmem:[%s15750_s10 + $0x48] sm:$0xff] }
0x2e9e   :  { %12721 = vmatpush3.msra.mxu1 %v10828_v41  ;;  %12722 = vmatprep.mubr.msk.f32.mxu1 %vm13912_vm1, %v13911_v8  ;;  %v9370_v8 = vld [vmem:[#allocation29 + $0x28] sm:$0xff]  ;;  %v12958_v41 = vpack.c.bf16 %v11657_v53, %v11656_v55 }
0x2e9f   :  { %v12942_v24 = vpack.c.bf16 %v9370_v8, %v9369_v27  ;;  %12951 = vmatprep.subr.bf16.mxu1 %v12950_v23 }
0x2ea1   :  { %12723 = vmatmul.mubr.msk.f32.vlgmr.msra.gmra.mrb[124].mxu1 %vm525_vm2, %v10826_v38  ;;  %12943 = vmatprep.subr.bf16.mxu0 %v12942_v24  ;;  %v11659_v38 = vld [vmem:[%s15750_s10 + $0x58] sm:$0xff] }
0x2ea2   :  { %12945 = vmatpush3.bf16.msra.mxu0 %v12942_v24  ;;  %12953 = vmatpush3.bf16.msra.mxu1 %v12950_v23 }
0x2ea3   :  { %12947 = vmatprep.subr.bf16.mxu0 %v12946_v0  ;;  %12955 = vmatprep.subr.bf16.mxu1 %v12954_v56 }
0x2ea6   :  { %12949 = vmatpush3.bf16.msra.mxu0 %v12946_v0  ;;  %12957 = vmatpush3.bf16.msra.mxu1 %v12954_v56 }
0x2ea7   :  { %12959 = vmatprep.subr.bf16.mxu0 %v12958_v41 }
0x2eda   :  { %v9717_v31 = vpop.f32.mrb[110].mxu1 }
0x2edb   :  { %v12654_v59 = vpop.f32.mrb[111].mxu1 }
0x2edc   :  { %v11660_v59 = vld [vmem:[%s15750_s10 + $0x60] sm:$0xff] }
0x2f2f   :  { %v9884_v51 = vpop.f32.mrb[112].mxu1 }
0x2f30   :  { %10223 = vrot.lane.b32.xlu0 %v9884_v51, %s13899_s13  ;;  %v12664_v46 = vpop.f32.mrb[113].mxu1  ;;  %v11661_v51 = vld [vmem:[%s15750_s10 + $0x68] sm:$0xff] }
0x2f31   :  { %v12966_v46 = vpack.c.bf16 %v11661_v51, %v11660_v59 }
0x2f33   :  { %v10051_v50 = vpop.f32.mrb[114].mxu1 }
0x2f34   :  { %10227 = vrot.lane.b32.xlu1 %v10051_v50, %s13889_s2  ;;  %v12674_v60 = vpop.f32.mrb[115].mxu1 }
0x2f37   :  { %v10218_v61 = vpop.f32.mrb[116].mxu1 }
0x2f38   :  { %10231 = vrot.lane.b32.xlu1 %v10218_v61, %s13925_s3  ;;  %v12684_v62 = vpop.f32.mrb[117].mxu1 }
0x2f68   :  { %v10398_v3 = vpop.f32.mrb[118].mxu1 }
0x2f69   :  { %v12694_v6 = vpop.f32.mrb[119].mxu1 }
0x2f6c   :  { %v10565_v9 = vpop.f32.mrb[120].mxu1 }
0x2f6d   :  { %10904 = vrot.lane.b32.xlu0 %v10565_v9, %s13899_s13  ;;  %v12704_v10 = vpop.f32.mrb[121].mxu1 }
0x2f70   :  { %v10732_v11 = vpop.f32.mrb[122].mxu1 }
0x2f71   :  { %10908 = vrot.lane.b32.xlu0 %v10732_v11, %s13889_s2  ;;  %v12714_v45 = vpop.f32.mrb[123].mxu1  ;;  %s13926_s2 = smov [#allocation34]  }
0x2f72   :  { %s11332_s12 = sshll.u32 %s13926_s2, 4  ;;  %s11333_s12 = int_to_ptr.vmem [resolvable:$true] %s11332_s12 }
0x2f73   :  { %s13782_s20 = scalar_lea.vmem %s11333_s12, 256  ;;  %p13787_p7 = scmp.lt.s32.totalorder %s11333_s12, %s11333_s12 }
0x2f74   :  { %v10899_v14 = vpop.f32.mrb[124].mxu1  ;;  %p13783_p6 = scmp.ne.s32.totalorder %s11333_s12, %s13782_s20  ;;  %p13788_p8 = scmp.lt.s32.totalorder %s13782_s20, %s13782_s20 }
0x2f75   :  { %10912 = vrot.lane.b32.xlu1 %v10899_v14, %s13925_s3  ;;  %v12724_v13 = vpop.f32.mrb[125].mxu1  ;;  %v11650_v14 = vld [vmem:[#allocation25 + $0x1] ss:$0 sm:$0xff] }
0x2f76   :  { %p13789_p9 = por %p13788_p8, %p13787_p7 }
0x2f78   :  { %p13790_p10 = pnand %p13789_p9, %p13783_p6 }
0x2fa2   :  { %v10224_v15 = vpop.permute.xlu0 %10223 }
0x2fa3   :  { %v10234_v33 = vsel %vm525_vm2, %v9717_v31, %v10224_v15  ;;  %v12962_v31 = vpack.c.bf16 %v11659_v38, %v11658_v57 }
0x2fa6   :  { %v10228_v16 = vpop.permute.xlu1 %10227 }
0x2fa7   :  { %v10235_v32 = vsel %vm1210_vm6, %v10234_v33, %v10228_v16  ;;  %v11651_v16 = vld [vmem:[#allocation23 + $0x1] ss:$0 sm:$0xff] }
0x2faa   :  { %v10232_v17 = vpop.permute.xlu1 %10231 }
0x2fab   :  { %v10236_v18 = vsel %vm1212_vm7, %v10235_v32, %v10232_v17 }
0x2fac   :  { %12733 = vmatprep.mubr.msk.f32.mxu0 %vm440_vm0, %v10236_v18 }
0x2fdf   :  { %v10905_v21 = vpop.permute.xlu0 %10904 }
0x2fe0   :  { %v10915_v22 = vsel %vm525_vm2, %v10398_v3, %v10905_v21 }
0x2fe3   :  { %v10909_v25 = vpop.permute.xlu0 %10908 }
0x2fe4   :  { %v10916_v26 = vsel %vm1210_vm6, %v10915_v22, %v10909_v25  ;;  %v11662_v22 = vld [vmem:[%s15750_s10 + $0x70] sm:$0xff] }
0x2fe7   :  { %v10913_v28 = vpop.permute.xlu1 %10912 }
0x2fe8   :  { %v10917_v29 = vsel %vm1212_vm7, %v10916_v26, %v10913_v28  ;;  %v11663_v26 = vld [vmem:[%s15750_s10 + $0x78] sm:$0xff] }
0x2fe9   :  { %12734 = vmatmul.mubr.msk.f32.vlgmr.msra.gmra.mrb[104].mxu0 %vm440_vm0, %v10917_v29  ;;  %v12970_v28 = vpack.c.bf16 %v11663_v26, %v11662_v22  ;;  %v11664_v29 = vld [vmem:[#allocation11 + $0x1] ss:$0 sm:$0xff] }
0x2fea   :  { %12961 = vmatpush3.bf16.msra.mxu0 %v12958_v41 }
0x2feb   :  { %12963 = vmatprep.subr.bf16.mxu0 %v12962_v31 }
0x2fee   :  { %12965 = vmatpush3.bf16.msra.mxu0 %v12962_v31 }
0x2fef   :  { %12967 = vmatprep.subr.bf16.mxu0 %v12966_v46 }
0x2ff2   :  { %12969 = vmatpush3.bf16.msra.mxu0 %v12966_v46 }
0x2ff3   :  { %12971 = vmatprep.subr.bf16.mxu0 %v12970_v28 }
0x2ff6   :  { %12973 = vmatpush3.bf16.msra.mxu0 %v12970_v28 }
0x30bc   :  { %v12735_v30 = vpop.f32.mrb[104].mxu0 }
0x30bd   :  { %v11002_v36 = vadd.f32 %v12735_v30, %v11647_v7  ;;  %v10996_v12 = vpop.f32.mrb[105].mxu0 }
0x30be   :  { %v10997_v37 = vadd.f32 %v11647_v7, %v10996_v12 }
0x30bf   :  { %v11010_v34 = vadd.f32 %v11002_v36, %v15478_v40 }
0x30c0   :  { %v11009_v35 = vadd.f32 %v10997_v37, %v15476_v48 }
0x30c1   :  { %v11014_v47 = vsel %vm440_vm0, %v11010_v34, 0.0 }
0x30c2   :  { %11015 = vadd.xlane.f32.xlu1 %v11014_v47  ;;  %v11011_v19 = vsel %vm440_vm0, %v11009_v35, 0.0 }
0x30c3   :  { %11012 = vadd.xlane.f32.xlu0 %v11011_v19 }
0x314f   :  { %v11016_v39 = vpop.xlane.xlu1 %11015 }
0x3150   :  { %v11018_v52 = vmul.f32 0.03125, %v11016_v39  ;;  %v11013_v20 = vpop.xlane.xlu0 %11012 }
0x3151   :  { %v11017_v42 = vmul.f32 0.03125, %v11013_v20 }
0x3152   :  { %v11020_v4 = vsub.f32 %v11010_v34, %v11018_v52 }
0x3153   :  { %v11019_v43 = vsub.f32 %v11009_v35, %v11017_v42  ;;  %v11667_v35 = vld [vmem:[#allocation13 + $0x1] ss:$0 sm:$0xff] }
0x3154   :  { %v11022_v40 = vmul.f32 %v11020_v4, %v11020_v4  ;;  %v11052_v32 = vmul.f32 %v11650_v14, %v11020_v4 }
0x3155   :  { %v11021_v44 = vmul.f32 %v11019_v43, %v11019_v43  ;;  %v11051_v13 = vmul.f32 %v11650_v14, %v11019_v43 }
0x3156   :  { %v11026_v58 = vsel %vm440_vm0, %v11022_v40, 0.0 }
0x3157   :  { %v11023_v48 = vsel %vm440_vm0, %v11021_v44, 0.0 }
0x3158   :  { %11024 = vadd.xlane.f32.xlu0 %v11023_v48 }
0x315c   :  { %11027 = vadd.xlane.f32.xlu0 %v11026_v58 }
0x31e5   :  { %v11025_v50 = vpop.xlane.xlu0 %11024 }
0x31e6   :  { %v11029_v60 = vmul.f32 0.032258064, %v11025_v50 }
0x31e8   :  { %13326 = vrsqrt.f32 %v11029_v60  ;;  %vm11033_vm1 = vcmp.eq.f32.partialorder %v11029_v60, inf  ;;  %v11036_v24 = vand.u32 2147483648, %v11029_v60  ;;  %vm11035_vm2 = vcmp.eq.f32.partialorder %v11029_v60, 0.0 }
0x31e9   :  { %v11028_v61 = vpop.xlane.xlu0 %11027 }
0x31ea   :  { %v11030_v62 = vmul.f32 0.032258064, %v11028_v61 }
0x31ec   :  { %13328 = vrsqrt.f32 %v11030_v62  ;;  %vm11040_vm4 = vcmp.eq.f32.partialorder %v11030_v62, inf  ;;  %v11043_v9 = vand.u32 2147483648, %v11030_v62  ;;  %vm11042_vm5 = vcmp.eq.f32.partialorder %v11030_v62, 0.0 }
0x31f2   :  { %v13327_v27 = vpop.eup %13326 }
0x31f3   :  { %v11032_v8 = vmul.f32 %v13327_v27, %v11029_v60 }
0x31f5   :  { %v11034_v63 = vsel %vm11033_vm1, %v11029_v60, %v11032_v8 }
0x31f6   :  { %v13329_v2 = vpop.eup %13328  ;;  %v11037_v0 = vsel %vm11035_vm2, %v11036_v24, %v11034_v63 }
0x31f7   :  { %v11039_v3 = vmul.f32 %v13329_v2, %v11030_v62  ;;  %v11053_v6 = vadd.f32 1e-06, %v11037_v0 }
0x31f9   :  { %v11041_v10 = vsel %vm11040_vm4, %v11030_v62, %v11039_v3  ;;  %13330 = vrcp.f32 %v11053_v6 }
0x31fa   :  { %v11044_v11 = vsel %vm11042_vm5, %v11043_v9, %v11041_v10 }
0x31fb   :  { %v11054_v45 = vadd.f32 1e-06, %v11044_v11 }
0x31fd   :  { %13332 = vrcp.f32 %v11054_v45 }
0x3203   :  { %v13331_v15 = vpop.eup %13330 }
0x3204   :  { %v11056_v33 = vmul.f32 %v13331_v15, %v11051_v13 }
0x3206   :  { %v11065_v17 = vadd.f32 %v11651_v16, %v11056_v33 }
0x3207   :  { %v13333_v18 = vpop.eup %13332 }
0x3208   :  { %v11058_v21 = vmul.f32 %v13333_v18, %v11052_v32  ;;  %12744 = vmatprep.mubr.msk.f32.mxu1 %vm440_vm0, %v11065_v17 }
0x320a   :  { %v11066_v25 = vadd.f32 %v11651_v16, %v11058_v21 }
0x320c   :  { %12745 = vmatmul.mubr.msk.f32.vlgmr.msra.gmra.mrb[126].mxu1 %vm440_vm0, %v11066_v25 }
0x32df   :  { %v12746_v7 = vpop.f32.mrb[126].mxu1 }
0x32e0   :  { %v11169_v30 = vadd.f32 %v12746_v7, %v11664_v29  ;;  %v11163_v36 = vpop.f32.mrb[127].mxu1 }
0x32e1   :  { %v11164_v12 = vadd.f32 %v11664_v29, %v11163_v36 }
0x32e2   :  { %v11173_v34 = vmax.f32 %v11169_v30, 0.0 }
0x32e3   :  { %v11172_v37 = vmax.f32 %v11164_v12, 0.0 }
0x32e5   :  { %12763 = vmatprep.mubr.msk.f32.mxu0 %vm2159_vm12, %v11172_v37 }
0x32e6   :  { %12764 = vmatmul.mubr.msk.f32.vlgmr.msra.gmra.mrb[106].mxu0 %vm2159_vm12, %v11173_v34 }
0x33b9   :  { %v12765_v47 = vpop.f32.mrb[106].mxu0 }
0x33ba   :  { %v11258_v19 = vadd.f32 %v12765_v47, %v11667_v35  ;;  %v11252_v39 = vpop.f32.mrb[107].mxu0 }
0x33bb   :  { %v11253_v52 = vadd.f32 %v11667_v35, %v11252_v39 }
0x33bc   :  { %v11266_v20 = vadd.f32 %v11258_v19, %v11066_v25 }
0x33bd   :  { %v11265_v42 = vadd.f32 %v11253_v52, %v11065_v17 }
0x33be   :  { %v11270_v4 = vsel %vm440_vm0, %v11266_v20, 0.0 }
0x33bf   :  { %11271 = vadd.xlane.f32.xlu0 %v11270_v4  ;;  %v11267_v43 = vsel %vm440_vm0, %v11265_v42, 0.0 }
0x33c0   :  { %11268 = vadd.xlane.f32.xlu1 %v11267_v43 }
0x344c   :  { %v11272_v44 = vpop.xlane.xlu0 %11271 }
0x344d   :  { %v11274_v48 = vmul.f32 0.03125, %v11272_v44  ;;  %v11269_v40 = vpop.xlane.xlu1 %11268 }
0x344e   :  { %v11273_v58 = vmul.f32 0.03125, %v11269_v40 }
0x344f   :  { %v11276_v54 = vsub.f32 %v11266_v20, %v11274_v48 }
0x3450   :  { %v11275_v49 = vsub.f32 %v11265_v42, %v11273_v58 }
0x3451   :  { %v11278_v1 = vmul.f32 %v11276_v54, %v11276_v54 }
0x3452   :  { %v11277_v23 = vmul.f32 %v11275_v49, %v11275_v49 }
0x3453   :  { %v11282_v5 = vsel %vm440_vm0, %v11278_v1, 0.0 }
0x3454   :  { %11283 = vadd.xlane.f32.xlu0 %v11282_v5  ;;  %v11279_v56 = vsel %vm440_vm0, %v11277_v23, 0.0 }
0x3455   :  { %11280 = vadd.xlane.f32.xlu1 %v11279_v56 }
0x3456   :  { %13793 = shalt.err (!%p13790_p10)
}
0x3457   :  { %s13794_s11 = scalar_lea.hbm %s14106_s6, 256 }
0x3458   :  { %p13795_p11 = scmp.ne.s32.totalorder %s14106_s6, %s13794_s11  ;;  %p13798_p12 = scmp.lt.u32.totalorder %s13794_s11, %s14106_s6 }
0x345a   :  { %p13800_p13 = pnand %p13798_p12, %p13795_p11 }
0x345c   :  { %13803 = shalt.err (!%p13800_p13)
}
0x345d   :  { %11338 = dma.vmem_to_hbm [thread:$0]  %s11333_s12, 256, %s14106_s6, [#allocation4], %s13898_s28, %s13898_s28, %s13899_s13   ;;  %v11670_v63 = vld [vmem:[#allocation28 + $0x1] ss:$0 sm:$0xff]  ;;  %v11671_v6 = vld [vmem:[#allocation26 + $0x1] ss:$0 sm:$0xff] }
0x345e   :  { %v11308_v2 = vmul.f32 %v11670_v63, %v11276_v54  ;;  %v11307_v3 = vmul.f32 %v11670_v63, %v11275_v49  ;;  %s13927_s6 = smov [#allocation35]  }
0x345f   :  { %s11344_s17 = sshll.u32 %s13927_s6, 4  ;;  %s11345_s17 = int_to_ptr.vmem [resolvable:$true] %s11344_s17 }
0x3460   :  { %s13804_s9 = scalar_lea.vmem %s11345_s17, 256  ;;  %p13809_p1 = scmp.lt.s32.totalorder %s11345_s17, %s11345_s17 }
0x3461   :  { %p13805_p0 = scmp.ne.s32.totalorder %s11345_s17, %s13804_s9  ;;  %p13810_p2 = scmp.lt.s32.totalorder %s13804_s9, %s13804_s9 }
0x3463   :  { %p13811_p3 = por %p13810_p2, %p13809_p1 }
0x3465   :  { %p13812_p4 = pnand %p13811_p3, %p13805_p0 }
0x34e1   :  { %v11284_v55 = vpop.xlane.xlu0 %11283 }
0x34e2   :  { %v11286_v53 = vmul.f32 0.032258064, %v11284_v55  ;;  %v11281_v57 = vpop.xlane.xlu1 %11280 }
0x34e3   :  { %v11285_v41 = vmul.f32 0.032258064, %v11281_v57 }
0x34e4   :  { %13334 = vrsqrt.f32 %v11286_v53  ;;  %vm11296_vm6 = vcmp.eq.f32.partialorder %v11286_v53, inf  ;;  %v11299_v51 = vand.u32 2147483648, %v11286_v53  ;;  %vm11298_vm7 = vcmp.eq.f32.partialorder %v11286_v53, 0.0 }
0x34e5   :  { %13336 = vrsqrt.f32 %v11285_v41  ;;  %vm11289_vm12 = vcmp.eq.f32.partialorder %v11285_v41, inf  ;;  %v11292_v60 = vand.u32 2147483648, %v11285_v41  ;;  %vm11291_vm3 = vcmp.eq.f32.partialorder %v11285_v41, 0.0 }
0x34ee   :  { %v13335_v38 = vpop.eup %13334 }
0x34ef   :  { %v13337_v31 = vpop.eup %13336  ;;  %v11295_v59 = vmul.f32 %v13335_v38, %v11286_v53 }
0x34f0   :  { %v11288_v46 = vmul.f32 %v13337_v31, %v11285_v41 }
0x34f1   :  { %v11297_v50 = vsel %vm11296_vm6, %v11286_v53, %v11295_v59 }
0x34f2   :  { %v11300_v61 = vsel %vm11298_vm7, %v11299_v51, %v11297_v50  ;;  %v11290_v62 = vsel %vm11289_vm12, %v11285_v41, %v11288_v46 }
0x34f3   :  { %v11310_v27 = vadd.f32 1e-06, %v11300_v61  ;;  %v11293_v8 = vsel %vm11291_vm3, %v11292_v60, %v11290_v62 }
0x34f4   :  { %v11309_v24 = vadd.f32 1e-06, %v11293_v8 }
0x34f5   :  { %13338 = vrcp.f32 %v11310_v27 }
0x34f6   :  { %13340 = vrcp.f32 %v11309_v24 }
0x34ff   :  { %v13339_v0 = vpop.eup %13338 }
0x3500   :  { %v13341_v9 = vpop.eup %13340  ;;  %v11314_v10 = vmul.f32 %v13339_v0, %v11308_v2 }
0x3501   :  { %v11312_v11 = vmul.f32 %v13341_v9, %v11307_v3 }
0x3502   :  { %v11322_v45 = vadd.f32 %v11671_v6, %v11314_v10 }
0x3503   :  { %v11321_v14 = vadd.f32 %v11671_v6, %v11312_v11 }
0x3504   :  { %11326 = vst.msk [vmem:[#allocation35 + $0x8] sm:$0xff] %vm440_vm0, %v11322_v45 }
0x3505   :  { %11325 = vst.msk [vmem:[#allocation35] sm:$0xff] %vm440_vm0, %v11321_v14 }
0x3506   :  { %13815 = shalt.err (!%p13812_p4)
}
0x3507   :  { %s13816_s29 = scalar_lea.hbm %s14111_s24, 256 }
0x3508   :  { %p13817_p5 = scmp.ne.s32.totalorder %s14111_s24, %s13816_s29  ;;  %p13820_p6 = scmp.lt.u32.totalorder %s13816_s29, %s14111_s24 }
0x350a   :  { %p13822_p7 = pnand %p13820_p6, %p13817_p5 }
0x350c   :  { %13825 = shalt.err (!%p13822_p7)
}
0x350d   :  { %11350 = dma.vmem_to_hbm [thread:$0]  %s11345_s17, 256, %s14111_s24, [#allocation36], %s13898_s28, %s13898_s28, %s13899_s13  }
0x350e   :  { %13848 = dma.done.wait [#allocation4], 256  }
0x350f   :  { %13849 = vsyncadd [#allocation4], 4294967040 }
0x3510   :  { %13850 = dma.done.wait [#allocation36], 256  }
0x3511   :  { %13851 = vsyncadd [#allocation36], 4294967040 }
0x3512   :  { %11357 = vsyncpa [#allocation3], 1 }
0x3513   :  { %11358 = vsyncpa [#allocation6], 1 }
0x3514   :  { %11359 = vsyncpa [#allocation9], 1 }
0x3515   :  { %11360 = vsyncpa [#allocation12], 1 }
0x3516   :  { %11361 = vsyncpa [#allocation15], 1 }
0x3517   :  { %11362 = vsyncpa [#allocation18], 1 }
0x3518   :  { %11363 = vsyncpa [#allocation21], 1 }
0x3519   :  { %11364 = vsyncpa [#allocation24], 1 }
0x351a   :  { %11365 = vsyncpa [#allocation27], 1 }
0x351b   :  { %11366 = vsyncpa [#allocation30], 1 }
0x351c   :  { %11367 = vsyncpa [#allocation33], 1 }
0x351d   :  { %11368 = vsyncpa [#allocation4], 1 }
0x351e   :  { %11369 = vsyncpa [#allocation36], 1 }

</bundles_post_ra>
